<compile_context>
chip_gen: v7x
topology: tpu7x:2x2x1
jax: 0.10.0
libtpu: 0.0.40
codegen_flags: <defaults>
</compile_context>

<pallas_src>
import functools

import jax
import jax.numpy as jnp
from jax import lax
from jax.experimental import pallas as pl
from jax.experimental.pallas import tpu as pltpu


def _round_up(x, m):
    return (x + m - 1) // m * m


def _largest_divisor_leq(n, cap):
    best = 1
    for d in range(1, n + 1):
        if n % d == 0 and d <= cap:
            best = d
    return best


# ------------------------------- tiling plan ----------------------------------
#
# Flattened channel-last layout ("chopped frame"): activation rows r = i*Wp + j
# hold pixel (i, j) for j < W (columns j >= W and rows >= H*Wp are zero and act
# as the left/right/bottom padding of the 3x3 conv).  The top border is never
# stored -- it is synthesized as zeros in the per-tile ReLU scratch.

def _make_plan(h, w, c, tms=128, tm_max=512):
    wp = w + 2
    halo = wp + 1                       # rows of top/bottom context a tile needs
    rows_img = h * wp                   # rows holding real image content
    cp = _round_up(c, 128)              # lane-dense channels
    tm = min(tm_max, _round_up(rows_img + wp, tms))
    tm = max(tm, _round_up(halo, tms))  # each tile must cover its own halo
    rt = _round_up(rows_img + wp, tm)   # grid-covered rows (incl. bottom border)
    nt = rt // tm
    ra = rt + _round_up(halo, 8)        # allocated rows (slack: halo reads stay
                                        # in bounds, never clamped)
    return dict(h=h, w=w, c=c, cp=cp, wp=wp, halo=halo, rows_img=rows_img,
                tm=tm, tms=tms, rt=rt, nt=nt, ra=ra)


# ----------------------------- Pallas kernels --------------------------------

def _make_conv_kernel(plan, n_res, nt):
    """3x3 same-padding conv + bias + fused residual adds + ReLU(prologue).

    Per row tile: stage a bf16 ReLU'd halo'd slab of the input, then for each
    TMS-row M-subtile accumulate the nine shifted-slice MXU dots in registers
    and store once (bias / residuals / border mask folded into the epilogue).
    """
    wp, halo = plan["wp"], plan["halo"]
    tm, tms, cp = plan["tm"], plan["tms"], plan["cp"]
    rows_img, w_img = plan["rows_img"], plan["w"]
    xr_rows = tm + 2 * halo
    n_sub = tm // tms
    n_wrap = -(-tms // wp)              # conditional-subtract count for col mod Wp

    def kernel(*refs):
        col0_ref = refs[0]                         # scalar-prefetch: (nt*n_sub,) i32
        x_ref = refs[1]                            # (RA, Cp) resident activation
        res_refs = refs[2:2 + n_res]               # (TM, Cp) residual tiles (f32)
        w_ref, b_ref, o_ref, xr_ref = refs[2 + n_res:]

        t = pl.program_id(1)
        row0 = t * tm

        # ---- stage ReLU'd bf16 halo'd slab for this tile ---------------------
        @pl.when(t == 0)
        def _():
            xr_ref[0:halo, :] = jnp.zeros((halo, cp), jnp.bfloat16)   # top border
            xr_ref[halo:xr_rows, :] = jnp.maximum(
                x_ref[pl.ds(0, tm + halo), :], 0).astype(jnp.bfloat16)

        if nt > 1:
            @pl.when(t > 0)
            def _():
                xr_ref[...] = jnp.maximum(
                    x_ref[pl.ds(row0 - halo, xr_rows), :], 0).astype(jnp.bfloat16)

        bias = b_ref[...].astype(jnp.float32)                          # (1, Cp)

        # ---- nine shifted MXU dots per M-subtile, register accumulation -----
        for s in range(n_sub):
            base = s * tms
            acc = None
            for k in range(9):
                ky, kx = divmod(k, 3)
                off = base + ky * wp + kx                              # static
                tap = xr_ref[off:off + tms, :]                         # bf16
                d = jnp.dot(tap, w_ref[k], preferred_element_type=jnp.float32)
                acc = d if acc is None else acc + d

            out = acc + bias
            for r_ref in res_refs:
                out = out + r_ref[base:base + tms, :].astype(jnp.float32)

            # Border / junk-column / tail-row mask, generated in-kernel.
            ridx = lax.broadcasted_iota(jnp.int32, (tms, 1), 0)
            col = col0_ref[t * n_sub + s] + ridx       # (row index) mod Wp, via
            for _ in range(n_wrap):                     # static conditional subs
                col = jnp.where(col >= wp, col - wp, col)
            gidx = row0 + base + ridx
            valid = jnp.logical_and(col < w_img, gidx < rows_img)
            out = jnp.where(valid, out, 0.0)

            o_ref[base:base + tms, :] = out.astype(o_ref.dtype)

    return kernel


def _upsample_kernel(x_ref, ah_ref, awt_ref, o_ref, t_ref):
    """Separable bilinear x2 (align_corners=True) for a block of channels."""
    cb = x_ref.shape[0]
    ho = ah_ref.shape[0]
    ah = ah_ref[...]
    for c in range(cb):                                       # static
        t_ref[c * ho:(c + 1) * ho, :] = jnp.dot(
            ah, x_ref[c], preferred_element_type=jnp.float32)
    o_ref[...] = jnp.dot(t_ref[...], awt_ref[...],
                         preferred_element_type=jnp.float32).astype(o_ref.dtype)


# ------------------------------ kernel wrappers -------------------------------

def _conv3x3_fused(x_flat, w_taps, bias, plan, residuals=(),
                   out_dtype=jnp.float32):
    n, ra, cp = x_flat.shape
    tm, tms, nt, rt = plan["tm"], plan["tms"], plan["nt"], plan["rt"]
    wp, halo = plan["wp"], plan["halo"]
    n_res = len(residuals)
    n_sub = tm // tms

    # Per-(tile, subtile) starting column index, precomputed host-side (avoids
    # a vector integer mod in the kernel) and scalar-prefetched into SMEM.
    col0s = jnp.asarray(
        [(ti * tm + si * tms) % wp for ti in range(nt) for si in range(n_sub)],
        dtype=jnp.int32)

    kernel = _make_conv_kernel(plan, n_res, nt)

    x_spec = pl.BlockSpec((None, ra, cp), lambda b, t, *_: (b, 0, 0))
    res_spec = pl.BlockSpec((None, tm, cp), lambda b, t, *_: (b, t, 0))
    in_specs = [x_spec] + [res_spec] * n_res + [
        pl.BlockSpec((9, cp, cp), lambda b, t, *_: (0, 0, 0)),   # tap weights
        pl.BlockSpec((1, cp), lambda b, t, *_: (0, 0)),          # bias
    ]
    out_spec = pl.BlockSpec((None, tm, cp), lambda b, t, *_: (b, t, 0))

    x_bytes = jnp.dtype(x_flat.dtype).itemsize
    out_bytes = jnp.dtype(out_dtype).itemsize
    vmem_est = (2 * ra * cp * x_bytes             # resident activation (x2 buf)
                + 2 * n_res * tm * cp * 4         # residual tiles
                + 2 * 9 * cp * cp * 2             # bf16 tap weights
                + 2 * tm * cp * out_bytes         # output tile
                + (tm + 2 * halo) * cp * 2        # bf16 ReLU scratch
                + (2 << 20))
    flops = 2 * 9 * n * rt * cp * cp
    bytes_accessed = (n * (ra * cp * x_bytes + n_res * rt * cp * 4
                           + rt * cp * out_bytes) + 9 * cp * cp * 2)

    return pl.pallas_call(
        kernel,
        out_shape=jax.ShapeDtypeStruct((n, ra, cp), out_dtype),
        grid_spec=pltpu.PrefetchScalarGridSpec(
            num_scalar_prefetch=1,
            grid=(n, nt),
            in_specs=in_specs,
            out_specs=out_spec,
            scratch_shapes=[pltpu.VMEM((tm + 2 * halo, cp), jnp.bfloat16)],
        ),
        compiler_params=pltpu.CompilerParams(
            dimension_semantics=("parallel", "parallel"),
            vmem_limit_bytes=int(min(max(vmem_est, 32 << 20), 100 << 20)),
        ),
        cost_estimate=pl.CostEstimate(flops=int(flops), transcendentals=0,
                                      bytes_accessed=int(bytes_accessed)),
    )(col0s, x_flat, *residuals, w_taps, bias)


def _bilinear_matrix(n_in, n_out):
    """1-D linear interpolation matrix, align_corners=True semantics."""
    if n_in == 1:
        return jnp.ones((n_out, 1), jnp.float32)
    src = jnp.arange(n_out, dtype=jnp.float32) * (n_in - 1) / (n_out - 1)
    lo = jnp.clip(jnp.floor(src).astype(jnp.int32), 0, n_in - 2)
    frac = src - lo.astype(jnp.float32)
    rows = jnp.arange(n_out)
    m = jnp.zeros((n_out, n_in), jnp.float32)
    m = m.at[rows, lo].set(1.0 - frac)
    m = m.at[rows, lo + 1].add(frac)
    return m


def _bilinear_upsample_x2(y_nchw, h, w):
    """(N, C, H, W+2) (zero right-pad cols) -> (N, C, 2H, 2W), align_corners."""
    n, c, _, wp = y_nchw.shape
    ho, wo = 2 * h, 2 * w
    cb = _largest_divisor_leq(c, 16)                  # channels per grid step

    ah = _bilinear_matrix(h, ho)                                        # (HO, H)
    awt = jnp.zeros((wp, wo), jnp.float32).at[:w, :].set(
        _bilinear_matrix(w, wo).T)                                      # (Wp, WO)

    out = pl.pallas_call(
        _upsample_kernel,
        out_shape=jax.ShapeDtypeStruct((n, c * ho, wo), jnp.float32),
        grid=(n, c // cb),
        in_specs=[
            pl.BlockSpec((None, cb, h, wp), lambda i, j: (i, j, 0, 0)),
            pl.BlockSpec((ho, h), lambda i, j: (0, 0)),
            pl.BlockSpec((wp, wo), lambda i, j: (0, 0)),
        ],
        out_specs=pl.BlockSpec((None, cb * ho, wo), lambda i, j: (i, j, 0)),
        scratch_shapes=[pltpu.VMEM((cb * ho, wp), jnp.float32)],
        compiler_params=pltpu.CompilerParams(
            dimension_semantics=("parallel", "parallel")),
    )(y_nchw, ah, awt)
    return out.reshape(n, c, ho, wo)


# ------------------------------ forward pass ----------------------------------

def feature_fusion_block(params, *xs):
    """Forward pass of FeatureFusionBlock.  Inputs are NCHW (PyTorch layout)."""
    n, c, h, w = xs[0].shape
    cp = params["rcu2_w1"].shape[-1]
    plan = _make_plan(h, w, c)
    assert plan["cp"] == cp
    wp, ra, rows_img = plan["wp"], plan["ra"], plan["rows_img"]

    def to_flat(x_nchw):
        # NCHW -> channel-last flattened rows (zero right-pad cols, zero tail).
        x = jnp.transpose(x_nchw.astype(jnp.float32), (0, 2, 3, 1))     # N,H,W,C
        x = jnp.pad(x, ((0, 0), (0, 0), (0, wp - w), (0, cp - c)))      # N,H,Wp,Cp
        x = x.reshape(n, rows_img, cp)
        return jnp.pad(x, ((0, 0), (0, ra - rows_img), (0, 0)))         # N,RA,Cp

    conv = functools.partial(_conv3x3_fused, plan=plan)

    x0 = to_flat(xs[0])
    if len(xs) == 2:
        # output = xs[0] + resConfUnit1(xs[1]); "+ xs[0]" is fused into the
        # second conv of RCU1 as an extra residual stream.
        x1 = to_flat(xs[1])
        t1 = conv(x1, params["rcu1_w1"], params["rcu1_b1"],
                  out_dtype=jnp.bfloat16)            # bf16 storage is MXU-exact
        cur = conv(t1, params["rcu1_w2"], params["rcu1_b2"],
                   residuals=(x1, x0), out_dtype=jnp.float32)
    else:
        cur = x0

    # resConfUnit2
    t2 = conv(cur, params["rcu2_w1"], params["rcu2_b1"], out_dtype=jnp.bfloat16)
    cur = conv(t2, params["rcu2_w2"], params["rcu2_b2"],
               residuals=(cur,), out_dtype=jnp.float32)

    # Back to NCHW *before* the x2 upsample (4x less transpose traffic); keep
    # the already-zero right-pad columns so no extra slice copy is needed.
    y = cur[:, :rows_img, :c].reshape(n, h, wp, c)
    y = jnp.transpose(y, (0, 3, 1, 2))                                  # N,C,H,Wp
    return _bilinear_upsample_x2(y, h, w)                               # N,C,2H,2W


# --------------------------- parameter setup ----------------------------------

def _to_tap_weights(w_oihw, cp):
    """PyTorch (O, I, 3, 3) conv weight -> (9, Cp, Cp) bf16 per-tap matrices."""
    o, i = w_oihw.shape[0], w_oihw.shape[1]
    wt = jnp.transpose(w_oihw, (2, 3, 1, 0)).reshape(9, i, o)    # (tap, in, out)
    wt = jnp.pad(wt, ((0, 0), (0, cp - i), (0, cp - o)))
    return wt.astype(jnp.bfloat16)


def init_params(key, features):
    cp = _round_up(features, 128)
    keys = jax.random.split(key, 8)

    def conv_w(k):
        return (0.1 * jax.random.normal(k, (features, features, 3, 3))).astype(jnp.float32)

    def conv_b(k):
        return (0.1 * jax.random.normal(k, (features,))).astype(jnp.float32)

    pt = {
        "rcu1": (conv_w(keys[0]), conv_b(keys[1]), conv_w(keys[2]), conv_b(keys[3])),
        "rcu2": (conv_w(keys[4]), conv_b(keys[5]), conv_w(keys[6]), conv_b(keys[7])),
    }
    kparams = {}
    for name in ("rcu1", "rcu2"):
        w1, b1, w2, b2 = pt[name]
        kparams[f"{name}_w1"] = _to_tap_weights(w1, cp)
        kparams[f"{name}_b1"] = jnp.pad(b1, (0, cp - features)).reshape(1, cp)
        kparams[f"{name}_w2"] = _to_tap_weights(w2, cp)
        kparams[f"{name}_b2"] = jnp.pad(b2, (0, cp - features)).reshape(1, cp)
    return kparams, pt


# ------------------------ pure-JAX references (check) --------------------------

def _reference(pt_params, *xs, conv_dtype=jnp.float32):
    def conv(x, wgt, b):
        y = lax.conv_general_dilated(
            x.astype(conv_dtype), wgt.astype(conv_dtype), (1, 1), ((1, 1), (1, 1)),
            dimension_numbers=("NCHW", "OIHW", "NCHW"),
            preferred_element_type=jnp.float32)
        return y + b[None, :, None, None]

    def rcu(x, w1, b1, w2, b2):
        out = conv(jax.nn.relu(x), w1, b1)
        out = conv(jax.nn.relu(out), w2, b2)
        return out + x

    output = xs[0]
    if len(xs) == 2:
        output = output + rcu(xs[1], *pt_params["rcu1"])
    output = rcu(output, *pt_params["rcu2"])
    n, c, h, w = output.shape
    ah = _bilinear_matrix(h, 2 * h)
    aw = _bilinear_matrix(w, 2 * w)
    return jnp.einsum("ih,jw,nchw->ncij", ah, aw, output)


# ----------------------------------- main --------------------------------------

if __name__ == "__main__":
    features = 4
    N, C, H, W = 2, features, 16, 16

    key = jax.random.PRNGKey(0)
    k_params, k_x0, k_x1 = jax.random.split(key, 3)
    params, pt_params = init_params(k_params, features)

    x0 = jax.random.normal(k_x0, (N, C, H, W), dtype=jnp.float32)
    x1 = jax.random.normal(k_x1, (N, C, H, W), dtype=jnp.float32)

    out = jax.block_until_ready(feature_fusion_block(params, x0, x1))
    assert out.shape == (N, C, 2 * H, 2 * W), out.shape

    # Tight check vs a reference using the same bf16 MXU operand rounding.
    ref_bf16 = jax.block_until_ready(
        _reference(pt_params, x0, x1, conv_dtype=jnp.bfloat16))
    assert jnp.allclose(out, ref_bf16, atol=2e-3, rtol=2e-3), \
        float(jnp.max(jnp.abs(out - ref_bf16)))

    # Loose check vs the full-f32 PyTorch-equivalent reference.
    ref_f32 = jax.block_until_ready(_reference(pt_params, x0, x1))
    assert jnp.allclose(out, ref_f32, atol=1e-1, rtol=1e-1), \
        float(jnp.max(jnp.abs(out - ref_f32)))

    print("KERNEL_OK")
</pallas_src>

<mosaic_0001>
module attributes {stable_mosaic.version = 11 : i64} {
  func.func @kernel(%arg0: i32, %arg1: i32, %arg2: memref<3xi32, #tpu.memory_space<smem>>, %arg3: memref<1x408x128xf32, #tpu.memory_space<vmem>>, %arg4: memref<9x128x128xbf16, #tpu.memory_space<vmem>>, %arg5: memref<1x128xf32, #tpu.memory_space<vmem>>, %arg6: memref<1x384x128xbf16, #tpu.memory_space<vmem>>, %arg7: memref<422x128xbf16, #tpu.memory_space<vmem>>) attributes {dimension_semantics = [#tpu.dimension_semantics<parallel>, #tpu.dimension_semantics<parallel>], iteration_bounds = array<i64: 2, 1>, scalar_prefetch = 1 : i64, scratch_operands = 1 : i64, tpu.core_type = #tpu.core_type<tc>, window_params = [{transform_indices = @transform_0, window_bounds = array<i64: 1, 408, 128>}, {pipeline_mode = #tpu.pipeline_mode<synchronous>, transform_indices = @transform_1, window_bounds = array<i64: 9, 128, 128>}, {pipeline_mode = #tpu.pipeline_mode<synchronous>, transform_indices = @transform_2, window_bounds = array<i64: 1, 128>}, {transform_indices = @transform_3, window_bounds = array<i64: 1, 384, 128>}]} {
    %c384_i32 = arith.constant 384 : i32
    %0 = arith.muli %arg1, %c384_i32 : i32
    %c0_i32 = arith.constant 0 : i32
    %1 = arith.cmpi eq, %arg1, %c0_i32 : i32
    %2 = arith.extui %1 : i1 to i32
    %c0_i32_0 = arith.constant 0 : i32
    %3 = arith.cmpi ne, %2, %c0_i32_0 : i32
    scf.if %3 {
      %cst_198 = arith.constant 0.000000e+00 : bf16
      %332 = vector.broadcast %cst_198 : bf16 to vector<19x128xbf16>
      %c0_199 = arith.constant 0 : index
      %c0_200 = arith.constant 0 : index
      %333 = vector.load %arg7[%c0_199, %c0_200] : memref<422x128xbf16, #tpu.memory_space<vmem>>, vector<19x128xbf16>
      tpu.vector_store %arg7[%c0_199, %c0_200], %332 {strides = array<i32>} : memref<422x128xbf16, #tpu.memory_space<vmem>>, vector<19x128xbf16>,
      %c0_201 = arith.constant 0 : index
      %c0_202 = arith.constant 0 : index
      %c0_203 = arith.constant 0 : index
      %334 = vector.load %arg3[%c0_201, %c0_202, %c0_203] : memref<1x408x128xf32, #tpu.memory_space<vmem>>, vector<1x403x128xf32>
      %335 = vector.shape_cast %334 : vector<1x403x128xf32> to vector<403x128xf32>
      %cst_204 = arith.constant 0.000000e+00 : f32
      %336 = vector.broadcast %cst_204 : f32 to vector<403x128xf32>
      %337 = arith.maximumf %335, %336 : vector<403x128xf32>
      %338 = arith.truncf %337 : vector<403x128xf32> to vector<403x128xbf16>
      %c19_205 = arith.constant 19 : index
      %c0_206 = arith.constant 0 : index
      %339 = vector.load %arg7[%c19_205, %c0_206] : memref<422x128xbf16, #tpu.memory_space<vmem>>, vector<403x128xbf16>
      tpu.vector_store %arg7[%c19_205, %c0_206], %338 {strides = array<i32>} : memref<422x128xbf16, #tpu.memory_space<vmem>>, vector<403x128xbf16>,
    } else {
    }
    %c0 = arith.constant 0 : index
    %c0_1 = arith.constant 0 : index
    %4 = vector.load %arg5[%c0, %c0_1] : memref<1x128xf32, #tpu.memory_space<vmem>>, vector<1x128xf32>
    %c0_2 = arith.constant 0 : index
    %c0_3 = arith.constant 0 : index
    %5 = vector.load %arg7[%c0_2, %c0_3] : memref<422x128xbf16, #tpu.memory_space<vmem>>, vector<128x128xbf16>
    %c0_4 = arith.constant 0 : index
    %c0_5 = arith.constant 0 : index
    %c0_6 = arith.constant 0 : index
    %6 = vector.load %arg4[%c0_4, %c0_5, %c0_6] : memref<9x128x128xbf16, #tpu.memory_space<vmem>>, vector<1x128x128xbf16>
    %7 = vector.shape_cast %6 : vector<1x128x128xbf16> to vector<128x128xbf16>
    %cst = arith.constant dense<0.000000e+00> : vector<128x128xf32>
    %8 = tpu.matmul %5, %7, %cst {dimension_numbers = #tpu.dot_dimension_numbers<[1], [0], [0], [1], [0, 0, 1, 1], [], []>} : vector<128x128xbf16>, vector<128x128xbf16>, vector<128x128xf32> -> vector<128x128xf32>
    %c1 = arith.constant 1 : index
    %c0_7 = arith.constant 0 : index
    %9 = vector.load %arg7[%c1, %c0_7] : memref<422x128xbf16, #tpu.memory_space<vmem>>, vector<128x128xbf16>
    %c1_8 = arith.constant 1 : index
    %c0_9 = arith.constant 0 : index
    %c0_10 = arith.constant 0 : index
    %10 = vector.load %arg4[%c1_8, %c0_9, %c0_10] : memref<9x128x128xbf16, #tpu.memory_space<vmem>>, vector<1x128x128xbf16>
    %11 = vector.shape_cast %10 : vector<1x128x128xbf16> to vector<128x128xbf16>
    %cst_11 = arith.constant dense<0.000000e+00> : vector<128x128xf32>
    %12 = tpu.matmul %9, %11, %cst_11 {dimension_numbers = #tpu.dot_dimension_numbers<[1], [0], [0], [1], [0, 0, 1, 1], [], []>} : vector<128x128xbf16>, vector<128x128xbf16>, vector<128x128xf32> -> vector<128x128xf32>
    %13 = arith.addf %8, %12 : vector<128x128xf32>
    %c2 = arith.constant 2 : index
    %c0_12 = arith.constant 0 : index
    %14 = vector.load %arg7[%c2, %c0_12] : memref<422x128xbf16, #tpu.memory_space<vmem>>, vector<128x128xbf16>
    %c2_13 = arith.constant 2 : index
    %c0_14 = arith.constant 0 : index
    %c0_15 = arith.constant 0 : index
    %15 = vector.load %arg4[%c2_13, %c0_14, %c0_15] : memref<9x128x128xbf16, #tpu.memory_space<vmem>>, vector<1x128x128xbf16>
    %16 = vector.shape_cast %15 : vector<1x128x128xbf16> to vector<128x128xbf16>
    %cst_16 = arith.constant dense<0.000000e+00> : vector<128x128xf32>
    %17 = tpu.matmul %14, %16, %cst_16 {dimension_numbers = #tpu.dot_dimension_numbers<[1], [0], [0], [1], [0, 0, 1, 1], [], []>} : vector<128x128xbf16>, vector<128x128xbf16>, vector<128x128xf32> -> vector<128x128xf32>
    %18 = arith.addf %13, %17 : vector<128x128xf32>
    %c18 = arith.constant 18 : index
    %c0_17 = arith.constant 0 : index
    %19 = vector.load %arg7[%c18, %c0_17] : memref<422x128xbf16, #tpu.memory_space<vmem>>, vector<128x128xbf16>
    %c3 = arith.constant 3 : index
    %c0_18 = arith.constant 0 : index
    %c0_19 = arith.constant 0 : index
    %20 = vector.load %arg4[%c3, %c0_18, %c0_19] : memref<9x128x128xbf16, #tpu.memory_space<vmem>>, vector<1x128x128xbf16>
    %21 = vector.shape_cast %20 : vector<1x128x128xbf16> to vector<128x128xbf16>
    %cst_20 = arith.constant dense<0.000000e+00> : vector<128x128xf32>
    %22 = tpu.matmul %19, %21, %cst_20 {dimension_numbers = #tpu.dot_dimension_numbers<[1], [0], [0], [1], [0, 0, 1, 1], [], []>} : vector<128x128xbf16>, vector<128x128xbf16>, vector<128x128xf32> -> vector<128x128xf32>
    %23 = arith.addf %18, %22 : vector<128x128xf32>
    %c19 = arith.constant 19 : index
    %c0_21 = arith.constant 0 : index
    %24 = vector.load %arg7[%c19, %c0_21] : memref<422x128xbf16, #tpu.memory_space<vmem>>, vector<128x128xbf16>
    %c4 = arith.constant 4 : index
    %c0_22 = arith.constant 0 : index
    %c0_23 = arith.constant 0 : index
    %25 = vector.load %arg4[%c4, %c0_22, %c0_23] : memref<9x128x128xbf16, #tpu.memory_space<vmem>>, vector<1x128x128xbf16>
    %26 = vector.shape_cast %25 : vector<1x128x128xbf16> to vector<128x128xbf16>
    %cst_24 = arith.constant dense<0.000000e+00> : vector<128x128xf32>
    %27 = tpu.matmul %24, %26, %cst_24 {dimension_numbers = #tpu.dot_dimension_numbers<[1], [0], [0], [1], [0, 0, 1, 1], [], []>} : vector<128x128xbf16>, vector<128x128xbf16>, vector<128x128xf32> -> vector<128x128xf32>
    %28 = arith.addf %23, %27 : vector<128x128xf32>
    %c20 = arith.constant 20 : index
    %c0_25 = arith.constant 0 : index
    %29 = vector.load %arg7[%c20, %c0_25] : memref<422x128xbf16, #tpu.memory_space<vmem>>, vector<128x128xbf16>
    %c5 = arith.constant 5 : index
    %c0_26 = arith.constant 0 : index
    %c0_27 = arith.constant 0 : index
    %30 = vector.load %arg4[%c5, %c0_26, %c0_27] : memref<9x128x128xbf16, #tpu.memory_space<vmem>>, vector<1x128x128xbf16>
    %31 = vector.shape_cast %30 : vector<1x128x128xbf16> to vector<128x128xbf16>
    %cst_28 = arith.constant dense<0.000000e+00> : vector<128x128xf32>
    %32 = tpu.matmul %29, %31, %cst_28 {dimension_numbers = #tpu.dot_dimension_numbers<[1], [0], [0], [1], [0, 0, 1, 1], [], []>} : vector<128x128xbf16>, vector<128x128xbf16>, vector<128x128xf32> -> vector<128x128xf32>
    %33 = arith.addf %28, %32 : vector<128x128xf32>
    %c36 = arith.constant 36 : index
    %c0_29 = arith.constant 0 : index
    %34 = vector.load %arg7[%c36, %c0_29] : memref<422x128xbf16, #tpu.memory_space<vmem>>, vector<128x128xbf16>
    %c6 = arith.constant 6 : index
    %c0_30 = arith.constant 0 : index
    %c0_31 = arith.constant 0 : index
    %35 = vector.load %arg4[%c6, %c0_30, %c0_31] : memref<9x128x128xbf16, #tpu.memory_space<vmem>>, vector<1x128x128xbf16>
    %36 = vector.shape_cast %35 : vector<1x128x128xbf16> to vector<128x128xbf16>
    %cst_32 = arith.constant dense<0.000000e+00> : vector<128x128xf32>
    %37 = tpu.matmul %34, %36, %cst_32 {dimension_numbers = #tpu.dot_dimension_numbers<[1], [0], [0], [1], [0, 0, 1, 1], [], []>} : vector<128x128xbf16>, vector<128x128xbf16>, vector<128x128xf32> -> vector<128x128xf32>
    %38 = arith.addf %33, %37 : vector<128x128xf32>
    %c37 = arith.constant 37 : index
    %c0_33 = arith.constant 0 : index
    %39 = vector.load %arg7[%c37, %c0_33] : memref<422x128xbf16, #tpu.memory_space<vmem>>, vector<128x128xbf16>
    %c7 = arith.constant 7 : index
    %c0_34 = arith.constant 0 : index
    %c0_35 = arith.constant 0 : index
    %40 = vector.load %arg4[%c7, %c0_34, %c0_35] : memref<9x128x128xbf16, #tpu.memory_space<vmem>>, vector<1x128x128xbf16>
    %41 = vector.shape_cast %40 : vector<1x128x128xbf16> to vector<128x128xbf16>
    %cst_36 = arith.constant dense<0.000000e+00> : vector<128x128xf32>
    %42 = tpu.matmul %39, %41, %cst_36 {dimension_numbers = #tpu.dot_dimension_numbers<[1], [0], [0], [1], [0, 0, 1, 1], [], []>} : vector<128x128xbf16>, vector<128x128xbf16>, vector<128x128xf32> -> vector<128x128xf32>
    %43 = arith.addf %38, %42 : vector<128x128xf32>
    %c38 = arith.constant 38 : index
    %c0_37 = arith.constant 0 : index
    %44 = vector.load %arg7[%c38, %c0_37] : memref<422x128xbf16, #tpu.memory_space<vmem>>, vector<128x128xbf16>
    %c8 = arith.constant 8 : index
    %c0_38 = arith.constant 0 : index
    %c0_39 = arith.constant 0 : index
    %45 = vector.load %arg4[%c8, %c0_38, %c0_39] : memref<9x128x128xbf16, #tpu.memory_space<vmem>>, vector<1x128x128xbf16>
    %46 = vector.shape_cast %45 : vector<1x128x128xbf16> to vector<128x128xbf16>
    %cst_40 = arith.constant dense<0.000000e+00> : vector<128x128xf32>
    %47 = tpu.matmul %44, %46, %cst_40 {dimension_numbers = #tpu.dot_dimension_numbers<[1], [0], [0], [1], [0, 0, 1, 1], [], []>} : vector<128x128xbf16>, vector<128x128xbf16>, vector<128x128xf32> -> vector<128x128xf32>
    %48 = arith.addf %43, %47 : vector<128x128xf32>
    %49 = vector.broadcast %4 : vector<1x128xf32> to vector<128x128xf32>
    %50 = arith.addf %48, %49 : vector<128x128xf32>
    %51 = tpu.iota {dimensions = array<i32: 0>} : vector<128x1xi32>
    %c3_i32 = arith.constant 3 : i32
    %52 = arith.muli %arg1, %c3_i32 : i32
    %c0_i32_41 = arith.constant 0 : i32
    %53 = arith.addi %52, %c0_i32_41 : i32
    %54 = arith.index_cast %53 : i32 to index
    %55 = memref.load %arg2[%54] : memref<3xi32, #tpu.memory_space<smem>>
    %56 = vector.broadcast %55 : i32 to vector<128x1xi32>
    %57 = arith.addi %56, %51 : vector<128x1xi32>
    %c18_i32 = arith.constant 18 : i32
    %58 = vector.broadcast %c18_i32 : i32 to vector<128x1xi32>
    %59 = arith.cmpi sge, %57, %58 : vector<128x1xi32>
    %c18_i32_42 = arith.constant 18 : i32
    %60 = vector.broadcast %c18_i32_42 : i32 to vector<128x1xi32>
    %61 = arith.subi %57, %60 : vector<128x1xi32>
    %62 = arith.select %59, %61, %57 : vector<128x1xi1>, vector<128x1xi32>
    %c18_i32_43 = arith.constant 18 : i32
    %63 = vector.broadcast %c18_i32_43 : i32 to vector<128x1xi32>
    %64 = arith.cmpi sge, %62, %63 : vector<128x1xi32>
    %c18_i32_44 = arith.constant 18 : i32
    %65 = vector.broadcast %c18_i32_44 : i32 to vector<128x1xi32>
    %66 = arith.subi %62, %65 : vector<128x1xi32>
    %67 = arith.select %64, %66, %62 : vector<128x1xi1>, vector<128x1xi32>
    %c18_i32_45 = arith.constant 18 : i32
    %68 = vector.broadcast %c18_i32_45 : i32 to vector<128x1xi32>
    %69 = arith.cmpi sge, %67, %68 : vector<128x1xi32>
    %c18_i32_46 = arith.constant 18 : i32
    %70 = vector.broadcast %c18_i32_46 : i32 to vector<128x1xi32>
    %71 = arith.subi %67, %70 : vector<128x1xi32>
    %72 = arith.select %69, %71, %67 : vector<128x1xi1>, vector<128x1xi32>
    %c18_i32_47 = arith.constant 18 : i32
    %73 = vector.broadcast %c18_i32_47 : i32 to vector<128x1xi32>
    %74 = arith.cmpi sge, %72, %73 : vector<128x1xi32>
    %c18_i32_48 = arith.constant 18 : i32
    %75 = vector.broadcast %c18_i32_48 : i32 to vector<128x1xi32>
    %76 = arith.subi %72, %75 : vector<128x1xi32>
    %77 = arith.select %74, %76, %72 : vector<128x1xi1>, vector<128x1xi32>
    %c18_i32_49 = arith.constant 18 : i32
    %78 = vector.broadcast %c18_i32_49 : i32 to vector<128x1xi32>
    %79 = arith.cmpi sge, %77, %78 : vector<128x1xi32>
    %c18_i32_50 = arith.constant 18 : i32
    %80 = vector.broadcast %c18_i32_50 : i32 to vector<128x1xi32>
    %81 = arith.subi %77, %80 : vector<128x1xi32>
    %82 = arith.select %79, %81, %77 : vector<128x1xi1>, vector<128x1xi32>
    %c18_i32_51 = arith.constant 18 : i32
    %83 = vector.broadcast %c18_i32_51 : i32 to vector<128x1xi32>
    %84 = arith.cmpi sge, %82, %83 : vector<128x1xi32>
    %c18_i32_52 = arith.constant 18 : i32
    %85 = vector.broadcast %c18_i32_52 : i32 to vector<128x1xi32>
    %86 = arith.subi %82, %85 : vector<128x1xi32>
    %87 = arith.select %84, %86, %82 : vector<128x1xi1>, vector<128x1xi32>
    %c18_i32_53 = arith.constant 18 : i32
    %88 = vector.broadcast %c18_i32_53 : i32 to vector<128x1xi32>
    %89 = arith.cmpi sge, %87, %88 : vector<128x1xi32>
    %c18_i32_54 = arith.constant 18 : i32
    %90 = vector.broadcast %c18_i32_54 : i32 to vector<128x1xi32>
    %91 = arith.subi %87, %90 : vector<128x1xi32>
    %92 = arith.select %89, %91, %87 : vector<128x1xi1>, vector<128x1xi32>
    %c18_i32_55 = arith.constant 18 : i32
    %93 = vector.broadcast %c18_i32_55 : i32 to vector<128x1xi32>
    %94 = arith.cmpi sge, %92, %93 : vector<128x1xi32>
    %c18_i32_56 = arith.constant 18 : i32
    %95 = vector.broadcast %c18_i32_56 : i32 to vector<128x1xi32>
    %96 = arith.subi %92, %95 : vector<128x1xi32>
    %97 = arith.select %94, %96, %92 : vector<128x1xi1>, vector<128x1xi32>
    %c0_i32_57 = arith.constant 0 : i32
    %98 = arith.addi %0, %c0_i32_57 : i32
    %99 = vector.broadcast %98 : i32 to vector<128x1xi32>
    %100 = arith.addi %99, %51 : vector<128x1xi32>
    %c16_i32 = arith.constant 16 : i32
    %101 = vector.broadcast %c16_i32 : i32 to vector<128x1xi32>
    %102 = arith.cmpi slt, %97, %101 : vector<128x1xi32>
    %c288_i32 = arith.constant 288 : i32
    %103 = vector.broadcast %c288_i32 : i32 to vector<128x1xi32>
    %104 = arith.cmpi slt, %100, %103 : vector<128x1xi32>
    %105 = arith.andi %102, %104 : vector<128x1xi1>
    %cst_58 = arith.constant 0.000000e+00 : f32
    %106 = vector.shape_cast %105 : vector<128x1xi1> to vector<128x1xi1>
    %107 = vector.broadcast %106 : vector<128x1xi1> to vector<128x128xi1>
    %108 = vector.broadcast %cst_58 : f32 to vector<128x128xf32>
    %109 = arith.select %107, %50, %108 : vector<128x128xi1>, vector<128x128xf32>
    %110 = arith.truncf %109 : vector<128x128xf32> to vector<128x128xbf16>
    %c0_59 = arith.constant 0 : index
    %c0_60 = arith.constant 0 : index
    %c0_61 = arith.constant 0 : index
    %111 = vector.load %arg6[%c0_59, %c0_60, %c0_61] : memref<1x384x128xbf16, #tpu.memory_space<vmem>>, vector<1x128x128xbf16>
    %112 = vector.shape_cast %111 : vector<1x128x128xbf16> to vector<128x128xbf16>
    %113 = vector.shape_cast %110 : vector<128x128xbf16> to vector<1x128x128xbf16>
    tpu.vector_store %arg6[%c0_59, %c0_60, %c0_61], %113 {strides = array<i32>} : memref<1x384x128xbf16, #tpu.memory_space<vmem>>, vector<1x128x128xbf16>,
    %c128 = arith.constant 128 : index
    %c0_62 = arith.constant 0 : index
    %114 = vector.load %arg7[%c128, %c0_62] : memref<422x128xbf16, #tpu.memory_space<vmem>>, vector<128x128xbf16>
    %c0_63 = arith.constant 0 : index
    %c0_64 = arith.constant 0 : index
    %c0_65 = arith.constant 0 : index
    %115 = vector.load %arg4[%c0_63, %c0_64, %c0_65] : memref<9x128x128xbf16, #tpu.memory_space<vmem>>, vector<1x128x128xbf16>
    %116 = vector.shape_cast %115 : vector<1x128x128xbf16> to vector<128x128xbf16>
    %cst_66 = arith.constant dense<0.000000e+00> : vector<128x128xf32>
    %117 = tpu.matmul %114, %116, %cst_66 {dimension_numbers = #tpu.dot_dimension_numbers<[1], [0], [0], [1], [0, 0, 1, 1], [], []>} : vector<128x128xbf16>, vector<128x128xbf16>, vector<128x128xf32> -> vector<128x128xf32>
    %c129 = arith.constant 129 : index
    %c0_67 = arith.constant 0 : index
    %118 = vector.load %arg7[%c129, %c0_67] : memref<422x128xbf16, #tpu.memory_space<vmem>>, vector<128x128xbf16>
    %c1_68 = arith.constant 1 : index
    %c0_69 = arith.constant 0 : index
    %c0_70 = arith.constant 0 : index
    %119 = vector.load %arg4[%c1_68, %c0_69, %c0_70] : memref<9x128x128xbf16, #tpu.memory_space<vmem>>, vector<1x128x128xbf16>
    %120 = vector.shape_cast %119 : vector<1x128x128xbf16> to vector<128x128xbf16>
    %cst_71 = arith.constant dense<0.000000e+00> : vector<128x128xf32>
    %121 = tpu.matmul %118, %120, %cst_71 {dimension_numbers = #tpu.dot_dimension_numbers<[1], [0], [0], [1], [0, 0, 1, 1], [], []>} : vector<128x128xbf16>, vector<128x128xbf16>, vector<128x128xf32> -> vector<128x128xf32>
    %122 = arith.addf %117, %121 : vector<128x128xf32>
    %c130 = arith.constant 130 : index
    %c0_72 = arith.constant 0 : index
    %123 = vector.load %arg7[%c130, %c0_72] : memref<422x128xbf16, #tpu.memory_space<vmem>>, vector<128x128xbf16>
    %c2_73 = arith.constant 2 : index
    %c0_74 = arith.constant 0 : index
    %c0_75 = arith.constant 0 : index
    %124 = vector.load %arg4[%c2_73, %c0_74, %c0_75] : memref<9x128x128xbf16, #tpu.memory_space<vmem>>, vector<1x128x128xbf16>
    %125 = vector.shape_cast %124 : vector<1x128x128xbf16> to vector<128x128xbf16>
    %cst_76 = arith.constant dense<0.000000e+00> : vector<128x128xf32>
    %126 = tpu.matmul %123, %125, %cst_76 {dimension_numbers = #tpu.dot_dimension_numbers<[1], [0], [0], [1], [0, 0, 1, 1], [], []>} : vector<128x128xbf16>, vector<128x128xbf16>, vector<128x128xf32> -> vector<128x128xf32>
    %127 = arith.addf %122, %126 : vector<128x128xf32>
    %c146 = arith.constant 146 : index
    %c0_77 = arith.constant 0 : index
    %128 = vector.load %arg7[%c146, %c0_77] : memref<422x128xbf16, #tpu.memory_space<vmem>>, vector<128x128xbf16>
    %c3_78 = arith.constant 3 : index
    %c0_79 = arith.constant 0 : index
    %c0_80 = arith.constant 0 : index
    %129 = vector.load %arg4[%c3_78, %c0_79, %c0_80] : memref<9x128x128xbf16, #tpu.memory_space<vmem>>, vector<1x128x128xbf16>
    %130 = vector.shape_cast %129 : vector<1x128x128xbf16> to vector<128x128xbf16>
    %cst_81 = arith.constant dense<0.000000e+00> : vector<128x128xf32>
    %131 = tpu.matmul %128, %130, %cst_81 {dimension_numbers = #tpu.dot_dimension_numbers<[1], [0], [0], [1], [0, 0, 1, 1], [], []>} : vector<128x128xbf16>, vector<128x128xbf16>, vector<128x128xf32> -> vector<128x128xf32>
    %132 = arith.addf %127, %131 : vector<128x128xf32>
    %c147 = arith.constant 147 : index
    %c0_82 = arith.constant 0 : index
    %133 = vector.load %arg7[%c147, %c0_82] : memref<422x128xbf16, #tpu.memory_space<vmem>>, vector<128x128xbf16>
    %c4_83 = arith.constant 4 : index
    %c0_84 = arith.constant 0 : index
    %c0_85 = arith.constant 0 : index
    %134 = vector.load %arg4[%c4_83, %c0_84, %c0_85] : memref<9x128x128xbf16, #tpu.memory_space<vmem>>, vector<1x128x128xbf16>
    %135 = vector.shape_cast %134 : vector<1x128x128xbf16> to vector<128x128xbf16>
    %cst_86 = arith.constant dense<0.000000e+00> : vector<128x128xf32>
    %136 = tpu.matmul %133, %135, %cst_86 {dimension_numbers = #tpu.dot_dimension_numbers<[1], [0], [0], [1], [0, 0, 1, 1], [], []>} : vector<128x128xbf16>, vector<128x128xbf16>, vector<128x128xf32> -> vector<128x128xf32>
    %137 = arith.addf %132, %136 : vector<128x128xf32>
    %c148 = arith.constant 148 : index
    %c0_87 = arith.constant 0 : index
    %138 = vector.load %arg7[%c148, %c0_87] : memref<422x128xbf16, #tpu.memory_space<vmem>>, vector<128x128xbf16>
    %c5_88 = arith.constant 5 : index
    %c0_89 = arith.constant 0 : index
    %c0_90 = arith.constant 0 : index
    %139 = vector.load %arg4[%c5_88, %c0_89, %c0_90] : memref<9x128x128xbf16, #tpu.memory_space<vmem>>, vector<1x128x128xbf16>
    %140 = vector.shape_cast %139 : vector<1x128x128xbf16> to vector<128x128xbf16>
    %cst_91 = arith.constant dense<0.000000e+00> : vector<128x128xf32>
    %141 = tpu.matmul %138, %140, %cst_91 {dimension_numbers = #tpu.dot_dimension_numbers<[1], [0], [0], [1], [0, 0, 1, 1], [], []>} : vector<128x128xbf16>, vector<128x128xbf16>, vector<128x128xf32> -> vector<128x128xf32>
    %142 = arith.addf %137, %141 : vector<128x128xf32>
    %c164 = arith.constant 164 : index
    %c0_92 = arith.constant 0 : index
    %143 = vector.load %arg7[%c164, %c0_92] : memref<422x128xbf16, #tpu.memory_space<vmem>>, vector<128x128xbf16>
    %c6_93 = arith.constant 6 : index
    %c0_94 = arith.constant 0 : index
    %c0_95 = arith.constant 0 : index
    %144 = vector.load %arg4[%c6_93, %c0_94, %c0_95] : memref<9x128x128xbf16, #tpu.memory_space<vmem>>, vector<1x128x128xbf16>
    %145 = vector.shape_cast %144 : vector<1x128x128xbf16> to vector<128x128xbf16>
    %cst_96 = arith.constant dense<0.000000e+00> : vector<128x128xf32>
    %146 = tpu.matmul %143, %145, %cst_96 {dimension_numbers = #tpu.dot_dimension_numbers<[1], [0], [0], [1], [0, 0, 1, 1], [], []>} : vector<128x128xbf16>, vector<128x128xbf16>, vector<128x128xf32> -> vector<128x128xf32>
    %147 = arith.addf %142, %146 : vector<128x128xf32>
    %c165 = arith.constant 165 : index
    %c0_97 = arith.constant 0 : index
    %148 = vector.load %arg7[%c165, %c0_97] : memref<422x128xbf16, #tpu.memory_space<vmem>>, vector<128x128xbf16>
    %c7_98 = arith.constant 7 : index
    %c0_99 = arith.constant 0 : index
    %c0_100 = arith.constant 0 : index
    %149 = vector.load %arg4[%c7_98, %c0_99, %c0_100] : memref<9x128x128xbf16, #tpu.memory_space<vmem>>, vector<1x128x128xbf16>
    %150 = vector.shape_cast %149 : vector<1x128x128xbf16> to vector<128x128xbf16>
    %cst_101 = arith.constant dense<0.000000e+00> : vector<128x128xf32>
    %151 = tpu.matmul %148, %150, %cst_101 {dimension_numbers = #tpu.dot_dimension_numbers<[1], [0], [0], [1], [0, 0, 1, 1], [], []>} : vector<128x128xbf16>, vector<128x128xbf16>, vector<128x128xf32> -> vector<128x128xf32>
    %152 = arith.addf %147, %151 : vector<128x128xf32>
    %c166 = arith.constant 166 : index
    %c0_102 = arith.constant 0 : index
    %153 = vector.load %arg7[%c166, %c0_102] : memref<422x128xbf16, #tpu.memory_space<vmem>>, vector<128x128xbf16>
    %c8_103 = arith.constant 8 : index
    %c0_104 = arith.constant 0 : index
    %c0_105 = arith.constant 0 : index
    %154 = vector.load %arg4[%c8_103, %c0_104, %c0_105] : memref<9x128x128xbf16, #tpu.memory_space<vmem>>, vector<1x128x128xbf16>
    %155 = vector.shape_cast %154 : vector<1x128x128xbf16> to vector<128x128xbf16>
    %cst_106 = arith.constant dense<0.000000e+00> : vector<128x128xf32>
    %156 = tpu.matmul %153, %155, %cst_106 {dimension_numbers = #tpu.dot_dimension_numbers<[1], [0], [0], [1], [0, 0, 1, 1], [], []>} : vector<128x128xbf16>, vector<128x128xbf16>, vector<128x128xf32> -> vector<128x128xf32>
    %157 = arith.addf %152, %156 : vector<128x128xf32>
    %158 = vector.broadcast %4 : vector<1x128xf32> to vector<128x128xf32>
    %159 = arith.addf %157, %158 : vector<128x128xf32>
    %160 = tpu.iota {dimensions = array<i32: 0>} : vector<128x1xi32>
    %c3_i32_107 = arith.constant 3 : i32
    %161 = arith.muli %arg1, %c3_i32_107 : i32
    %c1_i32 = arith.constant 1 : i32
    %162 = arith.addi %161, %c1_i32 : i32
    %163 = arith.index_cast %162 : i32 to index
    %164 = memref.load %arg2[%163] : memref<3xi32, #tpu.memory_space<smem>>
    %165 = vector.broadcast %164 : i32 to vector<128x1xi32>
    %166 = arith.addi %165, %160 : vector<128x1xi32>
    %c18_i32_108 = arith.constant 18 : i32
    %167 = vector.broadcast %c18_i32_108 : i32 to vector<128x1xi32>
    %168 = arith.cmpi sge, %166, %167 : vector<128x1xi32>
    %c18_i32_109 = arith.constant 18 : i32
    %169 = vector.broadcast %c18_i32_109 : i32 to vector<128x1xi32>
    %170 = arith.subi %166, %169 : vector<128x1xi32>
    %171 = arith.select %168, %170, %166 : vector<128x1xi1>, vector<128x1xi32>
    %c18_i32_110 = arith.constant 18 : i32
    %172 = vector.broadcast %c18_i32_110 : i32 to vector<128x1xi32>
    %173 = arith.cmpi sge, %171, %172 : vector<128x1xi32>
    %c18_i32_111 = arith.constant 18 : i32
    %174 = vector.broadcast %c18_i32_111 : i32 to vector<128x1xi32>
    %175 = arith.subi %171, %174 : vector<128x1xi32>
    %176 = arith.select %173, %175, %171 : vector<128x1xi1>, vector<128x1xi32>
    %c18_i32_112 = arith.constant 18 : i32
    %177 = vector.broadcast %c18_i32_112 : i32 to vector<128x1xi32>
    %178 = arith.cmpi sge, %176, %177 : vector<128x1xi32>
    %c18_i32_113 = arith.constant 18 : i32
    %179 = vector.broadcast %c18_i32_113 : i32 to vector<128x1xi32>
    %180 = arith.subi %176, %179 : vector<128x1xi32>
    %181 = arith.select %178, %180, %176 : vector<128x1xi1>, vector<128x1xi32>
    %c18_i32_114 = arith.constant 18 : i32
    %182 = vector.broadcast %c18_i32_114 : i32 to vector<128x1xi32>
    %183 = arith.cmpi sge, %181, %182 : vector<128x1xi32>
    %c18_i32_115 = arith.constant 18 : i32
    %184 = vector.broadcast %c18_i32_115 : i32 to vector<128x1xi32>
    %185 = arith.subi %181, %184 : vector<128x1xi32>
    %186 = arith.select %183, %185, %181 : vector<128x1xi1>, vector<128x1xi32>
    %c18_i32_116 = arith.constant 18 : i32
    %187 = vector.broadcast %c18_i32_116 : i32 to vector<128x1xi32>
    %188 = arith.cmpi sge, %186, %187 : vector<128x1xi32>
    %c18_i32_117 = arith.constant 18 : i32
    %189 = vector.broadcast %c18_i32_117 : i32 to vector<128x1xi32>
    %190 = arith.subi %186, %189 : vector<128x1xi32>
    %191 = arith.select %188, %190, %186 : vector<128x1xi1>, vector<128x1xi32>
    %c18_i32_118 = arith.constant 18 : i32
    %192 = vector.broadcast %c18_i32_118 : i32 to vector<128x1xi32>
    %193 = arith.cmpi sge, %191, %192 : vector<128x1xi32>
    %c18_i32_119 = arith.constant 18 : i32
    %194 = vector.broadcast %c18_i32_119 : i32 to vector<128x1xi32>
    %195 = arith.subi %191, %194 : vector<128x1xi32>
    %196 = arith.select %193, %195, %191 : vector<128x1xi1>, vector<128x1xi32>
    %c18_i32_120 = arith.constant 18 : i32
    %197 = vector.broadcast %c18_i32_120 : i32 to vector<128x1xi32>
    %198 = arith.cmpi sge, %196, %197 : vector<128x1xi32>
    %c18_i32_121 = arith.constant 18 : i32
    %199 = vector.broadcast %c18_i32_121 : i32 to vector<128x1xi32>
    %200 = arith.subi %196, %199 : vector<128x1xi32>
    %201 = arith.select %198, %200, %196 : vector<128x1xi1>, vector<128x1xi32>
    %c18_i32_122 = arith.constant 18 : i32
    %202 = vector.broadcast %c18_i32_122 : i32 to vector<128x1xi32>
    %203 = arith.cmpi sge, %201, %202 : vector<128x1xi32>
    %c18_i32_123 = arith.constant 18 : i32
    %204 = vector.broadcast %c18_i32_123 : i32 to vector<128x1xi32>
    %205 = arith.subi %201, %204 : vector<128x1xi32>
    %206 = arith.select %203, %205, %201 : vector<128x1xi1>, vector<128x1xi32>
    %c128_i32 = arith.constant 128 : i32
    %207 = arith.addi %0, %c128_i32 : i32
    %208 = vector.broadcast %207 : i32 to vector<128x1xi32>
    %209 = arith.addi %208, %160 : vector<128x1xi32>
    %c16_i32_124 = arith.constant 16 : i32
    %210 = vector.broadcast %c16_i32_124 : i32 to vector<128x1xi32>
    %211 = arith.cmpi slt, %206, %210 : vector<128x1xi32>
    %c288_i32_125 = arith.constant 288 : i32
    %212 = vector.broadcast %c288_i32_125 : i32 to vector<128x1xi32>
    %213 = arith.cmpi slt, %209, %212 : vector<128x1xi32>
    %214 = arith.andi %211, %213 : vector<128x1xi1>
    %cst_126 = arith.constant 0.000000e+00 : f32
    %215 = vector.shape_cast %214 : vector<128x1xi1> to vector<128x1xi1>
    %216 = vector.broadcast %215 : vector<128x1xi1> to vector<128x128xi1>
    %217 = vector.broadcast %cst_126 : f32 to vector<128x128xf32>
    %218 = arith.select %216, %159, %217 : vector<128x128xi1>, vector<128x128xf32>
    %219 = arith.truncf %218 : vector<128x128xf32> to vector<128x128xbf16>
    %c0_127 = arith.constant 0 : index
    %c128_128 = arith.constant 128 : index
    %c0_129 = arith.constant 0 : index
    %220 = vector.load %arg6[%c0_127, %c128_128, %c0_129] : memref<1x384x128xbf16, #tpu.memory_space<vmem>>, vector<1x128x128xbf16>
    %221 = vector.shape_cast %220 : vector<1x128x128xbf16> to vector<128x128xbf16>
    %222 = vector.shape_cast %219 : vector<128x128xbf16> to vector<1x128x128xbf16>
    tpu.vector_store %arg6[%c0_127, %c128_128, %c0_129], %222 {strides = array<i32>} : memref<1x384x128xbf16, #tpu.memory_space<vmem>>, vector<1x128x128xbf16>,
    %c256 = arith.constant 256 : index
    %c0_130 = arith.constant 0 : index
    %223 = vector.load %arg7[%c256, %c0_130] : memref<422x128xbf16, #tpu.memory_space<vmem>>, vector<128x128xbf16>
    %c0_131 = arith.constant 0 : index
    %c0_132 = arith.constant 0 : index
    %c0_133 = arith.constant 0 : index
    %224 = vector.load %arg4[%c0_131, %c0_132, %c0_133] : memref<9x128x128xbf16, #tpu.memory_space<vmem>>, vector<1x128x128xbf16>
    %225 = vector.shape_cast %224 : vector<1x128x128xbf16> to vector<128x128xbf16>
    %cst_134 = arith.constant dense<0.000000e+00> : vector<128x128xf32>
    %226 = tpu.matmul %223, %225, %cst_134 {dimension_numbers = #tpu.dot_dimension_numbers<[1], [0], [0], [1], [0, 0, 1, 1], [], []>} : vector<128x128xbf16>, vector<128x128xbf16>, vector<128x128xf32> -> vector<128x128xf32>
    %c257 = arith.constant 257 : index
    %c0_135 = arith.constant 0 : index
    %227 = vector.load %arg7[%c257, %c0_135] : memref<422x128xbf16, #tpu.memory_space<vmem>>, vector<128x128xbf16>
    %c1_136 = arith.constant 1 : index
    %c0_137 = arith.constant 0 : index
    %c0_138 = arith.constant 0 : index
    %228 = vector.load %arg4[%c1_136, %c0_137, %c0_138] : memref<9x128x128xbf16, #tpu.memory_space<vmem>>, vector<1x128x128xbf16>
    %229 = vector.shape_cast %228 : vector<1x128x128xbf16> to vector<128x128xbf16>
    %cst_139 = arith.constant dense<0.000000e+00> : vector<128x128xf32>
    %230 = tpu.matmul %227, %229, %cst_139 {dimension_numbers = #tpu.dot_dimension_numbers<[1], [0], [0], [1], [0, 0, 1, 1], [], []>} : vector<128x128xbf16>, vector<128x128xbf16>, vector<128x128xf32> -> vector<128x128xf32>
    %231 = arith.addf %226, %230 : vector<128x128xf32>
    %c258 = arith.constant 258 : index
    %c0_140 = arith.constant 0 : index
    %232 = vector.load %arg7[%c258, %c0_140] : memref<422x128xbf16, #tpu.memory_space<vmem>>, vector<128x128xbf16>
    %c2_141 = arith.constant 2 : index
    %c0_142 = arith.constant 0 : index
    %c0_143 = arith.constant 0 : index
    %233 = vector.load %arg4[%c2_141, %c0_142, %c0_143] : memref<9x128x128xbf16, #tpu.memory_space<vmem>>, vector<1x128x128xbf16>
    %234 = vector.shape_cast %233 : vector<1x128x128xbf16> to vector<128x128xbf16>
    %cst_144 = arith.constant dense<0.000000e+00> : vector<128x128xf32>
    %235 = tpu.matmul %232, %234, %cst_144 {dimension_numbers = #tpu.dot_dimension_numbers<[1], [0], [0], [1], [0, 0, 1, 1], [], []>} : vector<128x128xbf16>, vector<128x128xbf16>, vector<128x128xf32> -> vector<128x128xf32>
    %236 = arith.addf %231, %235 : vector<128x128xf32>
    %c274 = arith.constant 274 : index
    %c0_145 = arith.constant 0 : index
    %237 = vector.load %arg7[%c274, %c0_145] : memref<422x128xbf16, #tpu.memory_space<vmem>>, vector<128x128xbf16>
    %c3_146 = arith.constant 3 : index
    %c0_147 = arith.constant 0 : index
    %c0_148 = arith.constant 0 : index
    %238 = vector.load %arg4[%c3_146, %c0_147, %c0_148] : memref<9x128x128xbf16, #tpu.memory_space<vmem>>, vector<1x128x128xbf16>
    %239 = vector.shape_cast %238 : vector<1x128x128xbf16> to vector<128x128xbf16>
    %cst_149 = arith.constant dense<0.000000e+00> : vector<128x128xf32>
    %240 = tpu.matmul %237, %239, %cst_149 {dimension_numbers = #tpu.dot_dimension_numbers<[1], [0], [0], [1], [0, 0, 1, 1], [], []>} : vector<128x128xbf16>, vector<128x128xbf16>, vector<128x128xf32> -> vector<128x128xf32>
    %241 = arith.addf %236, %240 : vector<128x128xf32>
    %c275 = arith.constant 275 : index
    %c0_150 = arith.constant 0 : index
    %242 = vector.load %arg7[%c275, %c0_150] : memref<422x128xbf16, #tpu.memory_space<vmem>>, vector<128x128xbf16>
    %c4_151 = arith.constant 4 : index
    %c0_152 = arith.constant 0 : index
    %c0_153 = arith.constant 0 : index
    %243 = vector.load %arg4[%c4_151, %c0_152, %c0_153] : memref<9x128x128xbf16, #tpu.memory_space<vmem>>, vector<1x128x128xbf16>
    %244 = vector.shape_cast %243 : vector<1x128x128xbf16> to vector<128x128xbf16>
    %cst_154 = arith.constant dense<0.000000e+00> : vector<128x128xf32>
    %245 = tpu.matmul %242, %244, %cst_154 {dimension_numbers = #tpu.dot_dimension_numbers<[1], [0], [0], [1], [0, 0, 1, 1], [], []>} : vector<128x128xbf16>, vector<128x128xbf16>, vector<128x128xf32> -> vector<128x128xf32>
    %246 = arith.addf %241, %245 : vector<128x128xf32>
    %c276 = arith.constant 276 : index
    %c0_155 = arith.constant 0 : index
    %247 = vector.load %arg7[%c276, %c0_155] : memref<422x128xbf16, #tpu.memory_space<vmem>>, vector<128x128xbf16>
    %c5_156 = arith.constant 5 : index
    %c0_157 = arith.constant 0 : index
    %c0_158 = arith.constant 0 : index
    %248 = vector.load %arg4[%c5_156, %c0_157, %c0_158] : memref<9x128x128xbf16, #tpu.memory_space<vmem>>, vector<1x128x128xbf16>
    %249 = vector.shape_cast %248 : vector<1x128x128xbf16> to vector<128x128xbf16>
    %cst_159 = arith.constant dense<0.000000e+00> : vector<128x128xf32>
    %250 = tpu.matmul %247, %249, %cst_159 {dimension_numbers = #tpu.dot_dimension_numbers<[1], [0], [0], [1], [0, 0, 1, 1], [], []>} : vector<128x128xbf16>, vector<128x128xbf16>, vector<128x128xf32> -> vector<128x128xf32>
    %251 = arith.addf %246, %250 : vector<128x128xf32>
    %c292 = arith.constant 292 : index
    %c0_160 = arith.constant 0 : index
    %252 = vector.load %arg7[%c292, %c0_160] : memref<422x128xbf16, #tpu.memory_space<vmem>>, vector<128x128xbf16>
    %c6_161 = arith.constant 6 : index
    %c0_162 = arith.constant 0 : index
    %c0_163 = arith.constant 0 : index
    %253 = vector.load %arg4[%c6_161, %c0_162, %c0_163] : memref<9x128x128xbf16, #tpu.memory_space<vmem>>, vector<1x128x128xbf16>
    %254 = vector.shape_cast %253 : vector<1x128x128xbf16> to vector<128x128xbf16>
    %cst_164 = arith.constant dense<0.000000e+00> : vector<128x128xf32>
    %255 = tpu.matmul %252, %254, %cst_164 {dimension_numbers = #tpu.dot_dimension_numbers<[1], [0], [0], [1], [0, 0, 1, 1], [], []>} : vector<128x128xbf16>, vector<128x128xbf16>, vector<128x128xf32> -> vector<128x128xf32>
    %256 = arith.addf %251, %255 : vector<128x128xf32>
    %c293 = arith.constant 293 : index
    %c0_165 = arith.constant 0 : index
    %257 = vector.load %arg7[%c293, %c0_165] : memref<422x128xbf16, #tpu.memory_space<vmem>>, vector<128x128xbf16>
    %c7_166 = arith.constant 7 : index
    %c0_167 = arith.constant 0 : index
    %c0_168 = arith.constant 0 : index
    %258 = vector.load %arg4[%c7_166, %c0_167, %c0_168] : memref<9x128x128xbf16, #tpu.memory_space<vmem>>, vector<1x128x128xbf16>
    %259 = vector.shape_cast %258 : vector<1x128x128xbf16> to vector<128x128xbf16>
    %cst_169 = arith.constant dense<0.000000e+00> : vector<128x128xf32>
    %260 = tpu.matmul %257, %259, %cst_169 {dimension_numbers = #tpu.dot_dimension_numbers<[1], [0], [0], [1], [0, 0, 1, 1], [], []>} : vector<128x128xbf16>, vector<128x128xbf16>, vector<128x128xf32> -> vector<128x128xf32>
    %261 = arith.addf %256, %260 : vector<128x128xf32>
    %c294 = arith.constant 294 : index
    %c0_170 = arith.constant 0 : index
    %262 = vector.load %arg7[%c294, %c0_170] : memref<422x128xbf16, #tpu.memory_space<vmem>>, vector<128x128xbf16>
    %c8_171 = arith.constant 8 : index
    %c0_172 = arith.constant 0 : index
    %c0_173 = arith.constant 0 : index
    %263 = vector.load %arg4[%c8_171, %c0_172, %c0_173] : memref<9x128x128xbf16, #tpu.memory_space<vmem>>, vector<1x128x128xbf16>
    %264 = vector.shape_cast %263 : vector<1x128x128xbf16> to vector<128x128xbf16>
    %cst_174 = arith.constant dense<0.000000e+00> : vector<128x128xf32>
    %265 = tpu.matmul %262, %264, %cst_174 {dimension_numbers = #tpu.dot_dimension_numbers<[1], [0], [0], [1], [0, 0, 1, 1], [], []>} : vector<128x128xbf16>, vector<128x128xbf16>, vector<128x128xf32> -> vector<128x128xf32>
    %266 = arith.addf %261, %265 : vector<128x128xf32>
    %267 = vector.broadcast %4 : vector<1x128xf32> to vector<128x128xf32>
    %268 = arith.addf %266, %267 : vector<128x128xf32>
    %269 = tpu.iota {dimensions = array<i32: 0>} : vector<128x1xi32>
    %c3_i32_175 = arith.constant 3 : i32
    %270 = arith.muli %arg1, %c3_i32_175 : i32
    %c2_i32 = arith.constant 2 : i32
    %271 = arith.addi %270, %c2_i32 : i32
    %272 = arith.index_cast %271 : i32 to index
    %273 = memref.load %arg2[%272] : memref<3xi32, #tpu.memory_space<smem>>
    %274 = vector.broadcast %273 : i32 to vector<128x1xi32>
    %275 = arith.addi %274, %269 : vector<128x1xi32>
    %c18_i32_176 = arith.constant 18 : i32
    %276 = vector.broadcast %c18_i32_176 : i32 to vector<128x1xi32>
    %277 = arith.cmpi sge, %275, %276 : vector<128x1xi32>
    %c18_i32_177 = arith.constant 18 : i32
    %278 = vector.broadcast %c18_i32_177 : i32 to vector<128x1xi32>
    %279 = arith.subi %275, %278 : vector<128x1xi32>
    %280 = arith.select %277, %279, %275 : vector<128x1xi1>, vector<128x1xi32>
    %c18_i32_178 = arith.constant 18 : i32
    %281 = vector.broadcast %c18_i32_178 : i32 to vector<128x1xi32>
    %282 = arith.cmpi sge, %280, %281 : vector<128x1xi32>
    %c18_i32_179 = arith.constant 18 : i32
    %283 = vector.broadcast %c18_i32_179 : i32 to vector<128x1xi32>
    %284 = arith.subi %280, %283 : vector<128x1xi32>
    %285 = arith.select %282, %284, %280 : vector<128x1xi1>, vector<128x1xi32>
    %c18_i32_180 = arith.constant 18 : i32
    %286 = vector.broadcast %c18_i32_180 : i32 to vector<128x1xi32>
    %287 = arith.cmpi sge, %285, %286 : vector<128x1xi32>
    %c18_i32_181 = arith.constant 18 : i32
    %288 = vector.broadcast %c18_i32_181 : i32 to vector<128x1xi32>
    %289 = arith.subi %285, %288 : vector<128x1xi32>
    %290 = arith.select %287, %289, %285 : vector<128x1xi1>, vector<128x1xi32>
    %c18_i32_182 = arith.constant 18 : i32
    %291 = vector.broadcast %c18_i32_182 : i32 to vector<128x1xi32>
    %292 = arith.cmpi sge, %290, %291 : vector<128x1xi32>
    %c18_i32_183 = arith.constant 18 : i32
    %293 = vector.broadcast %c18_i32_183 : i32 to vector<128x1xi32>
    %294 = arith.subi %290, %293 : vector<128x1xi32>
    %295 = arith.select %292, %294, %290 : vector<128x1xi1>, vector<128x1xi32>
    %c18_i32_184 = arith.constant 18 : i32
    %296 = vector.broadcast %c18_i32_184 : i32 to vector<128x1xi32>
    %297 = arith.cmpi sge, %295, %296 : vector<128x1xi32>
    %c18_i32_185 = arith.constant 18 : i32
    %298 = vector.broadcast %c18_i32_185 : i32 to vector<128x1xi32>
    %299 = arith.subi %295, %298 : vector<128x1xi32>
    %300 = arith.select %297, %299, %295 : vector<128x1xi1>, vector<128x1xi32>
    %c18_i32_186 = arith.constant 18 : i32
    %301 = vector.broadcast %c18_i32_186 : i32 to vector<128x1xi32>
    %302 = arith.cmpi sge, %300, %301 : vector<128x1xi32>
    %c18_i32_187 = arith.constant 18 : i32
    %303 = vector.broadcast %c18_i32_187 : i32 to vector<128x1xi32>
    %304 = arith.subi %300, %303 : vector<128x1xi32>
    %305 = arith.select %302, %304, %300 : vector<128x1xi1>, vector<128x1xi32>
    %c18_i32_188 = arith.constant 18 : i32
    %306 = vector.broadcast %c18_i32_188 : i32 to vector<128x1xi32>
    %307 = arith.cmpi sge, %305, %306 : vector<128x1xi32>
    %c18_i32_189 = arith.constant 18 : i32
    %308 = vector.broadcast %c18_i32_189 : i32 to vector<128x1xi32>
    %309 = arith.subi %305, %308 : vector<128x1xi32>
    %310 = arith.select %307, %309, %305 : vector<128x1xi1>, vector<128x1xi32>
    %c18_i32_190 = arith.constant 18 : i32
    %311 = vector.broadcast %c18_i32_190 : i32 to vector<128x1xi32>
    %312 = arith.cmpi sge, %310, %311 : vector<128x1xi32>
    %c18_i32_191 = arith.constant 18 : i32
    %313 = vector.broadcast %c18_i32_191 : i32 to vector<128x1xi32>
    %314 = arith.subi %310, %313 : vector<128x1xi32>
    %315 = arith.select %312, %314, %310 : vector<128x1xi1>, vector<128x1xi32>
    %c256_i32 = arith.constant 256 : i32
    %316 = arith.addi %0, %c256_i32 : i32
    %317 = vector.broadcast %316 : i32 to vector<128x1xi32>
    %318 = arith.addi %317, %269 : vector<128x1xi32>
    %c16_i32_192 = arith.constant 16 : i32
    %319 = vector.broadcast %c16_i32_192 : i32 to vector<128x1xi32>
    %320 = arith.cmpi slt, %315, %319 : vector<128x1xi32>
    %c288_i32_193 = arith.constant 288 : i32
    %321 = vector.broadcast %c288_i32_193 : i32 to vector<128x1xi32>
    %322 = arith.cmpi slt, %318, %321 : vector<128x1xi32>
    %323 = arith.andi %320, %322 : vector<128x1xi1>
    %cst_194 = arith.constant 0.000000e+00 : f32
    %324 = vector.shape_cast %323 : vector<128x1xi1> to vector<128x1xi1>
    %325 = vector.broadcast %324 : vector<128x1xi1> to vector<128x128xi1>
    %326 = vector.broadcast %cst_194 : f32 to vector<128x128xf32>
    %327 = arith.select %325, %268, %326 : vector<128x128xi1>, vector<128x128xf32>
    %328 = arith.truncf %327 : vector<128x128xf32> to vector<128x128xbf16>
    %c0_195 = arith.constant 0 : index
    %c256_196 = arith.constant 256 : index
    %c0_197 = arith.constant 0 : index
    %329 = vector.load %arg6[%c0_195, %c256_196, %c0_197] : memref<1x384x128xbf16, #tpu.memory_space<vmem>>, vector<1x128x128xbf16>
    %330 = vector.shape_cast %329 : vector<1x128x128xbf16> to vector<128x128xbf16>
    %331 = vector.shape_cast %328 : vector<128x128xbf16> to vector<1x128x128xbf16>
    tpu.vector_store %arg6[%c0_195, %c256_196, %c0_197], %331 {strides = array<i32>} : memref<1x384x128xbf16, #tpu.memory_space<vmem>>, vector<1x128x128xbf16>,
    return
  }
  func.func @transform_0(%arg0: i32, %arg1: i32, %arg2: memref<3xi32, #tpu.memory_space<smem>>) -> (i32, i32, i32) {
    %c0_i32 = arith.constant 0 : i32
    %c0_i32_0 = arith.constant 0 : i32
    %c0_i32_1 = arith.constant 0 : i32
    return %arg0, %c0_i32, %c0_i32_0 : i32, i32, i32
  }
  func.func @transform_1(%arg0: i32, %arg1: i32, %arg2: memref<3xi32, #tpu.memory_space<smem>>) -> (i32, i32, i32) {
    %c0_i32 = arith.constant 0 : i32
    %c0_i32_0 = arith.constant 0 : i32
    %c0_i32_1 = arith.constant 0 : i32
    %c0_i32_2 = arith.constant 0 : i32
    return %c0_i32, %c0_i32_0, %c0_i32_1 : i32, i32, i32
  }
  func.func @transform_2(%arg0: i32, %arg1: i32, %arg2: memref<3xi32, #tpu.memory_space<smem>>) -> (i32, i32) {
    %c0_i32 = arith.constant 0 : i32
    %c0_i32_0 = arith.constant 0 : i32
    %c0_i32_1 = arith.constant 0 : i32
    return %c0_i32, %c0_i32_0 : i32, i32
  }
  func.func @transform_3(%arg0: i32, %arg1: i32, %arg2: memref<3xi32, #tpu.memory_space<smem>>) -> (i32, i32, i32) {
    %c0_i32 = arith.constant 0 : i32
    %c0_i32_0 = arith.constant 0 : i32
    return %arg0, %arg1, %c0_i32 : i32, i32, i32
  }
}

</mosaic_0001>

<bundles_post_ra>
// kernel: tpu_custom_call.1
= control target key start
LH: loop header
LB: loop body
LE: loop exit
PB: predicated region body
PF: predicated region fallthrough
CT: control target
= control target key end

     0   :  { %s15170_s0 = inlined_call_operand.hbm [shape: s32[3], index: 0, kind: input, shape index: {}]   ;;  %s15171_s1 = inlined_call_operand.hbm [shape: f32[2,408,128], index: 1, kind: input, shape index: {}]   ;;  %s15172_s2 = inlined_call_operand.hbm [shape: bf16[9,128,128], index: 2, kind: input, shape index: {}]   ;;  %s15173_s3 = inlined_call_operand.vmem [shape: f32[1,128], index: 3, kind: input, shape index: {}]   ;;  %s15174_s4 = inlined_call_operand.hbm [shape: bf16[2,408,128], index: 4, kind: output, shape index: {}]  }
   0x1   :  { %s12566_s17 = scalar_lea.hbm %s15170_s0, 16 }
   0x2   :  { %p12567_p0 = scmp.ne.s32.totalorder %s15170_s0, %s12566_s17  ;;  %p12570_p1 = scmp.lt.u32.totalorder %s12566_s17, %s15170_s0 }
   0x4   :  { %p12572_p2 = pnand %p12570_p1, %p12567_p0 }
   0x6   :  { %12575 = shalt.err (!%p12572_p2)  }
   0x7   :  { %s12724_s22 = smov [#allocation4]  }
   0x8   :  { %10 = dma.hbm_to_smem %s15170_s0, 16, %s12724_s22, [#allocation3] }
   0x9   :  { %12686 = dma.done.wait [#allocation3], 16 }
   0xa   :  { %12687 = vsyncadd [#allocation3], 4294967280 }
   0xb   :  { %12 = sfence }
   0xc   :  { %13 = vsyncpa [#allocation6], 0 }
   0xd   :  { %15 = vsyncpa [#allocation6 + $0x1], 0 }
   0xe   :  { %16 = vsyncpa [#allocation9], 0 }
   0xf   :  { %17 = vsyncpa [#allocation7], 0 }
  0x10   :  { %19 = vsyncpa [#allocation7 + $0x1], 0  ;;  %s12773_s25 = smov 0   ;;  %s12775_s26 = smov 0  }
  0x11   :  { %s12777_s27 = smov 0   ;;  %s12779_s28 = smov 0  }
  0x12   :  { %s12781_s29 = smov 0   ;;  %s12783_s30 = smov 0  }
  0x13 LB: > { %s9545_s0 = sadd.s32 4294967295, %s12722_s30   ;;  %s9546_s5 = sadd.s32 4294967294, %s12722_s30   ;;  %s12722_s30 = sphi %s12783_s30, %s25_s30   ;;  %s12718_s29 = sphi %s12781_s29, %s15276_s29   ;;  %s12714_s28 = sphi %s12779_s28, %s15275_s28   ;;  %s12710_s27 = sphi %s12777_s27, %s15274_s27   ;;  %s12706_s26 = sphi %s12775_s26, %s15273_s26   ;;  %s12702_s25 = sphi %s12773_s25, %s15272_s25  }
  0x14   : > { %p57_p3 = scmp.ne.s32.totalorder %s12706_s26, %s12702_s25  ;;  %p12807_p4 = scmp.eq.s32.totalorder %s9545_s0, 0 }
  0x15   : > { %p12811_p5 = scmp.eq.s32.totalorder %s9545_s0, 1  ;;  %p131_p6 = scmp.eq.s32.totalorder %s9546_s5, 1 }
  0x16   : > { %s15196_s6 = scalar_select %p12807_p4, 1, 0 }
  0x17   : > { %s15197_s7 = scalar_select %p12811_p5, 1, 0 }
  0x18   : > { %p12817_p7 = por %p12807_p4, %p57_p3  ;;  %p9547_p8 = scmp.ge.s32.totalorder %s12722_s30, 1 }
  0x19   : > { %p12822_p9 = por %p131_p6, %p57_p3  ;;  %p138_p10 = scmp.lt.s32.totalorder %s12722_s30, 3 }
  0x1a   : > { %s15198_s8 = scalar_select %p12817_p7, 1, 0 }
  0x1b   : > { %s15199_s9 = scalar_select %p12822_p9, 1, 0 }
  0x1c   : > { %p12827_p11 = pnand %p9547_p8, %p138_p10  ;;  %s12725_s11 = smov [#allocation8]  }
  0x1d   : > { %s150_s12 = sshll.u32 %s12725_s11, 4  ;;  %s37_s14 = sadd.s32 1, %s12718_s29  ;;  %s151_s12 = int_to_ptr.vmem [resolvable:$true] %s150_s12 }
  0x1e   : > { %s15200_s10 = scalar_select %p12827_p11, 1, 0 }
  0x1f   : > { %p12161_p12 = pneg %p12827_p11  ;;  %s12576_s17 = scalar_lea.hbm %s15172_s2, 9216 }
  0x20   : > { %p12577_p1 = scmp.ne.s32.totalorder %s15172_s2, %s12576_s17  ;;  %p12583_p8 = scmp.lt.u32.totalorder %s12576_s17, %s15172_s2 }
  0x21   : > { %p12836_p0 = pnand %p12161_p12, %p12807_p4 }
  0x23   : > { %p12578_p2 = pneg %p12836_p0 }
  0x25   : > { %p12579_p3 = pnand %p12578_p2, %p12577_p1 }
  0x27   : > { %p12580_p6 = pneg %p12579_p3 }
  0x29   : > { %p12585_p10 = pnand %p12583_p8, %p12580_p6 }
  0x2b   : > { %12588 = shalt.err (!%p12585_p10)
}
  0x2c   : > { %s12589_s22 = scalar_lea.vmem %s151_s12, 9216  ;;  %p12597_p4 = scmp.lt.s32.totalorder %s151_s12, %s151_s12 }
  0x2d   : > { %p12590_p12 = scmp.ne.s32.totalorder %s151_s12, %s12589_s22  ;;  %p12598_p7 = scmp.lt.s32.totalorder %s12589_s22, %s12589_s22 }
  0x2f   : > { %p12592_p13 = pnand %p12590_p12, %p12578_p2  ;;  %p12599_p11 = por %p12598_p7, %p12597_p4 }
  0x31   : > { %p12593_p9 = pneg %p12592_p13 }
  0x33   : > { %p12600_p5 = pnand %p12599_p11, %p12593_p9 }
  0x35   : > { %12603 = shalt.err (!%p12600_p5)
}
  0x36   : > { %s12726_s23 = smov 64   ;;  %s12727_s24 = smov 4  }
  0x37   : > { %12164 = dma.hbm_to_vmem [thread:$0]  (!%p12836_p0), %s15172_s2, 9216, %s151_s12, [#allocation9], %s12726_s23, %s12726_s23, %s12727_s24  }
  0x38   : > { %p39_p4 = scmp.ge.s32.totalorder %s37_s14, 2  ;;  %s44_s11 = sadd.s32 1, %s12710_s27 }
  0x39   : > { %p51_p5 = scmp.ne.s32.totalorder %s12710_s27, %s12706_s26  ;;  %p52_p7 = scmp.eq.s32.totalorder %s12722_s30, 0 }
  0x3a   : > { %s15278_s14 = smov (%p39_p4, %s37_s14), 0  ;;  %p15202_p11 = scmp.ne.s32.totalorder %s15197_s7, 0 }
  0x3b   : > { %p53_p9 = por %p52_p7, %p51_p5  ;;  %s41_s16 = ssub.s32 %s12718_s29, %s15278_s14 }
  0x3c   : > { %p12865_p13 = por %p15202_p11, %p51_p5  ;;  %p12174_p1 = scmp.lt.s32.totalorder %s12722_s30, 2 }
  0x3d   : > { %p42_p2 = scmp.eq.s32.totalorder %s41_s16, 0  ;;  %s167_s13 = sand.u32 1, %s12710_s27  }
  0x3e   : > { %s12148_s17 = smul.u32 408, %s167_s13  ;;  %p12877_p0 = pnand %p12174_p1, %p53_p9 }
  0x3f   : > { %s12874_s18 = scalar_select %p42_p2, %s12710_s27, %s44_s11  }
  0x40   : > { %s12149_s12 = smul.u32 6528, %s12718_s29  ;;  %s171_s19 = scalar_lea.vmem [#allocation5], %s12148_s17 }
  0x41   : > { %s178_s20 = sshll.u32 %s171_s19, 4  ;;  %s12888_s24 = scalar_lea.sflag [#allocation6], %s167_s13  ;;  %s12886_s20 = int_to_ptr.vmem [resolvable:$true] %s178_s20 }
  0x42   : > { %s12884_s23 = scalar_lea.hbm %s15171_s1, %s12149_s12  ;;  %p12606_p6 = pneg %p12877_p0 }
  0x43   : > { %s12604_s0 = scalar_lea.hbm %s12884_s23, 6528  ;;  %s12609_s16 = scalar_lea.hbm %s15171_s1, 13056 }
  0x44   : > { %p12605_p3 = scmp.ne.s32.totalorder %s12884_s23, %s12604_s0  ;;  %p12610_p12 = scmp.lt.u32.totalorder %s12884_s23, %s15171_s1 }
  0x45   : > { %p12611_p4 = scmp.lt.u32.totalorder %s12609_s16, %s12604_s0  ;;  %p12613_p7 = scmp.lt.u32.totalorder %s12604_s0, %s12884_s23 }
  0x46   : > { %p12607_p8 = pnand %p12606_p6, %p12605_p3 }
  0x47   : > { %p12612_p5 = por %p12611_p4, %p12610_p12 }
  0x48   : > { %p12608_p10 = pneg %p12607_p8 }
  0x49   : > { %p12614_p9 = por %p12613_p7, %p12612_p5 }
  0x4b   : > { %p12615_p11 = pnand %p12614_p9, %p12608_p10 }
  0x4d   : > { %12618 = shalt.err (!%p12615_p11)
}
  0x4e   : > { %s12619_s13 = scalar_lea.vmem %s12886_s20, 6528  ;;  %s12728_s19 = smov [#allocation5]  }
  0x4f   : > { %p12620_p1 = scmp.ne.s32.totalorder %s12886_s20, %s12619_s13  ;;  %s12624_s22 = sshll.u32 %s12728_s19, 4  ;;  %s12625_s22 = int_to_ptr.vmem [resolvable:$false] %s12624_s22 }
  0x50   : > { %s12626_s7 = scalar_lea.vmem %s12625_s22, 13056  ;;  %p12627_p8 = scmp.lt.s32.totalorder %s12886_s20, %s12625_s22 }
  0x51   : > { %p12622_p2 = pnand %p12620_p1, %p12606_p6  ;;  %p12628_p12 = scmp.lt.s32.totalorder %s12626_s7, %s12619_s13 }
  0x53   : > { %p12623_p3 = pneg %p12622_p2  ;;  %p12629_p4 = por %p12628_p12, %p12627_p8 }
  0x55   : > { %p12630_p5 = pnand %p12629_p4, %p12623_p3 }
  0x57   : > { %12633 = shalt.err (!%p12630_p5)
}
  0x58   : > { %s12729_s0 = smov 128   ;;  %s12730_s5 = smov 8  }
  0x59   : > { %12168 = dma.hbm_to_vmem [thread:$0]  (!%p12877_p0), %s12884_s23, 6528, %s12886_s20, %s12888_s24, %s12729_s0, %s12729_s0, %s12730_s5  }
  0x5a   : > { %p15205_p6 = scmp.ne.s32.totalorder %s15200_s10, 0 }
  0x5c   : > { %190 = sbr.rel (%p15205_p6) target bundleno = 875 (0x36b), region = 32 }
  0x63   : > { %s12919_s11 = sand.u32 1, %s12706_s26   ;;  %p15206_p10 = scmp.ne.s32.totalorder %s15198_s8, 0 }
  0x64   : > { %s12150_s16 = smul.u32 408, %s12919_s11  ;;  %s193_s17 = scalar_lea.sflag [#allocation6], %s12919_s11 }
  0x66   : > { %s12923_s12 = scalar_lea.vmem [#allocation5], %s12150_s16 }
  0x67   : > { %12689 = dma.done.wait (%p15206_p10), %s193_s17, 6528  }
  0x68   : > { %12691 = vsyncadd (%p15206_p10), %s193_s17, 4294960768  ;;  %p15207_p0 = scmp.ne.s32.totalorder %s15196_s6, 0 }
  0x6a   : > { %12693 = dma.done.wait (%p15207_p0), [#allocation9], 9216  }
  0x6b   : > { %12695 = vsyncadd (%p15207_p0), [#allocation9], 4294958080  ;;  %v12731_v0 = vmov 0   ;;  %v12235_v1 = vld [vmem:[#allocation8 + $0x40] sm:$0xff]   ;;  %v12237_v3 = vld [vmem:[#allocation8 + $0x48] sm:$0xff]   ;;  %vm236_vm1 = vcmask 1041408  }
  0x6c   : > { %234 = vst [vmem:[#allocation2] sm:$0xf] %v12731_v0  ;;  %235 = vst [vmem:[#allocation2 + $0x4] sm:$0xf] %v12731_v0  ;;  %v12236_v2 = vld [vmem:[#allocation8 + $0x100] sm:$0xff]   ;;  %10980 = vmatprep.subr.bf16.mxu1 %v12235_v1  ;;  %v12238_v4 = vld [vmem:[#allocation8 + $0x108] sm:$0xff]  }
  0x6d   : > { %11108 = vmatprep.subr.bf16.mxu0 %v12236_v2  ;;  %10981 = vmatpush3.bf16.msra.mxu1 %v12235_v1  ;;  %v12239_v5 = vld [vmem:[#allocation8 + $0x50] sm:$0xff]   ;;  %vm237_vm0 = vsmask.f32 1280  ;;  %v12241_v7 = vld [vmem:[#allocation8 + $0x58] sm:$0xff]   ;;  %v12243_v10 = vld [vmem:[#allocation8 + $0x60] sm:$0xff]   ;;  %vm1059_vm4 = vcmask 1043457  }
  0x6e   : > { %11109 = vmatpush3.bf16.msra.mxu0 %v12236_v2  ;;  %10982 = vmatprep.subr.bf16.mxu1 %v12237_v3  ;;  %v12240_v6 = vld [vmem:[#allocation8 + $0x110] sm:$0xff]   ;;  %v12242_v8 = vld [vmem:[#allocation8 + $0x118] sm:$0xff]   ;;  %vm12934_vm2 = vmand %vm236_vm1, %vm237_vm0  ;;  %vm498_vm3 = vsmask.f32 5392  ;;  %vm1060_vm5 = vsmask.f32 7942 }
  0x6f   : > { %11110 = vmatprep.subr.bf16.mxu0 %v12238_v4  ;;  %v12244_v11 = vld [vmem:[#allocation8 + $0x120] sm:$0xff]   ;;  %v12245_v12 = vld [vmem:[#allocation8 + $0x68] sm:$0xff]   ;;  %v243_v16 = vld [vmem:[%s12923_s12 + $0x8] sm:$0xff]  ;;  %v15212_v54 = vmov 0  ;;  %vm1209_vm8 = vsmask.f32 7424 }
  0x70   : > { %v12246_v13 = vld [vmem:[#allocation8 + $0x128] sm:$0xff]   ;;  %v239_v14 = vld [vmem:[#allocation2 + $0x8] sm:$0x3]  ;;  %v294_v19 = vmax.f32 %v243_v16, 0.0  ;;  %v12247_v30 = vld [vmem:[#allocation8 + $0x70] sm:$0xff]   ;;  %vm2347_vm10 = vcmask 1045504  }
  0x71   : > { %10983 = vmatpush3.bf16.msra.mxu1 %v12237_v3  ;;  %v242_v15 = vld [vmem:[%s12923_s12] sm:$0xff]  ;;  %v240_v17 = vsel %vm12934_vm2, 0, %v239_v14  ;;  %v244_v21 = vld [vmem:[%s12923_s12 + $0x10] sm:$0xff]  ;;  %v245_v23 = vld [vmem:[%s12923_s12 + $0x18] sm:$0xff]  ;;  %vm2076_vm9 = vsmask.f32 6400 }
  0x72   : > { %11111 = vmatpush3.bf16.msra.mxu0 %v12238_v4  ;;  %10984 = vmatprep.subr.bf16.mxu1 %v12239_v5  ;;  %v293_v18 = vmax.f32 %v242_v15, 0.0  ;;  %241 = vst [vmem:[#allocation2 + $0x8] sm:$0x3] %v240_v17  ;;  %v295_v24 = vmax.f32 %v244_v21, 0.0  ;;  %v10355_v26 = vpack.c.bf16 %v294_v19, %v294_v19  ;;  %v296_v28 = vmax.f32 %v245_v23, 0.0  ;;  %v246_v29 = vld [vmem:[%s12923_s12 + $0x20] sm:$0xff]  ;;  %vm12952_vm6 = vmand %vm1059_vm4, %vm1060_vm5 }
  0x73   : > { %11112 = vmatprep.subr.bf16.mxu0 %v12240_v6  ;;  %v1116_v20 = vld [vmem:[#allocation2] sm:$0xf]  ;;  %v1117_v22 = vld [vmem:[#allocation2 + $0x4] sm:$0xf]  ;;  %v297_v32 = vmax.f32 %v246_v29, 0.0  ;;  %v12248_v33 = vld [vmem:[#allocation8 + $0x130] sm:$0xff]  }
  0x74   : > { %v10354_v25 = vpack.c.bf16 %v293_v18, %v293_v18  ;;  %v12944_v27 = vcombine.low %v1116_v20, %v1117_v22  ;;  %v10356_v31 = vpack.c.bf16 %v295_v24, %v295_v24  ;;  %v510_v36 = vshrl.u32 %v10355_v26, 16  ;;  %v12249_v38 = vld [vmem:[#allocation8 + $0x78] sm:$0xff]   ;;  %vm12960_vm7 = vmor %vm237_vm0, %vm498_vm3  ;;  %v249_v0 = vld [vmem:[%s12923_s12 + $0x38] sm:$0xff]  ;;  %s14173_s6 = sld [smem:[#allocation4]]  ;;  %s12151_s20 = smul.u32 192, %s12919_s11 }
  0x75   : > { %10985 = vmatpush3.bf16.msra.mxu1 %v12239_v5  ;;  %v513_v37 = vshll.u32 %v10355_v26, 16  ;;  %v10357_v41 = vpack.c.bf16 %v296_v28, %v296_v28  ;;  %v247_v43 = vld [vmem:[%s12923_s12 + $0x28] sm:$0xff]  ;;  %v15213_v54 = vsel %vm12960_vm7, 4294967295, %v15212_v54  ;;  %v10358_v62 = vpack.c.bf16 %v297_v32, %v297_v32  ;;  %v248_v63 = vld [vmem:[%s12923_s12 + $0x30] sm:$0xff]  ;;  %v250_v15 = vld [vmem:[%s12923_s12 + $0x40] sm:$0xff]  ;;  %s9957_s23 = sld [smem:[#allocation4 + $0x1]] }
  0x76   : > { %11113 = vmatpush3.bf16.msra.mxu0 %v12240_v6  ;;  %10986 = vmatprep.subr.bf16.mxu1 %v12241_v7  ;;  %v501_v34 = vshrl.u32 %v10354_v25, 16  ;;  %v504_v35 = vshll.u32 %v10354_v25, 16  ;;  %v1211_v39 = vshrl.u32 %v12944_v27, 16  ;;  %v1213_v40 = vshll.u32 %v12944_v27, 16  ;;  %v12250_v44 = vld [vmem:[#allocation8 + $0x138] sm:$0xff]   ;;  %15214 = vst [vmem:[#allocation15_spill] sm:$0xff] %v15213_v54 }
  0x77   : > { %11114 = vmatprep.subr.bf16.mxu0 %v12242_v8  ;;  %v520_v42 = vshrl.u32 %v10356_v31, 16  ;;  %v512_v47 = vrot.slane %v510_v36, 6  ;;  %v515_v48 = vrot.slane %v513_v37, 7  ;;  %v523_v52 = vshll.u32 %v10356_v31, 16  ;;  %v12968_v6 = vld [vmem:[#allocation8] sm:$0xff]   ;;  %v251_v28 = vld [vmem:[%s12923_s12 + $0x48] sm:$0xff] }
  0x78   : > { %v503_v45 = vrot.slane %v501_v34, 6  ;;  %v506_v46 = vrot.slane %v504_v35, 7  ;;  %v12956_v50 = vrot.slane %v1213_v40, 1  ;;  %v530_v53 = vshrl.u32 %v10357_v41, 16  ;;  %s14584_s21 = scalar_lea.vmem [#allocation10], %s12151_s20  ;;  %s14929_s24 = sld [smem:[#allocation4 + $0x2]] }
  0x79   : > { %10987 = vmatpush3.bf16.msra.mxu1 %v12241_v7  ;;  %v522_v51 = vrot.slane %v520_v42, 6  ;;  %v516_v56 = vor.u32 %v515_v48, %v512_v47  ;;  %v1062_v57 = vld [vmem:[#allocation2 + $0x8] sm:$0xe]  ;;  %v533_v58 = vshll.u32 %v10357_v41, 16  ;;  %v298_v59 = vmax.f32 %v247_v43, 0.0  ;;  %s12152_s22 = smul.u32 3264, %s12714_s28 }
  0x7a   : > { %11115 = vmatpush3.bf16.msra.mxu0 %v12242_v8  ;;  %10988 = vmatprep.subr.bf16.mxu1 %v12243_v10  ;;  %v507_v55 = vor.u32 %v506_v46, %v503_v45  ;;  %v525_v60 = vrot.slane %v523_v52, 7  ;;  %v532_v61 = vrot.slane %v530_v53, 6  ;;  %v540_v8 = vshrl.u32 %v10358_v62, 16  ;;  %s9451_s7 = sshll.u32 %s14584_s21, 4  ;;  %s9430_s16 = scalar_lea.sflag [#allocation7], %s12919_s11  ;;  %s15119_s7 = int_to_ptr.vmem [resolvable:$true] %s9451_s7 }
  0x7b   : > { %11116 = vmatprep.subr.bf16.mxu0 %v12244_v11  ;;  %v518_v3 = vrot.slane %v516_v56, 4  ;;  %v535_v4 = vrot.slane %v533_v58, 7  ;;  %v10359_v7 = vpack.c.bf16 %v298_v59, %v298_v59  ;;  %v543_v9 = vshll.u32 %v10358_v62, 16  ;;  %s15117_s28 = scalar_lea.hbm %s15174_s4, %s12152_s22  ;;  %s12634_s17 = scalar_lea.vmem %s15119_s7, 3072 }
  0x7c   : > { %v508_v1 = vrot.slane %v507_v55, 4  ;;  %v1063_v2 = vsel %vm12952_vm6, %v507_v55, %v1062_v57  ;;  %v526_v5 = vor.u32 %v525_v60, %v522_v51  ;;  %v300_v14 = vmax.f32 %v249_v0, 0.0  ;;  %p12635_p7 = scmp.ne.s32.totalorder %s15119_s7, %s12634_s17 }
  0x7d   : > { %10989 = vmatpush3.bf16.msra.mxu1 %v12243_v10  ;;  %1064 = vst [vmem:[#allocation2 + $0x8] sm:$0xe] %v1063_v2  ;;  %v542_v18 = vrot.slane %v540_v8, 6  ;;  %v545_v19 = vrot.slane %v543_v9, 7  ;;  %v550_v21 = vshrl.u32 %v10359_v7, 16  ;;  %v553_v22 = vshll.u32 %v10359_v7, 16 }
  0x7e   : > { %11117 = vmatpush3.bf16.msra.mxu0 %v12244_v11  ;;  %10990 = vmatprep.subr.bf16.mxu1 %v12245_v12  ;;  %v517_v10 = vsel %vm12960_vm7, %v508_v1, %v516_v56  ;;  %v536_v11 = vor.u32 %v535_v4, %v532_v61  ;;  %v527_v16 = vsel %vm12960_vm7, %v518_v3, %v526_v5  ;;  %v528_v17 = vrot.slane %v526_v5, 4  ;;  %p12636_p9 = pnand %p12635_p7, %p12865_p13 }
  0x7f   : > { %11118 = vmatprep.subr.bf16.mxu0 %v12246_v13  ;;  %1065 = vst [vmem:[#allocation2 + $0xc] sm:$0xf] %v517_v10  ;;  %1066 = vst [vmem:[#allocation2 + $0x10] sm:$0xf] %v527_v16  ;;  %v546_v25 = vor.u32 %v545_v19, %v542_v18  ;;  %v10361_v26 = vpack.c.bf16 %v300_v14, %v300_v14  ;;  %v301_v29 = vmax.f32 %v250_v15, 0.0  ;;  %v555_v31 = vrot.slane %v553_v22, 7 }
  0x80   : > { %v538_v20 = vrot.slane %v536_v11, 4  ;;  %v537_v24 = vsel %vm12960_vm7, %v528_v17, %v536_v11  ;;  %v302_v47 = vmax.f32 %v251_v28, 0.0  ;;  %v1216_v49 = vor.u32 %v12956_v50, %v1211_v39  ;;  %p12637_p11 = pneg %p12636_p9 }
  0x81   : > { %10991 = vmatpush3.bf16.msra.mxu1 %v12245_v12  ;;  %v12972_v12 = vld [vmem:[#allocation8 + $0x140] sm:$0xff]   ;;  %1067 = vst [vmem:[#allocation2 + $0x14] sm:$0xf] %v537_v24  ;;  %v548_v35 = vrot.slane %v546_v25, 4  ;;  %v570_v36 = vshrl.u32 %v10361_v26, 16  ;;  %v573_v37 = vshll.u32 %v10361_v26, 16 }
  0x82   : > { %11119 = vmatpush3.bf16.msra.mxu0 %v12246_v13  ;;  %10992 = vmatprep.subr.bf16.mxu1 %v12247_v30  ;;  %v299_v13 = vmax.f32 %v248_v63, 0.0  ;;  %v547_v34 = vsel %vm12960_vm7, %v538_v20, %v546_v25  ;;  %v10363_v2 = vpack.c.bf16 %v302_v47, %v302_v47  ;;  %v12259_v20 = vld [vmem:[#allocation8 + $0x8] sm:$0xff]   ;;  %vm1605_vm11 = vcmask 1046528  }
  0x83   : > { %11120 = vmatprep.subr.bf16.mxu0 %v12248_v33  ;;  %1068 = vst [vmem:[#allocation2 + $0x18] sm:$0xf] %v547_v34  ;;  %v572_v45 = vrot.slane %v570_v36, 6  ;;  %v575_v46 = vrot.slane %v573_v37, 7  ;;  %vm2818_vm12 = vsmask.f32 5376 }
  0x84   : > { %v10360_v23 = vpack.c.bf16 %v299_v13, %v299_v13  ;;  %v1792_v40 = vld [vmem:[#allocation2 + $0x8] sm:$0xe]  ;;  %v590_v28 = vshrl.u32 %v10363_v2, 16  ;;  %vm15195_vm13 = vcmask 1044480  }
  0x85   : > { %10993 = vmatpush3.bf16.msra.mxu1 %v12247_v30  ;;  %v552_v30 = vrot.slane %v550_v21, 6  ;;  %v576_v57 = vor.u32 %v575_v46, %v572_v45 }
  0x86   : > { %11121 = vmatpush3.bf16.msra.mxu0 %v12248_v33  ;;  %10994 = vmatprep.subr.bf16.mxu1 %v12249_v38  ;;  %v560_v32 = vshrl.u32 %v10360_v23, 16  ;;  %v563_v33 = vshll.u32 %v10360_v23, 16  ;;  %v12987_v48 = vld [vmem:[#allocation2 + $0x8] sm:$0xff]   ;;  %v592_v46 = vrot.slane %v590_v28, 6 }
  0x87   : > { %11122 = vmatprep.subr.bf16.mxu0 %v12250_v44  ;;  %v556_v41 = vor.u32 %v555_v31, %v552_v30  ;;  %v12992_v51 = vld [vmem:[#allocation2 + $0xc] sm:$0xf]  ;;  %v1218_v60 = vshll.u32 %v12987_v48, 16  ;;  %v1222_v39 = vshrl.u32 %v12987_v48, 16  ;;  %v578_v5 = vrot.slane %v576_v57, 4 }
  0x88   : > { %v562_v42 = vrot.slane %v560_v32, 6  ;;  %v565_v43 = vrot.slane %v563_v33, 7  ;;  %v12997_v56 = vcombine.low %v1792_v40, %v12992_v51  ;;  %v13004_v62 = vld [vmem:[#allocation2 + $0x10] sm:$0xff]  }
  0x89   : > { %10995 = vmatpush3.bf16.msra.mxu1 %v12249_v38  ;;  %v12985_v38 = vld [vmem:[%s12923_s12 + $0x50] sm:$0xff]  ;;  %v557_v52 = vsel %vm12960_vm7, %v548_v35, %v556_v41  ;;  %v558_v53 = vrot.slane %v556_v41, 4  ;;  %v13008_v1 = vld [vmem:[#allocation2 + $0x10] sm:$0xff]   ;;  %v1220_v3 = vrot.slane %v1218_v60, 1  ;;  %v2086_v10 = vshrl.u32 %v13004_v62, 16 }
  0x8a   : > { %11123 = vmatpush3.bf16.msra.mxu0 %v12250_v44  ;;  %11012 = vmatprep.subr.bf16.mxu1 %v12968_v6  ;;  %v10362_v44 = vpack.c.bf16 %v301_v29, %v301_v29  ;;  %v566_v55 = vor.u32 %v565_v43, %v562_v42  ;;  %1069 = vst [vmem:[#allocation2 + $0x1c] sm:$0xf] %v557_v52  ;;  %v303_v59 = vmax.f32 %v12985_v38, 0.0  ;;  %v2078_v63 = vshrl.u32 %v12997_v56, 16  ;;  %v257_v28 = vld [vmem:[%s12923_s12 + $0x78] sm:$0xff] }
  0x8b   : > { %11140 = vmatprep.subr.bf16.mxu0 %v12972_v12  ;;  %v2081_v0 = vshll.u32 %v12997_v56, 16  ;;  %v2089_v11 = vshll.u32 %v13004_v62, 16  ;;  %v1221_v13 = vsel %vm1209_vm8, %v1216_v49, %v1220_v3  ;;  %v1224_v14 = vor.u32 %v1222_v39, %v1220_v3  ;;  %v12267_v3 = vld [vmem:[#allocation8 + $0x18] sm:$0xff]  }
  0x8c   : > { %v580_v58 = vshrl.u32 %v10362_v44, 16  ;;  %v567_v50 = vsel %vm12960_vm7, %v558_v53, %v566_v55  ;;  %v568_v61 = vrot.slane %v566_v55, 4  ;;  %v2080_v8 = vrot.slane %v2078_v63, 1  ;;  %10996 = vmatprep.mubr.bf16.mxu1 %v1221_v13  ;;  %v253_v55 = vld [vmem:[%s12923_s12 + $0x58] sm:$0xff] }
  0x8d   : > { %1070 = vst [vmem:[#allocation2 + $0x20] sm:$0xf] %v567_v50  ;;  %v2083_v9 = vrot.slane %v2081_v0, 2  ;;  %v1226_v15 = vshll.u32 %v13008_v1, 16  ;;  %v1230_v16 = vshrl.u32 %v13008_v1, 16  ;;  %v2088_v18 = vrot.slane %v2086_v10, 1 }
  0x8e   : > { %v577_v4 = vsel %vm12960_vm7, %v568_v61, %v576_v57  ;;  %v582_v7 = vrot.slane %v580_v58, 6  ;;  %v2091_v19 = vrot.slane %v2089_v11, 2  ;;  %v583_v21 = vshll.u32 %v10362_v44, 16  ;;  %v12264_v44 = vld [vmem:[#allocation8 + $0x10] sm:$0xff]   ;;  %v12260_v57 = vld [vmem:[#allocation8 + $0x148] sm:$0xff]  }
  0x8f   : > { %1071 = vst [vmem:[#allocation2 + $0x24] sm:$0xf] %v577_v4  ;;  %v2084_v17 = vor.u32 %v2083_v9, %v2080_v8  ;;  %v1228_v22 = vrot.slane %v1226_v15, 1  ;;  %v593_v29 = vshll.u32 %v10363_v2, 16  ;;  %v10364_v47 = vpack.c.bf16 %v303_v59, %v303_v59  ;;  %v254_v61 = vld [vmem:[%s12923_s12 + $0x60] sm:$0xff]  ;;  %v255_v10 = vld [vmem:[%s12923_s12 + $0x68] sm:$0xff] }
  0x90   : > { %v2092_v24 = vor.u32 %v2091_v19, %v2088_v18  ;;  %v585_v26 = vrot.slane %v583_v21, 7  ;;  %v305_v15 = vmax.f32 %v254_v61, 0.0 }
  0x91   : > { %v13017_v23 = vld [vmem:[#allocation2 + $0x18] sm:$0xff]   ;;  %v1229_v30 = vsel %vm1209_vm8, %v1224_v14, %v1228_v22  ;;  %v1232_v33 = vor.u32 %v1230_v16, %v1228_v22  ;;  %v595_v50 = vrot.slane %v593_v29, 7  ;;  %v600_v8 = vshrl.u32 %v10364_v47, 16 }
  0x92   : > { %v13019_v25 = vld [vmem:[#allocation2 + $0x18] sm:$0xff]   ;;  %v2095_v31 = vshrl.u32 %v13017_v23, 16  ;;  %v2098_v32 = vshll.u32 %v13017_v23, 16  ;;  %v2093_v34 = vsel %vm2076_vm9, %v2084_v17, %v2092_v24  ;;  %10997 = vmatmul.mubr.bf16.vlgmr.msra.gmra.mrb[0].mxu1 %v1229_v30  ;;  %v586_v37 = vor.u32 %v585_v26, %v582_v7 }
  0x93   : > { %v1234_v35 = vshll.u32 %v13019_v25, 16  ;;  %v1238_v36 = vshrl.u32 %v13019_v25, 16  ;;  %11124 = vmatprep.mubr.bf16.mxu0 %v2093_v34  ;;  %11013 = vmatpush3.bf16.msra.mxu1 %v12968_v6  ;;  %v596_v4 = vor.u32 %v595_v50, %v592_v46  ;;  %v304_v7 = vmax.f32 %v253_v55, 0.0  ;;  %v256_v26 = vld [vmem:[%s12923_s12 + $0x70] sm:$0xff] }
  0x94   : > { %v2097_v38 = vrot.slane %v2095_v31, 1  ;;  %v2100_v40 = vrot.slane %v2098_v32, 2  ;;  %11014 = vmatprep.subr.bf16.mxu1 %v12259_v20  ;;  %v587_v45 = vsel %vm12960_vm7, %v578_v5, %v586_v37  ;;  %v588_v39 = vrot.slane %v586_v37, 4  ;;  %v12266_v5 = vld [vmem:[#allocation8 + $0x150] sm:$0xff]   ;;  %v12268_v29 = vld [vmem:[#allocation8 + $0x158] sm:$0xff]  }
  0x95   : > { %v1236_v43 = vrot.slane %v1234_v35, 1  ;;  %1072 = vst [vmem:[#allocation2 + $0x28] sm:$0xf] %v587_v45  ;;  %v603_v9 = vshll.u32 %v10364_v47, 16  ;;  %v10365_v17 = vpack.c.bf16 %v304_v7, %v304_v7  ;;  %v598_v18 = vrot.slane %v596_v4, 4  ;;  %v13057_v32 = vld [vmem:[%s12923_s12 + $0x80] sm:$0xff] }
  0x96   : > { %v13028_v41 = vld [vmem:[#allocation2 + $0x20] sm:$0xff]   ;;  %v2101_v49 = vor.u32 %v2100_v40, %v2097_v38  ;;  %v597_v16 = vsel %vm12960_vm7, %v588_v39, %v596_v4  ;;  %v602_v19 = vrot.slane %v600_v8, 6  ;;  %v306_v22 = vmax.f32 %v255_v10, 0.0 }
  0x97   : > { %v13030_v42 = vld [vmem:[#allocation2 + $0x20] sm:$0xff]   ;;  %v2104_v52 = vshrl.u32 %v13028_v41, 16  ;;  %v2107_v53 = vshll.u32 %v13028_v41, 16  ;;  %v1237_v58 = vsel %vm1209_vm8, %v1232_v33, %v1236_v43  ;;  %v1240_v60 = vor.u32 %v1238_v36, %v1236_v43  ;;  %11015 = vmatpush3.bf16.msra.mxu1 %v12259_v20  ;;  %1073 = vst [vmem:[#allocation2 + $0x2c] sm:$0xf] %v597_v16 }
  0x98   : > { %v1242_v6 = vshll.u32 %v13030_v42, 16  ;;  %v2102_v63 = vsel %vm2076_vm9, %v2092_v24, %v2101_v49  ;;  %11000 = vmatprep.mubr.bf16.mxu1 %v1237_v58  ;;  %11016 = vmatprep.subr.bf16.mxu1 %v12264_v44  ;;  %v1246_v14 = vshrl.u32 %v13030_v42, 16  ;;  %v605_v21 = vrot.slane %v603_v9, 7  ;;  %v12274_v58 = vld [vmem:[#allocation8 + $0x160] sm:$0xff]  }
  0x99   : > { %v2106_v59 = vrot.slane %v2104_v52, 1  ;;  %v2109_v0 = vrot.slane %v2107_v53, 2  ;;  %11125 = vmatmul.mubr.bf16.vlgmr.msra.gmra.mrb[0].mxu0 %v2102_v63  ;;  %v10366_v24 = vpack.c.bf16 %v305_v15, %v305_v15  ;;  %v610_v30 = vshrl.u32 %v10365_v17, 16 }
  0x9a   : > { %v13041_v2 = vrot.slane %v1242_v6, 1  ;;  %11141 = vmatpush3.bf16.msra.mxu0 %v12972_v12  ;;  %v12272_v12 = vld [vmem:[#allocation8 + $0x20] sm:$0xff]   ;;  %v613_v31 = vshll.u32 %v10365_v17, 16  ;;  %v606_v33 = vor.u32 %v605_v21, %v602_v19  ;;  %v10367_v34 = vpack.c.bf16 %v306_v22, %v306_v22  ;;  %v12275_v6 = vld [vmem:[#allocation8 + $0x28] sm:$0xff]   ;;  %v12283_v22 = vld [vmem:[#allocation8 + $0x38] sm:$0xff]  }
  0x9b   : > { %v13045_v11 = vor.u32 %v2109_v0, %v2106_v59  ;;  %11142 = vmatprep.subr.bf16.mxu0 %v12260_v57  ;;  %11017 = vmatpush3.bf16.msra.mxu1 %v12264_v44  ;;  %v620_v35 = vshrl.u32 %v10366_v24, 16  ;;  %v623_v36 = vshll.u32 %v10366_v24, 16  ;;  %v612_v37 = vrot.slane %v610_v30, 6  ;;  %v12276_v17 = vld [vmem:[#allocation8 + $0x168] sm:$0xff]  }
  0x9c   : > { %v1245_v13 = vsel %vm1209_vm8, %v1240_v60, %v13041_v2  ;;  %11018 = vmatprep.subr.bf16.mxu1 %v12267_v3  ;;  %v615_v38 = vrot.slane %v613_v31, 7  ;;  %v307_v40 = vmax.f32 %v256_v26, 0.0  ;;  %v308_v43 = vmax.f32 %v257_v28, 0.0 }
  0x9d   : > { %11001 = vmatmul.mubr.bf16.gmra.mrb[4].mxu1 %v1245_v13  ;;  %v2111_v20 = vsel %vm2076_vm9, %v2101_v49, %v13045_v11  ;;  %v607_v44 = vsel %vm12960_vm7, %v598_v18, %v606_v33  ;;  %v608_v45 = vrot.slane %v606_v33, 4  ;;  %v622_v46 = vrot.slane %v620_v35, 6  ;;  %v12280_v13 = vld [vmem:[#allocation8 + $0x30] sm:$0xff]  }
  0x9e   : > { %11128 = vmatprep.mubr.bf16.mxu0 %v2111_v20  ;;  %11143 = vmatpush3.bf16.msra.mxu0 %v12260_v57  ;;  %v625_v47 = vrot.slane %v623_v36, 7  ;;  %v616_v49 = vor.u32 %v615_v38, %v612_v37  ;;  %1074 = vst [vmem:[#allocation2 + $0x30] sm:$0xf] %v607_v44  ;;  %v630_v52 = vshrl.u32 %v10367_v34, 16  ;;  %v633_v53 = vshll.u32 %v10367_v34, 16  ;;  %v13062_v39 = vld [vmem:[#allocation2 + $0x28] sm:$0xff]  }
  0x9f   : > { %11144 = vmatprep.subr.bf16.mxu0 %v12266_v5  ;;  %11019 = vmatpush3.bf16.msra.mxu1 %v12267_v3  ;;  %v10368_v55 = vpack.c.bf16 %v307_v40, %v307_v40  ;;  %v309_v60 = vmax.f32 %v13057_v32, 0.0  ;;  %v1248_v50 = vor.u32 %v1246_v14, %v13041_v2  ;;  %v10369_v59 = vpack.c.bf16 %v308_v43, %v308_v43  ;;  %v13067_v0 = vld [vmem:[#allocation2 + $0x28] sm:$0xff]   ;;  %v12282_v34 = vld [vmem:[#allocation8 + $0x170] sm:$0xff]  }
  0xa0   : > { %11020 = vmatprep.subr.bf16.mxu1 %v12272_v12  ;;  %v626_v57 = vor.u32 %v625_v47, %v622_v46  ;;  %v617_v61 = vsel %vm12960_vm7, %v608_v45, %v616_v49  ;;  %v618_v63 = vrot.slane %v616_v49, 4  ;;  %v632_v4 = vrot.slane %v630_v52, 6  ;;  %v13086_v52 = vld [vmem:[#allocation8 + $0x80] sm:$0xff]  }
  0xa1   : > { %1075 = vst [vmem:[#allocation2 + $0x34] sm:$0xf] %v617_v61  ;;  %v640_v7 = vshrl.u32 %v10368_v55, 16  ;;  %v2113_v8 = vshrl.u32 %v13062_v39, 16  ;;  %v2116_v9 = vshll.u32 %v13062_v39, 16  ;;  %v643_v10 = vshll.u32 %v10368_v55, 16 }
  0xa2   : > { %11145 = vmatpush3.bf16.msra.mxu0 %v12266_v5  ;;  %v628_v3 = vrot.slane %v626_v57, 4  ;;  %v635_v5 = vrot.slane %v633_v53, 7  ;;  %v627_v2 = vsel %vm12960_vm7, %v618_v63, %v626_v57  ;;  %v1250_v14 = vshll.u32 %v13067_v0, 16  ;;  %v12284_v63 = vld [vmem:[#allocation8 + $0x178] sm:$0xff]  }
  0xa3   : > { %11146 = vmatprep.subr.bf16.mxu0 %v12268_v29  ;;  %11021 = vmatpush3.bf16.msra.mxu1 %v12272_v12  ;;  %v1254_v15 = vshrl.u32 %v13067_v0, 16  ;;  %1076 = vst [vmem:[#allocation2 + $0x38] sm:$0xf] %v627_v2  ;;  %v642_v18 = vrot.slane %v640_v7, 6  ;;  %v2115_v19 = vrot.slane %v2113_v8, 1  ;;  %v2118_v12 = vrot.slane %v2116_v9, 2 }
  0xa4   : > { %11022 = vmatprep.subr.bf16.mxu1 %v12275_v6  ;;  %v636_v16 = vor.u32 %v635_v5, %v632_v4  ;;  %v645_v20 = vrot.slane %v643_v10, 7  ;;  %v650_v21 = vshrl.u32 %v10369_v59, 16  ;;  %v1252_v24 = vrot.slane %v1250_v14, 1  ;;  %v13101_v9 = vld [vmem:[#allocation8 + $0x180] sm:$0xff]  }
  0xa5   : > { %v2119_v30 = vor.u32 %v2118_v12, %v2115_v19  ;;  %v653_v33 = vshll.u32 %v10369_v59, 16 }
  0xa6   : > { %11147 = vmatpush3.bf16.msra.mxu0 %v12268_v29  ;;  %v637_v26 = vsel %vm12960_vm7, %v628_v3, %v636_v16  ;;  %v638_v28 = vrot.slane %v636_v16, 4  ;;  %v10370_v29 = vpack.c.bf16 %v309_v60, %v309_v60  ;;  %v646_v31 = vor.u32 %v645_v20, %v642_v18 }
  0xa7   : > { %11148 = vmatprep.subr.bf16.mxu0 %v12274_v58  ;;  %11023 = vmatpush3.bf16.msra.mxu1 %v12275_v6  ;;  %1077 = vst [vmem:[#allocation2 + $0x3c] sm:$0xf] %v637_v26  ;;  %v652_v32 = vrot.slane %v650_v21, 6  ;;  %v1253_v35 = vsel %vm1209_vm8, %v1248_v50, %v1252_v24  ;;  %v2120_v38 = vsel %vm2076_vm9, %v13045_v11, %v2119_v30  ;;  %v655_v46 = vrot.slane %v653_v33, 7 }
  0xa8   : > { %11024 = vmatprep.subr.bf16.mxu1 %v12280_v13  ;;  %v660_v36 = vshrl.u32 %v10370_v29, 16  ;;  %v663_v37 = vshll.u32 %v10370_v29, 16  ;;  %11004 = vmatprep.mubr.bf16.mxu1 %v1253_v35  ;;  %v13080_v40 = vld [vmem:[#allocation2 + $0x30] sm:$0xff]   ;;  %v647_v43 = vsel %vm12960_vm7, %v638_v28, %v646_v31  ;;  %v648_v45 = vrot.slane %v646_v31, 4  ;;  %v2326_v29 = vld [vmem:[#allocation2 + $0x8] sm:$0xc] }
  0xa9   : > { %11129 = vmatmul.mubr.bf16.gmra.mrb[4].mxu0 %v2120_v38  ;;  %v13084_v44 = vld [vmem:[#allocation2 + $0x30] sm:$0xff]   ;;  %1078 = vst [vmem:[#allocation2 + $0x40] sm:$0xf] %v647_v43  ;;  %v2122_v11 = vshrl.u32 %v13080_v40, 16  ;;  %v2125_v53 = vshll.u32 %v13080_v40, 16  ;;  %v1256_v6 = vor.u32 %v1254_v15, %v1252_v24 }
  0xaa   : > { %11149 = vmatpush3.bf16.msra.mxu0 %v12274_v58  ;;  %v662_v47 = vrot.slane %v660_v36, 6  ;;  %v665_v49 = vrot.slane %v663_v37, 7  ;;  %v1258_v55 = vshll.u32 %v13084_v44, 16  ;;  %v1262_v57 = vshrl.u32 %v13084_v44, 16 }
  0xab   : > { %11150 = vmatprep.subr.bf16.mxu0 %v12276_v17  ;;  %11025 = vmatpush3.bf16.msra.mxu1 %v12280_v13  ;;  %v656_v58 = vor.u32 %v655_v46, %v652_v32  ;;  %v2124_v60 = vrot.slane %v2122_v11, 1  ;;  %v2127_v50 = vrot.slane %v2125_v53, 2  ;;  %v9664_v36 = vcombine.low %v2326_v29, %v12992_v51 }
  0xac   : > { %11026 = vmatprep.subr.bf16.mxu1 %v12283_v22  ;;  %v13092_v61 = vor.u32 %v665_v49, %v662_v47  ;;  %v1260_v59 = vrot.slane %v1258_v55, 1  ;;  %v2349_v11 = vrot.slane %v13004_v62, 2  ;;  %v1607_v53 = vrot.slane %v12987_v48, 1 }
  0xad   : > { %v657_v4 = vsel %vm12960_vm7, %v648_v45, %v656_v58  ;;  %v2128_v5 = vor.u32 %v2127_v50, %v2124_v60  ;;  %v658_v8 = vrot.slane %v656_v58, 4  ;;  %v2348_v49 = vrot.slane %v9664_v36, 2  ;;  %v12288_v58 = vld [vmem:[#allocation8 + $0x88] sm:$0xff]  }
  0xae   : > { %11151 = vmatpush3.bf16.msra.mxu0 %v12276_v17  ;;  %v13094_v3 = vld [vmem:[#allocation2 + $0x38] sm:$0xff]   ;;  %1079 = vst [vmem:[#allocation2 + $0x44] sm:$0xf] %v657_v4  ;;  %v1261_v2 = vsel %vm1209_vm8, %v1256_v6, %v1260_v59  ;;  %v1264_v14 = vor.u32 %v1262_v57, %v1260_v59  ;;  %v1609_v57 = vrot.slane %v13008_v1, 1  ;;  %v1611_v62 = vrot.slane %v13019_v25, 1 }
  0xaf   : > { %11152 = vmatprep.subr.bf16.mxu0 %v12282_v34  ;;  %11027 = vmatpush3.bf16.msra.mxu1 %v12283_v22  ;;  %v13098_v7 = vld [vmem:[#allocation2 + $0x38] sm:$0xff]   ;;  %v2131_v10 = vshrl.u32 %v13094_v3, 16  ;;  %v2134_v13 = vshll.u32 %v13094_v3, 16  ;;  %v2129_v15 = vsel %vm2076_vm9, %v2119_v30, %v2128_v5  ;;  %v667_v18 = vsel %vm12960_vm7, %v658_v8, %v13092_v61 }
  0xb0   : > { %11044 = vmatprep.subr.bf16.mxu1 %v13086_v52  ;;  %11005 = vmatmul.mubr.bf16.gmra.mrb[8].mxu1 %v1261_v2  ;;  %v1266_v16 = vshll.u32 %v13098_v7, 16  ;;  %v1270_v17 = vshrl.u32 %v13098_v7, 16  ;;  %v13112_v20 = vld [vmem:[#allocation2 + $0x40] ss:$0 sps:$4 sm:$0x11]   ;;  %v2350_v60 = vsel %vm2347_vm10, %v2348_v49, %v2349_v11  ;;  %v13137_v50 = vsel %vm1605_vm11, %v1607_v53, %v1609_v57  ;;  %v12290_v59 = vld [vmem:[#allocation8 + $0x90] sm:$0xff]  }
  0xb1   : > { %11132 = vmatprep.mubr.bf16.mxu0 %v2129_v15  ;;  %v2133_v19 = vrot.slane %v2131_v10, 1  ;;  %v2136_v12 = vrot.slane %v2134_v13, 2  ;;  %1080 = vst [vmem:[#allocation2 + $0x48] sm:$0xf] %v667_v18  ;;  %v1274_v24 = vshll.u32 %v13112_v20, 16  ;;  %v13144_v4 = vsel %vm1605_vm11, %v1609_v57, %v1611_v62 }
  0xb2   : > { %11153 = vmatpush3.bf16.msra.mxu0 %v12282_v34  ;;  %v1268_v21 = vrot.slane %v1266_v16, 1  ;;  %v2351_v8 = vrot.slane %v13017_v23, 2  ;;  %v1615_v2 = vrot.slane %v13067_v0, 1  ;;  %v2353_v10 = vrot.slane %v13028_v41, 2  ;;  %v12292_v41 = vld [vmem:[#allocation8 + $0x98] sm:$0xff]  }
  0xb3   : > { %11154 = vmatprep.subr.bf16.mxu0 %v12284_v63  ;;  %v2137_v22 = vor.u32 %v2136_v12, %v2133_v19  ;;  %v1276_v32 = vrot.slane %v1274_v24, 1  ;;  %v1619_v23 = vrot.slane %v13098_v7, 1  ;;  %v1621_v19 = vrot.slane %v13112_v20, 1  ;;  %v12291_v24 = vld [vmem:[#allocation8 + $0x190] sm:$0xff]   ;;  %v12293_v20 = vld [vmem:[#allocation8 + $0x198] sm:$0xff]  }
  0xb4   : > { %v1269_v26 = vsel %vm1209_vm8, %v1264_v14, %v1268_v21  ;;  %v1272_v28 = vor.u32 %v1270_v17, %v1268_v21  ;;  %v2352_v16 = vsel %vm2347_vm10, %v2349_v11, %v2351_v8  ;;  %v12289_v17 = vld [vmem:[#allocation8 + $0x188] sm:$0xff]   ;;  %v2355_v12 = vrot.slane %v13062_v39, 2  ;;  %v12294_v21 = vld [vmem:[#allocation8 + $0xa0] sm:$0xff]  }
  0xb5   : > { %v2138_v30 = vsel %vm2076_vm9, %v2128_v5, %v2137_v22  ;;  %11008 = vmatprep.mubr.bf16.mxu1 %v1269_v26  ;;  %v13118_v31 = vld [vmem:[#allocation2 + $0x40] sm:$0xff]   ;;  %v1613_v5 = vrot.slane %v13030_v42, 1  ;;  %v2357_v26 = vrot.slane %v13080_v40, 2  ;;  %v2359_v29 = vrot.slane %v13094_v3, 2 }
  0xb6   : > { %11155 = vmatpush3.bf16.msra.mxu0 %v12284_v63  ;;  %v2140_v33 = vshrl.u32 %v13118_v31, 16  ;;  %v2143_v34 = vshll.u32 %v13118_v31, 16  ;;  %v1277_v35 = vsel %vm1209_vm8, %v1272_v28, %v1276_v32  ;;  %v2356_v28 = vsel %vm2347_vm10, %v2353_v10, %v2355_v12 }
  0xb7   : > { %11172 = vmatprep.subr.bf16.mxu0 %v13101_v9  ;;  %11133 = vmatmul.mubr.bf16.gmra.mrb[8].mxu0 %v2138_v30  ;;  %v13152_v13 = vsel %vm1605_vm11, %v1611_v62, %v1613_v5  ;;  %v13156_v14 = vsel %vm1605_vm11, %v1613_v5, %v1615_v2  ;;  %v259_v30 = vld [vmem:[%s12923_s12 + $0x88] sm:$0xff]  ;;  %v2358_v32 = vsel %vm2347_vm10, %v2355_v12, %v2357_v26  ;;  %v2361_v11 = vrot.slane %v13118_v31, 2 }
  0xb8   : > { %11009 = vmatmul.mubr.bf16.gmra.mrb[12].mxu1 %v1277_v35  ;;  %v13124_v37 = vld [vmem:[#allocation2 + $0x48] ss:$0 sps:$4 sm:$0x33]   ;;  %v2142_v38 = vrot.slane %v2140_v33, 1  ;;  %v2145_v43 = vrot.slane %v2143_v34, 2  ;;  %v310_v36 = vmax.f32 %v259_v30, 0.0 }
  0xb9   : > { %11028 = vmatprep.mubr.bf16.mxu1 %v12944_v27  ;;  %v2149_v45 = vshrl.u32 %v13124_v37, 16  ;;  %v2152_v46 = vshll.u32 %v13124_v37, 16  ;;  %v12547_v33 = vld [vmem:[#allocation2 + $0x4] sm:$0xf]  ;;  %v2534_v35 = vld [vmem:[#allocation2 + $0x10] sm:$0xc] }
  0xba   : > { %v2146_v47 = vor.u32 %v2145_v43, %v2142_v38  ;;  %v260_v38 = vld [vmem:[%s12923_s12 + $0x90] sm:$0xff]  ;;  %v261_v43 = vld [vmem:[%s12923_s12 + $0x98] sm:$0xff]  ;;  %v668_v5 = vrot.slane %v13092_v61, 4 }
  0xbb   : > { %v2151_v51 = vrot.slane %v2149_v45, 1  ;;  %v2154_v6 = vrot.slane %v2152_v46, 2  ;;  %v311_v45 = vmax.f32 %v260_v38, 0.0  ;;  %v12298_v46 = vld [vmem:[#allocation8 + $0xb0] sm:$0xff]   ;;  %v312_v49 = vmax.f32 %v261_v43, 0.0  ;;  %v12305_v30 = vld [vmem:[#allocation8 + $0xc0] sm:$0xff]  }
  0xbc   : > { %v2147_v55 = vsel %vm2076_vm9, %v2137_v22, %v2146_v47  ;;  %v13172_v22 = vsel %vm1605_vm11, %v1619_v23, %v1621_v19  ;;  %v13202_v19 = vld [vmem:[#allocation2 + $0x30] sm:$0xff]   ;;  %v13204_v61 = vld [vmem:[#allocation2 + $0x38] sm:$0xff]   ;;  %v1869_v43 = vrot.slane %v12997_v56, 1 }
  0xbd   : > { %11136 = vmatprep.mubr.bf16.mxu0 %v2147_v55  ;;  %v2155_v27 = vor.u32 %v2154_v6, %v2151_v51  ;;  %v2363_v51 = vrot.slane %v13124_v37, 2  ;;  %v10372_v6 = vpack.c.bf16 %v311_v45, %v311_v45  ;;  %v12295_v55 = vld [vmem:[#allocation8 + $0x1a0] sm:$0xff]   ;;  %v10373_v62 = vpack.c.bf16 %v312_v49, %v312_v49  ;;  %v12299_v45 = vld [vmem:[#allocation8 + $0x1b0] sm:$0xff]   ;;  %v12315_v56 = vld [vmem:[#allocation8 + $0x1d8] sm:$0xff]  }
  0xbe   : > { %v13226_v49 = vld [vmem:[#allocation2 + $0x10] sm:$0xff]  }
  0xbf   : > { %v2156_v63 = vsel %vm2076_vm9, %v2146_v47, %v2155_v27  ;;  %v10371_v47 = vpack.c.bf16 %v310_v36, %v310_v36  ;;  %v13187_v27 = vld [vmem:[#allocation2 + $0x18] sm:$0xff]  }
  0xc0   : > { %11029 = vmatmul.mubr.bf16.vlgmr.msra.gmra.mrb[0].mxu1 %v12987_v48  ;;  %11137 = vmatmul.mubr.bf16.gmra.mrb[12].mxu0 %v2156_v63  ;;  %v2618_v48 = vrot.slane %v13202_v19, 2  ;;  %v12311_v37 = vld [vmem:[#allocation8 + $0xd0] sm:$0xff]  }
  0xc1   : > { %11045 = vmatpush3.bf16.msra.mxu1 %v13086_v52  ;;  %11156 = vmatprep.mubr.bf16.mxu0 %v2350_v60  ;;  %v1617_v52 = vrot.slane %v13084_v44, 1  ;;  %v673_v60 = vshll.u32 %v10371_v47, 16 }
  0xc2   : > { %11046 = vmatprep.subr.bf16.mxu1 %v12288_v58  ;;  %11032 = vmatprep.mubr.bf16.mxu1 %v13008_v1  ;;  %v2354_v1 = vsel %vm2347_vm10, %v2351_v8, %v2353_v10  ;;  %v680_v8 = vshrl.u32 %v10372_v6, 16  ;;  %v12297_v10 = vld [vmem:[#allocation8 + $0x1a8] sm:$0xff]  }
  0xc3   : > { %v13159_v15 = vsel %vm1605_vm11, %v1615_v2, %v1617_v52  ;;  %v13165_v18 = vsel %vm1605_vm11, %v1617_v52, %v1619_v23  ;;  %v683_v2 = vshll.u32 %v10372_v6, 16  ;;  %v12300_v52 = vld [vmem:[#allocation8 + $0xb8] sm:$0xff]   ;;  %v1870_v6 = vrot.slane %v13226_v49, 1 }
  0xc4   : > { %v682_v12 = vrot.slane %v680_v8, 6  ;;  %v2831_v8 = vshll.u32 %v13187_v27, 16 }
  0xc5   : > { %11047 = vmatpush3.bf16.msra.mxu1 %v12288_v58  ;;  %v670_v58 = vshrl.u32 %v10371_v47, 16 }
  0xc6   : > { %11048 = vmatprep.subr.bf16.mxu1 %v12290_v59 }
  0xc7   : > { %v672_v23 = vrot.slane %v670_v58, 6 }
  0xc8   : > { %11033 = vmatmul.mubr.bf16.gmra.mrb[4].mxu1 %v13019_v25  ;;  %11157 = vmatmul.mubr.bf16.vlgmr.msra.gmra.mrb[0].mxu0 %v2352_v16  ;;  %v1584_v25 = vld [vmem:[#allocation2] sm:$0xe]  ;;  %v675_v16 = vrot.slane %v673_v60, 7  ;;  %v2828_v60 = vshrl.u32 %v13187_v27, 16 }
  0xc9   : > { %11049 = vmatpush3.bf16.msra.mxu1 %v12290_v59  ;;  %11173 = vmatpush3.bf16.msra.mxu0 %v13101_v9  ;;  %v12296_v9 = vld [vmem:[#allocation8 + $0xa8] sm:$0xff]   ;;  %v9629_v34 = vcombine.low %v1584_v25, %v12547_v33  ;;  %v13207_v25 = vld [vmem:[#allocation2 + $0x40] sm:$0xff]  }
  0xca   : > { %11160 = vmatprep.mubr.bf16.mxu0 %v2354_v1  ;;  %11174 = vmatprep.subr.bf16.mxu0 %v12289_v17  ;;  %v13195_v59 = vld [vmem:[#allocation2 + $0x28] sm:$0xff]   ;;  %v693_v1 = vshll.u32 %v10373_v62, 16 }
  0xcb   : > { %11050 = vmatprep.subr.bf16.mxu1 %v12292_v41  ;;  %11036 = vmatprep.mubr.bf16.mxu1 %v13030_v42  ;;  %v13180_v42 = vld [vmem:[#allocation2 + $0x14] sm:$0xf]  ;;  %v1606_v57 = vrot.slane %v9629_v34, 1  ;;  %v2616_v34 = vrot.slane %v13195_v59, 2 }
  0xcc   : > { %v13193_v63 = vcombine.low %v2534_v35, %v13180_v42 }
  0xcd   : > { %11051 = vmatpush3.bf16.msra.mxu1 %v12292_v41  ;;  %11175 = vmatpush3.bf16.msra.mxu0 %v12289_v17  ;;  %v690_v17 = vshrl.u32 %v10373_v62, 16  ;;  %v2360_v41 = vsel %vm2347_vm10, %v2357_v26, %v2359_v29  ;;  %v1608_v26 = vsel %vm1605_vm11, %v1606_v57, %v1607_v53  ;;  %v12301_v62 = vld [vmem:[#allocation8 + $0x1b8] sm:$0xff]  }
  0xce   : > { %11052 = vmatprep.subr.bf16.mxu1 %v12294_v21  ;;  %11176 = vmatprep.subr.bf16.mxu0 %v12291_v24  ;;  %v2823_v58 = vshll.u32 %v13193_v63, 16 }
  0xd0   : > { %11037 = vmatmul.mubr.bf16.gmra.mrb[8].mxu1 %v13067_v0  ;;  %11161 = vmatmul.mubr.bf16.gmra.mrb[4].mxu0 %v2356_v28  ;;  %v13189_v0 = vld [vmem:[#allocation2 + $0x20] sm:$0xff]   ;;  %v695_v28 = vrot.slane %v693_v1, 7 }
  0xd1   : > { %11053 = vmatpush3.bf16.msra.mxu1 %v12294_v21  ;;  %11177 = vmatpush3.bf16.msra.mxu0 %v12291_v24  ;;  %v685_v21 = vrot.slane %v683_v2, 7  ;;  %v2612_v24 = vrot.slane %v13187_v27, 2  ;;  %v2837_v2 = vshrl.u32 %v13189_v0, 16  ;;  %v3093_v49 = vrot.slane %v13189_v0, 3 }
  0xd2   : > { %11164 = vmatprep.mubr.bf16.mxu0 %v2358_v32  ;;  %11178 = vmatprep.subr.bf16.mxu0 %v12293_v20  ;;  %v2614_v32 = vrot.slane %v13189_v0, 2 }
  0xd3   : > { %11054 = vmatprep.subr.bf16.mxu1 %v12296_v9  ;;  %11040 = vmatprep.mubr.bf16.mxu1 %v13084_v44  ;;  %v2362_v44 = vsel %vm2347_vm10, %v2359_v29, %v2361_v11  ;;  %v2611_v29 = vrot.slane %v13193_v63, 2  ;;  %v686_v33 = vor.u32 %v685_v21, %v682_v12  ;;  %v12307_v12 = vld [vmem:[#allocation8 + $0x1c0] sm:$0xff]   ;;  %v2830_v21 = vrot.slane %v2828_v60, 2 }
  0xd4   : > { %v2873_v60 = vshrl.u32 %v13207_v25, 16 }
  0xd5   : > { %11055 = vmatpush3.bf16.msra.mxu1 %v12296_v9  ;;  %11179 = vmatpush3.bf16.msra.mxu0 %v12293_v20  ;;  %v676_v9 = vor.u32 %v675_v16, %v672_v23  ;;  %v692_v20 = vrot.slane %v690_v17, 6  ;;  %v688_v53 = vrot.slane %v686_v33, 4  ;;  %v2840_v23 = vshll.u32 %v13189_v0, 16 }
  0xd6   : > { %11056 = vmatprep.subr.bf16.mxu1 %v12298_v46  ;;  %11180 = vmatprep.subr.bf16.mxu0 %v12295_v55  ;;  %v2846_v16 = vshrl.u32 %v13195_v59, 16  ;;  %v1878_v17 = vrot.slane %v13080_v40, 1  ;;  %v2613_v1 = vsel %vm2347_vm10, %v2611_v29, %v2612_v24  ;;  %v13265_v29 = vld [vmem:[#allocation2 + $0x20] sm:$0xff]  }
  0xd7   : > { %v677_v35 = vsel %vm12960_vm7, %v668_v5, %v676_v9  ;;  %v678_v36 = vrot.slane %v676_v9, 4  ;;  %v13218_v38 = vor.u32 %v695_v28, %v692_v20  ;;  %v12308_v5 = vld [vmem:[#allocation8 + $0xc8] sm:$0xff]   ;;  %v2833_v9 = vrot.slane %v2831_v8, 3  ;;  %v13262_v20 = vld [vmem:[#allocation2 + $0x18] sm:$0xff]  }
  0xd8   : > { %11041 = vmatmul.mubr.bf16.gmra.mrb[12].mxu1 %v13098_v7  ;;  %11165 = vmatmul.mubr.bf16.gmra.mrb[8].mxu0 %v2360_v41  ;;  %v2620_v7 = vrot.slane %v13204_v61, 2  ;;  %1081 = vst [vmem:[#allocation2 + $0x4c] sm:$0xf] %v677_v35  ;;  %v2849_v41 = vshll.u32 %v13195_v59, 16  ;;  %v2839_v28 = vrot.slane %v2837_v2, 2  ;;  %v2615_v8 = vsel %vm2347_vm10, %v2612_v24, %v2614_v32 }
  0xd9   : > { %11057 = vmatpush3.bf16.msra.mxu1 %v12298_v46  ;;  %11181 = vmatpush3.bf16.msra.mxu0 %v12295_v55  ;;  %v2622_v46 = vrot.slane %v13207_v25, 2  ;;  %v687_v47 = vsel %vm12960_vm7, %v678_v36, %v686_v33  ;;  %v2820_v55 = vshrl.u32 %v13193_v63, 16  ;;  %v697_v57 = vsel %vm12960_vm7, %v688_v53, %v13218_v38 }
  0xda   : > { %11168 = vmatprep.mubr.bf16.mxu0 %v2362_v44  ;;  %11182 = vmatprep.subr.bf16.mxu0 %v12297_v10  ;;  %1082 = vst [vmem:[#allocation2 + $0x50] sm:$0xf] %v687_v47  ;;  %1083 = vst [vmem:[#allocation2 + $0x54] sm:$0xf] %v697_v57  ;;  %v2364_v63 = vsel %vm2347_vm10, %v2361_v11, %v2363_v51  ;;  %v13254_v11 = vrot.slane %v2823_v58, 3  ;;  %v1880_v51 = vrot.slane %v13094_v3, 1 }
  0xdb   : > { %11058 = vmatprep.subr.bf16.mxu1 %v12300_v52  ;;  %11060 = vmatprep.mubr.bf16.mxu1 %v1608_v26  ;;  %v13252_v44 = vrot.slane %v2820_v55, 2  ;;  %v2842_v26 = vrot.slane %v2840_v23, 3  ;;  %v2848_v3 = vrot.slane %v2846_v16, 2  ;;  %v2858_v53 = vshll.u32 %v13202_v19, 16  ;;  %v12309_v55 = vld [vmem:[#allocation8 + $0x1c8] sm:$0xff]   ;;  %v12314_v57 = vld [vmem:[#allocation8 + $0xd8] sm:$0xff]  }
  0xdc   : > { %v13269_v35 = vsel %vm1605_vm11, %v1878_v17, %v1880_v51  ;;  %v2867_v47 = vshll.u32 %v13204_v61, 16  ;;  %v15180_v2 = vrot.slane %v13118_v31, 1  ;;  %v2619_v24 = vsel %vm2347_vm10, %v2616_v34, %v2618_v48  ;;  %v12317_v16 = vld [vmem:[#allocation8 + $0xe0] sm:$0xff]  }
  0xdd   : > { %11059 = vmatpush3.bf16.msra.mxu1 %v12300_v52  ;;  %11183 = vmatpush3.bf16.msra.mxu0 %v12297_v10  ;;  %v15179_v52 = vrot.slane %v13062_v39, 1  ;;  %v2855_v10 = vshrl.u32 %v13202_v19, 16  ;;  %v2834_v33 = vor.u32 %v2833_v9, %v2830_v21  ;;  %v13331_v9 = vld [vmem:[#allocation2 + $0x48] ss:$0 sps:$4 sm:$0x11]  }
  0xde   : > { %11076 = vmatprep.subr.bf16.mxu1 %v12305_v30  ;;  %11184 = vmatprep.subr.bf16.mxu0 %v12299_v45 }
  0xdf   : > { %v13259_v40 = vsel %vm1605_vm11, %v15179_v52, %v1878_v17  ;;  %v2857_v36 = vrot.slane %v2855_v10, 2  ;;  %v13275_v58 = vld [vmem:[#allocation2 + $0x48] sm:$0xff]   ;;  %v2869_v52 = vrot.slane %v2867_v47, 3 }
  0xe0   : > { %11061 = vmatmul.mubr.bf16.vlgmr.msra.gmra.mrb[0].mxu1 %v13137_v50  ;;  %11169 = vmatmul.mubr.bf16.gmra.mrb[12].mxu0 %v2364_v63  ;;  %v1872_v50 = vrot.slane %v13262_v20, 1  ;;  %v13302_v63 = vsel %vm1605_vm11, %v1880_v51, %v15180_v2  ;;  %v2875_v51 = vrot.slane %v2873_v60, 2 }
  0xe1   : > { %11077 = vmatpush3.bf16.msra.mxu1 %v12305_v30  ;;  %11185 = vmatpush3.bf16.msra.mxu0 %v12299_v45  ;;  %v2851_v30 = vrot.slane %v2849_v41, 3  ;;  %v2864_v45 = vshrl.u32 %v13204_v61, 16  ;;  %v13290_v23 = vld [vmem:[#allocation2 + $0x50] ss:$0 sps:$4 sm:$0x33]   ;;  %v2860_v41 = vrot.slane %v2858_v53, 3 }
  0xe2   : > { %11188 = vmatprep.mubr.bf16.mxu0 %v2613_v1  ;;  %11186 = vmatprep.subr.bf16.mxu0 %v12301_v62  ;;  %v13305_v17 = vld [vmem:[#allocation2 + $0x50] ss:$0 sps:$4 sm:$0x77]   ;;  %v12313_v1 = vld [vmem:[#allocation8 + $0x1d0] sm:$0xff]   ;;  %v2626_v53 = vrot.slane %v13290_v23, 2  ;;  %v12319_v23 = vld [vmem:[#allocation8 + $0x1e0] sm:$0xff]  }
  0xe3   : > { %11078 = vmatprep.subr.bf16.mxu1 %v12308_v5  ;;  %11064 = vmatprep.mubr.bf16.mxu1 %v13144_v4  ;;  %v2876_v4 = vshll.u32 %v13207_v25, 16  ;;  %v2866_v10 = vrot.slane %v2864_v45, 2  ;;  %v2891_v45 = vshrl.u32 %v13305_v17, 16  ;;  %v2852_v47 = vor.u32 %v2851_v30, %v2848_v3  ;;  %v3912_v3 = vld [vmem:[#allocation2 + $0x44] sm:$0xf] }
  0xe4   : > { %v2861_v60 = vor.u32 %v2860_v41, %v2857_v36  ;;  %v15215_v30 = vrot.slane %v13265_v29, 1  ;;  %v1884_v29 = vrot.slane %v13331_v9, 1 }
  0xe5   : > { %11079 = vmatpush3.bf16.msra.mxu1 %v12308_v5  ;;  %11187 = vmatpush3.bf16.msra.mxu0 %v12301_v62  ;;  %v2617_v5 = vsel %vm2347_vm10, %v2614_v32, %v2616_v34  ;;  %v2882_v62 = vshrl.u32 %v13275_v58, 16  ;;  %v2885_v32 = vshll.u32 %v13275_v58, 16  ;;  %v2826_v34 = vor.u32 %v13254_v11, %v13252_v44 }
  0xe6   : > { %11080 = vmatprep.subr.bf16.mxu1 %v12311_v37  ;;  %11204 = vmatprep.subr.bf16.mxu0 %v12307_v12  ;;  %v2878_v2 = vrot.slane %v2876_v4, 3  ;;  %v13329_v11 = vsel %vm2347_vm10, %v2620_v7, %v2622_v46  ;;  %v3911_v4 = vld [vmem:[#allocation2 + $0x40] sm:$0xf]  ;;  %v2870_v36 = vor.u32 %v2869_v52, %v2866_v10  ;;  %v2894_v52 = vshll.u32 %v13305_v17, 16 }
  0xe7   : > { %v2884_v44 = vrot.slane %v2882_v62, 2  ;;  %v2887_v21 = vrot.slane %v2885_v32, 3  ;;  %v12323_v62 = vld [vmem:[#allocation8 + $0xf0] sm:$0xff]   ;;  %v13394_v41 = vrot.slane %v2891_v45, 2 }
  0xe8   : > { %11065 = vmatmul.mubr.bf16.gmra.mrb[4].mxu1 %v13152_v13  ;;  %11189 = vmatmul.mubr.bf16.vlgmr.msra.gmra.mrb[0].mxu0 %v2615_v8  ;;  %v2624_v13 = vrot.slane %v13275_v58, 2  ;;  %v3068_v8 = vld [vmem:[#allocation2 + $0x10] sm:$0x8] }
  0xe9   : > { %11081 = vmatpush3.bf16.msra.mxu1 %v12311_v37  ;;  %11205 = vmatpush3.bf16.msra.mxu0 %v12307_v12  ;;  %v2621_v37 = vsel %vm2347_vm10, %v2618_v48, %v2620_v7  ;;  %v13321_v12 = vsel %vm1605_vm11, %v1869_v43, %v1870_v6  ;;  %v2843_v48 = vor.u32 %v2842_v26, %v2839_v28  ;;  %v12320_v43 = vld [vmem:[#allocation8 + $0xe8] sm:$0xff]  }
  0xea   : > { %11192 = vmatprep.mubr.bf16.mxu0 %v2617_v5  ;;  %11206 = vmatprep.subr.bf16.mxu0 %v12309_v55  ;;  %v13336_v7 = vsel %vm2818_vm12, %v2826_v34, %v2834_v33  ;;  %v13343_v28 = vsel %vm1605_vm11, %v1870_v6, %v1872_v50  ;;  %v9699_v26 = vcombine.low %v3068_v8, %v13180_v42  ;;  %v15216_v6 = vrot.slane %v13062_v39, 1  ;;  %v13376_v39 = vld [vmem:[#allocation2 + $0x50] sm:$0xff]  }
  0xeb   : > { %11082 = vmatprep.subr.bf16.mxu1 %v12314_v57  ;;  %11068 = vmatprep.mubr.bf16.mxu1 %v13156_v14  ;;  %v3091_v14 = vrot.slane %v13187_v27, 3  ;;  %v13351_v27 = vsel %vm1605_vm11, %v1872_v50, %v15215_v30  ;;  %v13360_v42 = vsel %vm2818_vm12, %v2834_v33, %v2843_v48  ;;  %v15217_v5 = vmov %v15215_v30 }
  0xec   : > { %v13367_v20 = vsel %vm1605_vm11, %v15217_v5, %v15216_v6  ;;  %v3090_v50 = vrot.slane %v9699_v26, 3  ;;  %v13371_v0 = vsel %vm2818_vm12, %v2843_v48, %v2852_v47  ;;  %v2879_v33 = vor.u32 %v2878_v2, %v2875_v51  ;;  %v12321_v48 = vld [vmem:[#allocation8 + $0x1e8] sm:$0xff]  }
  0xed   : > { %11083 = vmatpush3.bf16.msra.mxu1 %v12314_v57  ;;  %11207 = vmatpush3.bf16.msra.mxu0 %v12309_v55  ;;  %v13353_v55 = vcombine.low %v3911_v4, %v3912_v3  ;;  %v13355_v57 = vld [vmem:[#allocation2 + $0x48] sm:$0xff]   ;;  %v2625_v2 = vsel %vm2347_vm10, %v2622_v46, %v2624_v13  ;;  %v13401_v34 = vsel %vm2347_vm10, %v2624_v13, %v2626_v53  ;;  %v263_v53 = vld [vmem:[%s12923_s12 + $0xa8] sm:$0xff]  ;;  %v15218_v26 = vrot.slane %v13118_v31, 1 }
  0xee   : > { %11084 = vmatprep.subr.bf16.mxu1 %v12317_v16  ;;  %11208 = vmatprep.subr.bf16.mxu0 %v12313_v1  ;;  %v13380_v32 = vsel %vm15195_vm13, %v3090_v50, %v3091_v14  ;;  %v4011_v10 = vshll.u32 %v13355_v57, 16  ;;  %v13403_v51 = vor.u32 %v2887_v21, %v2884_v44  ;;  %v13409_v9 = vsel %vm2818_vm12, %v2870_v36, %v2879_v33  ;;  %v262_v13 = vld [vmem:[%s12923_s12 + $0xa0] sm:$0xff]  ;;  %v264_v44 = vld [vmem:[%s12923_s12 + $0xb0] sm:$0xff]  ;;  %v265_v4 = vld [vmem:[%s12923_s12 + $0xb8] sm:$0xff] }
  0xef   : > { %v4004_v46 = vshrl.u32 %v13353_v55, 16  ;;  %v12326_v21 = vld [vmem:[#allocation8 + $0xf8] sm:$0xff]   ;;  %v313_v8 = vmax.f32 %v262_v13, 0.0  ;;  %v13424_v3 = vsel %vm1605_vm11, %v15218_v26, %v1884_v29 }
  0xf0   : > { %11069 = vmatmul.mubr.bf16.gmra.mrb[8].mxu1 %v13159_v15  ;;  %11193 = vmatmul.mubr.bf16.gmra.mrb[4].mxu0 %v2619_v24  ;;  %v13374_v15 = vsel %vm2818_vm12, %v2852_v47, %v2861_v60  ;;  %v4006_v24 = vshll.u32 %v13353_v55, 16  ;;  %v3095_v47 = vrot.slane %v13195_v59, 3  ;;  %v13426_v59 = vrot.slane %v4011_v10, 1 }
  0xf1   : > { %11085 = vmatpush3.bf16.msra.mxu1 %v12317_v16  ;;  %11209 = vmatpush3.bf16.msra.mxu0 %v12313_v1  ;;  %v13384_v16 = vsel %vm15195_vm13, %v3091_v14, %v3093_v49  ;;  %v13392_v1 = vsel %vm2818_vm12, %v2861_v60, %v2870_v36  ;;  %v314_v14 = vmax.f32 %v263_v53, 0.0  ;;  %v12329_v36 = vld [vmem:[#allocation8 + $0x40] sm:$0xff]   ;;  %v13434_v6 = vsel %vm2818_vm12, %v2879_v33, %v13403_v51 }
  0xf2   : > { %11196 = vmatprep.mubr.bf16.mxu0 %v2621_v37  ;;  %11210 = vmatprep.subr.bf16.mxu0 %v12315_v56  ;;  %v13405_v37 = vrot.slane %v2894_v52, 3  ;;  %v13417_v60 = vrot.slane %v4006_v24, 1  ;;  %v13429_v30 = vsel %vm15195_vm13, %v3093_v49, %v3095_v47  ;;  %v698_v52 = vrot.slane %v13218_v38, 4 }
  0xf3   : > { %11086 = vmatprep.subr.bf16.mxu1 %v12320_v43  ;;  %11072 = vmatprep.mubr.bf16.mxu1 %v13165_v18  ;;  %v4019_v18 = vshll.u32 %v13376_v39, 16  ;;  %v10375_v5 = vpack.c.bf16 %v314_v14, %v314_v14  ;;  %v3099_v53 = vrot.slane %v13204_v61, 3  ;;  %v267_v14 = vld [vmem:[%s12923_s12 + $0xc8] sm:$0xff] }
  0xf4   : > { %v2897_v49 = vor.u32 %v13405_v37, %v13394_v41  ;;  %v12335_v61 = vld [vmem:[#allocation8 + $0x58] sm:$0xff]  }
  0xf5   : > { %11087 = vmatpush3.bf16.msra.mxu1 %v12320_v43  ;;  %11211 = vmatpush3.bf16.msra.mxu0 %v12315_v56  ;;  %v3097_v43 = vrot.slane %v13202_v19, 3  ;;  %v315_v56 = vmax.f32 %v264_v44, 0.0  ;;  %v10374_v19 = vpack.c.bf16 %v313_v8, %v313_v8  ;;  %v710_v24 = vshrl.u32 %v10375_v5, 16  ;;  %v266_v44 = vld [vmem:[%s12923_s12 + $0xc0] sm:$0xff] }
  0xf6   : > { %11088 = vmatprep.subr.bf16.mxu1 %v12323_v62  ;;  %11212 = vmatprep.subr.bf16.mxu0 %v12319_v23  ;;  %v713_v10 = vshll.u32 %v10375_v5, 16  ;;  %v12327_v5 = vld [vmem:[#allocation8 + $0x1f8] sm:$0xff]  }
  0xf7   : > { %v13437_v31 = vsel %vm15195_vm13, %v3095_v47, %v3097_v43  ;;  %v10376_v50 = vpack.c.bf16 %v315_v56, %v315_v56  ;;  %v700_v33 = vshrl.u32 %v10374_v19, 16  ;;  %v703_v29 = vshll.u32 %v10374_v19, 16  ;;  %v12325_v47 = vld [vmem:[#allocation8 + $0x1f0] sm:$0xff]  }
  0xf8   : > { %11073 = vmatmul.mubr.bf16.gmra.mrb[12].mxu1 %v13172_v22  ;;  %11197 = vmatmul.mubr.bf16.gmra.mrb[8].mxu0 %v13329_v11  ;;  %v316_v22 = vmax.f32 %v265_v4, 0.0  ;;  %v13450_v45 = vsel %vm15195_vm13, %v3097_v43, %v3099_v53  ;;  %v13456_v43 = vld [vmem:[#allocation8 + $0x200] sm:$0xff]  }
  0xf9   : > { %11089 = vmatpush3.bf16.msra.mxu1 %v12323_v62  ;;  %11213 = vmatpush3.bf16.msra.mxu0 %v12319_v23  ;;  %v720_v62 = vshrl.u32 %v10376_v50, 16  ;;  %v723_v13 = vshll.u32 %v10376_v50, 16  ;;  %v702_v38 = vrot.slane %v700_v33, 6  ;;  %v705_v8 = vrot.slane %v703_v29, 7  ;;  %v12331_v33 = vld [vmem:[#allocation8 + $0x48] sm:$0xff]  }
  0xfa   : > { %11200 = vmatprep.mubr.bf16.mxu0 %v2625_v2  ;;  %11214 = vmatprep.subr.bf16.mxu0 %v12321_v48  ;;  %v10377_v11 = vpack.c.bf16 %v316_v22, %v316_v22  ;;  %v712_v23 = vrot.slane %v710_v24, 6  ;;  %v715_v2 = vrot.slane %v713_v10, 7  ;;  %v318_v10 = vmax.f32 %v267_v14, 0.0 }
  0xfb   : > { %11090 = vmatprep.subr.bf16.mxu1 %v12326_v21  ;;  %11092 = vmatprep.mubr.bf16.mxu1 %v13321_v12  ;;  %v722_v4 = vrot.slane %v720_v62, 6  ;;  %v725_v26 = vrot.slane %v723_v13, 7  ;;  %v706_v22 = vor.u32 %v705_v8, %v702_v38  ;;  %v317_v12 = vmax.f32 %v266_v44, 0.0  ;;  %v12333_v44 = vld [vmem:[#allocation8 + $0x50] sm:$0xff]  }
  0xfc   : > { %v730_v56 = vshrl.u32 %v10377_v11, 16  ;;  %v733_v19 = vshll.u32 %v10377_v11, 16  ;;  %v716_v50 = vor.u32 %v715_v2, %v712_v23  ;;  %v10379_v23 = vpack.c.bf16 %v318_v10, %v318_v10  ;;  %v268_v2 = vld [vmem:[%s12923_s12 + $0xd0] sm:$0xff] }
  0xfd   : > { %11091 = vmatpush3.bf16.msra.mxu1 %v12326_v21  ;;  %11215 = vmatpush3.bf16.msra.mxu0 %v12321_v48  ;;  %v726_v29 = vor.u32 %v725_v26, %v722_v4  ;;  %v707_v48 = vsel %vm12960_vm7, %v698_v52, %v706_v22  ;;  %v708_v11 = vrot.slane %v706_v22, 4  ;;  %v10378_v13 = vpack.c.bf16 %v317_v12, %v317_v12  ;;  %v269_v4 = vld [vmem:[%s12923_s12 + $0xd8] sm:$0xff]  ;;  %v270_v26 = vld [vmem:[%s12923_s12 + $0xe0] sm:$0xff] }
  0xfe   : > { %11268 = vmatprep.subr.bf16.mxu1 %v12329_v36  ;;  %11216 = vmatprep.subr.bf16.mxu0 %v12325_v47  ;;  %v732_v24 = vrot.slane %v730_v56, 6  ;;  %v735_v21 = vrot.slane %v733_v19, 7  ;;  %v718_v62 = vrot.slane %v716_v50, 4  ;;  %1084 = vst [vmem:[#allocation2 + $0x58] sm:$0xf] %v707_v48  ;;  %v750_v56 = vshrl.u32 %v10379_v23, 16 }
  0xff   : > { %v728_v38 = vrot.slane %v726_v29, 4  ;;  %v740_v14 = vshrl.u32 %v10378_v13, 16  ;;  %v271_v19 = vld [vmem:[%s12923_s12 + $0xe8] sm:$0xff]  ;;  %v320_v10 = vmax.f32 %v269_v4, 0.0  ;;  %v3103_v48 = vrot.slane %v13275_v58, 3 }
 0x100   : > { %11093 = vmatmul.mubr.bf16.vlgmr.msra.gmra.mrb[0].mxu1 %v13343_v28  ;;  %11201 = vmatmul.mubr.bf16.gmra.mrb[12].mxu0 %v13401_v34  ;;  %v736_v8 = vor.u32 %v735_v21, %v732_v24  ;;  %v3101_v28 = vrot.slane %v13207_v25, 3  ;;  %v717_v34 = vsel %vm12960_vm7, %v708_v11, %v716_v50  ;;  %v727_v52 = vsel %vm12960_vm7, %v718_v62, %v726_v29  ;;  %v12330_v11 = vld [vmem:[#allocation8 + $0x208] sm:$0xff]  }
 0x101   : > { %11269 = vmatpush3.bf16.msra.mxu1 %v12329_v36  ;;  %11217 = vmatpush3.bf16.msra.mxu0 %v12325_v47  ;;  %v743_v36 = vshll.u32 %v10378_v13, 16  ;;  %1085 = vst [vmem:[#allocation2 + $0x5c] sm:$0xf] %v717_v34  ;;  %1086 = vst [vmem:[#allocation2 + $0x60] sm:$0xf] %v727_v52  ;;  %v742_v22 = vrot.slane %v740_v14, 6 }
 0x102   : > { %11220 = vmatprep.mubr.bf16.mxu0 %v13336_v7  ;;  %11218 = vmatprep.subr.bf16.mxu0 %v12327_v5  ;;  %v737_v25 = vsel %vm12960_vm7, %v728_v38, %v736_v8  ;;  %v738_v47 = vrot.slane %v736_v8, 4  ;;  %v753_v7 = vshll.u32 %v10379_v23, 16  ;;  %v13474_v12 = vsel %vm15195_vm13, %v3099_v53, %v3101_v28  ;;  %v13491_v14 = vld [vmem:[#allocation8 + $0x210] sm:$0xff]  }
 0x103   : > { %11270 = vmatprep.subr.bf16.mxu1 %v12331_v33  ;;  %11096 = vmatprep.mubr.bf16.mxu1 %v13351_v27  ;;  %1087 = vst [vmem:[#allocation2 + $0x64] sm:$0xf] %v737_v25  ;;  %v745_v50 = vrot.slane %v743_v36, 7  ;;  %v319_v29 = vmax.f32 %v268_v2, 0.0  ;;  %v752_v24 = vrot.slane %v750_v56, 6  ;;  %v321_v13 = vmax.f32 %v270_v26, 0.0 }
 0x104   : > { %v755_v21 = vrot.slane %v753_v7, 7  ;;  %v322_v38 = vmax.f32 %v271_v19, 0.0  ;;  %v13480_v53 = vrot.slane %v4019_v18, 1  ;;  %v10381_v8 = vpack.c.bf16 %v320_v10, %v320_v10  ;;  %v12337_v18 = vld [vmem:[#allocation8 + $0x60] sm:$0xff]  }
 0x105   : > { %11271 = vmatpush3.bf16.msra.mxu1 %v12331_v33  ;;  %11219 = vmatpush3.bf16.msra.mxu0 %v12327_v5  ;;  %v746_v62 = vor.u32 %v745_v50, %v742_v22  ;;  %v10380_v27 = vpack.c.bf16 %v319_v29, %v319_v29  ;;  %v13485_v23 = vsel %vm15195_vm13, %v3101_v28, %v3103_v48  ;;  %v4023_v7 = vshrl.u32 %v13376_v39, 16  ;;  %v13516_v50 = vld [vmem:[#allocation8 + $0x218] sm:$0xff]  }
 0x106   : > { %11272 = vmatprep.subr.bf16.mxu1 %v12333_v44  ;;  %11236 = vmatprep.subr.bf16.mxu0 %v13456_v43  ;;  %v756_v33 = vor.u32 %v755_v21, %v752_v24  ;;  %v770_v4 = vshrl.u32 %v10381_v8, 16  ;;  %v773_v26 = vshll.u32 %v10381_v8, 16  ;;  %v10382_v28 = vpack.c.bf16 %v321_v13, %v321_v13  ;;  %v274_v8 = vld [vmem:[%s12923_s12 + $0x100] sm:$0xff] }
 0x107   : > { %v747_v5 = vsel %vm12960_vm7, %v738_v47, %v746_v62  ;;  %v748_v2 = vrot.slane %v746_v62, 4  ;;  %v760_v34 = vshrl.u32 %v10380_v27, 16  ;;  %v763_v52 = vshll.u32 %v10380_v27, 16  ;;  %v12339_v62 = vld [vmem:[#allocation8 + $0x68] sm:$0xff]  }
 0x108   : > { %11097 = vmatmul.mubr.bf16.gmra.mrb[4].mxu1 %v13367_v20  ;;  %11221 = vmatmul.mubr.bf16.vlgmr.msra.gmra.mrb[0].mxu0 %v13360_v42  ;;  %1088 = vst [vmem:[#allocation2 + $0x68] sm:$0xf] %v747_v5  ;;  %v758_v36 = vrot.slane %v756_v33, 4  ;;  %v13500_v20 = vsel %vm2818_vm12, %v13403_v51, %v2897_v49  ;;  %v13502_v42 = vld [vmem:[#allocation2 + $0x58] sm:$0xff]   ;;  %v10383_v47 = vpack.c.bf16 %v322_v38, %v322_v38  ;;  %v772_v51 = vrot.slane %v770_v4, 6 }
 0x109   : > { %11273 = vmatpush3.bf16.msra.mxu1 %v12333_v44  ;;  %11237 = vmatpush3.bf16.msra.mxu0 %v13456_v43  ;;  %v757_v44 = vsel %vm12960_vm7, %v748_v2, %v756_v33  ;;  %v762_v25 = vrot.slane %v760_v34, 6  ;;  %v765_v41 = vrot.slane %v763_v52, 7  ;;  %v775_v37 = vrot.slane %v773_v26, 7  ;;  %v273_v33 = vld [vmem:[%s12923_s12 + $0xf8] sm:$0xff]  ;;  %v275_v4 = vld [vmem:[%s12923_s12 + $0x108] sm:$0xff] }
 0x10a   : > { %11224 = vmatprep.mubr.bf16.mxu0 %v13371_v0  ;;  %11238 = vmatprep.subr.bf16.mxu0 %v12330_v11  ;;  %v4009_v0 = vor.u32 %v13417_v60, %v4004_v46  ;;  %v13509_v43 = vld [vmem:[#allocation2 + $0x60] sm:$0xff]   ;;  %1089 = vst [vmem:[#allocation2 + $0x6c] sm:$0xf] %v757_v44  ;;  %v15219_v49 = vshrl.u32 %v13355_v57, 16  ;;  %v780_v19 = vshrl.u32 %v10382_v28, 16  ;;  %v783_v22 = vshll.u32 %v10382_v28, 16 }
 0x10b   : > { %11274 = vmatprep.subr.bf16.mxu1 %v12335_v61  ;;  %11100 = vmatprep.mubr.bf16.mxu1 %v13259_v40  ;;  %v4027_v46 = vshll.u32 %v13502_v42, 16  ;;  %v766_v60 = vor.u32 %v765_v41, %v762_v25  ;;  %v776_v29 = vor.u32 %v775_v37, %v772_v51  ;;  %v3105_v24 = vrot.slane %v13305_v17, 3  ;;  %v272_v40 = vld [vmem:[%s12923_s12 + $0xf0] sm:$0xff] }
 0x10c   : > { %v4017_v56 = vor.u32 %v15219_v49, %v13426_v59  ;;  %v4031_v57 = vshrl.u32 %v13502_v42, 16  ;;  %v782_v21 = vrot.slane %v780_v19, 6  ;;  %v785_v39 = vrot.slane %v783_v22, 7  ;;  %v276_v51 = vld [vmem:[%s12923_s12 + $0x110] sm:$0xff] }
 0x10d   : > { %11275 = vmatpush3.bf16.msra.mxu1 %v12335_v61  ;;  %11239 = vmatpush3.bf16.msra.mxu0 %v12330_v11  ;;  %v790_v10 = vshrl.u32 %v10383_v47, 16  ;;  %v4035_v27 = vshll.u32 %v13509_v43, 16  ;;  %v767_v13 = vsel %vm12960_vm7, %v758_v36, %v766_v60  ;;  %v768_v38 = vrot.slane %v766_v60, 4  ;;  %v12343_v11 = vld [vmem:[#allocation8 + $0x70] sm:$0xff]   ;;  %v12336_v36 = vld [vmem:[#allocation8 + $0x220] sm:$0xff]  }
 0x10e   : > { %11276 = vmatprep.subr.bf16.mxu1 %v12337_v18  ;;  %11240 = vmatprep.subr.bf16.mxu0 %v13491_v14  ;;  %v778_v61 = vrot.slane %v776_v29, 4  ;;  %v13531_v5 = vsel %vm1209_vm8, %v4009_v0, %v13426_v59  ;;  %v13535_v2 = vsel %vm1209_vm8, %v4017_v56, %v13480_v53  ;;  %1090 = vst [vmem:[#allocation2 + $0x70] sm:$0xf] %v767_v13  ;;  %v793_v59 = vshll.u32 %v10383_v47, 16 }
 0x10f   : > { %v786_v34 = vor.u32 %v785_v39, %v782_v21  ;;  %v792_v52 = vrot.slane %v790_v10, 6  ;;  %v13540_v26 = vor.u32 %v4023_v7, %v13480_v53  ;;  %v323_v28 = vmax.f32 %v272_v40, 0.0  ;;  %v12338_v7 = vld [vmem:[#allocation8 + $0x228] sm:$0xff]   ;;  %v12345_v40 = vld [vmem:[#allocation8 + $0x78] sm:$0xff]  }
 0x110   : > { %11101 = vmatmul.mubr.bf16.gmra.mrb[8].mxu1 %v13269_v35  ;;  %11225 = vmatmul.mubr.bf16.gmra.mrb[4].mxu0 %v13374_v15  ;;  %v777_v35 = vsel %vm12960_vm7, %v768_v38, %v776_v29  ;;  %v4039_v25 = vshrl.u32 %v13509_v43, 16  ;;  %v795_v47 = vrot.slane %v793_v59, 7  ;;  %v325_v41 = vmax.f32 %v274_v8, 0.0  ;;  %v277_v38 = vld [vmem:[%s12923_s12 + $0x118] sm:$0xff] }
 0x111   : > { %11277 = vmatpush3.bf16.msra.mxu1 %v12337_v18  ;;  %11241 = vmatpush3.bf16.msra.mxu0 %v13491_v14  ;;  %v13546_v44 = vld [vmem:[#allocation2 + $0x68] sm:$0xff]   ;;  %1091 = vst [vmem:[#allocation2 + $0x74] sm:$0xf] %v777_v35  ;;  %v787_v15 = vsel %vm12960_vm7, %v778_v61, %v786_v34  ;;  %v788_v53 = vrot.slane %v786_v34, 4  ;;  %v324_v18 = vmax.f32 %v273_v33, 0.0  ;;  %v10384_v0 = vpack.c.bf16 %v323_v28, %v323_v28 }
 0x112   : > { %11228 = vmatprep.mubr.bf16.mxu0 %v13392_v1  ;;  %11242 = vmatprep.subr.bf16.mxu0 %v13516_v50  ;;  %1092 = vst [vmem:[#allocation2 + $0x78] sm:$0xf] %v787_v15  ;;  %v326_v14 = vmax.f32 %v275_v4, 0.0  ;;  %v13554_v1 = vrot.slane %v4027_v46, 1  ;;  %v13556_v37 = vrot.slane %v4035_v27, 1  ;;  %v4043_v49 = vshll.u32 %v13546_v44, 16 }
 0x113   : > { %11278 = vmatprep.subr.bf16.mxu1 %v12339_v62  ;;  %11104 = vmatprep.mubr.bf16.mxu1 %v13302_v63  ;;  %v10385_v56 = vpack.c.bf16 %v324_v18, %v324_v18  ;;  %v796_v19 = vor.u32 %v795_v47, %v792_v52  ;;  %v800_v22 = vshrl.u32 %v10384_v0, 16  ;;  %v803_v60 = vshll.u32 %v10384_v0, 16  ;;  %v12350_v61 = vld [vmem:[#allocation8] sm:$0xff]   ;;  %v12342_v52 = vld [vmem:[#allocation8 + $0x230] sm:$0xff]  }
 0x114   : > { %v10386_v29 = vpack.c.bf16 %v325_v41, %v325_v41  ;;  %v10387_v21 = vpack.c.bf16 %v326_v14, %v326_v14  ;;  %v327_v39 = vmax.f32 %v276_v51, 0.0  ;;  %v13564_v33 = vrot.slane %v4043_v49, 1  ;;  %v278_v14 = vld [vmem:[%s12923_s12 + $0x120] sm:$0xff] }
 0x115   : > { %11279 = vmatpush3.bf16.msra.mxu1 %v12339_v62  ;;  %11243 = vmatpush3.bf16.msra.mxu0 %v13516_v50  ;;  %v810_v63 = vshrl.u32 %v10385_v56, 16  ;;  %v813_v46 = vshll.u32 %v10385_v56, 16  ;;  %v797_v10 = vsel %vm12960_vm7, %v788_v53, %v796_v19  ;;  %v798_v27 = vrot.slane %v796_v19, 4 }
 0x116   : > { %11280 = vmatprep.subr.bf16.mxu1 %v12343_v11  ;;  %11244 = vmatprep.subr.bf16.mxu0 %v12336_v36  ;;  %v802_v13 = vrot.slane %v800_v22, 6  ;;  %v805_v62 = vrot.slane %v803_v60, 7  ;;  %v4047_v50 = vshrl.u32 %v13546_v44, 16  ;;  %1093 = vst [vmem:[#allocation2 + $0x7c] sm:$0xf] %v797_v10  ;;  %v820_v59 = vshrl.u32 %v10386_v29, 16 }
 0x117   : > { %v812_v8 = vrot.slane %v810_v63, 6  ;;  %v815_v34 = vrot.slane %v813_v46, 7  ;;  %v823_v28 = vshll.u32 %v10386_v29, 16  ;;  %v830_v15 = vshrl.u32 %v10387_v21, 16  ;;  %v12344_v29 = vld [vmem:[#allocation8 + $0x238] sm:$0xff]  }
 0x118   : > { %11105 = vmatmul.mubr.bf16.gmra.mrb[12].mxu1 %v13424_v3  ;;  %11229 = vmatmul.mubr.bf16.gmra.mrb[8].mxu0 %v13409_v9  ;;  %v13568_v4 = vld [vmem:[#allocation2 + $0x70] sm:$0xff]   ;;  %v806_v35 = vor.u32 %v805_v62, %v802_v13  ;;  %v833_v53 = vshll.u32 %v10387_v21, 16  ;;  %v328_v18 = vmax.f32 %v277_v38, 0.0  ;;  %v10388_v47 = vpack.c.bf16 %v327_v39, %v327_v39 }
 0x119   : > { %11281 = vmatpush3.bf16.msra.mxu1 %v12343_v11  ;;  %11245 = vmatpush3.bf16.msra.mxu0 %v12336_v36  ;;  %v816_v3 = vor.u32 %v815_v34, %v812_v8  ;;  %v4051_v9 = vshll.u32 %v13568_v4, 16  ;;  %v4055_v11 = vshrl.u32 %v13568_v4, 16  ;;  %v825_v51 = vrot.slane %v823_v28, 7  ;;  %v12352_v21 = vld [vmem:[#allocation8 + $0x8] sm:$0xff]   ;;  %v279_v39 = vld [vmem:[%s12923_s12 + $0x128] sm:$0xff] }
 0x11a   : > { %11232 = vmatprep.mubr.bf16.mxu0 %v13434_v6  ;;  %11246 = vmatprep.subr.bf16.mxu0 %v12338_v7  ;;  %v807_v0 = vsel %vm12960_vm7, %v798_v27, %v806_v35  ;;  %v808_v41 = vrot.slane %v806_v35, 4  ;;  %v822_v6 = vrot.slane %v820_v59, 6  ;;  %v832_v49 = vrot.slane %v830_v15, 6  ;;  %v12351_v59 = vld [vmem:[#allocation8 + $0x40] sm:$0xff]  }
 0x11b   : > { %11282 = vmatprep.subr.bf16.mxu1 %v12345_v40  ;;  %11284 = vmatprep.mubr.bf16.mxu1 %v13531_v5  ;;  %1094 = vst [vmem:[#allocation2 + $0x80] sm:$0xf] %v807_v0  ;;  %v818_v36 = vrot.slane %v816_v3, 4  ;;  %v13577_v56 = vrot.slane %v4051_v9, 1  ;;  %v835_v22 = vrot.slane %v833_v53, 7  ;;  %v10389_v60 = vpack.c.bf16 %v328_v18, %v328_v18 }
 0x11c   : > { %v817_v19 = vsel %vm12960_vm7, %v808_v41, %v816_v3  ;;  %v826_v63 = vor.u32 %v825_v51, %v822_v6  ;;  %v840_v5 = vshrl.u32 %v10388_v47, 16  ;;  %v843_v46 = vshll.u32 %v10388_v47, 16  ;;  %v12353_v6 = vld [vmem:[#allocation8 + $0x48] sm:$0xff]   ;;  %v12358_v51 = vld [vmem:[#allocation8 + $0x18] sm:$0xff]  }
 0x11d   : > { %11283 = vmatpush3.bf16.msra.mxu1 %v12345_v40  ;;  %11247 = vmatpush3.bf16.msra.mxu0 %v12338_v7  ;;  %1095 = vst [vmem:[#allocation2 + $0x84] sm:$0xf] %v817_v19  ;;  %v329_v10 = vmax.f32 %v278_v14, 0.0  ;;  %v4030_v40 = vsel %vm1209_vm8, %v13540_v26, %v13554_v1  ;;  %v4033_v27 = vor.u32 %v4031_v57, %v13554_v1  ;;  %v13588_v13 = vld [vmem:[#allocation2 + $0x78] sm:$0xff]   ;;  %v850_v62 = vshrl.u32 %v10389_v60, 16 }
 0x11e   : > { %11300 = vmatprep.subr.bf16.mxu1 %v12350_v61  ;;  %11248 = vmatprep.subr.bf16.mxu0 %v12342_v52  ;;  %v836_v7 = vor.u32 %v835_v22, %v832_v49  ;;  %v827_v38 = vsel %vm12960_vm7, %v818_v36, %v826_v63  ;;  %v828_v8 = vrot.slane %v826_v63, 4  ;;  %v842_v34 = vrot.slane %v840_v5, 6  ;;  %v12356_v26 = vld [vmem:[#allocation8 + $0x10] sm:$0xff]   ;;  %v280_v36 = vld [vmem:[%s12923_s12 + $0x130] sm:$0xff] }
 0x11f   : > { %v845_v35 = vrot.slane %v843_v46, 7  ;;  %v4059_v28 = vshll.u32 %v13588_v13, 16  ;;  %v4063_v57 = vshrl.u32 %v13588_v13, 16  ;;  %1096 = vst [vmem:[#allocation2 + $0x88] sm:$0xf] %v827_v38  ;;  %v852_v15 = vrot.slane %v850_v62, 6 }
 0x120   : > { %11285 = vmatmul.mubr.bf16.vlgmr.msra.gmra.mrb[16].mxu1 %v13535_v2  ;;  %11233 = vmatmul.mubr.bf16.gmra.mrb[12].mxu0 %v13500_v20  ;;  %v838_v1 = vrot.slane %v836_v7, 4  ;;  %v837_v2 = vsel %vm12960_vm7, %v828_v8, %v836_v7  ;;  %v853_v53 = vshll.u32 %v10389_v60, 16  ;;  %v330_v20 = vmax.f32 %v279_v39, 0.0  ;;  %v281_v39 = vld [vmem:[%s12923_s12 + $0x138] sm:$0xff]  ;;  %v282_v62 = vld [vmem:[%s12923_s12 + $0x140] sm:$0xff]  ;;  %v283_v38 = vld [vmem:[%s12923_s12 + $0x148] sm:$0xff] }
 0x121   : > { %11301 = vmatpush3.bf16.msra.mxu1 %v12350_v61  ;;  %11249 = vmatpush3.bf16.msra.mxu0 %v12342_v52  ;;  %v846_v3 = vor.u32 %v845_v35, %v842_v34  ;;  %v4041_v61 = vor.u32 %v4039_v25, %v13556_v37  ;;  %v4061_v18 = vrot.slane %v4059_v28, 1  ;;  %1097 = vst [vmem:[#allocation2 + $0x8c] sm:$0xf] %v837_v2 }
 0x122   : > { %11252 = vmatprep.mubr.bf16.mxu0 %v13380_v32  ;;  %11250 = vmatprep.subr.bf16.mxu0 %v12344_v29  ;;  %v13602_v47 = vld [vmem:[#allocation2 + $0x80] ss:$0 sps:$4 sm:$0x11]   ;;  %v10390_v52 = vpack.c.bf16 %v329_v10, %v329_v10  ;;  %v855_v41 = vrot.slane %v853_v53, 7  ;;  %v10391_v14 = vpack.c.bf16 %v330_v20, %v330_v20  ;;  %v4038_v25 = vsel %vm1209_vm8, %v4033_v27, %v13556_v37 }
 0x123   : > { %11302 = vmatprep.subr.bf16.mxu1 %v12352_v21  ;;  %11288 = vmatprep.mubr.bf16.mxu1 %v4030_v40  ;;  %v6670_v32 = vld [vmem:[#allocation2 + $0x80] sm:$0xf]  ;;  %v847_v9 = vsel %vm12960_vm7, %v838_v1, %v846_v3  ;;  %v848_v0 = vrot.slane %v846_v3, 4  ;;  %v4067_v49 = vshll.u32 %v13602_v47, 16  ;;  %v331_v10 = vmax.f32 %v280_v36, 0.0 }
 0x124   : > { %v13610_v19 = vld [vmem:[#allocation2 + $0x84] sm:$0xf]  ;;  %1098 = vst [vmem:[#allocation2 + $0x90] sm:$0xf] %v847_v9  ;;  %v860_v22 = vshrl.u32 %v10390_v52, 16  ;;  %v856_v60 = vor.u32 %v855_v41, %v852_v15  ;;  %v863_v63 = vshll.u32 %v10390_v52, 16  ;;  %v4049_v40 = vor.u32 %v4047_v50, %v13564_v33 }
 0x125   : > { %11303 = vmatpush3.bf16.msra.mxu1 %v12352_v21  ;;  %11251 = vmatpush3.bf16.msra.mxu0 %v12344_v29  ;;  %v870_v5 = vshrl.u32 %v10391_v14, 16  ;;  %v4046_v21 = vsel %vm1209_vm8, %v4041_v61, %v13564_v33  ;;  %v873_v37 = vshll.u32 %v10391_v14, 16  ;;  %v4057_v29 = vor.u32 %v4055_v11, %v13577_v56  ;;  %v12357_v50 = vld [vmem:[#allocation8 + $0x50] sm:$0xff]   ;;  %v12362_v11 = vld [vmem:[#allocation8 + $0x20] sm:$0xff]   ;;  %v13636_v61 = vld [vmem:[#allocation8 + $0x58] sm:$0xff]  }
 0x126   : > { %11304 = vmatprep.subr.bf16.mxu1 %v12356_v26  ;;  %11556 = vmatprep.subr.bf16.mxu0 %v12351_v59  ;;  %v862_v46 = vrot.slane %v860_v22, 6  ;;  %v13622_v27 = vcombine.low %v6670_v32, %v13610_v19  ;;  %v857_v7 = vsel %vm12960_vm7, %v848_v0, %v856_v60  ;;  %v858_v8 = vrot.slane %v856_v60, 4  ;;  %v284_v41 = vld [vmem:[%s12923_s12 + $0x150] sm:$0xff] }
 0x127   : > { %1099 = vst [vmem:[#allocation2 + $0x94] sm:$0xf] %v857_v7  ;;  %v865_v34 = vrot.slane %v863_v63, 7  ;;  %v872_v35 = vrot.slane %v870_v5, 6  ;;  %v875_v33 = vrot.slane %v873_v37, 7  ;;  %v4065_v28 = vor.u32 %v4063_v57, %v4061_v18 }
 0x128   : > { %11289 = vmatmul.mubr.bf16.gmra.mrb[20].mxu1 %v4038_v25  ;;  %11253 = vmatmul.mubr.bf16.vlgmr.msra.gmra.mrb[0].mxu0 %v13384_v16  ;;  %v4069_v1 = vrot.slane %v4067_v49, 1  ;;  %v332_v15 = vmax.f32 %v281_v39, 0.0  ;;  %v10392_v2 = vpack.c.bf16 %v331_v10, %v331_v10  ;;  %v334_v53 = vmax.f32 %v283_v38, 0.0 }
 0x129   : > { %11305 = vmatpush3.bf16.msra.mxu1 %v12356_v26  ;;  %11557 = vmatpush3.bf16.msra.mxu0 %v12351_v59  ;;  %v866_v3 = vor.u32 %v865_v34, %v862_v46  ;;  %v13630_v16 = vor.u32 %v875_v33, %v872_v35  ;;  %v333_v26 = vmax.f32 %v282_v62, 0.0  ;;  %v4054_v59 = vsel %vm1209_vm8, %v4049_v40, %v13577_v56  ;;  %v285_v34 = vld [vmem:[%s12923_s12 + $0x158] sm:$0xff] }
 0x12a   : > { %11256 = vmatprep.mubr.bf16.mxu0 %v13429_v30  ;;  %11558 = vmatprep.subr.bf16.mxu0 %v12353_v6  ;;  %v4062_v30 = vsel %vm1209_vm8, %v4057_v29, %v4061_v18  ;;  %v6763_v20 = vshrl.u32 %v13622_v27, 16  ;;  %v10393_v57 = vpack.c.bf16 %v332_v15, %v332_v15  ;;  %v6765_v52 = vshll.u32 %v13622_v27, 16  ;;  %v13645_v18 = vld [vmem:[#allocation2 + $0x88] sm:$0xff]   ;;  %v287_v15 = vld [vmem:[%s12923_s12 + $0x168] sm:$0xff] }
 0x12b   : > { %11306 = vmatprep.subr.bf16.mxu1 %v12358_v51  ;;  %11292 = vmatprep.mubr.bf16.mxu1 %v4046_v21  ;;  %v867_v32 = vsel %vm12960_vm7, %v858_v8, %v866_v3  ;;  %v868_v9 = vrot.slane %v866_v3, 4  ;;  %v880_v0 = vshrl.u32 %v10392_v2, 16  ;;  %v13643_v56 = vsel %vm1209_vm8, %v4065_v28, %v4069_v1  ;;  %v12363_v35 = vld [vmem:[#allocation8 + $0x60] sm:$0xff]   ;;  %v286_v1 = vld [vmem:[%s12923_s12 + $0x160] sm:$0xff] }
 0x12c   : > { %1100 = vst [vmem:[#allocation2 + $0x98] sm:$0xf] %v867_v32  ;;  %v883_v14 = vshll.u32 %v10392_v2, 16  ;;  %v890_v36 = vshrl.u32 %v10393_v57, 16  ;;  %v893_v25 = vshll.u32 %v10393_v57, 16  ;;  %v10394_v60 = vpack.c.bf16 %v333_v26, %v333_v26  ;;  %v12365_v26 = vld [vmem:[#allocation8 + $0x68] sm:$0xff]  }
 0x12d   : > { %11307 = vmatpush3.bf16.msra.mxu1 %v12358_v51  ;;  %11559 = vmatpush3.bf16.msra.mxu0 %v12353_v6  ;;  %v12364_v51 = vld [vmem:[#allocation8 + $0x28] sm:$0xff]   ;;  %v877_v49 = vsel %vm12960_vm7, %v868_v9, %v13630_v16  ;;  %v882_v22 = vrot.slane %v880_v0, 6  ;;  %v10395_v63 = vpack.c.bf16 %v334_v53, %v334_v53  ;;  %v12368_v6 = vld [vmem:[#allocation8 + $0x30] sm:$0xff]   ;;  %v878_v5 = vrot.slane %v13630_v16, 4  ;;  %v12370_v53 = vld [vmem:[#allocation8 + $0x38] sm:$0xff]  }
 0x12e   : > { %11308 = vmatprep.subr.bf16.mxu1 %v12362_v11  ;;  %11560 = vmatprep.subr.bf16.mxu0 %v12357_v50  ;;  %1101 = vst [vmem:[#allocation2 + $0x9c] sm:$0xf] %v877_v49  ;;  %v885_v21 = vrot.slane %v883_v14, 7  ;;  %v892_v46 = vrot.slane %v890_v36, 6  ;;  %v335_v37 = vmax.f32 %v284_v41, 0.0  ;;  %v895_v39 = vrot.slane %v893_v25, 7 }
 0x12f   : > { %v900_v10 = vshrl.u32 %v10394_v60, 16  ;;  %v903_v40 = vshll.u32 %v10394_v60, 16  ;;  %v910_v29 = vshrl.u32 %v10395_v63, 16  ;;  %v6767_v7 = vrot.slane %v6765_v52, 1  ;;  %v12374_v49 = vld [vmem:[#allocation8 + $0x80] sm:$0xff]  }
 0x130   : > { %11293 = vmatmul.mubr.bf16.gmra.mrb[24].mxu1 %v4054_v59  ;;  %11257 = vmatmul.mubr.bf16.gmra.mrb[4].mxu0 %v13437_v31  ;;  %v6770_v62 = vshll.u32 %v13645_v18, 16  ;;  %v886_v38 = vor.u32 %v885_v21, %v882_v22  ;;  %v913_v8 = vshll.u32 %v10395_v63, 16  ;;  %v896_v31 = vor.u32 %v895_v39, %v892_v46  ;;  %v288_v39 = vld [vmem:[%s12923_s12 + $0x170] sm:$0xff] }
 0x131   : > { %11309 = vmatpush3.bf16.msra.mxu1 %v12362_v11  ;;  %11561 = vmatpush3.bf16.msra.mxu0 %v12357_v50  ;;  %v902_v33 = vrot.slane %v900_v10, 6  ;;  %v905_v11 = vrot.slane %v903_v40, 7  ;;  %v912_v28 = vrot.slane %v910_v29, 6  ;;  %v6774_v50 = vshrl.u32 %v13645_v18, 16 }
 0x132   : > { %11260 = vmatprep.mubr.bf16.mxu0 %v13450_v45  ;;  %11562 = vmatprep.subr.bf16.mxu0 %v13636_v61  ;;  %v13659_v45 = vld [vmem:[#allocation2 + $0x90] sm:$0xff]   ;;  %v887_v2 = vsel %vm12960_vm7, %v878_v5, %v886_v38  ;;  %v888_v3 = vrot.slane %v886_v38, 4  ;;  %v915_v16 = vrot.slane %v913_v8, 7  ;;  %v898_v59 = vrot.slane %v896_v31, 4 }
 0x133   : > { %11310 = vmatprep.subr.bf16.mxu1 %v12364_v51  ;;  %11296 = vmatprep.mubr.bf16.mxu1 %v4062_v30  ;;  %1102 = vst [vmem:[#allocation2 + $0xa0] sm:$0xf] %v887_v2  ;;  %v906_v57 = vor.u32 %v905_v11, %v902_v33  ;;  %v336_v52 = vmax.f32 %v285_v34, 0.0  ;;  %v10396_v32 = vpack.c.bf16 %v335_v37, %v335_v37  ;;  %v6772_v9 = vrot.slane %v6770_v62, 1 }
 0x134   : > { %v6768_v30 = vor.u32 %v6767_v7, %v6763_v20  ;;  %v897_v0 = vsel %vm12960_vm7, %v888_v3, %v896_v31  ;;  %v337_v41 = vmax.f32 %v286_v1, 0.0  ;;  %v338_v60 = vmax.f32 %v287_v15, 0.0  ;;  %v12377_v1 = vld [vmem:[#allocation8 + $0x88] sm:$0xff]  }
 0x135   : > { %11311 = vmatpush3.bf16.msra.mxu1 %v12364_v51  ;;  %11563 = vmatpush3.bf16.msra.mxu0 %v13636_v61  ;;  %v13668_v14 = vld [vmem:[#allocation2 + $0x98] sm:$0xff]   ;;  %1103 = vst [vmem:[#allocation2 + $0xa4] sm:$0xf] %v897_v0  ;;  %v907_v36 = vsel %vm12960_vm7, %v898_v59, %v906_v57  ;;  %v908_v25 = vrot.slane %v906_v57, 4  ;;  %v916_v51 = vor.u32 %v915_v16, %v912_v28  ;;  %v920_v20 = vshrl.u32 %v10396_v32, 16 }
 0x136   : > { %11312 = vmatprep.subr.bf16.mxu1 %v12368_v6  ;;  %11564 = vmatprep.subr.bf16.mxu0 %v12363_v35  ;;  %v10397_v61 = vpack.c.bf16 %v336_v52, %v336_v52  ;;  %1104 = vst [vmem:[#allocation2 + $0xa8] sm:$0xf] %v907_v36  ;;  %v923_v22 = vshll.u32 %v10396_v32, 16  ;;  %v10398_v63 = vpack.c.bf16 %v337_v41, %v337_v41  ;;  %v6778_v5 = vshll.u32 %v13659_v45, 16  ;;  %v12371_v28 = vld [vmem:[#allocation8 + $0x78] sm:$0xff]   ;;  %v12380_v41 = vld [vmem:[#allocation8 + $0x90] sm:$0xff]  }
 0x137   : > { %v6782_v21 = vshrl.u32 %v13659_v45, 16  ;;  %v917_v46 = vsel %vm12960_vm7, %v908_v25, %v916_v51  ;;  %v918_v37 = vrot.slane %v916_v51, 4  ;;  %v10399_v7 = vpack.c.bf16 %v338_v60, %v338_v60  ;;  %v12376_v25 = vld [vmem:[#allocation8] sm:$0xff]   ;;  %v13706_v60 = vld [vmem:[#allocation2 + $0x50] sm:$0xff]  }
 0x138   : > { %11297 = vmatmul.mubr.bf16.gmra.mrb[28].mxu1 %v13643_v56  ;;  %11261 = vmatmul.mubr.bf16.gmra.mrb[8].mxu0 %v13474_v12  ;;  %1105 = vst [vmem:[#allocation2 + $0xac] sm:$0xf] %v917_v46  ;;  %v922_v56 = vrot.slane %v920_v20, 6  ;;  %v925_v10 = vrot.slane %v923_v22, 7  ;;  %v930_v40 = vshrl.u32 %v10397_v61, 16  ;;  %v933_v29 = vshll.u32 %v10397_v61, 16 }
 0x139   : > { %11313 = vmatpush3.bf16.msra.mxu1 %v12368_v6  ;;  %11565 = vmatpush3.bf16.msra.mxu0 %v12363_v35  ;;  %v12369_v12 = vld [vmem:[#allocation8 + $0x70] sm:$0xff]   ;;  %v6786_v6 = vshll.u32 %v13668_v14, 16  ;;  %v940_v62 = vshrl.u32 %v10398_v63, 16  ;;  %v943_v38 = vshll.u32 %v10398_v63, 16  ;;  %v339_v31 = vmax.f32 %v288_v39, 0.0 }
 0x13a   : > { %11264 = vmatprep.mubr.bf16.mxu0 %v13485_v23  ;;  %11566 = vmatprep.subr.bf16.mxu0 %v12365_v26  ;;  %v926_v8 = vor.u32 %v925_v10, %v922_v56  ;;  %v932_v34 = vrot.slane %v930_v40, 6  ;;  %v935_v35 = vrot.slane %v933_v29, 7  ;;  %v3106_v23 = vsel %vm15195_vm13, %v3103_v48, %v3105_v24  ;;  %v12383_v10 = vld [vmem:[#allocation8 + $0x98] sm:$0xff]  }
 0x13b   : > { %11314 = vmatprep.subr.bf16.mxu1 %v12370_v53  ;;  %11316 = vmatprep.mubr.bf16.mxu1 %v13353_v55  ;;  %v942_v33 = vrot.slane %v940_v62, 6  ;;  %v945_v11 = vrot.slane %v943_v38, 7  ;;  %v950_v3 = vshrl.u32 %v10399_v7, 16  ;;  %v6773_v17 = vsel %vm1209_vm8, %v6768_v30, %v6772_v9 }
 0x13c   : > { %v927_v55 = vsel %vm12960_vm7, %v918_v37, %v926_v8  ;;  %v928_v15 = vrot.slane %v926_v8, 4  ;;  %v936_v2 = vor.u32 %v935_v35, %v932_v34  ;;  %v13690_v16 = vld [vmem:[#allocation2 + $0xa0] sm:$0xff]   ;;  %v953_v48 = vshll.u32 %v10399_v7, 16  ;;  %v12378_v37 = vld [vmem:[#allocation8 + $0x8] sm:$0xff]  }
 0x13d   : > { %11315 = vmatpush3.bf16.msra.mxu1 %v12370_v53  ;;  %11567 = vmatpush3.bf16.msra.mxu0 %v12365_v26  ;;  %1106 = vst [vmem:[#allocation2 + $0xb0] sm:$0xf] %v927_v55  ;;  %v946_v58 = vor.u32 %v945_v11, %v942_v33  ;;  %v10400_v24 = vpack.c.bf16 %v339_v31, %v339_v31  ;;  %v13694_v53 = vld [vmem:[#allocation2 + $0x48] sm:$0xff]   ;;  %v6780_v52 = vrot.slane %v6778_v5, 1  ;;  %v952_v30 = vrot.slane %v950_v3, 6  ;;  %v12382_v31 = vld [vmem:[#allocation8 + $0x10] sm:$0xff]  }
 0x13e   : > { %11332 = vmatprep.subr.bf16.mxu1 %v12374_v49  ;;  %11568 = vmatprep.subr.bf16.mxu0 %v12369_v12  ;;  %v6776_v26 = vor.u32 %v6774_v50, %v6772_v9  ;;  %v937_v59 = vsel %vm12960_vm7, %v928_v15, %v936_v2  ;;  %v938_v57 = vrot.slane %v936_v2, 4  ;;  %v955_v0 = vrot.slane %v953_v48, 7  ;;  %v12386_v2 = vld [vmem:[#allocation8 + $0xa0] sm:$0xff]  }
 0x13f   : > { %1107 = vst [vmem:[#allocation2 + $0xb4] sm:$0xf] %v937_v59  ;;  %v948_v32 = vrot.slane %v946_v58, 4  ;;  %v960_v9 = vshrl.u32 %v10400_v24, 16  ;;  %v963_v36 = vshll.u32 %v10400_v24, 16  ;;  %v6784_v51 = vor.u32 %v6782_v21, %v6780_v52  ;;  %v13704_v20 = vld [vmem:[#allocation2 + $0xa8] sm:$0xff]  }
 0x140   : > { %11317 = vmatmul.mubr.bf16.vlgmr.msra.gmra.mrb[16].mxu1 %v13694_v53  ;;  %11265 = vmatmul.mubr.bf16.gmra.mrb[12].mxu0 %v3106_v23  ;;  %v947_v50 = vsel %vm12960_vm7, %v938_v57, %v946_v58  ;;  %v6788_v61 = vrot.slane %v6786_v6, 1  ;;  %v956_v22 = vor.u32 %v955_v0, %v952_v30  ;;  %v6781_v46 = vsel %vm1209_vm8, %v6776_v26, %v6780_v52  ;;  %v4377_v23 = vld [vmem:[#allocation2 + $0x40] sm:$0xe]  ;;  %v12553_v0 = vld [vmem:[#allocation2 + $0x44] sm:$0xf] }
 0x141   : > { %11333 = vmatpush3.bf16.msra.mxu1 %v12374_v49  ;;  %11569 = vmatpush3.bf16.msra.mxu0 %v12369_v12  ;;  %v6794_v49 = vshll.u32 %v13690_v16, 16  ;;  %1108 = vst [vmem:[#allocation2 + $0xb8] sm:$0xf] %v947_v50  ;;  %v962_v63 = vrot.slane %v960_v9, 6  ;;  %v965_v5 = vrot.slane %v963_v36, 7  ;;  %v6790_v39 = vshrl.u32 %v13668_v14, 16 }
 0x142   : > { %11572 = vmatprep.mubr.bf16.mxu0 %v6773_v17  ;;  %11570 = vmatprep.subr.bf16.mxu0 %v12371_v28  ;;  %v957_v21 = vsel %vm12960_vm7, %v948_v32, %v956_v22  ;;  %v958_v56 = vrot.slane %v956_v22, 4  ;;  %v6798_v40 = vshrl.u32 %v13690_v16, 16  ;;  %v4402_v12 = vrot.slane %v13502_v42, 1  ;;  %v12389_v50 = vld [vmem:[#allocation8 + $0xa8] sm:$0xff]  }
 0x143   : > { %11334 = vmatprep.subr.bf16.mxu1 %v12377_v1  ;;  %11320 = vmatprep.mubr.bf16.mxu1 %v13706_v60  ;;  %1109 = vst [vmem:[#allocation2 + $0xbc] sm:$0xf] %v957_v21  ;;  %v13714_v29 = vor.u32 %v965_v5, %v962_v63  ;;  %v4404_v6 = vrot.slane %v13509_v43, 1  ;;  %v6789_v7 = vsel %vm1209_vm8, %v6784_v51, %v6788_v61  ;;  %v6802_v62 = vshll.u32 %v13704_v20, 16  ;;  %v12392_v63 = vld [vmem:[#allocation8 + $0xb0] sm:$0xff]  }
 0x144   : > { %v4406_v38 = vrot.slane %v13546_v44, 1  ;;  %v6796_v8 = vrot.slane %v6794_v49, 1  ;;  %v6792_v55 = vor.u32 %v6790_v39, %v6788_v61  ;;  %v6806_v3 = vshrl.u32 %v13704_v20, 16  ;;  %v12388_v49 = vld [vmem:[#allocation8 + $0x20] sm:$0xff]   ;;  %v7136_v5 = vld [vmem:[#allocation2 + $0x80] sm:$0xe] }
 0x145   : > { %11335 = vmatpush3.bf16.msra.mxu1 %v12377_v1  ;;  %11571 = vmatpush3.bf16.msra.mxu0 %v12371_v28  ;;  %v967_v35 = vsel %vm12960_vm7, %v958_v56, %v13714_v29  ;;  %v13730_v33 = vsel %vm1605_vm11, %v4402_v12, %v4404_v6  ;;  %v4408_v28 = vrot.slane %v13568_v4, 1  ;;  %v4410_v1 = vrot.slane %v13588_v13, 1 }
 0x146   : > { %11336 = vmatprep.subr.bf16.mxu1 %v12380_v41  ;;  %11588 = vmatprep.subr.bf16.mxu0 %v12376_v25  ;;  %v13722_v34 = vld [vmem:[#allocation2 + $0xb0] sm:$0xff]   ;;  %1110 = vst [vmem:[#allocation2 + $0xc0] sm:$0xf] %v967_v35  ;;  %v13733_v11 = vsel %vm1605_vm11, %v4404_v6, %v4406_v38  ;;  %v6800_v15 = vor.u32 %v6798_v40, %v6796_v8  ;;  %v6804_v17 = vrot.slane %v6802_v62, 1  ;;  %v4412_v24 = vrot.slane %v13602_v47, 1 }
 0x147   : > { %v13739_v58 = vsel %vm1605_vm11, %v4406_v38, %v4408_v28  ;;  %v13742_v48 = vsel %vm1605_vm11, %v4408_v28, %v4410_v1  ;;  %v6810_v26 = vshll.u32 %v13722_v34, 16  ;;  %v7157_v59 = vrot.slane %v13645_v18, 1  ;;  %v12395_v38 = vld [vmem:[#allocation8 + $0xb8] sm:$0xff]  }
 0x148   : > { %11321 = vmatmul.mubr.bf16.gmra.mrb[20].mxu1 %v13502_v42  ;;  %11573 = vmatmul.mubr.bf16.vlgmr.msra.gmra.mrb[16].mxu0 %v6781_v46  ;;  %v13751_v52 = vsel %vm1605_vm11, %v4410_v1, %v4412_v24  ;;  %v7159_v32 = vrot.slane %v13659_v45, 1  ;;  %v6797_v30 = vsel %vm1209_vm8, %v6792_v55, %v6796_v8  ;;  %v9878_v47 = vcombine.low %v4377_v23, %v12553_v0  ;;  %v12398_v1 = vld [vmem:[#allocation8 + $0xc0] sm:$0xff]  }
 0x149   : > { %11337 = vmatpush3.bf16.msra.mxu1 %v12380_v41  ;;  %11589 = vmatpush3.bf16.msra.mxu0 %v12376_v25  ;;  %v6805_v41 = vsel %vm1209_vm8, %v6800_v15, %v6804_v17  ;;  %v6814_v9 = vshrl.u32 %v13722_v34, 16  ;;  %v6812_v61 = vrot.slane %v6810_v26, 1  ;;  %v6808_v22 = vor.u32 %v6806_v3, %v6804_v17  ;;  %v12396_v26 = vld [vmem:[#allocation8 + $0x38] sm:$0xff]   ;;  %v12406_v42 = vld [vmem:[#allocation8 + $0xe0] sm:$0xff]  }
 0x14a   : > { %11576 = vmatprep.mubr.bf16.mxu0 %v6789_v7  ;;  %11590 = vmatprep.subr.bf16.mxu0 %v12378_v37  ;;  %v13748_v57 = vld [vmem:[#allocation2 + $0xb8] sm:$0xff]   ;;  %v13759_v25 = vsel %vm1605_vm11, %v7157_v59, %v7159_v32  ;;  %v4397_v39 = vrot.slane %v9878_v47, 1  ;;  %v10127_v21 = vcombine.low %v7136_v5, %v13610_v19  ;;  %v4398_v56 = vrot.slane %v13694_v53, 1 }
 0x14b   : > { %11338 = vmatprep.subr.bf16.mxu1 %v12383_v10  ;;  %11324 = vmatprep.mubr.bf16.mxu1 %v13509_v43  ;;  %v12384_v43 = vld [vmem:[#allocation8 + $0x18] sm:$0xff]   ;;  %v6818_v36 = vshll.u32 %v13748_v57, 16  ;;  %v6816_v46 = vor.u32 %v6814_v9, %v6812_v61  ;;  %v6813_v7 = vsel %vm1209_vm8, %v6808_v22, %v6812_v61  ;;  %v7163_v53 = vrot.slane %v13690_v16, 1  ;;  %v12401_v9 = vld [vmem:[#allocation8 + $0x88] sm:$0xff]  }
 0x14c   : > { %v7156_v6 = vrot.slane %v10127_v21, 1  ;;  %v4399_v8 = vsel %vm1605_vm11, %v4397_v39, %v4398_v56  ;;  %v4400_v35 = vrot.slane %v13706_v60, 1  ;;  %v7165_v15 = vrot.slane %v13704_v20, 1  ;;  %v13811_v61 = vld [vmem:[#allocation2 + $0x4c] sm:$0xf]  ;;  %v13819_v22 = vld [vmem:[#allocation2 + $0x58] sm:$0xff]  }
 0x14d   : > { %11339 = vmatpush3.bf16.msra.mxu1 %v12383_v10  ;;  %11591 = vmatpush3.bf16.msra.mxu0 %v12378_v37  ;;  %v13762_v51 = vld [vmem:[#allocation2 + $0xc0] ss:$0 sps:$4 sm:$0x11]   ;;  %v6820_v37 = vrot.slane %v6818_v36, 1  ;;  %v12390_v10 = vld [vmem:[#allocation8 + $0x28] sm:$0xff]   ;;  %v7169_v17 = vrot.slane %v13748_v57, 1 }
 0x14e   : > { %11340 = vmatprep.subr.bf16.mxu1 %v12386_v2  ;;  %11592 = vmatprep.subr.bf16.mxu0 %v12382_v31  ;;  %v6826_v40 = vshll.u32 %v13762_v51, 16  ;;  %v13772_v19 = vsel %vm1605_vm11, %v7156_v6, %v7157_v59  ;;  %v4401_v60 = vsel %vm1605_vm11, %v4398_v56, %v4400_v35  ;;  %v13789_v3 = vsel %vm1605_vm11, %v7163_v53, %v7165_v15  ;;  %v12404_v36 = vld [vmem:[#allocation8 + $0xd8] sm:$0xff]   ;;  %v13832_v56 = vld [vmem:[#allocation2 + $0x70] sm:$0xff]  }
 0x14f   : > { %v6821_v62 = vsel %vm1209_vm8, %v6816_v46, %v6820_v37  ;;  %v12409_v46 = vld [vmem:[#allocation8 + $0xa8] sm:$0xff]   ;;  %v4662_v39 = vrot.slane %v13819_v22, 1  ;;  %v13836_v6 = vld [vmem:[#allocation2 + $0x78] sm:$0xff]  }
 0x150   : > { %11325 = vmatmul.mubr.bf16.gmra.mrb[24].mxu1 %v13546_v44  ;;  %11577 = vmatmul.mubr.bf16.gmra.mrb[20].mxu0 %v6797_v30  ;;  %v6822_v44 = vshrl.u32 %v13748_v57, 16  ;;  %v6828_v28 = vrot.slane %v6826_v40, 1  ;;  %v12400_v30 = vld [vmem:[#allocation8 + $0xc8] sm:$0xff]  }
 0x151   : > { %11341 = vmatpush3.bf16.msra.mxu1 %v12386_v2  ;;  %11593 = vmatpush3.bf16.msra.mxu0 %v12382_v31  ;;  %v7167_v2 = vrot.slane %v13722_v34, 1 }
 0x152   : > { %11580 = vmatprep.mubr.bf16.mxu0 %v6805_v41  ;;  %11594 = vmatprep.subr.bf16.mxu0 %v12384_v43  ;;  %v6824_v23 = vor.u32 %v6822_v44, %v6820_v37  ;;  %v12402_v41 = vld [vmem:[#allocation8 + $0xd0] sm:$0xff]   ;;  %v12412_v37 = vld [vmem:[#allocation8 + $0xf8] sm:$0xff]  }
 0x153   : > { %11342 = vmatprep.subr.bf16.mxu1 %v12389_v50  ;;  %11328 = vmatprep.mubr.bf16.mxu1 %v13568_v4  ;;  %v7161_v4 = vrot.slane %v13668_v14, 1  ;;  %v13794_v59 = vsel %vm1605_vm11, %v7165_v15, %v7167_v2  ;;  %v13798_v0 = vsel %vm1605_vm11, %v7167_v2, %v7169_v17  ;;  %v12420_v15 = vld [vmem:[#allocation8 + $0x108] sm:$0xff]  }
 0x154   : > { %v6829_v24 = vsel %vm1209_vm8, %v6824_v23, %v6828_v28 }
 0x155   : > { %11343 = vmatpush3.bf16.msra.mxu1 %v12389_v50  ;;  %11595 = vmatpush3.bf16.msra.mxu0 %v12384_v43  ;;  %v13780_v31 = vsel %vm1605_vm11, %v7159_v32, %v7161_v4  ;;  %v13783_v55 = vsel %vm1605_vm11, %v7161_v4, %v7163_v53  ;;  %v7171_v32 = vrot.slane %v13762_v51, 1  ;;  %v4403_v43 = vsel %vm1605_vm11, %v4400_v35, %v4402_v12  ;;  %v12399_v50 = vld [vmem:[#allocation8 + $0x80] sm:$0xff]   ;;  %v12405_v12 = vld [vmem:[#allocation8 + $0x98] sm:$0xff]  }
 0x156   : > { %11344 = vmatprep.subr.bf16.mxu1 %v12392_v63  ;;  %11596 = vmatprep.subr.bf16.mxu0 %v12388_v49  ;;  %v4583_v51 = vld [vmem:[#allocation2 + $0x48] sm:$0xe]  ;;  %v4670_v35 = vrot.slane %v13836_v6, 1 }
 0x157   : > { %v13801_v47 = vsel %vm1605_vm11, %v7169_v17, %v7171_v32  ;;  %v7342_v4 = vld [vmem:[#allocation2 + $0x88] sm:$0xe]  ;;  %v12424_v32 = vld [vmem:[#allocation8 + $0x110] sm:$0xff]  }
 0x158   : > { %11329 = vmatmul.mubr.bf16.gmra.mrb[28].mxu1 %v13588_v13  ;;  %11581 = vmatmul.mubr.bf16.gmra.mrb[24].mxu0 %v6813_v7  ;;  %v12394_v13 = vld [vmem:[#allocation8 + $0x30] sm:$0xff]   ;;  %v13838_v7 = vld [vmem:[#allocation2 + $0x88] ss:$0 sps:$4 sm:$0x11]  }
 0x159   : > { %11345 = vmatpush3.bf16.msra.mxu1 %v12392_v63  ;;  %11597 = vmatpush3.bf16.msra.mxu0 %v12388_v49  ;;  %v13816_v49 = vld [vmem:[#allocation2 + $0x50] sm:$0xff]   ;;  %v13821_v63 = vld [vmem:[#allocation2 + $0x60] sm:$0xff]  }
 0x15a   : > { %11584 = vmatprep.mubr.bf16.mxu0 %v6821_v62  ;;  %11598 = vmatprep.subr.bf16.mxu0 %v12390_v10  ;;  %v4660_v5 = vrot.slane %v13816_v49, 1  ;;  %v4664_v21 = vrot.slane %v13821_v63, 1  ;;  %v4874_v23 = vshrl.u32 %v13816_v49, 16  ;;  %v4877_v17 = vshll.u32 %v13816_v49, 16 }
 0x15b   : > { %11346 = vmatprep.subr.bf16.mxu1 %v12395_v38  ;;  %11348 = vmatprep.mubr.bf16.mxu1 %v4399_v8  ;;  %v4668_v8 = vrot.slane %v13832_v56, 1 }
 0x15c   : > { %v4663_v53 = vsel %vm1605_vm11, %v4660_v5, %v4662_v39 }
 0x15d   : > { %11347 = vmatpush3.bf16.msra.mxu1 %v12395_v38  ;;  %11599 = vmatpush3.bf16.msra.mxu0 %v12390_v10  ;;  %v12411_v10 = vld [vmem:[#allocation8 + $0xb0] sm:$0xff]  }
 0x15e   : > { %11364 = vmatprep.subr.bf16.mxu1 %v12398_v1  ;;  %11600 = vmatprep.subr.bf16.mxu0 %v12394_v13 }
 0x160   : > { %11349 = vmatmul.mubr.bf16.vlgmr.msra.gmra.mrb[16].mxu1 %v4401_v60  ;;  %11585 = vmatmul.mubr.bf16.gmra.mrb[28].mxu0 %v6829_v24  ;;  %v4674_v60 = vrot.slane %v13838_v7, 1 }
 0x161   : > { %11365 = vmatpush3.bf16.msra.mxu1 %v12398_v1  ;;  %11601 = vmatpush3.bf16.msra.mxu0 %v12394_v13  ;;  %v12413_v13 = vld [vmem:[#allocation8 + $0xb8] sm:$0xff]  }
 0x162   : > { %11604 = vmatprep.mubr.bf16.mxu0 %v13622_v27  ;;  %11602 = vmatprep.subr.bf16.mxu0 %v12396_v26  ;;  %v12403_v27 = vld [vmem:[#allocation8 + $0x90] sm:$0xff]  }
 0x163   : > { %11366 = vmatprep.subr.bf16.mxu1 %v12400_v30  ;;  %11352 = vmatprep.mubr.bf16.mxu1 %v4403_v43 }
 0x165   : > { %11367 = vmatpush3.bf16.msra.mxu1 %v12400_v30  ;;  %11603 = vmatpush3.bf16.msra.mxu0 %v12396_v26  ;;  %v290_v26 = vld [vmem:[%s12923_s12 + $0x180] sm:$0xff] }
 0x166   : > { %11368 = vmatprep.subr.bf16.mxu1 %v12402_v41  ;;  %11620 = vmatprep.subr.bf16.mxu0 %v12399_v50 }
 0x168   : > { %11353 = vmatmul.mubr.bf16.gmra.mrb[20].mxu1 %v13730_v33  ;;  %11605 = vmatmul.mubr.bf16.vlgmr.msra.gmra.mrb[16].mxu0 %v13645_v18  ;;  %v12408_v33 = vld [vmem:[#allocation8 + $0xe8] sm:$0xff]   ;;  %v12407_v18 = vld [vmem:[#allocation8 + $0xa0] sm:$0xff]  }
 0x169   : > { %11369 = vmatpush3.bf16.msra.mxu1 %v12402_v41  ;;  %11621 = vmatpush3.bf16.msra.mxu0 %v12399_v50  ;;  %v341_v41 = vmax.f32 %v290_v26, 0.0  ;;  %v12419_v50 = vld [vmem:[#allocation8 + $0xc0] sm:$0xff]  }
 0x16a   : > { %11608 = vmatprep.mubr.bf16.mxu0 %v13659_v45  ;;  %11622 = vmatprep.subr.bf16.mxu0 %v12401_v9  ;;  %v9887_v45 = vcombine.low %v4583_v51, %v13811_v61 }
 0x16b   : > { %11370 = vmatprep.subr.bf16.mxu1 %v12404_v36  ;;  %11356 = vmatprep.mubr.bf16.mxu1 %v13733_v11  ;;  %v12410_v11 = vld [vmem:[#allocation8 + $0xf0] sm:$0xff]   ;;  %v10402_v51 = vpack.c.bf16 %v341_v41, %v341_v41 }
 0x16c   : > { %v4866_v62 = vshrl.u32 %v9887_v45, 16  ;;  %v4869_v38 = vshll.u32 %v9887_v45, 16 }
 0x16d   : > { %11371 = vmatpush3.bf16.msra.mxu1 %v12404_v36  ;;  %11623 = vmatpush3.bf16.msra.mxu0 %v12401_v9  ;;  %v4665_v9 = vsel %vm1605_vm11, %v4662_v39, %v4664_v21  ;;  %v13865_v36 = vrot.slane %v4874_v23, 1  ;;  %v12426_v39 = vld [vmem:[#allocation8 + $0x118] sm:$0xff]  }
 0x16e   : > { %11372 = vmatprep.subr.bf16.mxu1 %v12406_v42  ;;  %11624 = vmatprep.subr.bf16.mxu0 %v12403_v27  ;;  %v13850_v28 = vrot.slane %v4866_v62, 1  ;;  %v13859_v30 = vrot.slane %v4869_v38, 2  ;;  %v5114_v62 = vld [vmem:[#allocation2 + $0x48] sm:$0xc]  ;;  %v5135_v38 = vrot.slane %v13816_v49, 2 }
 0x170   : > { %11357 = vmatmul.mubr.bf16.gmra.mrb[24].mxu1 %v13739_v58  ;;  %11609 = vmatmul.mubr.bf16.gmra.mrb[32].mxu0 %v13668_v14  ;;  %v13824_v58 = vld [vmem:[#allocation2 + $0x68] sm:$0xff]   ;;  %v4659_v14 = vrot.slane %v9887_v45, 1  ;;  %v4886_v45 = vshll.u32 %v13819_v22, 16 }
 0x171   : > { %11373 = vmatpush3.bf16.msra.mxu1 %v12406_v42  ;;  %11625 = vmatpush3.bf16.msra.mxu0 %v12403_v27  ;;  %v4666_v44 = vrot.slane %v13824_v58, 1  ;;  %v13867_v42 = vld [vmem:[#allocation2 + $0x90] sm:$0xff]   ;;  %v4901_v49 = vshrl.u32 %v13824_v58, 16 }
 0x172   : > { %11612 = vmatprep.mubr.bf16.mxu0 %v13690_v16  ;;  %11626 = vmatprep.subr.bf16.mxu0 %v12405_v12  ;;  %v968_v16 = vrot.slane %v13714_v29, 4  ;;  %v4661_v40 = vsel %vm1605_vm11, %v4659_v14, %v4660_v5  ;;  %v980_v5 = vshrl.u32 %v10402_v51, 16 }
 0x173   : > { %11374 = vmatprep.subr.bf16.mxu1 %v12408_v33  ;;  %11360 = vmatprep.mubr.bf16.mxu1 %v13742_v48  ;;  %v12418_v48 = vld [vmem:[#allocation8 + $0x100] sm:$0xff]  }
 0x175   : > { %11375 = vmatpush3.bf16.msra.mxu1 %v12408_v33  ;;  %11627 = vmatpush3.bf16.msra.mxu0 %v12405_v12  ;;  %v13870_v33 = vrot.slane %v4877_v17, 2  ;;  %v12430_v17 = vld [vmem:[#allocation8 + $0x120] sm:$0xff]  }
 0x176   : > { %11376 = vmatprep.subr.bf16.mxu1 %v12410_v11  ;;  %11628 = vmatprep.subr.bf16.mxu0 %v12407_v18 }
 0x178   : > { %11361 = vmatmul.mubr.bf16.gmra.mrb[28].mxu1 %v13751_v52  ;;  %11613 = vmatmul.mubr.bf16.gmra.mrb[36].mxu0 %v13704_v20  ;;  %v13841_v52 = vld [vmem:[#allocation2 + $0x80] sm:$0xff]   ;;  %v13843_v20 = vld [vmem:[#allocation2 + $0x8c] sm:$0xf] }
 0x179   : > { %11377 = vmatpush3.bf16.msra.mxu1 %v12410_v11  ;;  %11629 = vmatpush3.bf16.msra.mxu0 %v12407_v18  ;;  %v4672_v2 = vrot.slane %v13841_v52, 1  ;;  %v13856_v24 = vcombine.low %v7342_v4, %v13843_v20  ;;  %v4883_v18 = vshrl.u32 %v13819_v22, 16 }
 0x17a   : > { %11616 = vmatprep.mubr.bf16.mxu0 %v13722_v34  ;;  %11630 = vmatprep.subr.bf16.mxu0 %v12409_v46  ;;  %v289_v34 = vld [vmem:[%s12923_s12 + $0x178] sm:$0xff] }
 0x17b   : > { %11378 = vmatprep.subr.bf16.mxu1 %v12412_v37  ;;  %11380 = vmatprep.mubr.bf16.mxu1 %v4661_v40  ;;  %v340_v1 = vmax.f32 %v289_v34, 0.0  ;;  %v4892_v40 = vshrl.u32 %v13821_v63, 16  ;;  %v9913_v34 = vcombine.low %v5114_v62, %v13811_v61  ;;  %v13939_v62 = vld [vmem:[#allocation2 + $0x88] ss:$0 sps:$4 sm:$0x33]  }
 0x17d   : > { %11379 = vmatpush3.bf16.msra.mxu1 %v12412_v37  ;;  %11631 = vmatpush3.bf16.msra.mxu0 %v12409_v46  ;;  %v10401_v43 = vpack.c.bf16 %v340_v1, %v340_v1  ;;  %v983_v46 = vshll.u32 %v10402_v51, 16  ;;  %v12421_v37 = vld [vmem:[#allocation8 + $0xc8] sm:$0xff]   ;;  %v4895_v1 = vshll.u32 %v13821_v63, 16  ;;  %v5134_v41 = vrot.slane %v9913_v34, 2  ;;  %v12425_v51 = vld [vmem:[#allocation8 + $0xd0] sm:$0xff]  }
 0x17e   : > { %11396 = vmatprep.subr.bf16.mxu1 %v12418_v48  ;;  %11632 = vmatprep.subr.bf16.mxu0 %v12411_v10  ;;  %v13910_v29 = vrot.slane %v4892_v40, 1  ;;  %v12432_v40 = vld [vmem:[#allocation8 + $0x128] sm:$0xff]   ;;  %v13954_v34 = vld [vmem:[#allocation2 + $0xb8] sm:$0xff]  }
 0x17f   : > { %v970_v27 = vshrl.u32 %v10401_v43, 16  ;;  %v973_v12 = vshll.u32 %v10401_v43, 16  ;;  %v985_v23 = vrot.slane %v983_v46, 7  ;;  %v12427_v46 = vld [vmem:[#allocation8 + $0xd8] sm:$0xff]  }
 0x180   : > { %11381 = vmatmul.mubr.bf16.vlgmr.msra.gmra.mrb[16].mxu1 %v4663_v53  ;;  %11617 = vmatmul.mubr.bf16.gmra.mrb[40].mxu0 %v13748_v57  ;;  %v7418_v57 = vrot.slane %v13856_v24, 1  ;;  %v982_v53 = vrot.slane %v980_v5, 6  ;;  %v5141_v5 = vrot.slane %v13824_v58, 2 }
 0x181   : > { %11397 = vmatpush3.bf16.msra.mxu1 %v12418_v48  ;;  %11633 = vmatpush3.bf16.msra.mxu0 %v12411_v10  ;;  %v972_v11 = vrot.slane %v970_v27, 6  ;;  %v975_v14 = vrot.slane %v973_v12, 7  ;;  %v7419_v48 = vrot.slane %v13867_v42, 1  ;;  %v13881_v10 = vld [vmem:[#allocation2 + $0x98] sm:$0xff]   ;;  %v5137_v12 = vrot.slane %v13819_v22, 2 }
 0x182   : > { %11636 = vmatprep.mubr.bf16.mxu0 %v13772_v19  ;;  %11634 = vmatprep.subr.bf16.mxu0 %v12413_v13  ;;  %v4667_v19 = vsel %vm1605_vm11, %v4664_v21, %v4666_v44  ;;  %v4669_v21 = vsel %vm1605_vm11, %v4666_v44, %v4668_v8  ;;  %v13900_v43 = vor.u32 %v985_v23, %v982_v53  ;;  %v13903_v44 = vrot.slane %v4883_v18, 1 }
 0x183   : > { %11398 = vmatprep.subr.bf16.mxu1 %v12420_v15  ;;  %11384 = vmatprep.mubr.bf16.mxu1 %v4665_v9  ;;  %v976_v4 = vor.u32 %v975_v14, %v972_v11  ;;  %v13905_v9 = vrot.slane %v4886_v45, 2  ;;  %v7421_v27 = vrot.slane %v13881_v10, 1  ;;  %v13920_v18 = vrot.slane %v4895_v1, 2 }
 0x184   : > { %15220 = vst [vmem:[#allocation16_spill] sm:$0xff] %v13900_v43  ;;  %v4910_v22 = vshrl.u32 %v13832_v56, 16  ;;  %v13928_v11 = vrot.slane %v4901_v49, 1  ;;  %v4922_v53 = vshll.u32 %v13836_v6, 16  ;;  %v4928_v1 = vshrl.u32 %v13841_v52, 16 }
 0x185   : > { %11399 = vmatpush3.bf16.msra.mxu1 %v12420_v15  ;;  %11635 = vmatpush3.bf16.msra.mxu0 %v12413_v13  ;;  %v13892_v15 = vld [vmem:[#allocation2 + $0xa0] sm:$0xff]   ;;  %v4904_v13 = vshll.u32 %v13824_v58, 16  ;;  %v977_v61 = vsel %vm12960_vm7, %v968_v16, %v976_v4  ;;  %v978_v26 = vrot.slane %v976_v4, 4  ;;  %v13912_v16 = vld [vmem:[#allocation2 + $0xa8] sm:$0xff]   ;;  %v13945_v4 = vld [vmem:[#allocation2 + $0xb0] sm:$0xff]   ;;  %v4931_v49 = vshll.u32 %v13841_v52, 16 }
 0x186   : > { %11400 = vmatprep.subr.bf16.mxu1 %v12424_v32  ;;  %11652 = vmatprep.subr.bf16.mxu0 %v12419_v50  ;;  %1111 = vst [vmem:[#allocation2 + $0xc4] sm:$0xf] %v977_v61  ;;  %v7423_v45 = vrot.slane %v13892_v15, 1  ;;  %v13952_v23 = vrot.slane %v4910_v22, 1  ;;  %v4937_v61 = vshrl.u32 %v13939_v62, 16 }
 0x187   : > { %v13930_v14 = vrot.slane %v4904_v13, 2 }
 0x188   : > { %11385 = vmatmul.mubr.bf16.gmra.mrb[20].mxu1 %v4667_v19  ;;  %11637 = vmatmul.mubr.bf16.vlgmr.msra.gmra.mrb[16].mxu0 %v13759_v25  ;;  %v987_v25 = vsel %vm12960_vm7, %v978_v26, %v13900_v43  ;;  %v4671_v19 = vsel %vm1605_vm11, %v4668_v8, %v4670_v35  ;;  %v4940_v26 = vshll.u32 %v13939_v62, 16  ;;  %v15222_v43 = vrot.slane %v13945_v4, 1 }
 0x189   : > { %11401 = vmatpush3.bf16.msra.mxu1 %v12424_v32  ;;  %11653 = vmatpush3.bf16.msra.mxu0 %v12419_v50  ;;  %v13918_v32 = vsel %vm2347_vm10, %v5134_v41, %v5135_v38  ;;  %1112 = vst [vmem:[#allocation2 + $0xc8] sm:$0xf] %v987_v25  ;;  %v5139_v50 = vrot.slane %v13821_v63, 2  ;;  %v4913_v63 = vshll.u32 %v13832_v56, 16  ;;  %v5143_v41 = vrot.slane %v13832_v56, 2 }
 0x18a   : > { %11640 = vmatprep.mubr.bf16.mxu0 %v13780_v31  ;;  %11654 = vmatprep.subr.bf16.mxu0 %v12421_v37  ;;  %v13924_v31 = vsel %vm2347_vm10, %v5135_v38, %v5137_v12  ;;  %v13973_v25 = vrot.slane %v4922_v53, 2  ;;  %v12433_v53 = vld [vmem:[#allocation8 + $0xe8] sm:$0xff]   ;;  %v13997_v22 = vrot.slane %v4940_v26, 2  ;;  %v12442_v26 = vld [vmem:[#allocation8 + $0x140] sm:$0xff]  }
 0x18b   : > { %11402 = vmatprep.subr.bf16.mxu1 %v12426_v39  ;;  %11388 = vmatprep.mubr.bf16.mxu1 %v4669_v21  ;;  %v13942_v38 = vsel %vm2347_vm10, %v5137_v12, %v5139_v50  ;;  %v13950_v8 = vsel %vm2347_vm10, %v5139_v50, %v5141_v5  ;;  %v12436_v21 = vld [vmem:[#allocation8 + $0x130] sm:$0xff]   ;;  %v13964_v13 = vrot.slane %v4913_v63, 2  ;;  %v7628_v50 = vshll.u32 %v13856_v24, 16 }
 0x18c   : > { %v13979_v56 = vsel %vm2347_vm10, %v5141_v5, %v5143_v41  ;;  %v13986_v63 = vrot.slane %v4928_v1, 1  ;;  %v4675_v5 = vsel %vm1605_vm11, %v4672_v2, %v4674_v60  ;;  %v15181_v60 = vrot.slane %v13841_v52, 2 }
 0x18d   : > { %11403 = vmatpush3.bf16.msra.mxu1 %v12426_v39  ;;  %11655 = vmatpush3.bf16.msra.mxu0 %v12421_v37  ;;  %v4919_v39 = vshrl.u32 %v13836_v6, 16  ;;  %v4673_v37 = vsel %vm1605_vm11, %v4670_v35, %v4672_v2  ;;  %v14005_v7 = vrot.slane %v7628_v50, 2  ;;  %v7642_v2 = vshrl.u32 %v13881_v10, 16 }
 0x18e   : > { %11404 = vmatprep.subr.bf16.mxu1 %v12430_v17  ;;  %11656 = vmatprep.subr.bf16.mxu0 %v12425_v51  ;;  %v7645_v1 = vshll.u32 %v13881_v10, 16  ;;  %v7663_v50 = vshll.u32 %v13912_v16, 16 }
 0x18f   : > { %v13971_v12 = vrot.slane %v4919_v39, 1  ;;  %v13988_v39 = vrot.slane %v4931_v49, 2  ;;  %v7651_v49 = vshrl.u32 %v13892_v15, 16 }
 0x190   : > { %11389 = vmatmul.mubr.bf16.gmra.mrb[24].mxu1 %v4671_v19  ;;  %11641 = vmatmul.mubr.bf16.gmra.mrb[44].mxu0 %v13783_v55  ;;  %v7625_v55 = vshrl.u32 %v13856_v24, 16  ;;  %v4880_v19 = vor.u32 %v13870_v33, %v13865_v36  ;;  %v7633_v36 = vshrl.u32 %v13867_v42, 16  ;;  %v7636_v33 = vshll.u32 %v13867_v42, 16 }
 0x191   : > { %11405 = vmatpush3.bf16.msra.mxu1 %v12430_v17  ;;  %11657 = vmatpush3.bf16.msra.mxu0 %v12425_v51  ;;  %v12431_v17 = vld [vmem:[#allocation8 + $0xe0] sm:$0xff]   ;;  %v4872_v51 = vor.u32 %v13859_v30, %v13850_v28 }
 0x192   : > { %11644 = vmatprep.mubr.bf16.mxu0 %v13789_v3  ;;  %11658 = vmatprep.subr.bf16.mxu0 %v12427_v46  ;;  %v5145_v3 = vrot.slane %v13836_v6, 2  ;;  %v12438_v6 = vld [vmem:[#allocation8 + $0x138] sm:$0xff]   ;;  %v14002_v30 = vrot.slane %v7625_v55, 1  ;;  %v7660_v55 = vshrl.u32 %v13912_v16, 16 }
 0x193   : > { %11406 = vmatprep.subr.bf16.mxu1 %v12432_v40  ;;  %11392 = vmatprep.mubr.bf16.mxu1 %v4673_v37  ;;  %v13995_v37 = vrot.slane %v4937_v61, 1  ;;  %v12437_v61 = vld [vmem:[#allocation8 + $0xf0] sm:$0xff]  }
 0x194   : > { %v14000_v28 = vsel %vm2347_vm10, %v5143_v41, %v5145_v3  ;;  %v7654_v41 = vshll.u32 %v13892_v15, 16  ;;  %v14041_v58 = vrot.slane %v7660_v55, 1  ;;  %v12444_v55 = vld [vmem:[#allocation8 + $0x100] sm:$0xff]  }
 0x195   : > { %11407 = vmatpush3.bf16.msra.mxu1 %v12432_v40  ;;  %11659 = vmatpush3.bf16.msra.mxu0 %v12427_v46  ;;  %v4881_v40 = vsel %vm2076_vm9, %v4872_v51, %v4880_v19  ;;  %v4889_v46 = vor.u32 %v13905_v9, %v13903_v44  ;;  %v14022_v51 = vsel %vm2347_vm10, %v5145_v3, %v15181_v60  ;;  %v14025_v44 = vrot.slane %v7633_v36, 1  ;;  %v12445_v36 = vld [vmem:[#allocation8 + $0x148] sm:$0xff]  }
 0x196   : > { %11408 = vmatprep.subr.bf16.mxu1 %v12436_v21  ;;  %11660 = vmatprep.subr.bf16.mxu0 %v12431_v17  ;;  %v14028_v9 = vrot.slane %v7636_v33, 2  ;;  %v4898_v3 = vor.u32 %v13920_v18, %v13910_v29  ;;  %v14035_v60 = vrot.slane %v7645_v1, 2  ;;  %v14039_v35 = vrot.slane %v7654_v41, 2 }
 0x197   : > { %v14043_v33 = vrot.slane %v7663_v50, 2  ;;  %v7678_v29 = vshrl.u32 %v13954_v34, 16  ;;  %v7420_v18 = vsel %vm1605_vm11, %v7418_v57, %v7419_v48  ;;  %v7894_v1 = vrot.slane %v13867_v42, 2  ;;  %v14061_v50 = vld [vmem:[#allocation2 + $0xc0] sm:$0xff]  }
 0x198   : > { %11393 = vmatmul.mubr.bf16.gmra.mrb[28].mxu1 %v4675_v5  ;;  %11645 = vmatmul.mubr.bf16.gmra.mrb[48].mxu0 %v13794_v59  ;;  %v7669_v59 = vshrl.u32 %v13945_v4, 16  ;;  %v4890_v5 = vsel %vm2076_vm9, %v4880_v19, %v4889_v46  ;;  %v4899_v24 = vsel %vm2076_vm9, %v4889_v46, %v4898_v3  ;;  %v14063_v57 = vld [vmem:[#allocation2 + $0xc8] ss:$0 sps:$4 sm:$0x33]   ;;  %v7898_v46 = vrot.slane %v13892_v15, 2 }
 0x199   : > { %11409 = vmatpush3.bf16.msra.mxu1 %v12436_v21  ;;  %11661 = vmatpush3.bf16.msra.mxu0 %v12431_v17  ;;  %v14030_v21 = vrot.slane %v7642_v2, 1  ;;  %v14037_v17 = vrot.slane %v7651_v49, 1  ;;  %v7672_v2 = vshll.u32 %v13945_v4, 16  ;;  %v12448_v49 = vld [vmem:[#allocation8 + $0x150] sm:$0xff]   ;;  %v7900_v42 = vrot.slane %v13912_v16, 2 }
 0x19a   : > { %11648 = vmatprep.mubr.bf16.mxu0 %v13798_v0  ;;  %11662 = vmatprep.subr.bf16.mxu0 %v12433_v53  ;;  %v12439_v0 = vld [vmem:[#allocation8 + $0xf8] sm:$0xff]   ;;  %v14046_v19 = vrot.slane %v7669_v59, 1  ;;  %v7896_v59 = vrot.slane %v13881_v10, 2  ;;  %v4943_v15 = vor.u32 %v13997_v22, %v13995_v37 }
 0x19b   : > { %11410 = vmatprep.subr.bf16.mxu1 %v12438_v6  ;;  %11412 = vmatprep.mubr.bf16.mxu1 %v4881_v40  ;;  %v7873_v40 = vld [vmem:[#allocation2 + $0x88] sm:$0xc] }
 0x19c   : > { %v10162_v41 = vcombine.low %v7873_v40, %v13843_v20  ;;  %v14073_v20 = vrot.slane %v7678_v29, 1  ;;  %v4916_v29 = vor.u32 %v13964_v13, %v13952_v23  ;;  %v7687_v40 = vshrl.u32 %v14061_v50, 16 }
 0x19d   : > { %11411 = vmatpush3.bf16.msra.mxu1 %v12438_v6  ;;  %11663 = vmatpush3.bf16.msra.mxu0 %v12433_v53  ;;  %v7681_v6 = vshll.u32 %v13954_v34, 16  ;;  %v4907_v53 = vor.u32 %v13930_v14, %v13928_v11  ;;  %v14076_v14 = vsel %vm2347_vm10, %v7894_v1, %v7896_v59  ;;  %v7424_v23 = vsel %vm1605_vm11, %v7421_v27, %v7423_v45 }
 0x19e   : > { %11428 = vmatprep.subr.bf16.mxu1 %v12442_v26  ;;  %11664 = vmatprep.subr.bf16.mxu0 %v12437_v61  ;;  %v7893_v11 = vrot.slane %v10162_v41, 2  ;;  %v14090_v41 = vsel %vm2347_vm10, %v7896_v59, %v7898_v46  ;;  %v7696_v13 = vshrl.u32 %v14063_v57, 16  ;;  %v4934_v59 = vor.u32 %v13988_v39, %v13986_v63  ;;  %v5321_v63 = vld [vmem:[#allocation2 + $0x54] sm:$0xf] }
 0x19f   : > { %v4917_v54 = vsel %vm2076_vm9, %v4907_v53, %v4916_v29  ;;  %v3298_v39 = vlaneseq }
 0x1a0   : > { %11413 = vmatmul.mubr.bf16.vlgmr.msra.gmra.mrb[16].mxu1 %v4890_v5  ;;  %11649 = vmatmul.mubr.bf16.gmra.mrb[52].mxu0 %v13801_v47  ;;  %v14066_v5 = vrot.slane %v7672_v2, 2  ;;  %v7422_v47 = vsel %vm1605_vm11, %v7419_v48, %v7421_v27  ;;  %v14083_v2 = vsel %vm2347_vm10, %v7893_v11, %v7894_v1  ;;  %v12451_v48 = vld [vmem:[#allocation8 + $0x158] sm:$0xff]   ;;  %v7690_v1 = vshll.u32 %v14061_v50, 16  ;;  %v14112_v11 = vld [vmem:[#allocation2 + $0xc8] ss:$0 sps:$4 sm:$0x11]  }
 0x1a1   : > { %11429 = vmatpush3.bf16.msra.mxu1 %v12442_v26  ;;  %11665 = vmatpush3.bf16.msra.mxu0 %v12437_v61  ;;  %v4908_v61 = vsel %vm2076_vm9, %v4898_v3, %v4907_v53  ;;  %v14080_v26 = vrot.slane %v7681_v6, 2  ;;  %v7902_v3 = vrot.slane %v13945_v4, 2  ;;  %v4925_v6 = vor.u32 %v13973_v25, %v13971_v12  ;;  %v12454_v25 = vld [vmem:[#allocation8 + $0x160] sm:$0xff]  }
 0x1a2   : > { %11668 = vmatprep.mubr.bf16.mxu0 %v7420_v18  ;;  %11666 = vmatprep.subr.bf16.mxu0 %v12439_v0  ;;  %v12446_v18 = vld [vmem:[#allocation8 + $0x108] sm:$0xff]   ;;  %v15221_v27 = vrot.slane %v13912_v16, 1  ;;  %v7631_v53 = vor.u32 %v14005_v7, %v14002_v30  ;;  %v7698_v16 = vrot.slane %v7696_v13, 1  ;;  %v12452_v30 = vld [vmem:[#allocation8 + $0x118] sm:$0xff]  }
 0x1a3   : > { %11430 = vmatprep.subr.bf16.mxu1 %v12445_v36  ;;  %11416 = vmatprep.mubr.bf16.mxu1 %v4899_v24  ;;  %v15186_v24 = vrot.slane %v13954_v34, 2  ;;  %v14108_v12 = vsel %vm2347_vm10, %v7900_v42, %v7902_v3  ;;  %v4935_v37 = vsel %vm2076_vm9, %v4925_v6, %v4934_v59  ;;  %v12457_v7 = vld [vmem:[#allocation8 + $0x168] sm:$0xff]  }
 0x1a5   : > { %11431 = vmatpush3.bf16.msra.mxu1 %v12445_v36  ;;  %11667 = vmatpush3.bf16.msra.mxu0 %v12439_v0  ;;  %v14097_v36 = vsel %vm2347_vm10, %v7898_v46, %v7900_v42  ;;  %v7699_v0 = vshll.u32 %v14063_v57, 16  ;;  %v5320_v46 = vld [vmem:[#allocation2 + $0x50] sm:$0xc]  ;;  %v14117_v10 = vsel %vm2347_vm10, %v7902_v3, %v15186_v24  ;;  %v7426_v42 = vsel %vm1605_vm11, %v7423_v45, %v15221_v27 }
 0x1a6   : > { %11432 = vmatprep.subr.bf16.mxu1 %v12448_v49  ;;  %11684 = vmatprep.subr.bf16.mxu0 %v12444_v55  ;;  %v15223_v3 = vmov %v15221_v27  ;;  %v4926_v24 = vsel %vm2076_vm9, %v4916_v29, %v4925_v6  ;;  %v7689_v45 = vrot.slane %v7687_v40, 1  ;;  %v14133_v27 = vld [vmem:[#allocation2 + $0x58] sm:$0xff]   ;;  %v15225_v29 = vrot.slane %v13945_v4, 1 }
 0x1a7   : > { %v7701_v40 = vrot.slane %v7699_v0, 2  ;;  %v7657_v4 = vor.u32 %v14039_v35, %v14037_v17  ;;  %v7433_v6 = vrot.slane %v14112_v11, 1  ;;  %v5397_v13 = vrot.slane %v14133_v27, 2  ;;  %v14163_v0 = vld [vmem:[#allocation2 + $0x68] sm:$0xff]  }
 0x1a8   : > { %11417 = vmatmul.mubr.bf16.gmra.mrb[20].mxu1 %v4908_v61  ;;  %11669 = vmatmul.mubr.bf16.vlgmr.msra.gmra.mrb[16].mxu0 %v7422_v47  ;;  %v12450_v61 = vld [vmem:[#allocation8 + $0x110] sm:$0xff]   ;;  %v7428_v47 = vsel %vm1605_vm11, %v15223_v3, %v15222_v43  ;;  %v15224_v43 = vrot.slane %v13954_v34, 1  ;;  %v14149_v3 = vld [vmem:[#allocation2 + $0x60] sm:$0xff]   ;;  %v7684_v17 = vor.u32 %v14080_v26, %v14073_v20 }
 0x1a9   : > { %11433 = vmatpush3.bf16.msra.mxu1 %v12448_v49  ;;  %11685 = vmatpush3.bf16.msra.mxu0 %v12444_v55  ;;  %v7639_v49 = vor.u32 %v14028_v9, %v14025_v44  ;;  %v7692_v55 = vrot.slane %v7690_v1, 2  ;;  %v7431_v44 = vrot.slane %v14061_v50, 1  ;;  %v14156_v9 = vshrl.u32 %v3298_v39, 7  ;;  %v14186_v26 = vld [vmem:[#allocation2 + $0x70] sm:$0xff]  }
 0x1aa   : > { %11672 = vmatprep.mubr.bf16.mxu0 %v7424_v23  ;;  %11686 = vmatprep.subr.bf16.mxu0 %v12446_v18  ;;  %v14144_v22 = vsel %vm1605_vm11, %v15225_v29, %v15224_v43  ;;  %v14147_v23 = vcombine.low %v5320_v46, %v5321_v63  ;;  %v7666_v1 = vor.u32 %v14043_v33, %v14041_v58  ;;  %v5399_v11 = vrot.slane %v14149_v3, 2 }
 0x1ab   : > { %11434 = vmatprep.subr.bf16.mxu1 %v12451_v48  ;;  %11420 = vmatprep.mubr.bf16.mxu1 %v4917_v54  ;;  %v7648_v54 = vor.u32 %v14035_v60, %v14030_v21  ;;  %v4944_v60 = vsel %vm2076_vm9, %v4934_v59, %v4943_v15  ;;  %v14167_v35 = vsel %vm2076_vm9, %v7631_v53, %v7639_v49  ;;  %v12456_v59 = vld [vmem:[#allocation8 + $0x120] sm:$0xff]   ;;  %v14198_v63 = vadd.s32 24, %v14156_v9  ;;  %v14210_v53 = vld [vmem:[#allocation2 + $0x78] sm:$0xff]  }
 0x1ac   : > { %v7675_v21 = vor.u32 %v14066_v5, %v14046_v19  ;;  %v7693_v58 = vor.u32 %v7692_v55, %v7689_v45  ;;  %v7702_v33 = vor.u32 %v7701_v40, %v7698_v16  ;;  %v15226_v46 = vmov %v15224_v43 }
 0x1ad   : > { %11435 = vmatpush3.bf16.msra.mxu1 %v12451_v48  ;;  %11687 = vmatpush3.bf16.msra.mxu0 %v12446_v18  ;;  %v5149_v48 = vrot.slane %v13939_v62, 2  ;;  %v12461_v62 = vld [vmem:[#allocation8 + $0x170] sm:$0xff]   ;;  %v5396_v18 = vrot.slane %v14147_v23, 2  ;;  %v7432_v19 = vsel %vm1605_vm11, %v15226_v46, %v7431_v44  ;;  %v14181_v5 = vsel %vm2076_vm9, %v7639_v49, %v7648_v54  ;;  %v14212_v49 = vld [vmem:[#allocation2 + $0x80] sm:$0xff]  }
 0x1ae   : > { %11436 = vmatprep.subr.bf16.mxu1 %v12454_v25  ;;  %11688 = vmatprep.subr.bf16.mxu0 %v12450_v61  ;;  %v14184_v20 = vsel %vm2076_vm9, %v7648_v54, %v7657_v4  ;;  %v15187_v39 = vrot.slane %v14061_v50, 2  ;;  %v14202_v15 = vsel %vm2076_vm9, %v7666_v1, %v7675_v21  ;;  %v15188_v45 = vrot.slane %v14163_v0, 2 }
 0x1af   : > { %v14215_v55 = vadd.s32 8, %v14156_v9  ;;  %v14218_v16 = vsel %vm2076_vm9, %v7675_v21, %v7684_v17  ;;  %v14221_v43 = vsel %vm2076_vm9, %v7684_v17, %v7693_v58  ;;  %v15229_v29 = vrot.slane %v13954_v34, 2  ;;  %v12464_v21 = vld [vmem:[#allocation8 + $0x178] sm:$0xff]  }
 0x1b0   : > { %11421 = vmatmul.mubr.bf16.gmra.mrb[24].mxu1 %v4926_v24  ;;  %11673 = vmatmul.mubr.bf16.gmra.mrb[56].mxu0 %v7426_v42  ;;  %v14189_v24 = vadd.s32 16, %v14156_v9  ;;  %v14192_v42 = vsel %vm1605_vm11, %v7431_v44, %v7433_v6  ;;  %v14234_v44 = vsel %vm2347_vm10, %v5396_v18, %v5397_v13 }
 0x1b1   : > { %11437 = vmatpush3.bf16.msra.mxu1 %v12454_v25  ;;  %11689 = vmatpush3.bf16.msra.mxu0 %v12450_v61  ;;  %v14195_v25 = vsel %vm2076_vm9, %v7657_v4, %v7666_v1  ;;  %v15227_v61 = vrot.slane %v13841_v52, 2  ;;  %15228 = vst [vmem:[#allocation17_spill] sm:$0xff] %v14215_v55  ;;  %v14224_v52 = vsel %vm2076_vm9, %v7693_v58, %v7702_v33  ;;  %v14241_v4 = vstv %s14173_s6  ;;  %v14249_v1 = vld [vmem:[#allocation2 + $0x88] sm:$0xff]  }
 0x1b2   : > { %11676 = vmatprep.mubr.bf16.mxu0 %v7428_v47  ;;  %11690 = vmatprep.subr.bf16.mxu0 %v12452_v30  ;;  %v14231_v40 = vsel %vm2347_vm10, %v15229_v29, %v15187_v39  ;;  %v3320_v6 = vadd.s32 %v14241_v4, %v14189_v24  ;;  %v3318_v34 = vadd.s32 %v14241_v4, %v14156_v9  ;;  %v12467_v39 = vld [vmem:[#allocation8 + $0x180] sm:$0xff]  }
 0x1b3   : > { %11438 = vmatprep.subr.bf16.mxu1 %v12457_v7  ;;  %v14207_v47 = vsel %vm2347_vm10, %v15227_v61, %v5149_v48  ;;  %11424 = vmatprep.mubr.bf16.mxu1 %v4935_v37  ;;  %v14237_v37 = vsel %vm2347_vm10, %v5397_v13, %v5399_v11  ;;  %v14252_v48 = vadd.s32 48, %v14156_v9  ;;  %v12458_v13 = vld [vmem:[#allocation8 + $0x128] sm:$0xff]   ;;  %v3319_v33 = vadd.s32 %v14241_v4, %v14215_v55  ;;  %v12463_v61 = vld [vmem:[#allocation8 + $0x130] sm:$0xff]  }
 0x1b4   : > { %vm3336_vm14 = vcmp.ge.s32.totalorder %v3320_v6, 18  ;;  %v9711_v18 = vadd.s32 4294967278, %v3320_v6  ;;  %vm3334_vm15 = vcmp.ge.s32.totalorder %v3318_v34, 18  ;;  %v9709_v46 = vadd.s32 4294967278, %v3318_v34 }
 0x1b5   : > { %11439 = vmatpush3.bf16.msra.mxu1 %v12457_v7  ;;  %11691 = vmatpush3.bf16.msra.mxu0 %v12452_v30  ;;  %v3321_v7 = vadd.s32 %v14241_v4, %v14198_v63  ;;  %15230 = vst [vmem:[#allocation18_spill] sm:$0xff] %v14252_v48  ;;  %v14257_v30 = vsel %vm2347_vm10, %v5399_v11, %v15188_v45  ;;  %vm3335_vm1 = vcmp.ge.s32.totalorder %v3319_v33, 18  ;;  %v9710_v11 = vadd.s32 4294967278, %v3319_v33 }
 0x1b6   : > { %11440 = vmatprep.subr.bf16.mxu1 %v12461_v62  ;;  %11692 = vmatprep.subr.bf16.mxu0 %v12456_v59  ;;  %v3368_v58 = vsel %vm3336_vm14, %v9711_v18, %v3320_v6  ;;  %v3366_v17 = vsel %vm3334_vm15, %v9709_v46, %v3318_v34 }
 0x1b7   : > { %vm3337_vm0 = vcmp.ge.s32.totalorder %v3321_v7, 18  ;;  %v9712_v29 = vadd.s32 4294967278, %v3321_v7  ;;  %vm3384_vm2 = vcmp.ge.s32.totalorder %v3368_v58, 18  ;;  %vm3382_vm3 = vcmp.ge.s32.totalorder %v3366_v17, 18 }
 0x1b8   : > { %11425 = vmatmul.mubr.bf16.gmra.mrb[28].mxu1 %v4944_v60  ;;  %11677 = vmatmul.mubr.bf16.gmra.mrb[60].mxu0 %v14144_v22  ;;  %v3324_v60 = vadd.s32 %v14241_v4, %v14252_v48  ;;  %v9727_v22 = vadd.s32 4294967278, %v3368_v58  ;;  %v12465_v48 = vld [vmem:[#allocation8 + $0x138] sm:$0xff]  }
 0x1b9   : > { %11441 = vmatpush3.bf16.msra.mxu1 %v12461_v62  ;;  %11693 = vmatpush3.bf16.msra.mxu0 %v12456_v59  ;;  %v9725_v62 = vadd.s32 4294967278, %v3366_v17  ;;  %v3369_v54 = vsel %vm3337_vm0, %v9712_v29, %v3321_v7  ;;  %v3367_v59 = vsel %vm3335_vm1, %v9710_v11, %v3319_v33  ;;  %v12471_v11 = vld [vmem:[#allocation8 + $0x190] sm:$0xff]  }
 0x1ba   : > { %11680 = vmatprep.mubr.bf16.mxu0 %v7432_v19  ;;  %11694 = vmatprep.subr.bf16.mxu0 %v12458_v13  ;;  %vm3340_vm4 = vcmp.ge.s32.totalorder %v3324_v60, 18  ;;  %v9715_v19 = vadd.s32 4294967278, %v3324_v60  ;;  %v3416_v6 = vsel %vm3384_vm2, %v9727_v22, %v3368_v58  ;;  %vm3385_vm5 = vcmp.ge.s32.totalorder %v3369_v54, 18 }
 0x1bb   : > { %11442 = vmatprep.subr.bf16.mxu1 %v12464_v21  ;;  %11444 = vmatprep.mubr.bf16.mxu1 %v13918_v32  ;;  %v3414_v34 = vsel %vm3382_vm3, %v9725_v62, %v3366_v17  ;;  %v9728_v18 = vadd.s32 4294967278, %v3369_v54  ;;  %vm3432_vm6 = vcmp.ge.s32.totalorder %v3416_v6, 18  ;;  %v9743_v46 = vadd.s32 4294967278, %v3416_v6  ;;  %v12469_v32 = vld [vmem:[#allocation8 + $0x188] sm:$0xff]  }
 0x1bc   : > { %vm3430_vm8 = vcmp.ge.s32.totalorder %v3414_v34, 18  ;;  %v9741_v45 = vadd.s32 4294967278, %v3414_v34  ;;  %vm3383_vm9 = vcmp.ge.s32.totalorder %v3367_v59, 18  ;;  %v9726_v7 = vadd.s32 4294967278, %v3367_v59 }
 0x1bd   : > { %11443 = vmatpush3.bf16.msra.mxu1 %v12464_v21  ;;  %11695 = vmatpush3.bf16.msra.mxu0 %v12458_v13  ;;  %v3417_v55 = vsel %vm3385_vm5, %v9728_v18, %v3369_v54  ;;  %v3372_v33 = vsel %vm3340_vm4, %v9715_v19, %v3324_v60  ;;  %v3464_v21 = vsel %vm3432_vm6, %v9743_v46, %v3416_v6  ;;  %v12468_v54 = vld [vmem:[#allocation8 + $0x140] sm:$0xff]   ;;  %v12470_v19 = vld [vmem:[#allocation8 + $0x148] sm:$0xff]  }
 0x1be   : > { %11460 = vmatprep.subr.bf16.mxu1 %v12467_v39  ;;  %11696 = vmatprep.subr.bf16.mxu0 %v12463_v61  ;;  %v3462_v17 = vsel %vm3430_vm8, %v9741_v45, %v3414_v34  ;;  %vm3433_vm11 = vcmp.ge.s32.totalorder %v3417_v55, 18  ;;  %v9744_v58 = vadd.s32 4294967278, %v3417_v55  ;;  %vm3480_vm14 = vcmp.ge.s32.totalorder %v3464_v21, 18 }
 0x1bf   : > { %v9759_v13 = vadd.s32 4294967278, %v3464_v21  ;;  %vm3478_vm15 = vcmp.ge.s32.totalorder %v3462_v17, 18  ;;  %v9757_v29 = vadd.s32 4294967278, %v3462_v17  ;;  %v3415_v60 = vsel %vm3383_vm9, %v9726_v7, %v3367_v59 }
 0x1c0   : > { %11445 = vmatmul.mubr.bf16.vlgmr.msra.gmra.mrb[16].mxu1 %v13924_v31  ;;  %11681 = vmatmul.mubr.bf16.gmra.mrb[64].mxu0 %v14192_v42  ;;  %v3465_v22 = vsel %vm3433_vm11, %v9744_v58, %v3417_v55  ;;  %vm3388_vm0 = vcmp.ge.s32.totalorder %v3372_v33, 18  ;;  %v9731_v31 = vadd.s32 4294967278, %v3372_v33  ;;  %v12473_v55 = vld [vmem:[#allocation8 + $0x198] sm:$0xff]   ;;  %vm3431_vm4 = vcmp.ge.s32.totalorder %v3415_v60, 18 }
 0x1c1   : > { %11461 = vmatpush3.bf16.msra.mxu1 %v12467_v39  ;;  %11697 = vmatpush3.bf16.msra.mxu0 %v12463_v61  ;;  %v3512_v45 = vsel %vm3480_vm14, %v9759_v13, %v3464_v21  ;;  %v3510_v62 = vsel %vm3478_vm15, %v9757_v29, %v3462_v17  ;;  %vm3481_vm1 = vcmp.ge.s32.totalorder %v3465_v22, 18  ;;  %v9760_v42 = vadd.s32 4294967278, %v3465_v22 }
 0x1c2   : > { %11700 = vmatprep.mubr.bf16.mxu0 %v14167_v35  ;;  %11698 = vmatprep.subr.bf16.mxu0 %v12465_v48  ;;  %vm3528_vm2 = vcmp.ge.s32.totalorder %v3512_v45, 18  ;;  %v9775_v39 = vadd.s32 4294967278, %v3512_v45  ;;  %vm3526_vm3 = vcmp.ge.s32.totalorder %v3510_v62, 18  ;;  %v9773_v61 = vadd.s32 4294967278, %v3510_v62 }
 0x1c3   : > { %11462 = vmatprep.subr.bf16.mxu1 %v12469_v32  ;;  %11448 = vmatprep.mubr.bf16.mxu1 %v13942_v38  ;;  %v14276_v35 = vld [vmem:[#allocation2 + $0x90] ss:$0 sps:$4 sm:$0x33]   ;;  %v3513_v59 = vsel %vm3481_vm1, %v9760_v42, %v3465_v22  ;;  %v9742_v6 = vadd.s32 4294967278, %v3415_v60  ;;  %v3420_v34 = vsel %vm3388_vm0, %v9731_v31, %v3372_v33  ;;  %v7908_v22 = vrot.slane %v14063_v57, 2 }
 0x1c4   : > { %v3560_v18 = vsel %vm3528_vm2, %v9775_v39, %v3512_v45  ;;  %v3558_v46 = vsel %vm3526_vm3, %v9773_v61, %v3510_v62  ;;  %vm3529_vm5 = vcmp.ge.s32.totalorder %v3513_v59, 18  ;;  %v9776_v38 = vadd.s32 4294967278, %v3513_v59 }
 0x1c5   : > { %11463 = vmatpush3.bf16.msra.mxu1 %v12469_v32  ;;  %11699 = vmatpush3.bf16.msra.mxu0 %v12465_v48  ;;  %vm3576_vm6 = vcmp.ge.s32.totalorder %v3560_v18, 18  ;;  %v9791_v7 = vadd.s32 4294967278, %v3560_v18  ;;  %vm3574_vm8 = vcmp.ge.s32.totalorder %v3558_v46, 18  ;;  %v9789_v21 = vadd.s32 4294967278, %v3558_v46  ;;  %v12475_v32 = vld [vmem:[#allocation8 + $0x1a0] sm:$0xff]  }
 0x1c6   : > { %11464 = vmatprep.subr.bf16.mxu1 %v12471_v11  ;;  %11716 = vmatprep.subr.bf16.mxu0 %v12468_v54  ;;  %v3561_v17 = vsel %vm3529_vm5, %v9776_v38, %v3513_v59  ;;  %v3463_v58 = vsel %vm3431_vm4, %v9742_v6, %v3415_v60  ;;  %vm3436_vm9 = vcmp.ge.s32.totalorder %v3420_v34, 18  ;;  %v9747_v13 = vadd.s32 4294967278, %v3420_v34  ;;  %v12472_v60 = vld [vmem:[#allocation8 + $0x150] sm:$0xff]  }
 0x1c7   : > { %v3608_v48 = vsel %vm3576_vm6, %v9791_v7, %v3560_v18  ;;  %v3606_v33 = vsel %vm3574_vm8, %v9789_v21, %v3558_v46  ;;  %v9792_v29 = vadd.s32 4294967278, %v3561_v17  ;;  %vm3577_vm14 = vcmp.ge.s32.totalorder %v3561_v17, 18 }
 0x1c8   : > { %11449 = vmatmul.mubr.bf16.gmra.mrb[20].mxu1 %v13950_v8  ;;  %11701 = vmatmul.mubr.bf16.vlgmr.msra.gmra.mrb[16].mxu0 %v14181_v5  ;;  %vm3624_vm11 = vcmp.ge.s32.totalorder %v3608_v48, 18  ;;  %v9807_v31 = vadd.s32 4294967278, %v3608_v48  ;;  %v5411_v8 = vrot.slane %v14276_v35, 2  ;;  %v9805_v45 = vadd.s32 4294967278, %v3606_v33 }
 0x1c9   : > { %11465 = vmatpush3.bf16.msra.mxu1 %v12471_v11  ;;  %11717 = vmatpush3.bf16.msra.mxu0 %v12468_v54  ;;  %vm3479_vm15 = vcmp.ge.s32.totalorder %v3463_v58, 18  ;;  %v9758_v5 = vadd.s32 4294967278, %v3463_v58  ;;  %v3468_v11 = vsel %vm3436_vm9, %v9747_v13, %v3420_v34  ;;  %v15231_v57 = vrot.slane %v14186_v26, 2 }
 0x1ca   : > { %11704 = vmatprep.mubr.bf16.mxu0 %v14184_v20  ;;  %11718 = vmatprep.subr.bf16.mxu0 %v12470_v19  ;;  %v15232_v54 = vrot.slane %v14163_v0, 2  ;;  %v15233_v62 = vrot.slane %v14210_v53, 2  ;;  %v15235_v61 = vrot.slane %v14212_v49, 2  ;;  %vm3622_vm0 = vcmp.ge.s32.totalorder %v3606_v33, 18  ;;  %v12474_v53 = vld [vmem:[#allocation8 + $0x158] sm:$0xff]   ;;  %v12477_v49 = vld [vmem:[#allocation8 + $0x1a8] sm:$0xff]  }
 0x1cb   : > { %11466 = vmatprep.subr.bf16.mxu1 %v12473_v55  ;;  %11452 = vmatprep.mubr.bf16.mxu1 %v13979_v56  ;;  %v15234_v42 = vmov %v15231_v57  ;;  %v14308_v0 = vsel %vm3577_vm14, %v9792_v29, %v3561_v17  ;;  %v15237_v59 = vrot.slane %v14249_v1, 2  ;;  %v14318_v34 = vadd.s32 32, %v14156_v9 }
 0x1cc   : > { %v14292_v20 = vsel %vm2347_vm10, %v15232_v54, %v15231_v57  ;;  %v14299_v39 = vsel %vm2347_vm10, %v15234_v42, %v15233_v62  ;;  %v15236_v35 = vmov %v15233_v62  ;;  %v15238_v6 = vmov %v15235_v61 }
 0x1cd   : > { %v14306_v56 = vsel %vm2347_vm10, %v15236_v35, %v15235_v61  ;;  %11467 = vmatpush3.bf16.msra.mxu1 %v12473_v55  ;;  %v14315_v26 = vsel %vm2347_vm10, %v15238_v6, %v15237_v59  ;;  %v14321_v18 = vadd.s32 56, %v14156_v9  ;;  %11719 = vmatpush3.bf16.msra.mxu0 %v12470_v19  ;;  %v14324_v55 = vsel %vm3624_vm11, %v9807_v31, %v3608_v48  ;;  %v12478_v35 = vld [vmem:[#allocation8 + $0x168] sm:$0xff]  }
 0x1ce   : > { %11468 = vmatprep.subr.bf16.mxu1 %v12475_v32  ;;  %v3511_v46 = vsel %vm3479_vm15, %v9758_v5, %v3463_v58  ;;  %vm3484_vm1 = vcmp.ge.s32.totalorder %v3468_v11, 18  ;;  %v9763_v38 = vadd.s32 4294967278, %v3468_v11  ;;  %11720 = vmatprep.subr.bf16.mxu0 %v12472_v60  ;;  %v3654_v7 = vsel %vm3622_vm0, %v9805_v45, %v3606_v33 }
 0x1cf   : > { %v15239_v21 = vmov %v15237_v59  ;;  %v15240_v13 = vrot.slane %v14061_v50, 2  ;;  %v14338_v48 = vadd.s32 40, %v14156_v9  ;;  %vm3625_vm2 = vcmp.ge.s32.totalorder %v14308_v0, 18 }
 0x1d0   : > { %v14330_v17 = vsel %vm2347_vm10, %v15239_v21, %v5411_v8  ;;  %11453 = vmatmul.mubr.bf16.gmra.mrb[24].mxu1 %v14000_v28  ;;  %v9808_v58 = vadd.s32 4294967278, %v14308_v0  ;;  %vm3527_vm3 = vcmp.ge.s32.totalorder %v3511_v46, 18  ;;  %v9774_v33 = vadd.s32 4294967278, %v3511_v46  ;;  %11705 = vmatmul.mubr.bf16.gmra.mrb[68].mxu0 %v14195_v25  ;;  %v12479_v28 = vld [vmem:[#allocation8 + $0x1b0] sm:$0xff]   ;;  %v12476_v25 = vld [vmem:[#allocation8 + $0x160] sm:$0xff]  }
 0x1d1   : > { %v14335_v19 = vsel %vm2347_vm10, %v15240_v13, %v7908_v22  ;;  %11469 = vmatpush3.bf16.msra.mxu1 %v12475_v32  ;;  %vm3672_vm4 = vcmp.ge.s32.totalorder %v14324_v55, 18  ;;  %v9823_v50 = vadd.s32 4294967278, %v14324_v55  ;;  %v3516_v1 = vsel %vm3484_vm1, %v9763_v38, %v3468_v11  ;;  %11721 = vmatpush3.bf16.msra.mxu0 %v12472_v60 }
 0x1d2   : > { %v3322_v29 = vadd.s32 %v14241_v4, %v14318_v34  ;;  %11708 = vmatprep.mubr.bf16.mxu0 %v14202_v15  ;;  %vm3670_vm5 = vcmp.ge.s32.totalorder %v3654_v7, 18  ;;  %v3559_v22 = vsel %vm3527_vm3, %v9774_v33, %v3511_v46  ;;  %vm3532_vm6 = vcmp.ge.s32.totalorder %v3516_v1, 18  ;;  %11722 = vmatprep.subr.bf16.mxu0 %v12474_v53  ;;  %v12482_v46 = vld [vmem:[#allocation8 + $0x1b8] sm:$0xff]  }
 0x1d3   : > { %v9779_v31 = vadd.s32 4294967278, %v3516_v1  ;;  %v14350_v32 = vpop.f32.mrb[0].mxu1  ;;  %11470 = vmatprep.subr.bf16.mxu1 %v12477_v49  ;;  %vm3575_vm8 = vcmp.ge.s32.totalorder %v3559_v22, 18  ;;  %v9790_v8 = vadd.s32 4294967278, %v3559_v22  ;;  %11456 = vmatprep.mubr.bf16.mxu1 %v14022_v51  ;;  %v9821_v60 = vadd.s32 4294967278, %v3654_v7 }
 0x1d4   : > { %vm3338_vm9 = vcmp.ge.s32.totalorder %v3322_v29, 18  ;;  %v9713_v45 = vadd.s32 4294967278, %v3322_v29  ;;  %v14352_v5 = vpop.f32.mrb[1].mxu1  ;;  %v3325_v11 = vadd.s32 %v14241_v4, %v14321_v18  ;;  %v3323_v57 = vadd.s32 %v14241_v4, %v14338_v48 }
 0x1d5   : > { %v3564_v15 = vsel %vm3532_vm6, %v9779_v31, %v3516_v1  ;;  %v14359_v54 = vpop.f32.mrb[2].mxu1  ;;  %11471 = vmatpush3.bf16.msra.mxu1 %v12477_v49  ;;  %v3607_v62 = vsel %vm3575_vm8, %v9790_v8, %v3559_v22  ;;  %11723 = vmatpush3.bf16.msra.mxu0 %v12474_v53  ;;  %v5603_v49 = vshrl.u32 %v14147_v23, 16  ;;  %v14368_v53 = vsel %vm3672_vm4, %v9823_v50, %v14324_v55  ;;  %v12488_v55 = vld [vmem:[#allocation8 + $0x1c0] sm:$0xff]  }
 0x1d6   : > { %vm3580_vm11 = vcmp.ge.s32.totalorder %v3564_v15, 18  ;;  %v9795_v42 = vadd.s32 4294967278, %v3564_v15  ;;  %v3370_v61 = vsel %vm3338_vm9, %v9713_v45, %v3322_v29  ;;  %v14361_v59 = vpop.f32.mrb[3].mxu1  ;;  %11472 = vmatprep.subr.bf16.mxu1 %v12479_v28  ;;  %vm3623_vm14 = vcmp.ge.s32.totalorder %v3607_v62, 18  ;;  %11724 = vmatprep.subr.bf16.mxu0 %v12476_v25  ;;  %v12481_v29 = vld [vmem:[#allocation8 + $0x170] sm:$0xff]  }
 0x1d7   : > { %v9806_v51 = vadd.s32 4294967278, %v3607_v62  ;;  %vm3386_vm15 = vcmp.ge.s32.totalorder %v3370_v61, 18  ;;  %v9729_v6 = vadd.s32 4294967278, %v3370_v61  ;;  %vm3341_vm0 = vcmp.ge.s32.totalorder %v3325_v11, 18 }
 0x1d8   : > { %v3612_v38 = vsel %vm3580_vm11, %v9795_v42, %v3564_v15  ;;  %v9716_v21 = vadd.s32 4294967278, %v3325_v11  ;;  %11457 = vmatmul.mubr.bf16.gmra.mrb[28].mxu1 %v14207_v47  ;;  %v14371_v13 = vsel %vm3670_vm5, %v9821_v60, %v3654_v7  ;;  %v3657_v33 = vsel %vm3625_vm2, %v9808_v58, %v14308_v0  ;;  %11709 = vmatmul.mubr.bf16.gmra.mrb[72].mxu0 %v14218_v16  ;;  %v12490_v60 = vld [vmem:[#allocation8 + $0x1c8] sm:$0xff]  }
 0x1d9   : > { %v3418_v1 = vsel %vm3386_vm15, %v9729_v6, %v3370_v61  ;;  %11473 = vmatpush3.bf16.msra.mxu1 %v12479_v28  ;;  %v14378_v22 = vsel %vm3623_vm14, %v9806_v51, %v3607_v62  ;;  %v9811_v47 = vadd.s32 4294967278, %v3612_v38  ;;  %11725 = vmatpush3.bf16.msra.mxu0 %v12476_v25  ;;  %vm3628_vm3 = vcmp.ge.s32.totalorder %v3612_v38, 18  ;;  %v14390_v25 = vld [vmem:[#allocation8 + $0x178] sm:$0xff]  }
 0x1da   : > { %vm3434_vm1 = vcmp.ge.s32.totalorder %v3418_v1, 18  ;;  %v9745_v31 = vadd.s32 4294967278, %v3418_v1  ;;  %11712 = vmatprep.mubr.bf16.mxu0 %v14221_v43  ;;  %v3373_v7 = vsel %vm3341_vm0, %v9716_v21, %v3325_v11  ;;  %vm3339_vm4 = vcmp.ge.s32.totalorder %v3323_v57, 18  ;;  %11726 = vmatprep.subr.bf16.mxu0 %v12478_v35 }
 0x1db   : > { %v9714_v0 = vadd.s32 4294967278, %v3323_v57  ;;  %v14382_v58 = vpop.f32.mrb[4].mxu1  ;;  %11474 = vmatprep.subr.bf16.mxu1 %v12482_v46  ;;  %vm3673_vm2 = vcmp.ge.s32.totalorder %v3657_v33, 18  ;;  %v9824_v16 = vadd.s32 4294967278, %v3657_v33  ;;  %v14384_v28 = vrot.slane %v5603_v49, 2  ;;  %11476 = vmatprep.mubr.bf16.mxu1 %v14234_v44 }
 0x1dc   : > { %v3466_v50 = vsel %vm3434_vm1, %v9745_v31, %v3418_v1  ;;  %v14386_v8 = vpop.f32.mrb[5].mxu1  ;;  %vm3671_vm5 = vcmp.ge.s32.totalorder %v14378_v22, 18  ;;  %vm3389_vm8 = vcmp.ge.s32.totalorder %v3373_v7, 18  ;;  %v14395_v15 = vadd.s32 4294967278, %v14378_v22  ;;  %v8079_v49 = vld [vmem:[#allocation2 + $0x90] sm:$0xc] }
 0x1dd   : > { %vm3482_vm6 = vcmp.ge.s32.totalorder %v3466_v50, 18  ;;  %v9761_v43 = vadd.s32 4294967278, %v3466_v50  ;;  %v14392_v45 = vpop.f32.mrb[6].mxu1  ;;  %11475 = vmatpush3.bf16.msra.mxu1 %v12482_v46  ;;  %v14398_v11 = vsel %vm3628_vm3, %v9811_v47, %v3612_v38  ;;  %v9732_v62 = vadd.s32 4294967278, %v3373_v7  ;;  %11727 = vmatpush3.bf16.msra.mxu0 %v12478_v35 }
 0x1de   : > { %v3371_v44 = vsel %vm3339_vm4, %v9714_v0, %v3323_v57  ;;  %v14401_v42 = vpop.f32.mrb[7].mxu1  ;;  %11492 = vmatprep.subr.bf16.mxu1 %v12488_v55  ;;  %v5606_v6 = vshll.u32 %v14147_v23, 16  ;;  %11728 = vmatprep.subr.bf16.mxu0 %v12481_v29  ;;  %v14405_v46 = vsel %vm3673_vm2, %v9824_v16, %v3657_v33  ;;  %v14410_v57 = vadd.s32 4294967278, %v14398_v11  ;;  %v12489_v23 = vld [vmem:[#allocation8 + $0x180] sm:$0xff]   ;;  %v8080_v0 = vld [vmem:[#allocation2 + $0x94] sm:$0xf] }
 0x1df   : > { %v3514_v61 = vsel %vm3482_vm6, %v9761_v43, %v3466_v50  ;;  %vm3387_vm9 = vcmp.ge.s32.totalorder %v3371_v44, 18  ;;  %v9730_v51 = vadd.s32 4294967278, %v3371_v44  ;;  %v3421_v38 = vsel %vm3389_vm8, %v9732_v62, %v3373_v7 }
 0x1e0   : > { %vm3530_vm11 = vcmp.ge.s32.totalorder %v3514_v61, 18  ;;  %v9777_v21 = vadd.s32 4294967278, %v3514_v61  ;;  %11477 = vmatmul.mubr.bf16.vlgmr.msra.gmra.mrb[16].mxu1 %v14237_v37  ;;  %vm3437_vm14 = vcmp.ge.s32.totalorder %v3421_v38, 18  ;;  %v9748_v35 = vadd.s32 4294967278, %v3421_v38  ;;  %11713 = vmatmul.mubr.bf16.gmra.mrb[76].mxu0 %v14224_v52  ;;  %v12494_v37 = vld [vmem:[#allocation8 + $0x1d0] sm:$0xff]  }
 0x1e1   : > { %v3419_v1 = vsel %vm3387_vm9, %v9730_v51, %v3371_v44  ;;  %11493 = vmatpush3.bf16.msra.mxu1 %v12488_v55  ;;  %v5611_v31 = vshrl.u32 %v14133_v27, 16  ;;  %11729 = vmatpush3.bf16.msra.mxu0 %v12481_v29  ;;  %v5614_v50 = vshll.u32 %v14133_v27, 16  ;;  %vm3676_vm1 = vcmp.ge.s32.totalorder %v14398_v11, 18 }
 0x1e2   : > { %v3562_v47 = vsel %vm3530_vm11, %v9777_v21, %v3514_v61  ;;  %vm3435_vm15 = vcmp.ge.s32.totalorder %v3419_v1, 18  ;;  %v9746_v33 = vadd.s32 4294967278, %v3419_v1  ;;  %11732 = vmatprep.mubr.bf16.mxu0 %v14083_v2  ;;  %v3469_v16 = vsel %vm3437_vm14, %v9748_v35, %v3421_v38  ;;  %11730 = vmatprep.subr.bf16.mxu0 %v14390_v25  ;;  %v12491_v61 = vld [vmem:[#allocation8 + $0x188] sm:$0xff]   ;;  %v12496_v21 = vld [vmem:[#allocation8 + $0x1d8] sm:$0xff]  }
 0x1e3   : > { %vm3578_vm0 = vcmp.ge.s32.totalorder %v3562_v47, 18  ;;  %v9793_v7 = vadd.s32 4294967278, %v3562_v47  ;;  %v14418_v52 = vpop.f32.mrb[8].mxu1  ;;  %11494 = vmatprep.subr.bf16.mxu1 %v12490_v60  ;;  %vm3485_vm3 = vcmp.ge.s32.totalorder %v3469_v16, 18  ;;  %v9764_v55 = vadd.s32 4294967278, %v3469_v16  ;;  %11480 = vmatprep.mubr.bf16.mxu1 %v14257_v30 }
 0x1e4   : > { %v3467_v29 = vsel %vm3435_vm15, %v9746_v33, %v3419_v1  ;;  %v14422_v43 = vrot.slane %v5606_v6, 3  ;;  %v14424_v2 = vpop.f32.mrb[9].mxu1  ;;  %v14427_v44 = vcombine.low %v8079_v49, %v8080_v0  ;;  %v5613_v6 = vrot.slane %v5611_v31, 2  ;;  %v14432_v1 = vld [vmem:[#allocation2 + $0x98] sm:$0xff]  }
 0x1e5   : > { %v3610_v62 = vsel %vm3578_vm0, %v9793_v7, %v3562_v47  ;;  %vm3483_vm4 = vcmp.ge.s32.totalorder %v3467_v29, 18  ;;  %v9762_v27 = vadd.s32 4294967278, %v3467_v29  ;;  %v14429_v51 = vpop.f32.mrb[10].mxu1  ;;  %11495 = vmatpush3.bf16.msra.mxu1 %v12490_v60  ;;  %v3517_v35 = vsel %vm3485_vm3, %v9764_v55, %v3469_v16  ;;  %11731 = vmatpush3.bf16.msra.mxu0 %v14390_v25  ;;  %v14446_v55 = vld [vmem:[#allocation2 + $0xa0] sm:$0xff]  }
 0x1e6   : > { %vm3626_vm2 = vcmp.ge.s32.totalorder %v3610_v62, 18  ;;  %v9809_v38 = vadd.s32 4294967278, %v3610_v62  ;;  %v14435_v30 = vpop.f32.mrb[11].mxu1  ;;  %11496 = vmatprep.subr.bf16.mxu1 %v12494_v37  ;;  %vm3533_vm6 = vcmp.ge.s32.totalorder %v3517_v35, 18  ;;  %v9780_v49 = vadd.s32 4294967278, %v3517_v35  ;;  %11748 = vmatprep.subr.bf16.mxu0 %v12489_v23 }
 0x1e7   : > { %v3515_v47 = vsel %vm3483_vm4, %v9762_v27, %v3467_v29  ;;  %v5616_v33 = vrot.slane %v5614_v50, 3  ;;  %v14442_v60 = vsel %vm3671_vm5, %v14395_v15, %v14378_v22  ;;  %v8155_v16 = vrot.slane %v14427_v44, 2  ;;  %v12500_v50 = vld [vmem:[#allocation8 + $0x1e0] sm:$0xff]  }
 0x1e8   : > { %v3658_v31 = vsel %vm3626_vm2, %v9809_v38, %v3610_v62  ;;  %vm3531_vm8 = vcmp.ge.s32.totalorder %v3515_v47, 18  ;;  %v9778_v0 = vadd.s32 4294967278, %v3515_v47  ;;  %11481 = vmatmul.mubr.bf16.gmra.mrb[20].mxu1 %v14292_v20  ;;  %v3565_v7 = vsel %vm3533_vm6, %v9780_v49, %v3517_v35  ;;  %11733 = vmatmul.mubr.bf16.vlgmr.msra.gmra.mrb[16].mxu0 %v14076_v14  ;;  %v12495_v38 = vld [vmem:[#allocation8 + $0x190] sm:$0xff]  }
 0x1e9   : > { %vm3674_vm9 = vcmp.ge.s32.totalorder %v3658_v31, 18  ;;  %v9825_v25 = vadd.s32 4294967278, %v3658_v31  ;;  %11497 = vmatpush3.bf16.msra.mxu1 %v12494_v37  ;;  %vm3581_vm11 = vcmp.ge.s32.totalorder %v3565_v7, 18  ;;  %v9796_v29 = vadd.s32 4294967278, %v3565_v7  ;;  %11749 = vmatpush3.bf16.msra.mxu0 %v12489_v23 }
 0x1ea   : > { %v3563_v22 = vsel %vm3531_vm8, %v9778_v0, %v3515_v47  ;;  %v5620_v15 = vshrl.u32 %v14149_v3, 16  ;;  %11736 = vmatprep.mubr.bf16.mxu0 %v14090_v41  ;;  %v5609_v62 = vor.u32 %v14422_v43, %v14384_v28  ;;  %v5617_v27 = vor.u32 %v5616_v33, %v5613_v6  ;;  %11750 = vmatprep.subr.bf16.mxu0 %v12491_v61 }
 0x1eb   : > { %vm3579_vm5 = vcmp.ge.s32.totalorder %v3563_v22, 18  ;;  %v9794_v20 = vadd.s32 4294967278, %v3563_v22  ;;  %v14453_v35 = vpop.f32.mrb[12].mxu1  ;;  %11498 = vmatprep.subr.bf16.mxu1 %v12496_v21  ;;  %v3613_v14 = vsel %vm3581_vm11, %v9796_v29, %v3565_v7  ;;  %v8156_v37 = vrot.slane %v14432_v1, 2  ;;  %11484 = vmatprep.mubr.bf16.mxu1 %v14299_v39 }
 0x1ec   : > { %v5622_v49 = vrot.slane %v5620_v15, 2  ;;  %v5623_v47 = vshll.u32 %v14149_v3, 16  ;;  %v14457_v23 = vpop.f32.mrb[13].mxu1  ;;  %vm3629_vm14 = vcmp.ge.s32.totalorder %v3613_v14, 18  ;;  %v9812_v41 = vadd.s32 4294967278, %v3613_v14  ;;  %v12497_v3 = vld [vmem:[#allocation8 + $0x198] sm:$0xff]  }
 0x1ed   : > { %v3611_v28 = vsel %vm3579_vm5, %v9794_v20, %v3563_v22  ;;  %v14462_v6 = vpop.f32.mrb[14].mxu1  ;;  %11499 = vmatpush3.bf16.msra.mxu1 %v12496_v21  ;;  %v14465_v1 = vadd.s32 80, %v14156_v9  ;;  %11751 = vmatpush3.bf16.msra.mxu0 %v12491_v61  ;;  %v14473_v39 = vsel %vm3676_vm1, %v14410_v57, %v14398_v11  ;;  %v14476_v21 = vadd.s32 64, %v14156_v9  ;;  %v12502_v15 = vld [vmem:[#allocation8 + $0x1e8] sm:$0xff]  }
 0x1ee   : > { %vm3627_vm15 = vcmp.ge.s32.totalorder %v3611_v28, 18  ;;  %v9810_v33 = vadd.s32 4294967278, %v3611_v28  ;;  %v5625_v0 = vrot.slane %v5623_v47, 3  ;;  %v14467_v7 = vpop.f32.mrb[15].mxu1  ;;  %11500 = vmatprep.subr.bf16.mxu1 %v12500_v50  ;;  %v3661_v29 = vsel %vm3629_vm14, %v9812_v41, %v3613_v14  ;;  %11752 = vmatprep.subr.bf16.mxu0 %v12495_v38  ;;  %v12506_v41 = vld [vmem:[#allocation8 + $0x1f0] sm:$0xff]  }
 0x1ef   : > { %15241 = vst [vmem:[#allocation19_spill] sm:$0xff] %v14476_v21  ;;  %v14479_v22 = vadd.s32 88, %v14156_v9  ;;  %v14482_v61 = vsel %vm3674_vm9, %v9825_v25, %v3658_v31  ;;  %v9828_v20 = vadd.s32 4294967278, %v3661_v29  ;;  %v14486_v43 = vsel %vm2818_vm12, %v5609_v62, %v5617_v27 }
 0x1f0   : > { %v3659_v47 = vsel %vm3627_vm15, %v9810_v33, %v3611_v28  ;;  %11485 = vmatmul.mubr.bf16.gmra.mrb[24].mxu1 %v14306_v56  ;;  %vm3677_vm0 = vcmp.ge.s32.totalorder %v3661_v29, 18  ;;  %v14489_v11 = vor.u32 %v5625_v0, %v5622_v49  ;;  %v3328_v57 = vadd.s32 %v14241_v4, %v14465_v1  ;;  %11737 = vmatmul.mubr.bf16.gmra.mrb[80].mxu0 %v14097_v36 }
 0x1f1   : > { %15242 = vst [vmem:[#allocation20_spill] sm:$0xff] %v14479_v22  ;;  %v3326_v14 = vadd.s32 %v14241_v4, %v14476_v21  ;;  %11501 = vmatpush3.bf16.msra.mxu1 %v12500_v50  ;;  %v14497_v31 = vsel %vm2347_vm10, %v8155_v16, %v8156_v37  ;;  %v15243_v25 = vrot.slane %v14446_v55, 2  ;;  %v3329_v56 = vadd.s32 %v14241_v4, %v14479_v22  ;;  %v12501_v50 = vld [vmem:[#allocation8 + $0x1a0] sm:$0xff]  }
 0x1f2   : > { %v14507_v49 = vadd.s32 72, %v14156_v9  ;;  %11753 = vmatpush3.bf16.msra.mxu0 %v12495_v38  ;;  %11740 = vmatprep.mubr.bf16.mxu0 %v14108_v12  ;;  %vm3675_vm1 = vcmp.ge.s32.totalorder %v3659_v47, 18  ;;  %v9826_v36 = vadd.s32 4294967278, %v3659_v47  ;;  %vm3344_vm3 = vcmp.ge.s32.totalorder %v3328_v57, 18 }
 0x1f3   : > { %v14502_v62 = vsel %vm2347_vm10, %v8156_v37, %v15243_v25  ;;  %v9719_v16 = vadd.s32 4294967278, %v3328_v57  ;;  %11754 = vmatprep.subr.bf16.mxu0 %v12497_v3  ;;  %11502 = vmatprep.subr.bf16.mxu1 %v12502_v15  ;;  %v14511_v37 = vsel %vm3677_vm0, %v9828_v20, %v3661_v29  ;;  %vm3342_vm4 = vcmp.ge.s32.totalorder %v3326_v14, 18  ;;  %v14520_v29 = vld [vmem:[#allocation2 + $0x68] sm:$0xff]  }
 0x1f4   : > { %15244 = vst [vmem:[#allocation21_spill] sm:$0xff] %v14507_v49  ;;  %v9717_v28 = vadd.s32 4294967278, %v3326_v14  ;;  %vm3345_vm2 = vcmp.ge.s32.totalorder %v3329_v56, 18  ;;  %11488 = vmatprep.mubr.bf16.mxu1 %v14315_v26  ;;  %v14516_v38 = vsel %vm2818_vm12, %v5617_v27, %v14489_v11  ;;  %v9720_v33 = vadd.s32 4294967278, %v3329_v56 }
 0x1f5   : > { %v3376_v12 = vsel %vm3344_vm3, %v9719_v16, %v3328_v57  ;;  %v3327_v0 = vadd.s32 %v14241_v4, %v14507_v49  ;;  %11503 = vmatpush3.bf16.msra.mxu1 %v12502_v15  ;;  %v5629_v20 = vshrl.u32 %v14520_v29, 16  ;;  %vm3737_vm8 = vcmp.lt.s32.totalorder %v14368_v53, 16  ;;  %v12503_v15 = vld [vmem:[#allocation8 + $0x1a8] sm:$0xff]   ;;  %v12508_v57 = vld [vmem:[#allocation8 + $0x1f8] sm:$0xff]  }
 0x1f6   : > { %vm3392_vm6 = vcmp.ge.s32.totalorder %v3376_v12, 18  ;;  %v9735_v25 = vadd.s32 4294967278, %v3376_v12  ;;  %v3374_v22 = vsel %vm3342_vm4, %v9717_v28, %v3326_v14  ;;  %11755 = vmatpush3.bf16.msra.mxu0 %v12497_v3  ;;  %11504 = vmatprep.subr.bf16.mxu1 %v12506_v41  ;;  %v3377_v27 = vsel %vm3345_vm2, %v9720_v33, %v3329_v56 }
 0x1f7   : > { %vm3390_vm9 = vcmp.ge.s32.totalorder %v3374_v22, 18  ;;  %v9733_v26 = vadd.s32 4294967278, %v3374_v22  ;;  %vm3343_vm11 = vcmp.ge.s32.totalorder %v3327_v0, 18  ;;  %11756 = vmatprep.subr.bf16.mxu0 %v12501_v50  ;;  %vm3735_vm5 = vcmp.lt.s32.totalorder %v14371_v13, 16 }
 0x1f8   : > { %v3424_v14 = vsel %vm3392_vm6, %v9735_v25, %v3376_v12  ;;  %vm3393_vm14 = vcmp.ge.s32.totalorder %v3377_v27, 18  ;;  %v9736_v16 = vadd.s32 4294967278, %v3377_v27  ;;  %v9718_v28 = vadd.s32 4294967278, %v3327_v0  ;;  %11489 = vmatmul.mubr.bf16.gmra.mrb[28].mxu1 %v14330_v17  ;;  %11741 = vmatmul.mubr.bf16.gmra.mrb[84].mxu0 %v14117_v10  ;;  %v12512_v17 = vld [vmem:[#allocation8 + $0x200] sm:$0xff]   ;;  %v12507_v10 = vld [vmem:[#allocation8 + $0x1b0] sm:$0xff]  }
 0x1f9   : > { %vm3738_vm15 = vcmp.lt.s32.totalorder %v14405_v46, 16  ;;  %v14530_v3 = vsel %vm3675_vm1, %v9826_v36, %v3659_v47  ;;  %vm3440_vm0 = vcmp.ge.s32.totalorder %v3424_v14, 18  ;;  %v9751_v56 = vadd.s32 4294967278, %v3424_v14  ;;  %11505 = vmatpush3.bf16.msra.mxu1 %v12506_v41  ;;  %11744 = vmatprep.mubr.bf16.mxu0 %v14231_v40 }
 0x1fa   : > { %v3422_v33 = vsel %vm3390_vm9, %v9733_v26, %v3374_v22  ;;  %vm3736_vm3 = vcmp.lt.s32.totalorder %v14442_v60, 16  ;;  %v3425_v25 = vsel %vm3393_vm14, %v9736_v16, %v3377_v27  ;;  %v14536_v49 = vsel %vm3343_vm11, %v9718_v28, %v3327_v0  ;;  %11757 = vmatpush3.bf16.msra.mxu0 %v12501_v50  ;;  %11506 = vmatprep.subr.bf16.mxu1 %v12508_v57  ;;  %v14546_v50 = vld [vmem:[%s15173_s3] ss:$0 sm:$0xff] }
 0x1fb   : > { %vm3438_vm4 = vcmp.ge.s32.totalorder %v3422_v33, 18  ;;  %v9749_v12 = vadd.s32 4294967278, %v3422_v33  ;;  %v3472_v47 = vsel %vm3440_vm0, %v9751_v56, %v3424_v14  ;;  %vm3441_vm1 = vcmp.ge.s32.totalorder %v3425_v25, 18  ;;  %11758 = vmatprep.subr.bf16.mxu0 %v12503_v15  ;;  %v11254_v40 = vpop.f32.mrb[0].mxu0  ;;  %11508 = vmatprep.mubr.bf16.mxu1 %v14486_v43 }
 0x1fc   : > { %v9752_v36 = vadd.s32 4294967278, %v3425_v25  ;;  %vm3488_vm2 = vcmp.ge.s32.totalorder %v3472_v47, 18  ;;  %v9767_v41 = vadd.s32 4294967278, %v3472_v47  ;;  %v14541_v27 = vrot.slane %v5629_v20, 2  ;;  %v3197_v56 = vpop.f32.mrb[1].mxu0 }
 0x1fd   : > { %v3470_v26 = vsel %vm3438_vm4, %v9749_v12, %v3422_v33  ;;  %v14550_v16 = vadd.s32 4294967278, %v14536_v49  ;;  %v11860_v28 = vadd.f32 %v11254_v40, %v14350_v32  ;;  %11507 = vmatpush3.bf16.msra.mxu1 %v12508_v57  ;;  %v11861_v12 = vadd.f32 %v3197_v56, %v14352_v5  ;;  %v11255_v22 = vpop.f32.mrb[2].mxu0  ;;  %v12509_v57 = vld [vmem:[#allocation8 + $0x1b8] sm:$0xff]  }
 0x1fe   : > { %vm3486_vm6 = vcmp.ge.s32.totalorder %v3470_v26, 18  ;;  %v9765_v0 = vadd.s32 4294967278, %v3470_v26  ;;  %v3473_v14 = vsel %vm3441_vm1, %v9752_v36, %v3425_v25  ;;  %v3520_v20 = vsel %vm3488_vm2, %v9767_v41, %v3472_v47  ;;  %11759 = vmatpush3.bf16.msra.mxu0 %v12503_v15  ;;  %11524 = vmatprep.subr.bf16.mxu1 %v12512_v17  ;;  %v3200_v32 = vpop.f32.mrb[3].mxu0  ;;  %v12515_v15 = vld [vmem:[#allocation8 + $0x208] sm:$0xff]  }
 0x1ff   : > { %vm3489_vm9 = vcmp.ge.s32.totalorder %v3473_v14, 18  ;;  %v9768_v33 = vadd.s32 4294967278, %v3473_v14  ;;  %vm3536_vm11 = vcmp.ge.s32.totalorder %v3520_v20, 18  ;;  %v9783_v43 = vadd.s32 4294967278, %v3520_v20  ;;  %11760 = vmatprep.subr.bf16.mxu0 %v12507_v10 }
 0x200   : > { %v3518_v25 = vsel %vm3486_vm6, %v9765_v0, %v3470_v26  ;;  %v3284_v36 = vadd.f32 %v11860_v28, %v14546_v50  ;;  %v11862_v21 = vadd.f32 %v11255_v22, %v14359_v54  ;;  %vm3741_vm14 = vcmp.lt.s32.totalorder %v14473_v39, 16  ;;  %11509 = vmatmul.mubr.bf16.vlgmr.msra.gmra.mrb[16].mxu1 %v14516_v38  ;;  %11745 = vmatmul.mubr.bf16.gmra.mrb[88].mxu0 %v14335_v19 }
 0x201   : > { %vm3739_vm0 = vcmp.lt.s32.totalorder %v14482_v61, 16  ;;  %vm3534_vm4 = vcmp.ge.s32.totalorder %v3518_v25, 18  ;;  %v9781_v5 = vadd.s32 4294967278, %v3518_v25  ;;  %v3282_v47 = vadd.f32 %v11861_v12, %v14546_v50  ;;  %11525 = vmatpush3.bf16.msra.mxu1 %v12512_v17  ;;  %11764 = vmatprep.mubr.bf16.mxu0 %v14497_v31  ;;  %v14609_v61 = vld [vmem:[#allocation2 + $0xa8] sm:$0xff]  }
 0x202   : > { %v11863_v41 = vadd.f32 %v3200_v32, %v14361_v59  ;;  %vm3742_vm1 = vcmp.lt.s32.totalorder %v14511_v37, 16  ;;  %v3568_v54 = vsel %vm3536_vm11, %v9783_v43, %v3520_v20  ;;  %v3521_v22 = vsel %vm3489_vm9, %v9768_v33, %v3473_v14  ;;  %11761 = vmatpush3.bf16.msra.mxu0 %v12507_v10  ;;  %v12518_v14 = vld [vmem:[#allocation8 + $0x210] sm:$0xff]   ;;  %11526 = vmatprep.subr.bf16.mxu1 %v12515_v15 }
 0x203   : > { %vm3391_vm2 = vcmp.ge.s32.totalorder %v14536_v49, 18  ;;  %v3817_v26 = vsel %vm3737_vm8, %v3284_v36, 0.0  ;;  %v3285_v40 = vadd.f32 %v11862_v21, %v14546_v50  ;;  %vm3740_vm6 = vcmp.lt.s32.totalorder %v14530_v3, 16  ;;  %11762 = vmatprep.subr.bf16.mxu0 %v12509_v57  ;;  %v12514_v21 = vld [vmem:[#allocation8 + $0x1c0] sm:$0xff]   ;;  %v11258_v56 = vpop.f32.mrb[4].mxu0 }
 0x204   : > { %vm3584_vm13 = vcmp.ge.s32.totalorder %v3568_v54, 18  ;;  %v9799_v59 = vadd.s32 4294967278, %v3568_v54  ;;  %v3815_v38 = vsel %vm3735_vm5, %v3282_v47, 0.0  ;;  %v3283_v0 = vadd.f32 %v11863_v41, %v14546_v50  ;;  %v3213_v12 = vpop.f32.mrb[5].mxu0 }
 0x205   : > { %v3566_v53 = vsel %vm3534_vm4, %v9781_v5, %v3518_v25  ;;  %vm3537_vm8 = vcmp.ge.s32.totalorder %v3521_v22, 18  ;;  %v3818_v19 = vsel %vm3738_vm15, %v3285_v40, 0.0  ;;  %v11864_v33 = vadd.f32 %v11258_v56, %v14382_v58  ;;  %11527 = vmatpush3.bf16.msra.mxu1 %v12515_v15  ;;  %v11259_v60 = vpop.f32.mrb[6].mxu0  ;;  %v12521_v5 = vld [vmem:[#allocation8 + $0x218] sm:$0xff]  }
 0x206   : > { %v3616_v17 = vsel %vm3584_vm13, %v9799_v59, %v3568_v54  ;;  %vm3582_vm9 = vcmp.ge.s32.totalorder %v3566_v53, 18  ;;  %v9797_v28 = vadd.s32 4294967278, %v3566_v53  ;;  %v10449_v13 = vpack.c.bf16 %v3818_v19, %v3817_v26  ;;  %11763 = vmatpush3.bf16.msra.mxu0 %v12509_v57  ;;  %11528 = vmatprep.subr.bf16.mxu1 %v12518_v14  ;;  %v3216_v47 = vpop.f32.mrb[7].mxu0  ;;  %v12516_v54 = vld [vmem:[#allocation8 + $0x1c8] sm:$0xff]  }
 0x207   : > { %v3816_v10 = vsel %vm3736_vm3, %v3283_v0, 0.0  ;;  %vm3632_vm5 = vcmp.ge.s32.totalorder %v3616_v17, 18  ;;  %v9815_v31 = vadd.s32 4294967278, %v3616_v17  ;;  %v9784_v43 = vadd.s32 4294967278, %v3521_v22  ;;  %11780 = vmatprep.subr.bf16.mxu0 %v12514_v21 }
 0x208   : > { %v10444_v20 = vpack.c.bf16 %v3816_v10, %v3815_v38  ;;  %v3614_v46 = vsel %vm3582_vm9, %v9797_v28, %v3566_v53  ;;  %10531 = vst [vmem:[%s14584_s21 + $0x8] sm:$0xff] %v10449_v13   ;;  %v11865_v25 = vadd.f32 %v3213_v12, %v14386_v8  ;;  %v3288_v58 = vadd.f32 %v11864_v33, %v14546_v50 }
 0x209   : > { %v3664_v36 = vsel %vm3632_vm5, %v9815_v31, %v3616_v17  ;;  %vm3630_vm13 = vcmp.ge.s32.totalorder %v3614_v46, 18  ;;  %v9813_v32 = vadd.s32 4294967278, %v3614_v46  ;;  %v11866_v15 = vadd.f32 %v11259_v60, %v14392_v45  ;;  %11765 = vmatmul.mubr.bf16.vlgmr.msra.gmra.mrb[16].mxu0 %v14502_v62  ;;  %11529 = vmatpush3.bf16.msra.mxu1 %v12518_v14  ;;  %v12524_v17 = vld [vmem:[#allocation8 + $0x220] sm:$0xff]   ;;  %v12520_v14 = vld [vmem:[#allocation8 + $0x1d0] sm:$0xff]  }
 0x20a   : > { %10445 = vst [vmem:[%s14584_s21] sm:$0xff] %v10444_v20   ;;  %vm3680_vm15 = vcmp.ge.s32.totalorder %v3664_v36, 18  ;;  %v9831_v41 = vadd.s32 4294967278, %v3664_v36  ;;  %v3286_v26 = vadd.f32 %v11865_v25, %v14546_v50  ;;  %v11867_v8 = vadd.f32 %v3216_v47, %v14401_v42  ;;  %11781 = vmatpush3.bf16.msra.mxu0 %v12514_v21  ;;  %11530 = vmatprep.subr.bf16.mxu1 %v12521_v5 }
 0x20b   : > { %v3662_v57 = vsel %vm3630_vm13, %v9813_v32, %v3614_v46  ;;  %v3569_v40 = vsel %vm3537_vm8, %v9784_v43, %v3521_v22  ;;  %v3289_v59 = vadd.f32 %v11866_v15, %v14546_v50  ;;  %v15245_v45 = vshll.u32 %v14520_v29, 16  ;;  %11782 = vmatprep.subr.bf16.mxu0 %v12516_v54  ;;  %v11262_v10 = vpop.f32.mrb[8].mxu0  ;;  %v12527_v46 = vld [vmem:[#allocation8 + $0x228] sm:$0xff]  }
 0x20c   : > { %v3712_v38 = vsel %vm3680_vm15, %v9831_v41, %v3664_v36  ;;  %vm3678_vm3 = vcmp.ge.s32.totalorder %v3662_v57, 18  ;;  %v3821_v53 = vsel %vm3741_vm14, %v3288_v58, 0.0  ;;  %v3819_v19 = vsel %vm3739_vm0, %v3286_v26, 0.0  ;;  %v3229_v20 = vpop.f32.mrb[9].mxu0  ;;  %v15246_v32 = vld [vmem:[#allocation16_spill] sm:$0xff] }
 0x20d   : > { %v5634_v0 = vrot.slane %v15245_v45, 3  ;;  %v3287_v42 = vadd.f32 %v11867_v8, %v14546_v50  ;;  %v9829_v22 = vadd.s32 4294967278, %v3662_v57  ;;  %v3822_v62 = vsel %vm3742_vm1, %v3289_v59, 0.0  ;;  %11531 = vmatpush3.bf16.msra.mxu1 %v12521_v5  ;;  %v14629_v41 = vld [vmem:[#allocation2 + $0xb0] sm:$0xff]  }
 0x20e   : > { %vm3585_vm11 = vcmp.ge.s32.totalorder %v3569_v40, 18  ;;  %v9800_v28 = vadd.s32 4294967278, %v3569_v40  ;;  %v3423_v39 = vsel %vm3391_vm2, %v14550_v16, %v14536_v49  ;;  %v10459_v13 = vpack.c.bf16 %v3822_v62, %v3821_v53  ;;  %v11263_v16 = vpop.f32.mrb[10].mxu0  ;;  %11783 = vmatpush3.bf16.msra.mxu0 %v12516_v54  ;;  %11532 = vmatprep.subr.bf16.mxu1 %v12524_v17  ;;  %v12526_v53 = vld [vmem:[#allocation8 + $0x1e0] sm:$0xff]  }
 0x20f   : > { %v3820_v21 = vsel %vm3740_vm6, %v3287_v42, 0.0  ;;  %vm3745_vm14 = vcmp.lt.s32.totalorder %v3712_v38, 16  ;;  %v14614_v37 = vsel %vm3678_vm3, %v9829_v22, %v3662_v57  ;;  %v11868_v31 = vadd.f32 %v11262_v10, %v14418_v52  ;;  %v3232_v52 = vpop.f32.mrb[11].mxu0  ;;  %11784 = vmatprep.subr.bf16.mxu0 %v12520_v14 }
 0x210   : > { %v10454_v56 = vpack.c.bf16 %v3820_v21, %v3819_v19  ;;  %v3617_v33 = vsel %vm3585_vm11, %v9800_v28, %v3569_v40  ;;  %vm3439_vm0 = vcmp.ge.s32.totalorder %v3423_v39, 18  ;;  %10533 = vst [vmem:[%s14584_s21 + $0x18] sm:$0xff] %v10459_v13   ;;  %v11869_v49 = vadd.f32 %v3229_v20, %v14424_v2  ;;  %v12522_v2 = vld [vmem:[#allocation8 + $0x1d8] sm:$0xff]  }
 0x211   : > { %vm3633_vm4 = vcmp.ge.s32.totalorder %v3617_v33, 18  ;;  %v9816_v3 = vadd.s32 4294967278, %v3617_v33  ;;  %v9750_v12 = vadd.s32 4294967278, %v3423_v39  ;;  %v3292_v43 = vadd.f32 %v11868_v31, %v14546_v50  ;;  %11533 = vmatpush3.bf16.msra.mxu1 %v12524_v17 }
 0x212   : > { %10532 = vst [vmem:[%s14584_s21 + $0x10] sm:$0xff] %v10454_v56   ;;  %v11870_v25 = vadd.f32 %v11263_v16, %v14429_v51  ;;  %v14623_v60 = vor.u32 %v5634_v0, %v14541_v27  ;;  %v8160_v36 = vrot.slane %v14609_v61, 2  ;;  %v988_v5 = vrot.slane %v15246_v32, 4  ;;  %11785 = vmatpush3.bf16.msra.mxu0 %v12520_v14  ;;  %11534 = vmatprep.subr.bf16.mxu1 %v12527_v46  ;;  %v14641_v0 = vld [vmem:[#allocation2 + $0x70] sm:$0xff]   ;;  %v12534_v56 = vld [vmem:[#allocation8 + $0x238] sm:$0xff]  }
 0x213   : > { %v3665_v58 = vsel %vm3633_vm4, %v9816_v3, %v3617_v33  ;;  %v11871_v15 = vadd.f32 %v3232_v52, %v14435_v30  ;;  %v3471_v47 = vsel %vm3439_vm0, %v9750_v12, %v3423_v39  ;;  %vm3743_vm1 = vcmp.lt.s32.totalorder %v14614_v37, 16  ;;  %v12531_v30 = vld [vmem:[#allocation8 + $0x230] sm:$0xff]   ;;  %11786 = vmatprep.subr.bf16.mxu0 %v12522_v2  ;;  %v11266_v17 = vpop.f32.mrb[12].mxu0  ;;  %v12528_v3 = vld [vmem:[#allocation8 + $0x1e8] sm:$0xff]   ;;  %v12562_v32 = vld [vmem:[#allocation2 + $0x60] sm:$0xff]  }
 0x214   : > { %v3293_v51 = vadd.f32 %v11870_v25, %v14546_v50  ;;  %vm3681_vm2 = vcmp.ge.s32.totalorder %v3665_v58, 18  ;;  %v9832_v27 = vadd.s32 4294967278, %v3665_v58  ;;  %v3825_v54 = vsel %vm3745_vm14, %v3292_v43, 0.0  ;;  %v3245_v28 = vpop.f32.mrb[13].mxu0 }
 0x215   : > { %v3290_v26 = vadd.f32 %v11869_v49, %v14546_v50  ;;  %vm3487_vm6 = vcmp.ge.s32.totalorder %v3471_v47, 18  ;;  %v9766_v8 = vadd.s32 4294967278, %v3471_v47  ;;  %v5636_v40 = vsel %vm2818_vm12, %v14489_v11, %v14623_v60  ;;  %11535 = vmatpush3.bf16.msra.mxu1 %v12527_v46  ;;  %v11267_v10 = vpop.f32.mrb[14].mxu0 }
 0x216   : > { %v3713_v57 = vsel %vm3681_vm2, %v9832_v27, %v3665_v58  ;;  %v15247_v59 = vrot.slane %v14446_v55, 2  ;;  %v5638_v38 = vshrl.u32 %v14641_v0, 16  ;;  %11512 = vmatprep.mubr.bf16.mxu1 %v5636_v40  ;;  %v5641_v42 = vshll.u32 %v14641_v0, 16  ;;  %11787 = vmatpush3.bf16.msra.mxu0 %v12522_v2  ;;  %v3248_v16 = vpop.f32.mrb[15].mxu0 }
 0x217   : > { %vm3746_vm8 = vcmp.lt.s32.totalorder %v3713_v57, 16  ;;  %v3519_v19 = vsel %vm3487_vm6, %v9766_v8, %v3471_v47  ;;  %v8162_v22 = vrot.slane %v14629_v41, 2  ;;  %v11872_v21 = vadd.f32 %v11266_v17, %v14453_v35  ;;  %11536 = vmatprep.subr.bf16.mxu1 %v12531_v30  ;;  %11788 = vmatprep.subr.bf16.mxu0 %v12526_v53 }
 0x218   : > { %v8161_v45 = vsel %vm2347_vm10, %v15247_v59, %v8160_v36  ;;  %v3826_v11 = vsel %vm3746_vm8, %v3293_v51, 0.0  ;;  %vm3535_vm9 = vcmp.ge.s32.totalorder %v3519_v19, 18  ;;  %v9782_v55 = vadd.s32 4294967278, %v3519_v19  ;;  %v12533_v51 = vld [vmem:[#allocation8 + $0x1f0] sm:$0xff]  }
 0x219   : > { %11768 = vmatprep.mubr.bf16.mxu0 %v8161_v45  ;;  %v5640_v62 = vrot.slane %v5638_v38, 2  ;;  %v10469_v39 = vpack.c.bf16 %v3826_v11, %v3825_v54  ;;  %v5643_v14 = vrot.slane %v5641_v42, 3  ;;  %v8163_v13 = vsel %vm2347_vm10, %v8160_v36, %v8162_v22  ;;  %11537 = vmatpush3.bf16.msra.mxu1 %v12531_v30 }
 0x21a   : > { %v3567_v31 = vsel %vm3535_vm9, %v9782_v55, %v3519_v19  ;;  %11769 = vmatmul.mubr.bf16.gmra.mrb[92].mxu0 %v8163_v13  ;;  %v14651_v20 = vadd.s32 112, %v14156_v9  ;;  %v11873_v33 = vadd.f32 %v3245_v28, %v14457_v23  ;;  %v14655_v49 = vadd.s32 96, %v14156_v9  ;;  %11538 = vmatprep.subr.bf16.mxu1 %v12534_v56 }
 0x21b   : > { %v14659_v35 = vsel %vm3743_vm1, %v3290_v26, 0.0  ;;  %10535 = vst [vmem:[%s14584_s21 + $0x28] sm:$0xff] %v10469_v39   ;;  %vm3583_vm5 = vcmp.ge.s32.totalorder %v3567_v31, 18  ;;  %v9798_v12 = vadd.s32 4294967278, %v3567_v31  ;;  %v14662_v46 = vor.u32 %v5643_v14, %v5640_v62  ;;  %11789 = vmatpush3.bf16.msra.mxu0 %v12526_v53  ;;  %v12535_v53 = vld [vmem:[#allocation8 + $0x1f8] sm:$0xff]  }
 0x21c   : > { %v3291_v43 = vadd.f32 %v11871_v15, %v14546_v50  ;;  %v3332_v23 = vadd.s32 %v14241_v4, %v14651_v20  ;;  %v3330_v25 = vadd.s32 %v14241_v4, %v14655_v49  ;;  %v14670_v52 = vadd.f32 %v11267_v10, %v14462_v6  ;;  %v14681_v15 = vld [vmem:[#allocation8 + $0x200] sm:$0xff]   ;;  %11790 = vmatprep.subr.bf16.mxu0 %v12528_v3 }
 0x21d   : > { %v3615_v37 = vsel %vm3583_vm5, %v9798_v12, %v3567_v31  ;;  %v5645_v36 = vsel %vm2818_vm12, %v14623_v60, %v14662_v46  ;;  %v14676_v2 = vadd.s32 120, %v14156_v9  ;;  %v14679_v58 = vadd.f32 %v3248_v16, %v14467_v7  ;;  %11539 = vmatpush3.bf16.msra.mxu1 %v12534_v56 }
 0x21e   : > { %vm3631_vm13 = vcmp.ge.s32.totalorder %v3615_v37, 18  ;;  %v9814_v47 = vadd.s32 4294967278, %v3615_v37  ;;  %11513 = vmatmul.mubr.bf16.gmra.mrb[20].mxu1 %v5645_v36  ;;  %vm3348_vm15 = vcmp.ge.s32.totalorder %v3332_v23, 18  ;;  %v9723_v6 = vadd.s32 4294967278, %v3332_v23  ;;  %11844 = vmatprep.subr.bf16.mxu1 %v14681_v15 }
 0x21f   : > { %v14684_v27 = vadd.f32 %v11872_v21, %v14546_v50  ;;  %vm3346_vm3 = vcmp.ge.s32.totalorder %v3330_v25, 18  ;;  %v9721_v60 = vadd.s32 4294967278, %v3330_v25  ;;  %v3333_v7 = vadd.s32 %v14241_v4, %v14676_v2  ;;  %11791 = vmatpush3.bf16.msra.mxu0 %v12528_v3 }
 0x220   : > { %v3663_v54 = vsel %vm3631_vm13, %v9814_v47, %v3615_v37  ;;  %v3380_v26 = vsel %vm3348_vm15, %v9723_v6, %v3332_v23  ;;  %v14689_v8 = vadd.f32 %v11873_v33, %v14546_v50  ;;  %v14692_v30 = vadd.s32 104, %v14156_v9  ;;  %11792 = vmatprep.subr.bf16.mxu0 %v12533_v51  ;;  %v14699_v23 = vld [vmem:[#allocation2 + $0x78] sm:$0xff]  }
 0x221   : > { %vm3679_vm11 = vcmp.ge.s32.totalorder %v3663_v54, 18  ;;  %v9830_v57 = vadd.s32 4294967278, %v3663_v54  ;;  %vm3396_vm14 = vcmp.ge.s32.totalorder %v3380_v26, 18  ;;  %v9739_v40 = vadd.s32 4294967278, %v3380_v26 }
 0x222   : > { %v3378_v59 = vsel %vm3346_vm3, %v9721_v60, %v3330_v25  ;;  %vm3349_vm0 = vcmp.ge.s32.totalorder %v3333_v7, 18  ;;  %v9724_v45 = vadd.s32 4294967278, %v3333_v7  ;;  %v3331_v38 = vadd.s32 %v14241_v4, %v14692_v30 }
 0x223   : > { %v3711_v19 = vsel %vm3679_vm11, %v9830_v57, %v3663_v54  ;;  %v3428_v42 = vsel %vm3396_vm14, %v9739_v40, %v3380_v26  ;;  %vm3394_vm4 = vcmp.ge.s32.totalorder %v3378_v59, 18  ;;  %v9737_v17 = vadd.s32 4294967278, %v3378_v59  ;;  %11793 = vmatpush3.bf16.msra.mxu0 %v12533_v51  ;;  %v11578_v56 = vpop.f32.mrb[20].mxu0 }
 0x224   : > { %vm3744_vm1 = vcmp.lt.s32.totalorder %v3711_v19, 16  ;;  %vm3444_vm2 = vcmp.ge.s32.totalorder %v3428_v42, 18  ;;  %v9755_v11 = vadd.s32 4294967278, %v3428_v42  ;;  %v3381_v55 = vsel %vm3349_vm0, %v9724_v45, %v3333_v7  ;;  %11794 = vmatprep.subr.bf16.mxu0 %v12535_v53  ;;  %v6936_v3 = vpop.f32.mrb[21].mxu0 }
 0x225   : > { %v3824_v62 = vsel %vm3744_vm1, %v3291_v43, 0.0  ;;  %v3426_v28 = vsel %vm3394_vm4, %v9737_v17, %v3378_v59  ;;  %vm3397_vm6 = vcmp.ge.s32.totalorder %v3381_v55, 18  ;;  %v9740_v39 = vadd.s32 4294967278, %v3381_v55  ;;  %v11579_v25 = vpop.f32.mrb[22].mxu0 }
 0x226   : > { %v10464_v14 = vpack.c.bf16 %v3824_v62, %v14659_v35  ;;  %v3476_v13 = vsel %vm3444_vm2, %v9755_v11, %v3428_v42  ;;  %vm3442_vm8 = vcmp.ge.s32.totalorder %v3426_v28, 18  ;;  %v9753_v4 = vadd.s32 4294967278, %v3426_v28  ;;  %v6939_v6 = vpop.f32.mrb[23].mxu0 }
 0x227   : > { %vm3492_vm9 = vcmp.ge.s32.totalorder %v3476_v13, 18  ;;  %v9771_v21 = vadd.s32 4294967278, %v3476_v13  ;;  %v3429_v10 = vsel %vm3397_vm6, %v9740_v39, %v3381_v55  ;;  %vm3347_vm5 = vcmp.ge.s32.totalorder %v3331_v38, 18  ;;  %11795 = vmatpush3.bf16.msra.mxu0 %v12535_v53 }
 0x228   : > { %10534 = vst [vmem:[%s14584_s21 + $0x20] sm:$0xff] %v10464_v14   ;;  %v3474_v31 = vsel %vm3442_vm8, %v9753_v4, %v3426_v28  ;;  %vm3445_vm13 = vcmp.ge.s32.totalorder %v3429_v10, 18  ;;  %v9756_v33 = vadd.s32 4294967278, %v3429_v10  ;;  %v9722_v16 = vadd.s32 4294967278, %v3331_v38  ;;  %11812 = vmatprep.subr.bf16.mxu0 %v14681_v15 }
 0x229   : > { %v3524_v12 = vsel %vm3492_vm9, %v9771_v21, %v3476_v13  ;;  %vm3490_vm15 = vcmp.ge.s32.totalorder %v3474_v31, 18  ;;  %v9769_v43 = vadd.s32 4294967278, %v3474_v31  ;;  %v5647_v35 = vshrl.u32 %v14699_v23, 16 }
 0x22a   : > { %vm3540_vm3 = vcmp.ge.s32.totalorder %v3524_v12, 18  ;;  %v9787_v37 = vadd.s32 4294967278, %v3524_v12  ;;  %v3477_v36 = vsel %vm3445_vm13, %v9756_v33, %v3429_v10  ;;  %v3379_v47 = vsel %vm3347_vm5, %v9722_v16, %v3331_v38 }
 0x22b   : > { %v3522_v51 = vsel %vm3490_vm15, %v9769_v43, %v3474_v31  ;;  %vm3493_vm11 = vcmp.ge.s32.totalorder %v3477_v36, 18  ;;  %v9772_v60 = vadd.s32 4294967278, %v3477_v36  ;;  %vm3395_vm14 = vcmp.ge.s32.totalorder %v3379_v47, 18  ;;  %v11582_v17 = vpop.f32.mrb[24].mxu0  ;;  %v14705_v31 = vld [vmem:[#allocation2 + $0xb8] sm:$0xff]  }
 0x22c   : > { %v3572_v7 = vsel %vm3540_vm3, %v9787_v37, %v3524_v12  ;;  %vm3538_vm0 = vcmp.ge.s32.totalorder %v3522_v51, 18  ;;  %v9785_v54 = vadd.s32 4294967278, %v3522_v51  ;;  %v9738_v26 = vadd.s32 4294967278, %v3379_v47  ;;  %v6952_v28 = vpop.f32.mrb[25].mxu0  ;;  %v14722_v17 = vld [vmem:[#allocation2 + $0x80] sm:$0xff]  }
 0x22d   : > { %vm3588_vm4 = vcmp.ge.s32.totalorder %v3572_v7, 18  ;;  %v9803_v57 = vadd.s32 4294967278, %v3572_v7  ;;  %v3525_v40 = vsel %vm3493_vm11, %v9772_v60, %v3477_v36  ;;  %v5649_v59 = vrot.slane %v5647_v35, 2  ;;  %v11583_v4 = vpop.f32.mrb[26].mxu0 }
 0x22e   : > { %v3570_v45 = vsel %vm3538_vm0, %v9785_v54, %v3522_v51  ;;  %vm3541_vm1 = vcmp.ge.s32.totalorder %v3525_v40, 18  ;;  %v9788_v53 = vadd.s32 4294967278, %v3525_v40  ;;  %v3427_v19 = vsel %vm3395_vm14, %v9738_v26, %v3379_v47  ;;  %v6955_v33 = vpop.f32.mrb[27].mxu0 }
 0x22f   : > { %v3620_v38 = vsel %vm3588_vm4, %v9803_v57, %v3572_v7  ;;  %vm3586_vm2 = vcmp.ge.s32.totalorder %v3570_v45, 18  ;;  %v9801_v42 = vadd.s32 4294967278, %v3570_v45  ;;  %vm3443_vm6 = vcmp.ge.s32.totalorder %v3427_v19, 18 }
 0x230   : > { %vm3636_vm8 = vcmp.ge.s32.totalorder %v3620_v38, 18  ;;  %v9819_v11 = vadd.s32 4294967278, %v3620_v38  ;;  %v3573_v55 = vsel %vm3541_vm1, %v9788_v53, %v3525_v40  ;;  %v9754_v62 = vadd.s32 4294967278, %v3427_v19  ;;  %v14716_v53 = vld [vmem:[#allocation2 + $0xc0] sm:$0xff]  }
 0x231   : > { %v3618_v39 = vsel %vm3586_vm2, %v9801_v42, %v3570_v45  ;;  %vm3589_vm9 = vcmp.ge.s32.totalorder %v3573_v55, 18  ;;  %v9804_v14 = vadd.s32 4294967278, %v3573_v55  ;;  %v5650_v13 = vshll.u32 %v14699_v23, 16 }
 0x232   : > { %v3668_v21 = vsel %vm3636_vm8, %v9819_v11, %v3620_v38  ;;  %vm3634_vm5 = vcmp.ge.s32.totalorder %v3618_v39, 18  ;;  %v9817_v10 = vadd.s32 4294967278, %v3618_v39  ;;  %v3475_v56 = vsel %vm3443_vm6, %v9754_v62, %v3427_v19  ;;  %v291_v62 = vld [vmem:[%s12923_s12 + $0x188] sm:$0xff] }
 0x233   : > { %vm3684_vm13 = vcmp.ge.s32.totalorder %v3668_v21, 18  ;;  %v9835_v16 = vadd.s32 4294967278, %v3668_v21  ;;  %v3621_v3 = vsel %vm3589_vm9, %v9804_v14, %v3573_v55  ;;  %vm3491_vm15 = vcmp.ge.s32.totalorder %v3475_v56, 18  ;;  %v11586_v26 = vpop.f32.mrb[28].mxu0 }
 0x234   : > { %v3666_v12 = vsel %vm3634_vm5, %v9817_v10, %v3618_v39  ;;  %vm3637_vm3 = vcmp.ge.s32.totalorder %v3621_v3, 18  ;;  %v9820_v43 = vadd.s32 4294967278, %v3621_v3  ;;  %v9770_v35 = vadd.s32 4294967278, %v3475_v56  ;;  %v6968_v19 = vpop.f32.mrb[29].mxu0  ;;  %v14733_v10 = vld [vmem:[#allocation2 + $0x88] sm:$0xff]  }
 0x235   : > { %v3716_v25 = vsel %vm3684_vm13, %v9835_v16, %v3668_v21  ;;  %vm3682_vm11 = vcmp.ge.s32.totalorder %v3666_v12, 18  ;;  %v9833_v37 = vadd.s32 4294967278, %v3666_v12  ;;  %v5652_v36 = vrot.slane %v5650_v13, 3 }
 0x236   : > { %vm3749_vm14 = vcmp.lt.s32.totalorder %v3716_v25, 16  ;;  %v3669_v47 = vsel %vm3637_vm3, %v9820_v43, %v3621_v3  ;;  %v3523_v6 = vsel %vm3491_vm15, %v9770_v35, %v3475_v56  ;;  %v8164_v51 = vrot.slane %v14705_v31, 2 }
 0x237   : > { %v14708_v60 = vsel %vm3682_vm11, %v9833_v37, %v3666_v12  ;;  %v3297_v7 = vadd.f32 %v14670_v52, %v14546_v50  ;;  %vm3685_vm0 = vcmp.ge.s32.totalorder %v3669_v47, 18  ;;  %v9836_v54 = vadd.s32 4294967278, %v3669_v47  ;;  %v292_v12 = vld [vmem:[%s12923_s12 + $0x190] sm:$0x7]  ;;  %s12733_s12 = smov [#allocation10]  }
 0x238   : > { %v14714_v57 = vadd.f32 %v14679_v58, %v14546_v50  ;;  %vm3539_vm4 = vcmp.ge.s32.totalorder %v3523_v6, 18  ;;  %v9786_v40 = vadd.s32 4294967278, %v3523_v6  ;;  %v5653_v45 = vor.u32 %v5652_v36, %v5649_v59  ;;  %v14725_v50 = vld [vmem:[#allocation2 + $0x90] ss:$0 sps:$4 sm:$0x77]   ;;  %v11587_v58 = vpop.f32.mrb[30].mxu0 }
 0x239   : > { %v3829_v38 = vsel %vm3749_vm14, %v14684_v27, 0.0  ;;  %v3717_v42 = vsel %vm3685_vm0, %v9836_v54, %v3669_v47  ;;  %v8165_v52 = vsel %vm2347_vm10, %v8162_v22, %v8164_v51  ;;  %v5656_v11 = vshrl.u32 %v14722_v17, 16  ;;  %v6971_v22 = vpop.f32.mrb[31].mxu0  ;;  %s12638_s6 = sshll.u32 %s12733_s12, 4  ;;  %s12639_s6 = int_to_ptr.vmem [resolvable:$false] %s12638_s6 }
 0x23a   : > { %vm3747_vm1 = vcmp.lt.s32.totalorder %v14708_v60, 16  ;;  %vm3750_vm2 = vcmp.lt.s32.totalorder %v3717_v42, 16  ;;  %v3571_v59 = vsel %vm3539_vm4, %v9786_v40, %v3523_v6  ;;  %v5654_v55 = vsel %vm2818_vm12, %v14662_v46, %v5653_v45  ;;  %11772 = vmatprep.mubr.bf16.mxu0 %v8165_v52  ;;  %s12640_s8 = scalar_lea.vmem %s12639_s6, 6144  ;;  %p12641_p1 = scmp.lt.s32.totalorder %s15119_s7, %s12639_s6 }
 0x23b   : > { %v5659_v27 = vshll.u32 %v14722_v17, 16  ;;  %v3830_v28 = vsel %vm3750_vm2, %v3297_v7, 0.0  ;;  %vm3587_vm6 = vcmp.ge.s32.totalorder %v3571_v59, 18  ;;  %v9802_v39 = vadd.s32 4294967278, %v3571_v59  ;;  %11516 = vmatprep.mubr.bf16.mxu1 %v5654_v55  ;;  %v5851_v7 = vld [vmem:[#allocation2 + $0x50] sm:$0x8]  ;;  %p12642_p2 = scmp.lt.s32.totalorder %s12640_s8, %s12634_s17 }
 0x23c   : > { %v5658_v14 = vrot.slane %v5656_v11, 2  ;;  %v10479_v13 = vpack.c.bf16 %v3830_v28, %v3829_v38  ;;  %v8166_v21 = vrot.slane %v14716_v53, 2  ;;  %v5665_v46 = vshrl.u32 %v14733_v10, 16  ;;  %v12560_v28 = vld [vmem:[#allocation2 + $0x58] sm:$0xff]  }
 0x23d   : > { %v5661_v4 = vrot.slane %v5659_v27, 3  ;;  %v3619_v56 = vsel %vm3587_vm6, %v9802_v39, %v3571_v59  ;;  %v5668_v33 = vshll.u32 %v14733_v10, 16  ;;  %v342_v16 = vmax.f32 %v291_v62, 0.0  ;;  %v12559_v59 = vld [vmem:[#allocation2 + $0x54] sm:$0xf]  ;;  %p12643_p3 = por %p12642_p2, %p12641_p1 }
 0x23e   : > { %v5674_v3 = vshrl.u32 %v14725_v50, 16  ;;  %10537 = vst [vmem:[%s14584_s21 + $0x38] sm:$0xff] %v10479_v13   ;;  %vm3635_vm8 = vcmp.ge.s32.totalorder %v3619_v56, 18  ;;  %v9818_v43 = vadd.s32 4294967278, %v3619_v56  ;;  %v8167_v25 = vsel %vm2347_vm10, %v8164_v51, %v8166_v21 }
 0x23f   : > { %v5662_v35 = vor.u32 %v5661_v4, %v5658_v14  ;;  %11773 = vmatmul.mubr.bf16.gmra.mrb[96].mxu0 %v8167_v25  ;;  %v5667_v37 = vrot.slane %v5665_v46, 2  ;;  %v5670_v36 = vrot.slane %v5668_v33, 3  ;;  %v10403_v47 = vpack.c.bf16 %v342_v16, %v342_v16  ;;  %p12644_p8 = pnand %p12643_p3, %p12637_p11 }
 0x240   : > { %v5676_v6 = vrot.slane %v5674_v3, 2  ;;  %v3667_v54 = vsel %vm3635_vm8, %v9818_v43, %v3619_v56  ;;  %v5677_v40 = vshll.u32 %v14725_v50, 16  ;;  %v343_v19 = vmax.f32 %v292_v12, 0.0 }
 0x241   : > { %v5663_v26 = vsel %vm2818_vm12, %v5653_v45, %v5662_v35  ;;  %vm3683_vm9 = vcmp.ge.s32.totalorder %v3667_v54, 18  ;;  %v9834_v38 = vadd.s32 4294967278, %v3667_v54  ;;  %v5671_v42 = vor.u32 %v5670_v36, %v5667_v37 }
 0x242   : > { %11517 = vmatmul.mubr.bf16.gmra.mrb[24].mxu1 %v5663_v26  ;;  %v990_v52 = vshrl.u32 %v10403_v47, 16  ;;  %v993_v11 = vshll.u32 %v10403_v47, 16  ;;  %v5679_v58 = vrot.slane %v5677_v40, 3  ;;  %v10404_v51 = vpack.c.bf16 %v343_v19, %v343_v19 }
 0x243   : > { %v9948_v55 = vcombine.low %v5851_v7, %v12559_v59  ;;  %v3715_v27 = vsel %vm3683_vm9, %v9834_v38, %v3667_v54  ;;  %v5672_v62 = vsel %vm2818_vm12, %v5662_v35, %v5671_v42  ;;  %v5872_v39 = vrot.slane %v12560_v28, 3  ;;  %v11610_v37 = vpop.f32.mrb[32].mxu0  ;;  %v14759_v54 = vld [vmem:[#allocation2 + $0x98] sm:$0xff]  }
 0x244   : > { %v992_v22 = vrot.slane %v990_v52, 6  ;;  %vm3748_vm5 = vcmp.lt.s32.totalorder %v3715_v27, 16  ;;  %11520 = vmatprep.mubr.bf16.mxu1 %v5672_v62  ;;  %v995_v45 = vrot.slane %v993_v11, 7  ;;  %v5680_v14 = vor.u32 %v5679_v58, %v5676_v6  ;;  %v7089_v47 = vpop.f32.mrb[33].mxu0 }
 0x245   : > { %v1000_v13 = vshrl.u32 %v10404_v51, 16  ;;  %v3827_v4 = vsel %vm3747_vm1, %v14689_v8, 0.0  ;;  %v3828_v46 = vsel %vm3748_vm5, %v14714_v57, 0.0  ;;  %v1003_v56 = vshll.u32 %v10404_v51, 16  ;;  %v11611_v19 = vpop.f32.mrb[34].mxu0 }
 0x246   : > { %v5871_v33 = vrot.slane %v9948_v55, 3  ;;  %v10474_v16 = vpack.c.bf16 %v3828_v46, %v3827_v4  ;;  %v996_v3 = vor.u32 %v995_v45, %v992_v22  ;;  %v5681_v12 = vsel %vm2818_vm12, %v5671_v42, %v5680_v14  ;;  %v14767_v55 = vld [vmem:[#allocation8 + $0x208] sm:$0xff]  }
 0x247   : > { %v1002_v43 = vrot.slane %v1000_v13, 6  ;;  %v1005_v35 = vrot.slane %v1003_v56, 7  ;;  %vm15248_vm13 = vcmask 1044480   ;;  %v8362_v57 = vshrl.u32 %v14427_v44, 16  ;;  %v14772_v13 = vld [vmem:[#allocation2 + $0xa0] sm:$0xff]  }
 0x248   : > { %v5873_v25 = vsel %vm15248_vm13, %v5871_v33, %v5872_v39  ;;  %10536 = vst [vmem:[%s14584_s21 + $0x30] sm:$0xff] %v10474_v16   ;;  %v997_v60 = vsel %vm12960_vm7, %v988_v5, %v996_v3  ;;  %v998_v8 = vrot.slane %v996_v3, 4  ;;  %v8365_v7 = vshll.u32 %v14427_v44, 16  ;;  %v7092_v5 = vpop.f32.mrb[35].mxu0  ;;  %vm15250_vm15 = vmmov %vm15248_vm13  ;;  %v14781_v3 = vld [vmem:[#allocation8 + $0x210] sm:$0xff]  }
 0x249   : > { %1113 = vst [vmem:[#allocation2 + $0xcc] sm:$0xf] %v997_v60  ;;  %v1006_v6 = vor.u32 %v1005_v35, %v1002_v43  ;;  %v8370_v26 = vshrl.u32 %v14759_v54, 16  ;;  %v8373_v40 = vshll.u32 %v14759_v54, 16  ;;  %v5874_v38 = vrot.slane %v12562_v32, 3  ;;  %vm15251_vm3 = vmmov %vm15248_vm13 }
 0x24a   : > { %11521 = vmatmul.mubr.bf16.gmra.mrb[28].mxu1 %v5681_v12  ;;  %v5876_v52 = vrot.slane %v14520_v29, 3  ;;  %v8364_v11 = vrot.slane %v8362_v57, 2  ;;  %v8367_v58 = vrot.slane %v8365_v7, 3  ;;  %v8379_v29 = vshrl.u32 %v14772_v13, 16  ;;  %vm15253_vm11 = vmmov %vm15251_vm3 }
 0x24b   : > { %11540 = vmatprep.mubr.bf16.mxu1 %v5873_v25  ;;  %v1007_v42 = vsel %vm12960_vm7, %v998_v8, %v1006_v6  ;;  %v8372_v44 = vrot.slane %v8370_v26, 2  ;;  %v8375_v51 = vrot.slane %v8373_v40, 3  ;;  %v5875_v59 = vsel %vm15250_vm15, %v5872_v39, %v5874_v38  ;;  %v11614_v62 = vpop.f32.mrb[36].mxu0  ;;  %vm15252_vm7 = vmmov %vm15251_vm3 }
 0x24c   : > { %1114 = vst [vmem:[#allocation2 + $0xd0] sm:$0x7] %v1007_v42  ;;  %v5877_v27 = vsel %vm15251_vm3, %v5874_v38, %v5876_v52  ;;  %v7105_v28 = vpop.f32.mrb[37].mxu0  ;;  %v8368_v45 = vor.u32 %v8367_v58, %v8364_v11  ;;  %v8382_v4 = vshll.u32 %v14772_v13, 16  ;;  %v8388_v56 = vshrl.u32 %v14609_v61, 16  ;;  %vm15255_vm14 = vmmov %vm15251_vm3 }
 0x24d   : > { %v8376_v14 = vor.u32 %v8375_v51, %v8372_v44  ;;  %v11615_v46 = vpop.f32.mrb[38].mxu0  ;;  %v8391_v33 = vshll.u32 %v14609_v61, 16  ;;  %v5878_v16 = vrot.slane %v14641_v0, 3  ;;  %v5880_v35 = vrot.slane %v14699_v23, 3  ;;  %v14793_v23 = vld [vmem:[#allocation8 + $0x218] sm:$0xff]   ;;  %v14803_v44 = vld [vmem:[#allocation8 + $0x220] sm:$0xff]   ;;  %vm15256_vm0 = vmmov %vm15251_vm3 }
 0x24e   : > { %v7108_v12 = vpop.f32.mrb[39].mxu0  ;;  %v8381_v36 = vrot.slane %v8379_v29, 2  ;;  %v8384_v60 = vrot.slane %v8382_v4, 3  ;;  %v8390_v0 = vrot.slane %v8388_v56, 2  ;;  %v8397_v19 = vshrl.u32 %v14629_v41, 16  ;;  %vm15257_vm4 = vmmov %vm15256_vm0 }
 0x24f   : > { %v8377_v8 = vsel %vm2818_vm12, %v8368_v45, %v8376_v14  ;;  %v8393_v57 = vrot.slane %v8391_v33, 3  ;;  %v5879_v47 = vsel %vm15252_vm7, %v5876_v52, %v5878_v16  ;;  %v8400_v32 = vshll.u32 %v14629_v41, 16  ;;  %vm15258_vm1 = vmmov %vm15256_vm0 }
 0x250   : > { %v14770_v22 = vld [vmem:[#allocation2 + $0xc8] sm:$0xff]   ;;  %v8385_v40 = vor.u32 %v8384_v60, %v8381_v36  ;;  %v8406_v42 = vshrl.u32 %v14705_v31, 16  ;;  %v8409_v52 = vshll.u32 %v14705_v31, 16  ;;  %v5882_v58 = vrot.slane %v14722_v17, 3  ;;  %vm15259_vm2 = vmmov %vm15256_vm0 }
 0x251   : > { %v8168_v39 = vrot.slane %v14770_v22, 2  ;;  %v8394_v5 = vor.u32 %v8393_v57, %v8390_v0  ;;  %v5884_v51 = vrot.slane %v14733_v10, 3  ;;  %v8402_v62 = vrot.slane %v8400_v32, 3  ;;  %v14811_v17 = vld [vmem:[#allocation8 + $0x228] sm:$0xff]   ;;  %vm15260_vm6 = vmmov %vm15256_vm0 }
 0x252   : > { %11541 = vmatmul.mubr.bf16.vlgmr.msra.gmra.mrb[16].mxu1 %v5875_v59  ;;  %v8386_v59 = vsel %vm2818_vm12, %v8376_v14, %v8385_v40  ;;  %v8408_v45 = vrot.slane %v8406_v42, 2  ;;  %v8411_v29 = vrot.slane %v8409_v52, 3  ;;  %v8415_v14 = vshrl.u32 %v14716_v53, 16  ;;  %vm15261_vm8 = vmmov %vm15256_vm0 }
 0x253   : > { %11852 = vmatpush3.bf16.msra.mxu1 %v14681_v15  ;;  %11544 = vmatprep.mubr.bf16.mxu1 %v5877_v27  ;;  %v12532_v43 = vld [vmem:[#allocation2 + $0xd0] ss:$0 sps:$4 sm:$0x33]   ;;  %v8169_v25 = vsel %vm2347_vm10, %v8166_v21, %v8168_v39  ;;  %v5881_v21 = vsel %vm15253_vm11, %v5878_v16, %v5880_v35  ;;  %v11618_v7 = vpop.f32.mrb[40].mxu0  ;;  %v8399_v27 = vrot.slane %v8397_v19, 2  ;;  %v8395_v28 = vsel %vm2818_vm12, %v8385_v40, %v8394_v5  ;;  %vm15263_vm9 = vmmov %vm15256_vm0 }
 0x254   : > { %11845 = vmatprep.subr.bf16.mxu1 %v14767_v55  ;;  %11776 = vmatprep.mubr.bf16.mxu0 %v8169_v25  ;;  %v8170_v37 = vrot.slane %v12532_v43, 2  ;;  %v7121_v26 = vpop.f32.mrb[41].mxu0  ;;  %v5885_v46 = vsel %vm15255_vm14, %v5882_v58, %v5884_v51  ;;  %v8412_v56 = vor.u32 %v8411_v29, %v8408_v45  ;;  %v8424_v33 = vshrl.u32 %v14770_v22, 16  ;;  %v12543_v60 = vld [vmem:[#allocation2 + $0xd0] ss:$0 sps:$4 sm:$0x77]   ;;  %vm15264_vm5 = vmmov %vm15256_vm0 }
 0x255   : > { %v11619_v38 = vpop.f32.mrb[42].mxu0  ;;  %v8403_v10 = vor.u32 %v8402_v62, %v8399_v27  ;;  %v8427_v16 = vshll.u32 %v14770_v22, 16  ;;  %v5886_v12 = vrot.slane %v14725_v50, 3  ;;  %v8637_v43 = vrot.slane %v14629_v41, 3 }
 0x256   : > { %v8171_v6 = vsel %vm2347_vm10, %v8168_v39, %v8170_v37  ;;  %v7124_v11 = vpop.f32.mrb[43].mxu0  ;;  %vm15254_vm10 = vmmov %vm15251_vm3  ;;  %v8418_v39 = vshll.u32 %v14716_v53, 16  ;;  %v8417_v37 = vrot.slane %v8415_v14, 2  ;;  %v8426_v50 = vrot.slane %v8424_v33, 2  ;;  %v8610_v38 = vld [vmem:[#allocation2 + $0x90] sm:$0x8] }
 0x257   : > { %11853 = vmatpush3.bf16.msra.mxu1 %v14767_v55  ;;  %11777 = vmatmul.mubr.bf16.gmra.mrb[100].mxu0 %v8171_v6  ;;  %v5883_v4 = vsel %vm15254_vm10, %v5880_v35, %v5882_v58  ;;  %v8639_v35 = vrot.slane %v14705_v31, 3  ;;  %v8404_v25 = vsel %vm2818_vm12, %v8394_v5, %v8403_v10  ;;  %v8429_v0 = vrot.slane %v8427_v16, 3  ;;  %v12545_v31 = vld [vmem:[#allocation8 + $0x238] sm:$0xff]  }
 0x258   : > { %11846 = vmatprep.subr.bf16.mxu1 %v14781_v3  ;;  %11796 = vmatprep.mubr.bf16.mxu0 %v8377_v8  ;;  %v8420_v36 = vrot.slane %v8418_v39, 3  ;;  %v8413_v8 = vsel %vm2818_vm12, %v8403_v10, %v8412_v56  ;;  %v5887_v57 = vsel %vm15256_vm0, %v5884_v51, %v5886_v12  ;;  %v8433_v7 = vshrl.u32 %v12543_v60, 16  ;;  %v12564_v51 = vld [vmem:[#allocation2 + $0x94] sm:$0xf] }
 0x259   : > { %v8436_v26 = vshll.u32 %v12543_v60, 16  ;;  %v8430_v19 = vor.u32 %v8429_v0, %v8426_v50  ;;  %v8641_v5 = vrot.slane %v14716_v53, 3  ;;  %v8643_v42 = vrot.slane %v14770_v22, 3 }
 0x25a   : > { %11545 = vmatmul.mubr.bf16.gmra.mrb[20].mxu1 %v5879_v47  ;;  %v8435_v52 = vrot.slane %v8433_v7, 2  ;;  %v8631_v29 = vrot.slane %v14759_v54, 3  ;;  %v8633_v54 = vrot.slane %v14772_v13, 3 }
 0x25b   : > { %11854 = vmatpush3.bf16.msra.mxu1 %v14781_v3  ;;  %11548 = vmatprep.mubr.bf16.mxu1 %v5881_v21  ;;  %v8421_v21 = vor.u32 %v8420_v36, %v8417_v37  ;;  %v8438_v11 = vrot.slane %v8436_v26, 3  ;;  %v8642_v27 = vsel %vm15258_vm1, %v8639_v35, %v8641_v5  ;;  %v8644_v53 = vsel %vm15259_vm2, %v8641_v5, %v8643_v42 }
 0x25c   : > { %11847 = vmatprep.subr.bf16.mxu1 %v14793_v23 }
 0x25d   : > { %v8431_v58 = vsel %vm2818_vm12, %v8421_v21, %v8430_v19 }
 0x25f   : > { %11855 = vmatpush3.bf16.msra.mxu1 %v14793_v23  ;;  %11797 = vmatmul.mubr.bf16.vlgmr.msra.gmra.mrb[16].mxu0 %v8386_v59  ;;  %v10197_v59 = vcombine.low %v8610_v38, %v12564_v51  ;;  %v15265_v51 = vld [vmem:[#allocation17_spill] sm:$0xff] }
 0x260   : > { %11848 = vmatprep.subr.bf16.mxu1 %v14803_v44  ;;  %11813 = vmatpush3.bf16.msra.mxu0 %v14681_v15  ;;  %v14823_v15 = vld [vmem:[#allocation8 + $0x230] sm:$0xff]  }
 0x261   : > { %11800 = vmatprep.mubr.bf16.mxu0 %v8395_v28  ;;  %11814 = vmatprep.subr.bf16.mxu0 %v14767_v55  ;;  %v8630_v45 = vrot.slane %v10197_v59, 3 }
 0x262   : > { %11549 = vmatmul.mubr.bf16.gmra.mrb[24].mxu1 %v5883_v4 }
 0x263   : > { %11856 = vmatpush3.bf16.msra.mxu1 %v14803_v44  ;;  %11552 = vmatprep.mubr.bf16.mxu1 %v5885_v46  ;;  %v11642_v47 = vpop.f32.mrb[44].mxu0  ;;  %v8645_v46 = vrot.slane %v12543_v60, 3 }
 0x264   : > { %11849 = vmatprep.subr.bf16.mxu1 %v14811_v17  ;;  %11815 = vmatpush3.bf16.msra.mxu0 %v14767_v55  ;;  %v8640_v55 = vsel %vm15257_vm4, %v8637_v43, %v8639_v35  ;;  %v7279_v6 = vpop.f32.mrb[45].mxu0 }
 0x265   : > { %11816 = vmatprep.subr.bf16.mxu0 %v14781_v3  ;;  %v11643_v40 = vpop.f32.mrb[46].mxu0  ;;  %v8646_v14 = vsel %vm15261_vm8, %v8643_v42, %v8645_v46 }
 0x266   : > { %v7282_v32 = vpop.f32.mrb[47].mxu0 }
 0x267   : > { %11857 = vmatpush3.bf16.msra.mxu1 %v14811_v17  ;;  %11801 = vmatmul.mubr.bf16.gmra.mrb[104].mxu0 %v8404_v25 }
 0x268   : > { %11850 = vmatprep.subr.bf16.mxu1 %v14823_v15  ;;  %11817 = vmatpush3.bf16.msra.mxu0 %v14781_v3  ;;  %v8422_v3 = vsel %vm2818_vm12, %v8412_v56, %v8421_v21  ;;  %v14864_v21 = vstv %s9957_s23 }
 0x269   : > { %11804 = vmatprep.mubr.bf16.mxu0 %v8413_v8  ;;  %11818 = vmatprep.subr.bf16.mxu0 %v14793_v23  ;;  %v6078_v7 = vadd.s32 %v14864_v21, %v14189_v24  ;;  %v6076_v26 = vadd.s32 %v14864_v21, %v14156_v9  ;;  %v6079_v38 = vadd.s32 %v14864_v21, %v14198_v63 }
 0x26a   : > { %11553 = vmatmul.mubr.bf16.gmra.mrb[28].mxu1 %v5887_v57  ;;  %v6077_v59 = vadd.s32 %v14864_v21, %v15265_v51 }
 0x26b   : > { %11858 = vmatpush3.bf16.msra.mxu1 %v14823_v15  ;;  %11836 = vmatprep.mubr.bf16.mxu1 %v8640_v55  ;;  %v11646_v62 = vpop.f32.mrb[48].mxu0  ;;  %vm6094_vm13 = vcmp.ge.s32.totalorder %v6078_v7, 18  ;;  %v9958_v42 = vadd.s32 4294967278, %v6076_v26  ;;  %vm6092_vm15 = vcmp.ge.s32.totalorder %v6076_v26, 18  ;;  %vm6095_vm3 = vcmp.ge.s32.totalorder %v6079_v38, 18 }
 0x26c   : > { %11851 = vmatprep.subr.bf16.mxu1 %v12545_v31  ;;  %11819 = vmatpush3.bf16.msra.mxu0 %v14793_v23  ;;  %v7295_v22 = vpop.f32.mrb[49].mxu0  ;;  %v8439_v23 = vor.u32 %v8438_v11, %v8435_v52  ;;  %v9961_v11 = vadd.s32 4294967278, %v6079_v38  ;;  %vm6093_vm10 = vcmp.ge.s32.totalorder %v6077_v59, 18 }
 0x26d   : > { %11820 = vmatprep.subr.bf16.mxu0 %v14803_v44  ;;  %v11647_v28 = vpop.f32.mrb[50].mxu0 }
 0x26e   : > { %v7298_v4 = vpop.f32.mrb[51].mxu0  ;;  %v8440_v10 = vsel %vm2818_vm12, %v8430_v19, %v8439_v23  ;;  %vm15262_vm12 = vmmov %vm15256_vm0  ;;  %v9960_v19 = vadd.s32 4294967278, %v6078_v7  ;;  %v6127_v23 = vsel %vm6095_vm3, %v9961_v11, %v6079_v38  ;;  %v6083_v38 = vadd.s32 %v14864_v21, %v14321_v18 }
 0x26f   : > { %11859 = vmatpush3.bf16.msra.mxu1 %v12545_v31  ;;  %11805 = vmatmul.mubr.bf16.gmra.mrb[108].mxu0 %v8422_v3  ;;  %v8634_v12 = vsel %vm15262_vm12, %v8631_v29, %v8633_v54  ;;  %v9977_v46 = vadd.s32 4294967278, %v6127_v23  ;;  %vm6143_vm14 = vcmp.ge.s32.totalorder %v6127_v23, 18  ;;  %v6081_v18 = vadd.s32 %v14864_v21, %v14338_v48 }
 0x270   : > { %11821 = vmatpush3.bf16.msra.mxu0 %v14803_v44  ;;  %11808 = vmatprep.mubr.bf16.mxu0 %v8431_v58  ;;  %v8632_v44 = vsel %vm15260_vm6, %v8630_v45, %v8631_v29  ;;  %v6126_v52 = vsel %vm6094_vm13, %v9960_v19, %v6078_v7  ;;  %v6124_v58 = vsel %vm6092_vm15, %v9958_v42, %v6076_v26  ;;  %v9959_v45 = vadd.s32 4294967278, %v6077_v59 }
 0x271   : > { %11822 = vmatprep.subr.bf16.mxu0 %v14811_v17  ;;  %vm6142_vm7 = vcmp.ge.s32.totalorder %v6126_v52, 18  ;;  %v9974_v22 = vadd.s32 4294967278, %v6124_v58  ;;  %vm6140_vm11 = vcmp.ge.s32.totalorder %v6124_v58, 18  ;;  %v6086_v48 = vadd.s32 %v14864_v21, %v14465_v1 }
 0x272   : > { %11837 = vmatmul.mubr.bf16.vlgmr.msra.gmra.mrb[32].mxu1 %v8642_v27  ;;  %v9976_v27 = vadd.s32 4294967278, %v6126_v52 }
 0x273   : > { %11840 = vmatprep.mubr.bf16.mxu1 %v8644_v53  ;;  %v11650_v39 = vpop.f32.mrb[52].mxu0 }
 0x274   : > { %11823 = vmatpush3.bf16.msra.mxu0 %v14811_v17  ;;  %v7311_v56 = vpop.f32.mrb[53].mxu0  ;;  %v8635_v17 = vrot.slane %v14609_v61, 3  ;;  %v6174_v4 = vsel %vm6142_vm7, %v9976_v27, %v6126_v52 }
 0x275   : > { %11824 = vmatprep.subr.bf16.mxu0 %v14823_v15  ;;  %v11651_v33 = vpop.f32.mrb[54].mxu0  ;;  %vm6190_vm0 = vcmp.ge.s32.totalorder %v6174_v4, 18  ;;  %v6175_v56 = vsel %vm6143_vm14, %v9977_v46, %v6127_v23 }
 0x276   : > { %v7314_v16 = vpop.f32.mrb[55].mxu0  ;;  %v8636_v35 = vsel %vm15263_vm9, %v8633_v54, %v8635_v17  ;;  %vm6191_vm2 = vcmp.ge.s32.totalorder %v6175_v56, 18 }
 0x277   : > { %11809 = vmatmul.mubr.bf16.gmra.mrb[112].mxu0 %v8440_v10  ;;  %v6172_v10 = vsel %vm6140_vm11, %v9974_v22, %v6124_v58  ;;  %v9965_v22 = vadd.s32 4294967278, %v6083_v38 }
 0x278   : > { %11825 = vmatpush3.bf16.msra.mxu0 %v14823_v15  ;;  %11828 = vmatprep.mubr.bf16.mxu0 %v8632_v44  ;;  %v8638_v15 = vsel %vm15264_vm5, %v8635_v17, %v8637_v43  ;;  %v9992_v44 = vadd.s32 4294967278, %v6174_v4  ;;  %v9990_v39 = vadd.s32 4294967278, %v6172_v10  ;;  %vm6188_vm4 = vcmp.ge.s32.totalorder %v6172_v10, 18  ;;  %v15266_v17 = vld [vmem:[#allocation18_spill] sm:$0xff] }
 0x279   : > { %11826 = vmatprep.subr.bf16.mxu0 %v12545_v31  ;;  %v6082_v16 = vadd.s32 %v14864_v21, %v15266_v17 }
 0x27a   : > { %11841 = vmatmul.mubr.bf16.gmra.mrb[36].mxu1 %v8646_v14  ;;  %v6125_v14 = vsel %vm6093_vm10, %v9959_v45, %v6077_v59  ;;  %v6222_v33 = vsel %vm6190_vm0, %v9992_v44, %v6174_v4  ;;  %vm6099_vm0 = vcmp.ge.s32.totalorder %v6083_v38, 18 }
 0x27b   : > { %v9975_v54 = vadd.s32 4294967278, %v6125_v14  ;;  %vm6141_vm1 = vcmp.ge.s32.totalorder %v6125_v14, 18  ;;  %vm6238_vm6 = vcmp.ge.s32.totalorder %v6222_v33, 18  ;;  %vm6098_vm8 = vcmp.ge.s32.totalorder %v6082_v16, 18 }
 0x27c   : > { %11827 = vmatpush3.bf16.msra.mxu0 %v12545_v31 }
 0x27f   : > { %11829 = vmatmul.mubr.bf16.vlgmr.msra.gmra.mrb[16].mxu0 %v8634_v12  ;;  %v9993_v12 = vadd.s32 4294967278, %v6175_v56 }
 0x280   : > { %11832 = vmatprep.mubr.bf16.mxu0 %v8636_v35  ;;  %v6220_v35 = vsel %vm6188_vm4, %v9990_v39, %v6172_v10  ;;  %v6131_v10 = vsel %vm6099_vm0, %v9965_v22, %v6083_v38 }
 0x281   : > { %vm6236_vm12 = vcmp.ge.s32.totalorder %v6220_v35, 18 }
 0x283   : > { %v11674_v25 = vpop.f32.mrb[56].mxu0 }
 0x284   : > { %v7541_v13 = vpop.f32.mrb[57].mxu0  ;;  %v6173_v25 = vsel %vm6141_vm1, %v9975_v54, %v6125_v14 }
 0x285   : > { %v11675_v37 = vpop.f32.mrb[58].mxu0  ;;  %v9964_v13 = vadd.s32 4294967278, %v6082_v16  ;;  %vm6189_vm9 = vcmp.ge.s32.totalorder %v6173_v25, 18 }
 0x286   : > { %v7544_v36 = vpop.f32.mrb[59].mxu0  ;;  %v10006_v37 = vadd.s32 4294967278, %v6220_v35 }
 0x287   : > { %11833 = vmatmul.mubr.bf16.gmra.mrb[116].mxu0 %v8638_v15  ;;  %v10008_v15 = vadd.s32 4294967278, %v6222_v33  ;;  %v6223_v36 = vsel %vm6191_vm2, %v9993_v12, %v6175_v56  ;;  %v9963_v56 = vadd.s32 4294967278, %v6081_v18  ;;  %v9981_v12 = vadd.s32 4294967278, %v6131_v10 }
 0x288   : > { %vm6239_vm5 = vcmp.ge.s32.totalorder %v6223_v36, 18 }
 0x28b   : > { %v11678_v60 = vpop.f32.mrb[60].mxu0 }
 0x28c   : > { %v7557_v61 = vpop.f32.mrb[61].mxu0 }
 0x28d   : > { %v11679_v8 = vpop.f32.mrb[62].mxu0  ;;  %v9991_v61 = vadd.s32 4294967278, %v6173_v25 }
 0x28e   : > { %v7560_v50 = vpop.f32.mrb[63].mxu0 }
 0x28f   : > { %v6270_v50 = vsel %vm6238_vm6, %v10008_v15, %v6222_v33 }
 0x290   : > { %vm6286_vm13 = vcmp.ge.s32.totalorder %v6270_v50, 18 }
 0x293   : > { %v11682_v0 = vpop.f32.mrb[64].mxu0 }
 0x294   : > { %v7573_v57 = vpop.f32.mrb[65].mxu0 }
 0x295   : > { %v11683_v47 = vpop.f32.mrb[66].mxu0  ;;  %v10009_v57 = vadd.s32 4294967278, %v6223_v36 }
 0x296   : > { %v7576_v31 = vpop.f32.mrb[67].mxu0  ;;  %v6130_v47 = vsel %vm6098_vm8, %v9964_v13, %v6082_v16 }
 0x297   : > { %v9980_v7 = vadd.s32 4294967278, %v6130_v47  ;;  %vm6146_vm15 = vcmp.ge.s32.totalorder %v6130_v47, 18 }
 0x2a3   : > { %v11706_v55 = vpop.f32.mrb[68].mxu0 }
 0x2a4   : > { %v7810_v6 = vpop.f32.mrb[69].mxu0  ;;  %v6268_v55 = vsel %vm6236_vm12, %v10006_v37, %v6220_v35  ;;  %vm6097_vm12 = vcmp.ge.s32.totalorder %v6081_v18, 18 }
 0x2a5   : > { %v11707_v41 = vpop.f32.mrb[70].mxu0  ;;  %v6080_v6 = vadd.s32 %v14864_v21, %v14318_v34  ;;  %v10022_v26 = vadd.s32 4294967278, %v6268_v55  ;;  %vm6284_vm3 = vcmp.ge.s32.totalorder %v6268_v55, 18  ;;  %v6178_v34 = vsel %vm6146_vm15, %v9980_v7, %v6130_v47  ;;  %v15267_v7 = vld [vmem:[#allocation19_spill] sm:$0xff] }
 0x2a6   : > { %v7813_v43 = vpop.f32.mrb[71].mxu0  ;;  %v10024_v41 = vadd.s32 4294967278, %v6270_v50  ;;  %v9996_v23 = vadd.s32 4294967278, %v6178_v34  ;;  %vm6194_vm4 = vcmp.ge.s32.totalorder %v6178_v34, 18 }
 0x2a7   : > { %v6221_v43 = vsel %vm6189_vm9, %v9991_v61, %v6173_v25  ;;  %vm6096_vm11 = vcmp.ge.s32.totalorder %v6080_v6, 18  ;;  %v6316_v58 = vsel %vm6284_vm3, %v10022_v26, %v6268_v55  ;;  %v6084_v26 = vadd.s32 %v14864_v21, %v15267_v7 }
 0x2a8   : > { %v10007_v19 = vadd.s32 4294967278, %v6221_v43  ;;  %v6318_v42 = vsel %vm6286_vm13, %v10024_v41, %v6270_v50  ;;  %vm6237_vm7 = vcmp.ge.s32.totalorder %v6221_v43, 18  ;;  %vm6332_vm1 = vcmp.ge.s32.totalorder %v6316_v58, 18 }
 0x2a9   : > { %v10040_v27 = vadd.s32 4294967278, %v6318_v42  ;;  %vm6334_vm14 = vcmp.ge.s32.totalorder %v6318_v42, 18  ;;  %v6226_v39 = vsel %vm6194_vm4, %v9996_v23, %v6178_v34  ;;  %v9966_v34 = vadd.s32 4294967278, %v6084_v26 }
 0x2aa   : > { %v10012_v13 = vadd.s32 4294967278, %v6226_v39  ;;  %vm6242_vm13 = vcmp.ge.s32.totalorder %v6226_v39, 18 }
 0x2ab   : > { %v11710_v40 = vpop.f32.mrb[72].mxu0  ;;  %v6366_v4 = vsel %vm6334_vm14, %v10040_v27, %v6318_v42 }
 0x2ac   : > { %v7826_v32 = vpop.f32.mrb[73].mxu0  ;;  %v6271_v40 = vsel %vm6239_vm5, %v10009_v57, %v6223_v36  ;;  %vm6382_vm9 = vcmp.ge.s32.totalorder %v6366_v4, 18  ;;  %v10056_v15 = vadd.s32 4294967278, %v6366_v4  ;;  %vm6147_vm5 = vcmp.ge.s32.totalorder %v6131_v10, 18 }
 0x2ad   : > { %v11711_v5 = vpop.f32.mrb[74].mxu0  ;;  %v9962_v32 = vadd.s32 4294967278, %v6080_v6  ;;  %v10025_v52 = vadd.s32 4294967278, %v6271_v40  ;;  %vm6287_vm10 = vcmp.ge.s32.totalorder %v6271_v40, 18  ;;  %v6179_v50 = vsel %vm6147_vm5, %v9981_v12, %v6131_v10 }
 0x2ae   : > { %v7829_v3 = vpop.f32.mrb[75].mxu0  ;;  %v6414_v1 = vsel %vm6382_vm9, %v10056_v15, %v6366_v4  ;;  %v9997_v41 = vadd.s32 4294967278, %v6179_v50  ;;  %vm6195_vm4 = vcmp.ge.s32.totalorder %v6179_v50, 18 }
 0x2af   : > { %v6319_v45 = vsel %vm6287_vm10, %v10025_v52, %v6271_v40  ;;  %vm6430_vm0 = vcmp.ge.s32.totalorder %v6414_v1, 18  ;;  %v10072_v40 = vadd.s32 4294967278, %v6414_v1 }
 0x2b0   : > { %v10041_v14 = vadd.s32 4294967278, %v6319_v45  ;;  %vm6335_vm8 = vcmp.ge.s32.totalorder %v6319_v45, 18  ;;  %v6227_v52 = vsel %vm6195_vm4, %v9997_v41, %v6179_v50 }
 0x2b1   : > { %v14893_v22 = vsel %vm6430_vm0, %v10072_v40, %v6414_v1 }
 0x2b2   : > { %v6367_v36 = vsel %vm6335_vm8, %v10041_v14, %v6319_v45  ;;  %v10013_v45 = vadd.s32 4294967278, %v6227_v52 }
 0x2b3   : > { %v11714_v62 = vpop.f32.mrb[76].mxu0  ;;  %vm6383_vm10 = vcmp.ge.s32.totalorder %v6367_v36, 18 }
 0x2b4   : > { %v7842_v53 = vpop.f32.mrb[77].mxu0  ;;  %v6269_v62 = vsel %vm6237_vm7, %v10007_v19, %v6221_v43 }
 0x2b5   : > { %v11715_v28 = vpop.f32.mrb[78].mxu0  ;;  %v6128_v53 = vsel %vm6096_vm11, %v9962_v32, %v6080_v6  ;;  %v10023_v46 = vadd.s32 4294967278, %v6269_v62  ;;  %vm6285_vm6 = vcmp.ge.s32.totalorder %v6269_v62, 18  ;;  %vm6102_vm11 = vcmp.ge.s32.totalorder %v6086_v48, 18 }
 0x2b6   : > { %v7845_v29 = vpop.f32.mrb[79].mxu0  ;;  %v10038_v28 = vadd.s32 4294967278, %v6316_v58  ;;  %vm6144_vm2 = vcmp.ge.s32.totalorder %v6128_v53, 18 }
 0x2b7   : > { %v9978_v29 = vadd.s32 4294967278, %v6128_v53  ;;  %v6317_v25 = vsel %vm6285_vm6, %v10023_v46, %v6269_v62  ;;  %v15269_v62 = vld [vmem:[#allocation21_spill] sm:$0xff] }
 0x2b8   : > { %v6364_v33 = vsel %vm6332_vm1, %v10038_v28, %v6316_v58  ;;  %vm6333_vm3 = vcmp.ge.s32.totalorder %v6317_v25, 18  ;;  %v10039_v55 = vadd.s32 4294967278, %v6317_v25 }
 0x2b9   : > { %v6176_v16 = vsel %vm6144_vm2, %v9978_v29, %v6128_v53  ;;  %v10054_v37 = vadd.s32 4294967278, %v6364_v33  ;;  %vm6380_vm15 = vcmp.ge.s32.totalorder %v6364_v33, 18  ;;  %v6085_v53 = vadd.s32 %v14864_v21, %v15269_v62 }
 0x2ba   : > { %v9994_v61 = vadd.s32 4294967278, %v6176_v16  ;;  %vm6192_vm7 = vcmp.ge.s32.totalorder %v6176_v16, 18  ;;  %v6365_v23 = vsel %vm6333_vm3, %v10039_v55, %v6317_v25 }
 0x2bb   : > { %v6412_v47 = vsel %vm6380_vm15, %v10054_v37, %v6364_v33  ;;  %v9967_v14 = vadd.s32 4294967278, %v6085_v53  ;;  %v10055_v15 = vadd.s32 4294967278, %v6365_v23 }
 0x2bc   : > { %v6224_v6 = vsel %vm6192_vm7, %v9994_v61, %v6176_v16  ;;  %vm6428_vm1 = vcmp.ge.s32.totalorder %v6412_v47, 18  ;;  %v10070_v32 = vadd.s32 4294967278, %v6412_v47 }
 0x2bd   : > { %vm6240_vm6 = vcmp.ge.s32.totalorder %v6224_v6, 18  ;;  %v10010_v42 = vadd.s32 4294967278, %v6224_v6 }
 0x2bf   : > { %v6272_v28 = vsel %vm6240_vm6, %v10010_v42, %v6224_v6 }
 0x2c3   : > { %v11738_v60 = vpop.f32.mrb[80].mxu0 }
 0x2c4   : > { %v8016_v8 = vpop.f32.mrb[81].mxu0  ;;  %v6129_v60 = vsel %vm6097_vm12, %v9963_v56, %v6081_v18  ;;  %vm6100_vm12 = vcmp.ge.s32.totalorder %v6084_v26, 18 }
 0x2c5   : > { %v11739_v0 = vpop.f32.mrb[82].mxu0  ;;  %v9968_v8 = vadd.s32 4294967278, %v6086_v48  ;;  %v9979_v57 = vadd.s32 4294967278, %v6129_v60  ;;  %vm6145_vm14 = vcmp.ge.s32.totalorder %v6129_v60, 18  ;;  %v6132_v46 = vsel %vm6100_vm12, %v9966_v34, %v6084_v26 }
 0x2c6   : > { %v8019_v31 = vpop.f32.mrb[83].mxu0  ;;  %v6274_v0 = vsel %vm6242_vm13, %v10012_v13, %v6226_v39  ;;  %vm6243_vm13 = vcmp.ge.s32.totalorder %v6227_v52, 18  ;;  %v10026_v39 = vadd.s32 4294967278, %v6272_v28  ;;  %v9982_v33 = vadd.s32 4294967278, %v6132_v46 }
 0x2c7   : > { %v10057_v31 = vadd.s32 4294967278, %v6367_v36  ;;  %v6134_v43 = vsel %vm6102_vm11, %v9968_v8, %v6086_v48  ;;  %v10028_v19 = vadd.s32 4294967278, %v6274_v0  ;;  %vm6290_vm2 = vcmp.ge.s32.totalorder %v6274_v0, 18 }
 0x2c8   : > { %v6177_v38 = vsel %vm6145_vm14, %v9979_v57, %v6129_v60  ;;  %vm6150_vm8 = vcmp.ge.s32.totalorder %v6134_v43, 18  ;;  %vm6381_vm11 = vcmp.ge.s32.totalorder %v6365_v23, 18  ;;  %vm6288_vm14 = vcmp.ge.s32.totalorder %v6272_v28, 18 }
 0x2c9   : > { %v9995_v27 = vadd.s32 4294967278, %v6177_v38  ;;  %vm6193_vm5 = vcmp.ge.s32.totalorder %v6177_v38, 18  ;;  %vm6148_vm0 = vcmp.ge.s32.totalorder %v6132_v46, 18  ;;  %v6413_v55 = vsel %vm6381_vm11, %v10055_v15, %v6365_v23 }
 0x2ca   : > { %v6180_v1 = vsel %vm6148_vm0, %v9982_v33, %v6132_v46  ;;  %v6088_v23 = vadd.s32 %v14864_v21, %v14655_v49 }
 0x2cb   : > { %v11742_v5 = vpop.f32.mrb[84].mxu0  ;;  %v9998_v7 = vadd.s32 4294967278, %v6180_v1 }
 0x2cc   : > { %v8032_v3 = vpop.f32.mrb[85].mxu0  ;;  %v6415_v5 = vsel %vm6383_vm10, %v10057_v31, %v6367_v36  ;;  %vm6101_vm10 = vcmp.ge.s32.totalorder %v6085_v53, 18  ;;  %v6320_v36 = vsel %vm6288_vm14, %v10026_v39, %v6272_v28 }
 0x2cd   : > { %v11743_v11 = vpop.f32.mrb[86].mxu0  ;;  %v9984_v3 = vadd.s32 4294967278, %v6134_v43  ;;  %vm6431_vm9 = vcmp.ge.s32.totalorder %v6415_v5, 18  ;;  %v10073_v18 = vadd.s32 4294967278, %v6415_v5  ;;  %v6133_v25 = vsel %vm6101_vm10, %v9967_v14, %v6085_v53 }
 0x2ce   : > { %v8035_v59 = vpop.f32.mrb[87].mxu0  ;;  %v15268_v11 = vld [vmem:[#allocation20_spill] sm:$0xff]  ;;  %v10042_v6 = vadd.s32 4294967278, %v6320_v36  ;;  %vm6336_vm12 = vcmp.ge.s32.totalorder %v6320_v36, 18  ;;  %v9970_v14 = vadd.s32 4294967278, %v6088_v23 }
 0x2cf   : > { %v6087_v58 = vadd.s32 %v14864_v21, %v15268_v11  ;;  %v6322_v59 = vsel %vm6290_vm2, %v10028_v19, %v6274_v0  ;;  %v6182_v29 = vsel %vm6150_vm8, %v9984_v3, %v6134_v43  ;;  %v14901_v37 = vsel %vm6431_vm9, %v10073_v18, %v6415_v5 }
 0x2d0   : > { %v10044_v4 = vadd.s32 4294967278, %v6322_v59  ;;  %vm6338_vm15 = vcmp.ge.s32.totalorder %v6322_v59, 18  ;;  %v10000_v56 = vadd.s32 4294967278, %v6182_v29  ;;  %vm6198_vm3 = vcmp.ge.s32.totalorder %v6182_v29, 18 }
 0x2d1   : > { %v9969_v10 = vadd.s32 4294967278, %v6087_v58  ;;  %vm6103_vm7 = vcmp.ge.s32.totalorder %v6087_v58, 18  ;;  %vm6149_vm8 = vcmp.ge.s32.totalorder %v6133_v25, 18  ;;  %v10071_v5 = vadd.s32 4294967278, %v6413_v55 }
 0x2d2   : > { %v6370_v48 = vsel %vm6338_vm15, %v10044_v4, %v6322_v59  ;;  %v6230_v61 = vsel %vm6198_vm3, %v10000_v56, %v6182_v29  ;;  %v6368_v42 = vsel %vm6336_vm12, %v10042_v6, %v6320_v36 }
 0x2d3   : > { %v11746_v44 = vpop.f32.mrb[88].mxu0  ;;  %v6135_v16 = vsel %vm6103_vm7, %v9969_v10, %v6087_v58  ;;  %v10060_v50 = vadd.s32 4294967278, %v6370_v48  ;;  %vm6386_vm6 = vcmp.ge.s32.totalorder %v6370_v48, 18  ;;  %v10016_v41 = vadd.s32 4294967278, %v6230_v61 }
 0x2d4   : > { %v8048_v54 = vpop.f32.mrb[89].mxu0  ;;  %v6225_v44 = vsel %vm6193_vm5, %v9995_v27, %v6177_v38  ;;  %v9985_v0 = vadd.s32 4294967278, %v6135_v16  ;;  %vm6246_vm9 = vcmp.ge.s32.totalorder %v6230_v61, 18  ;;  %vm6196_vm5 = vcmp.ge.s32.totalorder %v6180_v1, 18 }
 0x2d5   : > { %v11747_v17 = vpop.f32.mrb[90].mxu0  ;;  %v6275_v54 = vsel %vm6243_vm13, %v10013_v45, %v6227_v52  ;;  %vm6241_vm4 = vcmp.ge.s32.totalorder %v6225_v44, 18  ;;  %v6418_v26 = vsel %vm6386_vm6, %v10060_v50, %v6370_v48  ;;  %vm6429_vm13 = vcmp.ge.s32.totalorder %v6413_v55, 18 }
 0x2d6   : > { %v8051_v35 = vpop.f32.mrb[91].mxu0  ;;  %v10011_v17 = vadd.s32 4294967278, %v6225_v44  ;;  %v10029_v60 = vadd.s32 4294967278, %v6275_v54  ;;  %vm6291_vm2 = vcmp.ge.s32.totalorder %v6275_v54, 18  ;;  %v6090_v38 = vadd.s32 %v14864_v21, %v14651_v20 }
 0x2d7   : > { %v14898_v35 = vsel %vm6428_vm1, %v10070_v32, %v6412_v47  ;;  %vm6151_vm1 = vcmp.ge.s32.totalorder %v6135_v16, 18  ;;  %v9983_v47 = vadd.s32 4294967278, %v6133_v25  ;;  %v6278_v3 = vsel %vm6246_vm9, %v10016_v41, %v6230_v61 }
 0x2d8   : > { %v6273_v31 = vsel %vm6241_vm4, %v10011_v17, %v6225_v44  ;;  %v6323_v43 = vsel %vm6291_vm2, %v10029_v60, %v6275_v54  ;;  %v6183_v19 = vsel %vm6151_vm1, %v9985_v0, %v6135_v16  ;;  %vm6434_vm11 = vcmp.ge.s32.totalorder %v6418_v26, 18 }
 0x2d9   : > { %v10027_v40 = vadd.s32 4294967278, %v6273_v31  ;;  %vm6289_vm15 = vcmp.ge.s32.totalorder %v6273_v31, 18  ;;  %v6181_v32 = vsel %vm6149_vm8, %v9983_v47, %v6133_v25  ;;  %vm6339_vm7 = vcmp.ge.s32.totalorder %v6323_v43, 18 }
 0x2da   : > { %v10045_v52 = vadd.s32 4294967278, %v6323_v43  ;;  %v6228_v34 = vsel %vm6196_vm5, %v9998_v7, %v6180_v1  ;;  %v10001_v11 = vadd.s32 4294967278, %v6183_v19  ;;  %v10076_v58 = vadd.s32 4294967278, %v6418_v26 }
 0x2db   : > { %v6321_v59 = vsel %vm6289_vm15, %v10027_v40, %v6273_v31  ;;  %vm6199_vm10 = vcmp.ge.s32.totalorder %v6183_v19, 18  ;;  %v9999_v27 = vadd.s32 4294967278, %v6181_v32  ;;  %v10032_v62 = vadd.s32 4294967278, %v6278_v3 }
 0x2dc   : > { %vm6197_vm14 = vcmp.ge.s32.totalorder %v6181_v32, 18  ;;  %v9972_v53 = vadd.s32 4294967278, %v6090_v38  ;;  %v14909_v20 = vsel %vm6429_vm13, %v10071_v5, %v6413_v55  ;;  %vm6294_vm3 = vcmp.ge.s32.totalorder %v6278_v3, 18 }
 0x2dd   : > { %v10014_v18 = vadd.s32 4294967278, %v6228_v34  ;;  %vm6106_vm0 = vcmp.ge.s32.totalorder %v6090_v38, 18  ;;  %vm6384_vm4 = vcmp.ge.s32.totalorder %v6368_v42, 18  ;;  %v10058_v28 = vadd.s32 4294967278, %v6368_v42 }
 0x2de   : > { %vm6244_vm2 = vcmp.ge.s32.totalorder %v6228_v34, 18  ;;  %v6231_v45 = vsel %vm6199_vm10, %v10001_v11, %v6183_v19  ;;  %v14912_v29 = vsel %vm6434_vm11, %v10076_v58, %v6418_v26  ;;  %v6371_v4 = vsel %vm6339_vm7, %v10045_v52, %v6323_v43 }
 0x2df   : > { %v10043_v46 = vadd.s32 4294967278, %v6321_v59  ;;  %v6229_v10 = vsel %vm6197_vm14, %v9999_v27, %v6181_v32  ;;  %vm6337_vm6 = vcmp.ge.s32.totalorder %v6321_v59, 18  ;;  %v6326_v44 = vsel %vm6294_vm3, %v10032_v62, %v6278_v3 }
 0x2e0   : > { %v6138_v49 = vsel %vm6106_vm0, %v9972_v53, %v6090_v38  ;;  %v6276_v39 = vsel %vm6244_vm2, %v10014_v18, %v6228_v34  ;;  %v10017_v56 = vadd.s32 4294967278, %v6231_v45  ;;  %vm6104_vm1 = vcmp.ge.s32.totalorder %v6088_v23, 18 }
 0x2e1   : > { %v6091_v54 = vadd.s32 %v14864_v21, %v14676_v2  ;;  %vm6387_vm8 = vcmp.ge.s32.totalorder %v6371_v4, 18  ;;  %v10061_v33 = vadd.s32 4294967278, %v6371_v4  ;;  %vm6247_vm12 = vcmp.ge.s32.totalorder %v6231_v45, 18 }
 0x2e2   : > { %v10015_v48 = vadd.s32 4294967278, %v6229_v10  ;;  %v6369_v17 = vsel %vm6337_vm6, %v10043_v46, %v6321_v59  ;;  %vm6342_vm9 = vcmp.ge.s32.totalorder %v6326_v44, 18  ;;  %vm6245_vm5 = vcmp.ge.s32.totalorder %v6229_v10, 18 }
 0x2e3   : > { %v9988_v16 = vadd.s32 4294967278, %v6138_v49  ;;  %v10030_v15 = vadd.s32 4294967278, %v6276_v39  ;;  %vm6154_vm13 = vcmp.ge.s32.totalorder %v6138_v49, 18  ;;  %v6136_v25 = vsel %vm6104_vm1, %v9970_v14, %v6088_v23 }
 0x2e4   : > { %vm6292_vm15 = vcmp.ge.s32.totalorder %v6276_v39, 18  ;;  %v9973_v36 = vadd.s32 4294967278, %v6091_v54  ;;  %v6089_v60 = vadd.s32 %v14864_v21, %v14692_v30  ;;  %v14920_v2 = vsel %vm6384_vm4, %v10058_v28, %v6368_v42 }
 0x2e5   : > { %v10059_v61 = vadd.s32 4294967278, %v6369_v17  ;;  %vm6107_vm7 = vcmp.ge.s32.totalorder %v6091_v54, 18  ;;  %v14923_v50 = vsel %vm6387_vm8, %v10061_v33, %v6371_v4  ;;  %vm6385_vm11 = vcmp.ge.s32.totalorder %v6369_v17, 18 }
 0x2e6   : > { %v6186_v1 = vsel %vm6154_vm13, %v9988_v16, %v6138_v49  ;;  %v9986_v0 = vadd.s32 4294967278, %v6136_v25  ;;  %v6324_v31 = vsel %vm6292_vm15, %v10030_v15, %v6276_v39  ;;  %vm6152_vm10 = vcmp.ge.s32.totalorder %v6136_v25, 18 }
 0x2e7   : > { %v6139_v30 = vsel %vm6107_vm7, %v9973_v36, %v6091_v54  ;;  %v9971_v21 = vadd.s32 4294967278, %v6089_v60  ;;  %v14926_v6 = vsel %vm6385_vm11, %v10059_v61, %v6369_v17  ;;  %v10004_v41 = vadd.s32 4294967278, %v6186_v1 }
 0x2e8   : > { %vm6105_vm0 = vcmp.ge.s32.totalorder %v6089_v60, 18  ;;  %v10046_v7 = vadd.s32 4294967278, %v6324_v31  ;;  %vm6202_vm4 = vcmp.ge.s32.totalorder %v6186_v1, 18  ;;  %v6184_v26 = vsel %vm6152_vm10, %v9986_v0, %v6136_v25 }
 0x2e9   : > { %vm6340_vm6 = vcmp.ge.s32.totalorder %v6324_v31, 18  ;;  %v9989_v19 = vadd.s32 4294967278, %v6139_v30  ;;  %v10074_v32 = vadd.s32 4294967278, %v14920_v2  ;;  %vm6155_vm1 = vcmp.ge.s32.totalorder %v6139_v30, 18 }
 0x2ea   : > { %v6137_v5 = vsel %vm6105_vm0, %v9971_v21, %v6089_v60  ;;  %vm6432_vm8 = vcmp.ge.s32.totalorder %v14920_v2, 18  ;;  %v10077_v42 = vadd.s32 4294967278, %v14923_v50  ;;  %v6234_v3 = vsel %vm6202_vm4, %v10004_v41, %v6186_v1 }
 0x2eb   : > { %v10002_v52 = vadd.s32 4294967278, %v6184_v26  ;;  %v6372_v11 = vsel %vm6340_vm6, %v10046_v7, %v6324_v31  ;;  %v6187_v27 = vsel %vm6155_vm1, %v9989_v19, %v6139_v30  ;;  %v9987_v62 = vadd.s32 4294967278, %v6137_v5 }
 0x2ec   : > { %v10020_v53 = vadd.s32 4294967278, %v6234_v3  ;;  %vm6153_vm7 = vcmp.ge.s32.totalorder %v6137_v5, 18  ;;  %v10075_v23 = vadd.s32 4294967278, %v14926_v6  ;;  %v10062_v18 = vadd.s32 4294967278, %v6372_v11 }
 0x2ed   : > { %v11770_v12 = vpop.f32.mrb[92].mxu0  ;;  %vm6250_vm11 = vcmp.ge.s32.totalorder %v6234_v3, 18  ;;  %v10005_v4 = vadd.s32 4294967278, %v6187_v27  ;;  %v8834_v54 = vstv %s14929_s24  ;;  %v14950_v1 = vsel %vm6432_vm8, %v10074_v32, %v14920_v2 }
 0x2ee   : > { %v8278_v13 = vpop.f32.mrb[93].mxu0  ;;  %v10048_v12 = vadd.s32 4294967278, %v6326_v44  ;;  %v6282_v39 = vsel %vm6250_vm11, %v10020_v53, %v6234_v3  ;;  %v8837_v60 = vadd.s32 %v8834_v54, %v14189_v24  ;;  %v8835_v41 = vadd.s32 %v8834_v54, %v14156_v9 }
 0x2ef   : > { %v11771_v8 = vpop.f32.mrb[94].mxu0  ;;  %v6279_v13 = vsel %vm6247_vm12, %v10017_v56, %v6231_v45  ;;  %vm6435_vm12 = vcmp.ge.s32.totalorder %v14923_v50, 18  ;;  %v10036_v36 = vadd.s32 4294967278, %v6282_v39  ;;  %vm6298_vm1 = vcmp.ge.s32.totalorder %v6282_v39, 18 }
 0x2f0   : > { %v8281_v57 = vpop.f32.mrb[95].mxu0  ;;  %v6277_v8 = vsel %vm6245_vm5, %v10015_v48, %v6229_v10  ;;  %v10033_v47 = vadd.s32 4294967278, %v6279_v13  ;;  %vm6295_vm14 = vcmp.ge.s32.totalorder %v6279_v13, 18  ;;  %vm6200_vm5 = vcmp.ge.s32.totalorder %v6184_v26, 18 }
 0x2f1   : > { %v6374_v57 = vsel %vm6342_vm9, %v10048_v12, %v6326_v44  ;;  %v10031_v55 = vadd.s32 4294967278, %v6277_v8  ;;  %vm6293_vm3 = vcmp.ge.s32.totalorder %v6277_v8, 18  ;;  %vm6433_vm9 = vcmp.ge.s32.totalorder %v14926_v6, 18 }
 0x2f2   : > { %v10064_v43 = vadd.s32 4294967278, %v6374_v57  ;;  %vm6390_vm2 = vcmp.ge.s32.totalorder %v6374_v57, 18  ;;  %v6327_v40 = vsel %vm6295_vm14, %v10033_v47, %v6279_v13  ;;  %v6232_v28 = vsel %vm6200_vm5, %v10002_v52, %v6184_v26 }
 0x2f3   : > { %v6325_v38 = vsel %vm6293_vm3, %v10031_v55, %v6277_v8  ;;  %v10049_v58 = vadd.s32 4294967278, %v6327_v40  ;;  %vm6343_vm13 = vcmp.ge.s32.totalorder %v6327_v40, 18  ;;  %vm6388_vm14 = vcmp.ge.s32.totalorder %v6372_v11, 18 }
 0x2f4   : > { %v6422_v34 = vsel %vm6390_vm2, %v10064_v43, %v6374_v57  ;;  %v10047_v59 = vadd.s32 4294967278, %v6325_v38  ;;  %vm6341_vm15 = vcmp.ge.s32.totalorder %v6325_v38, 18  ;;  %vm6203_vm3 = vcmp.ge.s32.totalorder %v6187_v27, 18 }
 0x2f5   : > { %vm6438_vm10 = vcmp.ge.s32.totalorder %v6422_v34, 18  ;;  %v6375_v45 = vsel %vm6343_vm13, %v10049_v58, %v6327_v40  ;;  %v6185_v10 = vsel %vm6153_vm7, %v9987_v62, %v6137_v5  ;;  %v12732_v44 = vmov 0.0|0.0  }
 0x2f6   : > { %v6373_v46 = vsel %vm6341_vm15, %v10047_v59, %v6325_v38  ;;  %v10339_v49 = vcombine.low %v12732_v44, %v12732_v44  ;;  %v10080_v14 = vadd.s32 4294967278, %v6422_v34  ;;  %v10018_v56 = vadd.s32 4294967278, %v6232_v28 }
 0x2f7   : > { %v14937_v48 = vsel %vm6388_vm14, %v10062_v18, %v6372_v11  ;;  %vm6391_vm0 = vcmp.ge.s32.totalorder %v6375_v45, 18  ;;  %v10065_v17 = vadd.s32 4294967278, %v6375_v45  ;;  %vm6248_vm4 = vcmp.ge.s32.totalorder %v6232_v28, 18 }
 0x2f8   : > { %9417 = vst [vmem:[%s14584_s21 + $0x90] sm:$0xf] %v10339_v49  ;;  %9419 = vst [vmem:[%s14584_s21 + $0x98] sm:$0xf] %v10339_v49  ;;  %vm6389_vm2 = vcmp.ge.s32.totalorder %v6373_v46, 18  ;;  %v10063_v12 = vadd.s32 4294967278, %v6373_v46  ;;  %v6235_v15 = vsel %vm6203_vm3, %v10005_v4, %v6187_v27  ;;  %v10340_v61 = vcombine.high %v12732_v44, %v12732_v44 }
 0x2f9   : > { %9421 = vst [vmem:[%s14584_s21 + $0xa0] sm:$0xf] %v10339_v49  ;;  %9423 = vst [vmem:[%s14584_s21 + $0xa8] sm:$0xf] %v10339_v49  ;;  %v10003_v25 = vadd.s32 4294967278, %v6185_v10  ;;  %vm6201_vm6 = vcmp.ge.s32.totalorder %v6185_v10, 18  ;;  %v14955_v0 = vsel %vm6435_vm12, %v10077_v42, %v14923_v50  ;;  %v6280_v57 = vsel %vm6248_vm4, %v10018_v56, %v6232_v28 }
 0x2fa   : > { %9425 = vst [vmem:[%s14584_s21 + $0xb0] sm:$0xf] %v10339_v49  ;;  %9427 = vst [vmem:[%s14584_s21 + $0xb8] sm:$0xf] %v10339_v49  ;;  %v14961_v24 = vsel %vm6433_vm9, %v10075_v23, %v14926_v6  ;;  %v14964_v31 = vsel %vm6438_vm10, %v10080_v14, %v6422_v34  ;;  %vm6436_vm5 = vcmp.ge.s32.totalorder %v14937_v48, 18  ;;  %v10021_v2 = vadd.s32 4294967278, %v6235_v15 }
 0x2fb   : > { %9418 = vst [vmem:[%s14584_s21 + $0x94] sm:$0xf] %v10340_v61  ;;  %9420 = vst [vmem:[%s14584_s21 + $0x9c] sm:$0xf] %v10340_v61  ;;  %v6423_v50 = vsel %vm6391_vm0, %v10065_v17, %v6375_v45  ;;  %v6421_v47 = vsel %vm6389_vm2, %v10063_v12, %v6373_v46  ;;  %vm6251_vm8 = vcmp.ge.s32.totalorder %v6235_v15, 18  ;;  %v6233_v55 = vsel %vm6201_vm6, %v10003_v25, %v6185_v10 }
 0x2fc   : > { %9422 = vst [vmem:[%s14584_s21 + $0xa4] sm:$0xf] %v10340_v61  ;;  %9424 = vst [vmem:[%s14584_s21 + $0xac] sm:$0xf] %v10340_v61  ;;  %v6330_v30 = vsel %vm6298_vm1, %v10036_v36, %v6282_v39  ;;  %v10034_v21 = vadd.s32 4294967278, %v6280_v57  ;;  %v10209_v6 = vadd.s32 4294967278, %v8837_v60  ;;  %v8838_v7 = vadd.s32 %v8834_v54, %v14198_v63 }
 0x2fd   : > { %9426 = vst [vmem:[%s14584_s21 + $0xb4] sm:$0xf] %v10340_v61  ;;  %9428 = vst [vmem:[%s14584_s21 + $0xbc] sm:$0xf] %v10340_v61  ;;  %v10078_v43 = vadd.s32 4294967278, %v14937_v48  ;;  %vm6296_vm12 = vcmp.ge.s32.totalorder %v6280_v57, 18  ;;  %v6283_v26 = vsel %vm6251_vm8, %v10021_v2, %v6235_v15  ;;  %v8836_v19 = vadd.s32 %v8834_v54, %v15265_v51 }
 0x2fe   : > { %vm8853_vm9 = vcmp.ge.s32.totalorder %v8837_v60, 18  ;;  %vm6439_vm13 = vcmp.ge.s32.totalorder %v6423_v50, 18  ;;  %v10019_v40 = vadd.s32 4294967278, %v6233_v55  ;;  %v10081_v32 = vadd.s32 4294967278, %v6423_v50  ;;  %v15003_v54 = vld [vmem:[%s15173_s3] ss:$0 sm:$0xff] }
 0x2ff   : > { %vm6437_vm15 = vcmp.ge.s32.totalorder %v6421_v47, 18  ;;  %v10052_v38 = vadd.s32 4294967278, %v6330_v30  ;;  %vm6249_vm7 = vcmp.ge.s32.totalorder %v6233_v55, 18  ;;  %vm6346_vm11 = vcmp.ge.s32.totalorder %v6330_v30, 18 }
 0x300   : > { %v6328_v5 = vsel %vm6296_vm12, %v10034_v21, %v6280_v57  ;;  %v8885_v42 = vsel %vm8853_vm9, %v10209_v6, %v8837_v60  ;;  %v10207_v3 = vadd.s32 4294967278, %v8835_v41  ;;  %v10079_v9 = vadd.s32 4294967278, %v6421_v47 }
 0x301   : > { %v10037_v52 = vadd.s32 4294967278, %v6283_v26  ;;  %vm8851_vm10 = vcmp.ge.s32.totalorder %v8835_v41, 18  ;;  %v10210_v34 = vadd.s32 4294967278, %v8838_v7  ;;  %vm6496_vm14 = vcmp.lt.s32.totalorder %v14893_v22, 16 }
 0x302   : > { %vm6497_vm3 = vcmp.lt.s32.totalorder %v14901_v37, 16  ;;  %vm6299_vm0 = vcmp.ge.s32.totalorder %v6283_v26, 18  ;;  %v6281_v63 = vsel %vm6249_vm7, %v10019_v40, %v6233_v55  ;;  %vm8854_vm4 = vcmp.ge.s32.totalorder %v8838_v7, 18 }
 0x303   : > { %v10208_v51 = vadd.s32 4294967278, %v8836_v19  ;;  %vm6494_vm2 = vcmp.lt.s32.totalorder %v14898_v35, 16  ;;  %vm6495_vm6 = vcmp.lt.s32.totalorder %v14909_v20, 16  ;;  %v6378_v11 = vsel %vm6346_vm11, %v10052_v38, %v6330_v30 }
 0x304   : > { %v10050_v58 = vadd.s32 4294967278, %v6328_v5  ;;  %v10225_v59 = vadd.s32 4294967278, %v8885_v42  ;;  %vm8852_vm1 = vcmp.ge.s32.totalorder %v8836_v19, 18  ;;  %v14989_v27 = vsel %vm6436_vm5, %v10078_v43, %v14937_v48 }
 0x305   : > { %vm6344_vm8 = vcmp.ge.s32.totalorder %v6328_v5, 18  ;;  %vm8901_vm12 = vcmp.ge.s32.totalorder %v8885_v42, 18  ;;  %v8883_v62 = vsel %vm8851_vm10, %v10207_v3, %v8835_v41  ;;  %v14993_v53 = vsel %vm6439_vm13, %v10081_v32, %v6423_v50 }
 0x306   : > { %v6331_v23 = vsel %vm6299_vm0, %v10037_v52, %v6283_v26  ;;  %v10035_v18 = vadd.s32 4294967278, %v6281_v63  ;;  %v8886_v28 = vsel %vm8854_vm4, %v10210_v34, %v8838_v7  ;;  %v14996_v45 = vsel %vm6437_vm15, %v10079_v9, %v6421_v47 }
 0x307   : > { %v10068_v4 = vadd.s32 4294967278, %v6378_v11  ;;  %vm6297_vm9 = vcmp.ge.s32.totalorder %v6281_v63, 18  ;;  %v8884_v46 = vsel %vm8852_vm1, %v10208_v51, %v8836_v19  ;;  %vm6394_vm7 = vcmp.ge.s32.totalorder %v6378_v11, 18 }
 0x308   : > { %v14998_v10 = vsel %vm6344_vm8, %v10050_v58, %v6328_v5  ;;  %v8933_v44 = vsel %vm8901_vm12, %v10225_v59, %v8885_v42  ;;  %v10223_v49 = vadd.s32 4294967278, %v8883_v62  ;;  %vm6347_vm5 = vcmp.ge.s32.totalorder %v6331_v23, 18 }
 0x309   : > { %v10053_v39 = vadd.s32 4294967278, %v6331_v23  ;;  %vm8899_vm11 = vcmp.ge.s32.totalorder %v8883_v62, 18  ;;  %v10226_v56 = vadd.s32 4294967278, %v8886_v28  ;;  %v6329_v17 = vsel %vm6297_vm9, %v10035_v18, %v6281_v63 }
 0x30a   : > { %vm8902_vm13 = vcmp.ge.s32.totalorder %v8886_v28, 18  ;;  %vm6500_vm15 = vcmp.lt.s32.totalorder %v14912_v29, 16  ;;  %vm6501_vm10 = vcmp.lt.s32.totalorder %v14955_v0, 16  ;;  %v15010_v25 = vsel %vm6394_vm7, %v10068_v4, %v6378_v11 }
 0x30b   : > { %vm8900_vm0 = vcmp.ge.s32.totalorder %v8884_v46, 18  ;;  %vm6498_vm4 = vcmp.lt.s32.totalorder %v14950_v1, 16  ;;  %vm6499_vm1 = vcmp.lt.s32.totalorder %v14961_v24, 16  ;;  %vm8949_vm8 = vcmp.ge.s32.totalorder %v8933_v44, 18 }
 0x30c   : > { %v10241_v61 = vadd.s32 4294967278, %v8933_v44  ;;  %v6379_v2 = vsel %vm6347_vm5, %v10053_v39, %v6331_v23  ;;  %vm6345_vm12 = vcmp.ge.s32.totalorder %v6329_v17, 18  ;;  %v8934_v50 = vsel %vm8902_vm13, %v10226_v56, %v8886_v28 }
 0x30d   : > { %v10051_v30 = vadd.s32 4294967278, %v6329_v17  ;;  %vm6442_vm9 = vcmp.ge.s32.totalorder %v15010_v25, 18  ;;  %v10242_v37 = vadd.s32 4294967278, %v8934_v50  ;;  %v10069_v32 = vadd.s32 4294967278, %v6379_v2 }
 0x30e   : > { %v8981_v35 = vsel %vm8949_vm8, %v10241_v61, %v8933_v44  ;;  %v10084_v63 = vadd.s32 4294967278, %v15010_v25  ;;  %vm6504_vm5 = vcmp.lt.s32.totalorder %v14964_v31, 16  ;;  %vm6502_vm13 = vcmp.lt.s32.totalorder %v14989_v27, 16 }
 0x30f   : > { %v6377_v3 = vsel %vm6345_vm12, %v10051_v30, %v6329_v17 }
 0x310   : > { %v10067_v44 = vadd.s32 4294967278, %v6377_v3  ;;  %v15066_v0 = vsel %vm6442_vm9, %v10084_v63, %v15010_v25 }
 0x312   : > { %v11774_v33 = vpop.f32.mrb[96].mxu0 }
 0x313   : > { %v8294_v16 = vpop.f32.mrb[97].mxu0 }
 0x314   : > { %v11775_v13 = vpop.f32.mrb[98].mxu0  ;;  %v10224_v16 = vadd.s32 4294967278, %v8884_v46 }
 0x315   : > { %v8297_v8 = vpop.f32.mrb[99].mxu0  ;;  %v10066_v13 = vadd.s32 4294967278, %v14998_v10 }
 0x316   : > { %v8931_v8 = vsel %vm8899_vm11, %v10223_v49, %v8883_v62  ;;  %v8932_v21 = vsel %vm8900_vm0, %v10224_v16, %v8884_v46  ;;  %vm8997_vm11 = vcmp.ge.s32.totalorder %v8981_v35, 18  ;;  %v10257_v62 = vadd.s32 4294967278, %v8981_v35 }
 0x317   : > { %v10239_v7 = vadd.s32 4294967278, %v8931_v8  ;;  %vm8947_vm7 = vcmp.ge.s32.totalorder %v8931_v8, 18  ;;  %v10240_v38 = vadd.s32 4294967278, %v8932_v21  ;;  %vm6393_vm0 = vcmp.ge.s32.totalorder %v6377_v3, 18 }
 0x318   : > { %v9029_v29 = vsel %vm8997_vm11, %v10257_v62, %v8981_v35  ;;  %v6425_v16 = vsel %vm6393_vm0, %v10067_v44, %v6377_v3 }
 0x319   : > { %v8979_v11 = vsel %vm8947_vm7, %v10239_v7, %v8931_v8  ;;  %vm9045_vm9 = vcmp.ge.s32.totalorder %v9029_v29, 18  ;;  %vm6441_vm7 = vcmp.ge.s32.totalorder %v6425_v16, 18 }
 0x31a   : > { %v10255_v49 = vadd.s32 4294967278, %v8979_v11  ;;  %vm8995_vm8 = vcmp.ge.s32.totalorder %v8979_v11, 18 }
 0x325   : > { %v11542_v14 = vpop.f32.mrb[16].mxu1 }
 0x326   : > { %v6059_v33 = vadd.f32 %v15003_v54, %v11542_v14  ;;  %v5978_v48 = vpop.f32.mrb[17].mxu1 }
 0x327   : > { %v6057_v12 = vadd.f32 %v15003_v54, %v5978_v48  ;;  %v11543_v15 = vpop.f32.mrb[18].mxu1 }
 0x328   : > { %v6060_v36 = vadd.f32 %v15003_v54, %v11543_v15  ;;  %v5981_v60 = vpop.f32.mrb[19].mxu1  ;;  %v6576_v47 = vsel %vm6496_vm14, %v6059_v33, 0.0  ;;  %vm6392_vm14 = vcmp.ge.s32.totalorder %v14998_v10, 18 }
 0x329   : > { %v6058_v57 = vadd.f32 %v15003_v54, %v5981_v60  ;;  %v6574_v6 = vsel %vm6494_vm2, %v6057_v12, 0.0  ;;  %vm6395_vm2 = vcmp.ge.s32.totalorder %v6379_v2, 18  ;;  %v15040_v51 = vsel %vm6392_vm14, %v10066_v13, %v14998_v10 }
 0x32a   : > { %v6577_v55 = vsel %vm6497_vm3, %v6060_v36, 0.0  ;;  %v11778_v26 = vpop.f32.mrb[100].mxu0  ;;  %vm8950_vm3 = vcmp.ge.s32.totalorder %v8934_v50, 18  ;;  %v6427_v28 = vsel %vm6395_vm2, %v10069_v32, %v6379_v2  ;;  %v10082_v24 = vadd.s32 4294967278, %v15040_v51 }
 0x32b   : > { %v10489_v41 = vpack.c.bf16 %v6577_v55, %v6576_v47  ;;  %v6575_v43 = vsel %vm6495_vm6, %v6058_v57, 0.0  ;;  %v8310_v40 = vpop.f32.mrb[101].mxu0  ;;  %vm8948_vm6 = vcmp.ge.s32.totalorder %v8932_v21, 18  ;;  %v8982_v23 = vsel %vm8950_vm3, %v10242_v37, %v8934_v50 }
 0x32c   : > { %v10484_v22 = vpack.c.bf16 %v6575_v43, %v6574_v6  ;;  %v11779_v20 = vpop.f32.mrb[102].mxu0  ;;  %v8980_v4 = vsel %vm8948_vm6, %v10240_v38, %v8932_v21  ;;  %v10258_v33 = vadd.s32 4294967278, %v8982_v23  ;;  %vm8998_vm12 = vcmp.ge.s32.totalorder %v8982_v23, 18 }
 0x32d   : > { %10539 = vst [vmem:[%s14584_s21 + $0x48] sm:$0xff] %v10489_v41   ;;  %v11546_v19 = vpop.f32.mrb[20].mxu1  ;;  %v8313_v9 = vpop.f32.mrb[103].mxu0  ;;  %v10256_v17 = vadd.s32 4294967278, %v8980_v4  ;;  %vm8996_vm14 = vcmp.ge.s32.totalorder %v8980_v4, 18  ;;  %v9027_v13 = vsel %vm8995_vm8, %v10255_v49, %v8979_v11  ;;  %v10085_v8 = vadd.s32 4294967278, %v6427_v28 }
 0x32e   : > { %10538 = vst [vmem:[%s14584_s21 + $0x40] sm:$0xff] %v10484_v22   ;;  %v6063_v5 = vadd.f32 %v15003_v54, %v11546_v19  ;;  %v5994_v42 = vpop.f32.mrb[21].mxu1  ;;  %v9030_v36 = vsel %vm8998_vm12, %v10258_v33, %v8982_v23  ;;  %v10083_v50 = vadd.s32 4294967278, %v6425_v16  ;;  %v10273_v47 = vadd.s32 4294967278, %v9029_v29 }
 0x32f   : > { %v6061_v52 = vadd.f32 %v15003_v54, %v5994_v42  ;;  %v11547_v34 = vpop.f32.mrb[22].mxu1  ;;  %v9028_v25 = vsel %vm8996_vm14, %v10256_v17, %v8980_v4  ;;  %vm9043_vm3 = vcmp.ge.s32.totalorder %v9027_v13, 18  ;;  %v10271_v30 = vadd.s32 4294967278, %v9027_v13 }
 0x330   : > { %v6064_v58 = vadd.f32 %v15003_v54, %v11547_v34  ;;  %v5997_v59 = vpop.f32.mrb[23].mxu1  ;;  %v6580_v46 = vsel %vm6500_vm15, %v6063_v5, 0.0  ;;  %vm6505_vm15 = vcmp.lt.s32.totalorder %v14993_v53, 16  ;;  %v10274_v21 = vadd.s32 4294967278, %v9030_v36 }
 0x331   : > { %v6062_v18 = vadd.f32 %v15003_v54, %v5997_v59  ;;  %v6578_v14 = vsel %vm6498_vm4, %v6061_v52, 0.0  ;;  %vm6440_vm4 = vcmp.ge.s32.totalorder %v15040_v51, 18  ;;  %vm9046_vm2 = vcmp.ge.s32.totalorder %v9030_v36, 18 }
 0x332   : > { %v6581_v10 = vsel %vm6501_vm10, %v6064_v58, 0.0  ;;  %vm6503_vm10 = vcmp.lt.s32.totalorder %v14996_v45, 16  ;;  %v10272_v43 = vadd.s32 4294967278, %v9028_v25  ;;  %vm9044_vm6 = vcmp.ge.s32.totalorder %v9028_v25, 18 }
 0x333   : > { %v10499_v39 = vpack.c.bf16 %v6581_v10, %v6580_v46  ;;  %v6579_v56 = vsel %vm6499_vm1, %v6062_v18, 0.0  ;;  %vm6443_vm1 = vcmp.ge.s32.totalorder %v6427_v28, 18  ;;  %v6472_v31 = vsel %vm6440_vm4, %v10082_v24, %v15040_v51 }
 0x334   : > { %v10494_v48 = vpack.c.bf16 %v6579_v56, %v6578_v14  ;;  %v6475_v53 = vsel %vm6443_vm1, %v10085_v8, %v6427_v28  ;;  %v9077_v32 = vsel %vm9045_vm9, %v10273_v47, %v9029_v29  ;;  %v6473_v38 = vsel %vm6441_vm7, %v10083_v50, %v6425_v16 }
 0x335   : > { %10541 = vst [vmem:[%s14584_s21 + $0x58] sm:$0xff] %v10499_v39   ;;  %v11550_v1 = vpop.f32.mrb[24].mxu1  ;;  %v9078_v20 = vsel %vm9046_vm2, %v10274_v21, %v9030_v36  ;;  %v9075_v3 = vsel %vm9043_vm3, %v10271_v30, %v9027_v13  ;;  %v9076_v9 = vsel %vm9044_vm6, %v10272_v43, %v9028_v25  ;;  %vm6506_vm11 = vcmp.lt.s32.totalorder %v6472_v31, 16 }
 0x336   : > { %10540 = vst [vmem:[%s14584_s21 + $0x50] sm:$0xff] %v10494_v48   ;;  %v6067_v12 = vadd.f32 %v15003_v54, %v11550_v1  ;;  %v6010_v15 = vpop.f32.mrb[25].mxu1  ;;  %vm9093_vm0 = vcmp.ge.s32.totalorder %v9077_v32, 18  ;;  %vm6507_vm8 = vcmp.lt.s32.totalorder %v6473_v38, 16  ;;  %v10289_v11 = vadd.s32 4294967278, %v9077_v32 }
 0x337   : > { %v6065_v60 = vadd.f32 %v15003_v54, %v6010_v15  ;;  %v11551_v61 = vpop.f32.mrb[26].mxu1  ;;  %v10290_v58 = vadd.s32 4294967278, %v9078_v20  ;;  %v10287_v62 = vadd.s32 4294967278, %v9075_v3  ;;  %vm9094_vm12 = vcmp.ge.s32.totalorder %v9078_v20, 18 }
 0x338   : > { %v6068_v57 = vadd.f32 %v15003_v54, %v11551_v61  ;;  %v6013_v2 = vpop.f32.mrb[27].mxu1  ;;  %v6584_v6 = vsel %vm6504_vm5, %v6067_v12, 0.0  ;;  %vm6508_vm5 = vcmp.lt.s32.totalorder %v15066_v0, 16  ;;  %v10288_v23 = vadd.s32 4294967278, %v9076_v9 }
 0x339   : > { %v6066_v55 = vadd.f32 %v15003_v54, %v6013_v2  ;;  %v6582_v26 = vsel %vm6502_vm13, %v6065_v60, 0.0  ;;  %vm6509_vm13 = vcmp.lt.s32.totalorder %v6475_v53, 16  ;;  %v9125_v39 = vsel %vm9093_vm0, %v10289_v11, %v9077_v32 }
 0x33a   : > { %v6585_v41 = vsel %vm6505_vm15, %v6068_v57, 0.0  ;;  %v11802_v7 = vpop.f32.mrb[104].mxu0  ;;  %vm9091_vm15 = vcmp.ge.s32.totalorder %v9075_v3, 18  ;;  %v9126_v56 = vsel %vm9094_vm12, %v10290_v58, %v9078_v20  ;;  %v10305_v24 = vadd.s32 4294967278, %v9125_v39 }
 0x33b   : > { %v10509_v22 = vpack.c.bf16 %v6585_v41, %v6584_v6  ;;  %v6583_v37 = vsel %vm6503_vm10, %v6066_v55, 0.0  ;;  %v8547_v40 = vpop.f32.mrb[105].mxu0  ;;  %vm9092_vm10 = vcmp.ge.s32.totalorder %v9076_v9, 18  ;;  %v9123_v17 = vsel %vm9091_vm15, %v10287_v62, %v9075_v3 }
 0x33c   : > { %v10504_v19 = vpack.c.bf16 %v6583_v37, %v6582_v26  ;;  %v11803_v35 = vpop.f32.mrb[106].mxu0  ;;  %v9124_v29 = vsel %vm9092_vm10, %v10288_v23, %v9076_v9  ;;  %v10306_v16 = vadd.s32 4294967278, %v9126_v56  ;;  %vm9141_vm14 = vcmp.ge.s32.totalorder %v9125_v39, 18 }
 0x33d   : > { %10543 = vst [vmem:[%s14584_s21 + $0x68] sm:$0xff] %v10509_v22   ;;  %v11554_v27 = vpop.f32.mrb[28].mxu1  ;;  %v8550_v45 = vpop.f32.mrb[107].mxu0  ;;  %v10303_v15 = vadd.s32 4294967278, %v9123_v17  ;;  %vm9142_vm4 = vcmp.ge.s32.totalorder %v9126_v56, 18  ;;  %v10304_v13 = vadd.s32 4294967278, %v9124_v29  ;;  %v9173_v61 = vsel %vm9141_vm14, %v10305_v24, %v9125_v39 }
 0x33e   : > { %10542 = vst [vmem:[%s14584_s21 + $0x60] sm:$0xff] %v10504_v19   ;;  %v6071_v5 = vadd.f32 %v15003_v54, %v11554_v27  ;;  %v6026_v42 = vpop.f32.mrb[29].mxu1  ;;  %vm9139_vm1 = vcmp.ge.s32.totalorder %v9123_v17, 18  ;;  %vm9140_vm9 = vcmp.ge.s32.totalorder %v9124_v29, 18  ;;  %v9174_v8 = vsel %vm9142_vm4, %v10306_v16, %v9126_v56 }
 0x33f   : > { %v6069_v52 = vadd.f32 %v15003_v54, %v6026_v42  ;;  %v11555_v34 = vpop.f32.mrb[30].mxu1  ;;  %v9171_v57 = vsel %vm9139_vm1, %v10303_v15, %v9123_v17  ;;  %v9172_v2 = vsel %vm9140_vm9, %v10304_v13, %v9124_v29  ;;  %v10321_v30 = vadd.s32 4294967278, %v9173_v61 }
 0x340   : > { %v6072_v63 = vadd.f32 %v15003_v54, %v11555_v34  ;;  %v6029_v51 = vpop.f32.mrb[31].mxu1  ;;  %v6588_v18 = vsel %vm6508_vm5, %v6071_v5, 0.0  ;;  %v10322_v21 = vadd.s32 4294967278, %v9174_v8  ;;  %vm9189_vm7 = vcmp.ge.s32.totalorder %v9173_v61, 18 }
 0x341   : > { %v6070_v59 = vadd.f32 %v15003_v54, %v6029_v51  ;;  %v6586_v46 = vsel %vm6506_vm11, %v6069_v52, 0.0  ;;  %v10319_v41 = vadd.s32 4294967278, %v9171_v57  ;;  %vm9190_vm3 = vcmp.ge.s32.totalorder %v9174_v8, 18 }
 0x342   : > { %v6589_v28 = vsel %vm6509_vm13, %v6072_v63, 0.0  ;;  %v11806_v4 = vpop.f32.mrb[108].mxu0  ;;  %v10320_v43 = vadd.s32 4294967278, %v9172_v2  ;;  %vm9187_vm2 = vcmp.ge.s32.totalorder %v9171_v57, 18  ;;  %vm9188_vm6 = vcmp.ge.s32.totalorder %v9172_v2, 18 }
 0x343   : > { %v10519_v10 = vpack.c.bf16 %v6589_v28, %v6588_v18  ;;  %v6587_v44 = vsel %vm6507_vm8, %v6070_v59, 0.0  ;;  %v8563_v49 = vpop.f32.mrb[109].mxu0  ;;  %v9221_v22 = vsel %vm9189_vm7, %v10321_v30, %v9173_v61  ;;  %v9222_v37 = vsel %vm9190_vm3, %v10322_v21, %v9174_v8 }
 0x344   : > { %v10514_v14 = vpack.c.bf16 %v6587_v44, %v6586_v46  ;;  %v11807_v33 = vpop.f32.mrb[110].mxu0  ;;  %v9219_v19 = vsel %vm9187_vm2, %v10319_v41, %v9171_v57  ;;  %v9220_v31 = vsel %vm9188_vm6, %v10320_v43, %v9172_v2  ;;  %vm9255_vm5 = vcmp.lt.s32.totalorder %v9221_v22, 16 }
 0x345   : > { %10545 = vst [vmem:[%s14584_s21 + $0x78] sm:$0xff] %v10519_v10   ;;  %v11838_v48 = vpop.f32.mrb[32].mxu1  ;;  %v8566_v1 = vpop.f32.mrb[111].mxu0  ;;  %vm9256_vm11 = vcmp.lt.s32.totalorder %v9222_v37, 16  ;;  %vm9253_vm13 = vcmp.lt.s32.totalorder %v9219_v19, 16  ;;  %vm9254_vm0 = vcmp.lt.s32.totalorder %v9220_v31, 16 }
 0x346   : > { %10544 = vst [vmem:[%s14584_s21 + $0x70] sm:$0xff] %v10514_v14   ;;  %v8769_v0 = vpop.f32.mrb[33].mxu1 }
 0x347   : > { %v11839_v12 = vpop.f32.mrb[34].mxu1 }
 0x348   : > { %v8772_v36 = vpop.f32.mrb[35].mxu1 }
 0x34a   : > { %v11810_v60 = vpop.f32.mrb[112].mxu0 }
 0x34b   : > { %v8579_v25 = vpop.f32.mrb[113].mxu0 }
 0x34c   : > { %v11811_v50 = vpop.f32.mrb[114].mxu0 }
 0x34d   : > { %v11842_v47 = vpop.f32.mrb[36].mxu1  ;;  %v8582_v55 = vpop.f32.mrb[115].mxu0 }
 0x34e   : > { %v8785_v6 = vpop.f32.mrb[37].mxu1 }
 0x34f   : > { %v11843_v7 = vpop.f32.mrb[38].mxu1 }
 0x350   : > { %v8788_v26 = vpop.f32.mrb[39].mxu1 }
 0x352   : > { %v11830_v40 = vpop.f32.mrb[16].mxu0 }
 0x353   : > { %v8818_v53 = vadd.f32 %v15003_v54, %v11830_v40  ;;  %v8737_v32 = vpop.f32.mrb[17].mxu0 }
 0x354   : > { %v8816_v35 = vadd.f32 %v15003_v54, %v8737_v32  ;;  %v11831_v27 = vpop.f32.mrb[18].mxu0 }
 0x355   : > { %v8819_v38 = vadd.f32 %v15003_v54, %v11831_v27  ;;  %v8740_v20 = vpop.f32.mrb[19].mxu0  ;;  %v9335_v5 = vsel %vm9255_vm5, %v8818_v53, 0.0 }
 0x356   : > { %v8817_v45 = vadd.f32 %v15003_v54, %v8740_v20  ;;  %v9333_v3 = vsel %vm9253_vm13, %v8816_v35, 0.0 }
 0x357   : > { %v9336_v42 = vsel %vm9256_vm11, %v8819_v38, 0.0 }
 0x358   : > { %v10529_v9 = vpack.c.bf16 %v9336_v42, %v9335_v5  ;;  %v9334_v52 = vsel %vm9254_vm0, %v8817_v45, 0.0 }
 0x359   : > { %v10524_v34 = vpack.c.bf16 %v9334_v52, %v9333_v3 }
 0x35a   : > { %10547 = vst [vmem:[%s14584_s21 + $0x88] sm:$0xff] %v10529_v9   ;;  %v11834_v63 = vpop.f32.mrb[116].mxu0 }
 0x35b   : > { %10546 = vst [vmem:[%s14584_s21 + $0x80] sm:$0xff] %v10524_v34   ;;  %v8753_v54 = vpop.f32.mrb[117].mxu0 }
 0x35c   : > { %v11835_v51 = vpop.f32.mrb[118].mxu0 }
 0x35d   : > { %12647 = shalt.err (!%p12644_p8)
}
 0x35e   : > { %s12648_s10 = scalar_lea.hbm %s15117_s28, 3072  ;;  %s12652_s23 = scalar_lea.hbm %s15174_s4, 6528 }
 0x35f   : > { %p12649_p12 = scmp.ne.s32.totalorder %s15117_s28, %s12648_s10  ;;  %p12653_p6 = scmp.lt.u32.totalorder %s15117_s28, %s15174_s4 }
 0x360   : > { %p12654_p10 = scmp.lt.u32.totalorder %s12652_s23, %s12648_s10  ;;  %p12656_p7 = scmp.lt.u32.totalorder %s12648_s10, %s15117_s28 }
 0x361   : > { %p12650_p4 = pnand %p12649_p12, %p12865_p13 }
 0x362   : > { %p12655_p0 = por %p12654_p10, %p12653_p6 }
 0x363   : > { %p12651_p5 = pneg %p12650_p4 }
 0x364   : > { %p12657_p9 = por %p12656_p7, %p12655_p0 }
 0x366   : > { %p12658_p11 = pnand %p12657_p9, %p12651_p5 }
 0x368   : > { %12661 = shalt.err (!%p12658_p11)
}
 0x369   : > { %s12734_s19 = smov 64   ;;  %s12735_s22 = smov 4   ;;  %v8756_v11 = vpop.f32.mrb[119].mxu0 }
 0x36a   : > { %12159 = dma.vmem_to_hbm [thread:$0]  (%p12865_p13), %s15119_s7, 3072, %s15117_s28, %s9430_s16, %s12734_s19, %s12734_s19, %s12735_s22  }
 0x36b PF: > { %s9466_s0 = sand.u32 1, %s12702_s25   ;;  %p15270_p1 = scmp.ne.s32.totalorder %s15199_s9, 0 }
 0x36c   : > { %p15271_p2 = scmp.ge.s32.totalorder %s12722_s30, 2  ;;  %s9467_s5 = scalar_lea.sflag [#allocation7], %s9466_s0 }
 0x36e   : > { %p12170_p3 = pnand %p15271_p2, %p15270_p1 }
 0x370   : > { %12697 = dma.done.wait (!%p12170_p3), %s9467_s5, 3072  }
 0x371   : > { %12699 = vsyncadd (!%p12170_p3), %s9467_s5, 4294964224  ;;  %s25_s30 = sadd.s32 1, %s12722_s30   ;;  %s15272_s25 = smov %s12706_s26 }
 0x372   : > { %p22_p8 = scmp.ge.s32.totalorder %s25_s30, 4   ;;  %s15273_s26 = smov %s12710_s27 }
 0x373   : > { %s15274_s27 = smov %s12874_s18  ;;  %s15275_s28 = smov %s12718_s29 }
 0x374   : > { %s15276_s29 = smov %s15278_s14  ;;  %24 = sbr.rel (!%p22_p8) target bundleno = 19 (0x13), region = 93 }
 0x37b   :  { %9472 = vsyncpa [#allocation6], 1 }
 0x37c   :  { %9474 = vsyncpa [#allocation6 + $0x1], 1 }
 0x37d   :  { %9475 = vsyncpa [#allocation9], 1 }
 0x37e   :  { %9476 = vsyncpa [#allocation7], 1 }
 0x37f   :  { %9478 = vsyncpa [#allocation7 + $0x1], 1 }

</bundles_post_ra>
